<compile_context>
chip_gen: v7x
topology: tpu7x:2x2x1
jax: 0.10.0
libtpu: 0.0.40
codegen_flags: <defaults>
</compile_context>

<pallas_src>
import functools

import jax
import jax.numpy as jnp
from jax import lax
from jax.experimental import pallas as pl
from jax.experimental.pallas import tpu as pltpu


def _round_up(x, m):
    return ((x + m - 1) // m) * m


@functools.lru_cache(maxsize=1)
def _chip_config():
    """(vmem_limit_bytes, tm_plain) derived from the local chip's VMEM size."""
    try:
        cap = pltpu.get_tpu_info().vmem_capacity_bytes
    except Exception:
        cap = 64 << 20
    # Leave headroom for compiler-internal scratch (matters on v7x's 64 MiB),
    # grow toward physical capacity on v5e/v6e (128 MiB).
    vmem_limit = int(min(100 << 20, max(32 << 20, cap - (16 << 20))))
    tm_plain = 1024 if cap >= (96 << 20) else 512
    return vmem_limit, tm_plain


# ----------------------------------------------------------------------------
# Kernels
# ----------------------------------------------------------------------------
def _make_plain_kernel(*, kt, use_act, slope=0.2):
    """matmul + bias (+ LeakyReLU). Grid = (M_tiles, K_tiles); batch folded in M.

    Returns (kernel, needs_acc_scratch).
    """
    if kt == 1:
        # Single K tile: skip accumulator scratch and both pl.when branches.
        def kernel(p_ref, w_ref, b_ref, o_ref):
            y = jnp.dot(p_ref[...], w_ref[...],
                        preferred_element_type=jnp.float32) + b_ref[...]
            if use_act:
                y = jnp.where(y >= 0, y, slope * y)      # LeakyReLU(0.2)
            o_ref[...] = y.astype(o_ref.dtype)

        return kernel, False

    def kernel(p_ref, w_ref, b_ref, o_ref, acc_ref):
        k = pl.program_id(1)

        @pl.when(k == 0)
        def _():
            acc_ref[...] = jnp.zeros_like(acc_ref)

        acc_ref[...] += jnp.dot(p_ref[...], w_ref[...],
                                preferred_element_type=jnp.float32)

        @pl.when(k == pl.num_programs(1) - 1)
        def _():
            y = acc_ref[...] + b_ref[...]
            if use_act:
                y = jnp.where(y >= 0, y, slope * y)      # LeakyReLU(0.2)
            o_ref[...] = y.astype(o_ref.dtype)

    return kernel, True


def _make_norm_kernel(*, m_valid, kt, use_act, eps=1e-5, slope=0.2):
    """matmul + per-sample InstanceNorm (+ LeakyReLU). Grid = (N, K_tiles).

    One sample's (m_pad x Coutp) slab stays resident per grid step. The conv
    bias is skipped because InstanceNorm's mean subtraction cancels it.
    Padded patch rows are exact zeros (zero rows x W, no bias) so they add
    nothing to the sums -- no mask needed, just divide by m_valid.

    Returns (kernel, needs_acc_scratch).
    """
    inv_m = 1.0 / float(m_valid)      # Python float -> baked literal (no capture)

    def _normalize(y):                # y: (m_pad, Coutp) f32
        s1 = jnp.sum(y, axis=0, keepdims=True)
        s2 = jnp.sum(y * y, axis=0, keepdims=True)
        mean = s1 * inv_m
        var = s2 * inv_m - mean * mean          # biased var (InstanceNorm2d)
        yn = (y - mean) * lax.rsqrt(var + eps)
        if use_act:
            yn = jnp.where(yn >= 0, yn, slope * yn)      # LeakyReLU(0.2)
        return yn

    if kt == 1:
        def kernel(p_ref, w_ref, o_ref):
            y = jnp.dot(p_ref[...], w_ref[...],
                        preferred_element_type=jnp.float32)
            o_ref[...] = _normalize(y).astype(o_ref.dtype)

        return kernel, False

    def kernel(p_ref, w_ref, o_ref, acc_ref):
        k = pl.program_id(1)

        @pl.when(k == 0)
        def _():
            acc_ref[...] = jnp.zeros_like(acc_ref)

        acc_ref[...] += jnp.dot(p_ref[...], w_ref[...],
                                preferred_element_type=jnp.float32)

        @pl.when(k == pl.num_programs(1) - 1)
        def _():
            o_ref[...] = _normalize(acc_ref[...]).astype(o_ref.dtype)

    return kernel, True


# ----------------------------------------------------------------------------
# Conv2dLayer: zero-pad -> im2col (glue) -> fused Pallas matmul/norm/act kernel
# ----------------------------------------------------------------------------
def _im2col(x_nhwc, ksz, stride, padding):
    """Zero-pad + extract patches -> (N, Ho*Wo, ksz*ksz*Cin), tap order (kh,kw,ci)."""
    n, h, w, cin = x_nhwc.shape
    xp = jnp.pad(x_nhwc, ((0, 0), (padding, padding), (padding, padding), (0, 0)))
    ho = (h + 2 * padding - ksz) // stride + 1
    wo = (w + 2 * padding - ksz) // stride + 1
    cols = []
    for kh in range(ksz):
        for kw in range(ksz):
            cols.append(lax.slice(
                xp,
                (0, kh, kw, 0),
                (n, kh + (ho - 1) * stride + 1, kw + (wo - 1) * stride + 1, cin),
                (1, stride, stride, 1)))
    patches = jnp.concatenate(cols, axis=-1).reshape(n, ho * wo, ksz * ksz * cin)
    return patches, ho, wo


def conv2d_layer(x_nhwc, w_oihw, bias, *, stride, padding, norm, activation,
                 out_dtype=jnp.bfloat16):
    n, h, w, cin = x_nhwc.shape
    cout, cin2, ksz, _ = w_oihw.shape
    assert cin == cin2

    # bf16 BEFORE im2col: the k^2-inflated patch matrix is built at 2 B/elem.
    x_nhwc = x_nhwc.astype(jnp.bfloat16)
    # TODO(synk): replace im2col with in-kernel tap accumulation (strided DMA
    # from an ANY-space NHWC ref) to remove the k^2 HBM inflation entirely.
    patches, ho, wo = _im2col(x_nhwc, ksz, stride, padding)
    m = ho * wo
    ktot = ksz * ksz * cin

    # K tiling: lane-aligned (multiple of 128), capped so weight tiles stay small.
    tk = min(2048, _round_up(ktot, 128))
    k_pad = _round_up(ktot, tk)
    kt = k_pad // tk
    coutp = _round_up(cout, 128)        # lane-dense output / full MXU columns

    # Weights: (Cout, Cin, K, K) -> (Ktot, Coutp) matching (kh, kw, ci) tap order.
    w_mat = jnp.transpose(w_oihw, (2, 3, 1, 0)).reshape(ktot, cout)
    w_mat = jnp.pad(w_mat, ((0, k_pad - ktot), (0, coutp - cout))).astype(jnp.bfloat16)

    use_act = (activation == 'lrelu')
    vmem_limit, tm_plain = _chip_config()
    cparams = pltpu.CompilerParams(
        dimension_semantics=("parallel", "arbitrary"),
        vmem_limit_bytes=vmem_limit)

    if norm == 'in':
        # Per-sample grid: batch axis "parallel" (megacore), K reduction innermost.
        m_pad = max(16, _round_up(m, 16))      # packed bf16 sublane alignment
        p = jnp.pad(patches, ((0, 0), (0, m_pad - m), (0, k_pad - ktot)))
        kernel, needs_acc = _make_norm_kernel(m_valid=m, kt=kt, use_act=use_act)
        out = pl.pallas_call(
            kernel,
            out_shape=jax.ShapeDtypeStruct((n, m_pad, coutp), out_dtype),
            grid_spec=pltpu.PrefetchScalarGridSpec(
                num_scalar_prefetch=0,
                grid=(n, kt),
                in_specs=[
                    pl.BlockSpec((None, m_pad, tk), lambda b, k: (b, 0, k)),
                    pl.BlockSpec((tk, coutp), lambda b, k: (k, 0)),
                ],
                out_specs=pl.BlockSpec((None, m_pad, coutp), lambda b, k: (b, 0, 0)),
                scratch_shapes=(
                    [pltpu.VMEM((m_pad, coutp), jnp.float32)] if needs_acc else []),
            ),
            compiler_params=cparams,
        )(p, w_mat)
        out = out[:, :m, :cout]
    else:
        # Norm-free layers: fold batch into rows and tile M (resolution-independent).
        rows = n * m
        tm = min(tm_plain, _round_up(rows, 16))
        rows_pad = _round_up(rows, tm)
        mt = rows_pad // tm
        p = patches.reshape(rows, ktot)
        p = jnp.pad(p, ((0, rows_pad - rows), (0, k_pad - ktot)))
        b2 = jnp.pad(bias, (0, coutp - cout)).reshape(1, coutp).astype(jnp.float32)

        kernel, needs_acc = _make_plain_kernel(kt=kt, use_act=use_act)
        out = pl.pallas_call(
            kernel,
            out_shape=jax.ShapeDtypeStruct((rows_pad, coutp), out_dtype),
            grid_spec=pltpu.PrefetchScalarGridSpec(
                num_scalar_prefetch=0,
                grid=(mt, kt),
                in_specs=[
                    pl.BlockSpec((tm, tk), lambda i, k: (i, k)),
                    pl.BlockSpec((tk, coutp), lambda i, k: (k, 0)),
                    pl.BlockSpec((1, coutp), lambda i, k: (0, 0)),
                ],
                out_specs=pl.BlockSpec((tm, coutp), lambda i, k: (i, 0)),
                scratch_shapes=(
                    [pltpu.VMEM((tm, coutp), jnp.float32)] if needs_acc else []),
            ),
            compiler_params=cparams,
        )(p, w_mat, b2)
        out = out[:rows, :cout]

    return out.reshape(n, ho, wo, cout)


# ----------------------------------------------------------------------------
# Parameter setup (deterministic, synthetic): weight ~ N(0, 0.02), bias = 0,
# spectral norm applied as a weight preprocessing step (power iteration in JAX).
# ----------------------------------------------------------------------------
def spectral_normalize(w_oihw, key, n_iter=5):
    cout = w_oihw.shape[0]
    w_mat = w_oihw.reshape(cout, -1)
    u = jax.random.normal(key, (cout,), jnp.float32)
    u = u / (jnp.linalg.norm(u) + 1e-12)
    v = None
    for _ in range(n_iter):
        v = w_mat.T @ u
        v = v / (jnp.linalg.norm(v) + 1e-12)
        u = w_mat @ v
        u = u / (jnp.linalg.norm(u) + 1e-12)
    sigma = u @ (w_mat @ v)
    return w_oihw / sigma


LAYER_DEFS = (
    # name,    cin, cout,  k, stride, pad, norm,  act,    sn
    ('block1',   6,   64,  7, 1, 3, 'none', 'lrelu', True),
    ('block2',  64,  128,  4, 2, 1, 'none', 'lrelu', False),
    ('block3', 128,  256,  4, 2, 1, 'in',   'lrelu', False),
    ('block4', 256,  512,  4, 2, 1, 'in',   'lrelu', False),
    ('final1', 512,  512,  4, 1, 1, 'in',   'lrelu', True),
    ('final2', 512,    1,  4, 1, 1, 'none', 'none',  True),
)
# Hard-coded 512 in final1/final2 requires start_channels == 64.
assert LAYER_DEFS[3][2] == 512 and LAYER_DEFS[4][1] == 512


def init_params(key):
    params = {}
    for i, (name, cin, cout, k, _, _, _, _, sn) in enumerate(LAYER_DEFS):
        kw, ksn = jax.random.split(jax.random.fold_in(key, i))
        w = 0.02 * jax.random.normal(kw, (cout, cin, k, k), jnp.float32)
        if sn:
            # TODO(synk): PyTorch SpectralNorm keeps a persistent random `u`
            # with 1 power iteration per forward; here we bake it in at setup.
            w = spectral_normalize(w, ksn)
        b = jnp.zeros((cout,), jnp.float32)
        params[name] = (w, b)
    return params


def patch_discriminator70(img_a_nchw, img_b_nchw, params):
    x = jnp.concatenate([img_a_nchw, img_b_nchw], axis=1)    # NCHW concat on C
    x = jnp.transpose(x, (0, 2, 3, 1))                        # -> NHWC
    last_name = LAYER_DEFS[-1][0]
    for (name, _, _, _, stride, pad, norm, act, _) in LAYER_DEFS:
        w, b = params[name]
        x = conv2d_layer(
            x, w, b, stride=stride, padding=pad, norm=norm, activation=act,
            out_dtype=jnp.float32 if name == last_name else jnp.bfloat16)
    return jnp.transpose(x, (0, 3, 1, 2))                      # -> NCHW


if __name__ == "__main__":
    key = jax.random.PRNGKey(0)
    k_a, k_b, k_p = jax.random.split(key, 3)

    B, C, H, W = 2, 3, 32, 32
    img_A = jax.random.normal(k_a, (B, C, H, W), jnp.float32)
    img_B = jax.random.normal(k_b, (B, C, H, W), jnp.float32)
    params = init_params(k_p)

    fwd = jax.jit(functools.partial(patch_discriminator70, params=params))
    out = jax.block_until_ready(fwd(img_A, img_B))

    # 32 -> 32 -> 16 -> 8 -> 4 -> 3 -> 2 spatial, 1 channel (70x70 PatchGAN head)
    assert out.shape == (B, 1, 2, 2), out.shape
    assert out.dtype == jnp.float32
    print("KERNEL_OK")
</pallas_src>

<mosaic_0001>
module attributes {stable_mosaic.version = 11 : i64} {
  func.func @kernel(%arg0: i32, %arg1: i32, %arg2: memref<512x384xbf16, #tpu.memory_space<vmem>>, %arg3: memref<384x128xbf16, #tpu.memory_space<vmem>>, %arg4: memref<1x128xf32, #tpu.memory_space<vmem>>, %arg5: memref<512x128xbf16, #tpu.memory_space<vmem>>) attributes {dimension_semantics = [#tpu.dimension_semantics<parallel>, #tpu.dimension_semantics<arbitrary>], iteration_bounds = array<i64: 4, 1>, scalar_prefetch = 0 : i64, scratch_operands = 0 : i64, tpu.core_type = #tpu.core_type<tc>, window_params = [{transform_indices = @transform_0, window_bounds = array<i64: 512, 384>}, {transform_indices = @transform_1, window_bounds = array<i64: 384, 128>}, {pipeline_mode = #tpu.pipeline_mode<synchronous>, transform_indices = @transform_2, window_bounds = array<i64: 1, 128>}, {transform_indices = @transform_3, window_bounds = array<i64: 512, 128>}]} {
    %c0 = arith.constant 0 : index
    %c0_0 = arith.constant 0 : index
    %0 = vector.load %arg2[%c0, %c0_0] : memref<512x384xbf16, #tpu.memory_space<vmem>>, vector<512x384xbf16>
    %c0_1 = arith.constant 0 : index
    %c0_2 = arith.constant 0 : index
    %1 = vector.load %arg3[%c0_1, %c0_2] : memref<384x128xbf16, #tpu.memory_space<vmem>>, vector<384x128xbf16>
    %cst = arith.constant dense<0.000000e+00> : vector<512x128xf32>
    %2 = tpu.matmul %0, %1, %cst {dimension_numbers = #tpu.dot_dimension_numbers<[1], [0], [0], [1], [0, 0, 1, 1], [], []>} : vector<512x384xbf16>, vector<384x128xbf16>, vector<512x128xf32> -> vector<512x128xf32>
    %c0_3 = arith.constant 0 : index
    %c0_4 = arith.constant 0 : index
    %3 = vector.load %arg4[%c0_3, %c0_4] : memref<1x128xf32, #tpu.memory_space<vmem>>, vector<1x128xf32>
    %4 = vector.broadcast %3 : vector<1x128xf32> to vector<512x128xf32>
    %5 = arith.addf %2, %4 : vector<512x128xf32>
    %cst_5 = arith.constant 0.000000e+00 : f32
    %6 = vector.broadcast %cst_5 : f32 to vector<512x128xf32>
    %7 = arith.cmpf oge, %5, %6 : vector<512x128xf32>
    %cst_6 = arith.constant 2.000000e-01 : f32
    %8 = vector.broadcast %cst_6 : f32 to vector<512x128xf32>
    %9 = arith.mulf %8, %5 : vector<512x128xf32>
    %10 = arith.select %7, %5, %9 : vector<512x128xi1>, vector<512x128xf32>
    %11 = arith.truncf %10 : vector<512x128xf32> to vector<512x128xbf16>
    %c0_7 = arith.constant 0 : index
    %c0_8 = arith.constant 0 : index
    %12 = vector.load %arg5[%c0_7, %c0_8] : memref<512x128xbf16, #tpu.memory_space<vmem>>, vector<512x128xbf16>
    tpu.vector_store %arg5[%c0_7, %c0_8], %11 {strides = array<i32>} : memref<512x128xbf16, #tpu.memory_space<vmem>>, vector<512x128xbf16>,
    return
  }
  func.func @transform_0(%arg0: i32, %arg1: i32) -> (i32, i32) {
    %c0_i32 = arith.constant 0 : i32
    return %arg0, %arg1 : i32, i32
  }
  func.func @transform_1(%arg0: i32, %arg1: i32) -> (i32, i32) {
    %c0_i32 = arith.constant 0 : i32
    %c0_i32_0 = arith.constant 0 : i32
    return %arg1, %c0_i32 : i32, i32
  }
  func.func @transform_2(%arg0: i32, %arg1: i32) -> (i32, i32) {
    %c0_i32 = arith.constant 0 : i32
    %c0_i32_0 = arith.constant 0 : i32
    %c0_i32_1 = arith.constant 0 : i32
    return %c0_i32, %c0_i32_0 : i32, i32
  }
  func.func @transform_3(%arg0: i32, %arg1: i32) -> (i32, i32) {
    %c0_i32 = arith.constant 0 : i32
    %c0_i32_0 = arith.constant 0 : i32
    return %arg0, %c0_i32 : i32, i32
  }
}

module attributes {stable_mosaic.version = 11 : i64} {
  func.func @kernel(%arg0: i32, %arg1: i32, %arg2: memref<512x1024xbf16, #tpu.memory_space<vmem>>, %arg3: memref<1024x128xbf16, #tpu.memory_space<vmem>>, %arg4: memref<1x128xf32, #tpu.memory_space<vmem>>, %arg5: memref<512x128xbf16, #tpu.memory_space<vmem>>) attributes {dimension_semantics = [#tpu.dimension_semantics<parallel>, #tpu.dimension_semantics<arbitrary>], iteration_bounds = array<i64: 1, 1>, scalar_prefetch = 0 : i64, scratch_operands = 0 : i64, tpu.core_type = #tpu.core_type<tc>, window_params = [{transform_indices = @transform_0, window_bounds = array<i64: 512, 1024>}, {transform_indices = @transform_1, window_bounds = array<i64: 1024, 128>}, {pipeline_mode = #tpu.pipeline_mode<synchronous>, transform_indices = @transform_2, window_bounds = array<i64: 1, 128>}, {transform_indices = @transform_3, window_bounds = array<i64: 512, 128>}]} {
    %c0 = arith.constant 0 : index
    %c0_0 = arith.constant 0 : index
    %0 = vector.load %arg2[%c0, %c0_0] : memref<512x1024xbf16, #tpu.memory_space<vmem>>, vector<512x1024xbf16>
    %c0_1 = arith.constant 0 : index
    %c0_2 = arith.constant 0 : index
    %1 = vector.load %arg3[%c0_1, %c0_2] : memref<1024x128xbf16, #tpu.memory_space<vmem>>, vector<1024x128xbf16>
    %cst = arith.constant dense<0.000000e+00> : vector<512x128xf32>
    %2 = tpu.matmul %0, %1, %cst {dimension_numbers = #tpu.dot_dimension_numbers<[1], [0], [0], [1], [0, 0, 1, 1], [], []>} : vector<512x1024xbf16>, vector<1024x128xbf16>, vector<512x128xf32> -> vector<512x128xf32>
    %c0_3 = arith.constant 0 : index
    %c0_4 = arith.constant 0 : index
    %3 = vector.load %arg4[%c0_3, %c0_4] : memref<1x128xf32, #tpu.memory_space<vmem>>, vector<1x128xf32>
    %4 = vector.broadcast %3 : vector<1x128xf32> to vector<512x128xf32>
    %5 = arith.addf %2, %4 : vector<512x128xf32>
    %cst_5 = arith.constant 0.000000e+00 : f32
    %6 = vector.broadcast %cst_5 : f32 to vector<512x128xf32>
    %7 = arith.cmpf oge, %5, %6 : vector<512x128xf32>
    %cst_6 = arith.constant 2.000000e-01 : f32
    %8 = vector.broadcast %cst_6 : f32 to vector<512x128xf32>
    %9 = arith.mulf %8, %5 : vector<512x128xf32>
    %10 = arith.select %7, %5, %9 : vector<512x128xi1>, vector<512x128xf32>
    %11 = arith.truncf %10 : vector<512x128xf32> to vector<512x128xbf16>
    %c0_7 = arith.constant 0 : index
    %c0_8 = arith.constant 0 : index
    %12 = vector.load %arg5[%c0_7, %c0_8] : memref<512x128xbf16, #tpu.memory_space<vmem>>, vector<512x128xbf16>
    tpu.vector_store %arg5[%c0_7, %c0_8], %11 {strides = array<i32>} : memref<512x128xbf16, #tpu.memory_space<vmem>>, vector<512x128xbf16>,
    return
  }
  func.func @transform_0(%arg0: i32, %arg1: i32) -> (i32, i32) {
    %c0_i32 = arith.constant 0 : i32
    return %arg0, %arg1 : i32, i32
  }
  func.func @transform_1(%arg0: i32, %arg1: i32) -> (i32, i32) {
    %c0_i32 = arith.constant 0 : i32
    %c0_i32_0 = arith.constant 0 : i32
    return %arg1, %c0_i32 : i32, i32
  }
  func.func @transform_2(%arg0: i32, %arg1: i32) -> (i32, i32) {
    %c0_i32 = arith.constant 0 : i32
    %c0_i32_0 = arith.constant 0 : i32
    %c0_i32_1 = arith.constant 0 : i32
    return %c0_i32, %c0_i32_0 : i32, i32
  }
  func.func @transform_3(%arg0: i32, %arg1: i32) -> (i32, i32) {
    %c0_i32 = arith.constant 0 : i32
    %c0_i32_0 = arith.constant 0 : i32
    return %arg0, %c0_i32 : i32, i32
  }
}

module attributes {stable_mosaic.version = 11 : i64} {
  func.func @kernel(%arg0: i32, %arg1: i32, %arg2: memref<1x64x2048xbf16, #tpu.memory_space<vmem>>, %arg3: memref<2048x256xbf16, #tpu.memory_space<vmem>>, %arg4: memref<1x64x256xbf16, #tpu.memory_space<vmem>>) attributes {dimension_semantics = [#tpu.dimension_semantics<parallel>, #tpu.dimension_semantics<arbitrary>], iteration_bounds = array<i64: 2, 1>, scalar_prefetch = 0 : i64, scratch_operands = 0 : i64, tpu.core_type = #tpu.core_type<tc>, window_params = [{transform_indices = @transform_0, window_bounds = array<i64: 1, 64, 2048>}, {transform_indices = @transform_1, window_bounds = array<i64: 2048, 256>}, {transform_indices = @transform_2, window_bounds = array<i64: 1, 64, 256>}]} {
    %c0 = arith.constant 0 : index
    %c0_0 = arith.constant 0 : index
    %c0_1 = arith.constant 0 : index
    %0 = vector.load %arg2[%c0, %c0_0, %c0_1] : memref<1x64x2048xbf16, #tpu.memory_space<vmem>>, vector<1x64x2048xbf16>
    %1 = vector.shape_cast %0 : vector<1x64x2048xbf16> to vector<64x2048xbf16>
    %c0_2 = arith.constant 0 : index
    %c0_3 = arith.constant 0 : index
    %2 = vector.load %arg3[%c0_2, %c0_3] : memref<2048x256xbf16, #tpu.memory_space<vmem>>, vector<2048x256xbf16>
    %cst = arith.constant dense<0.000000e+00> : vector<64x256xf32>
    %3 = tpu.matmul %1, %2, %cst {dimension_numbers = #tpu.dot_dimension_numbers<[1], [0], [0], [1], [0, 0, 1, 1], [], []>} : vector<64x2048xbf16>, vector<2048x256xbf16>, vector<64x256xf32> -> vector<64x256xf32>
    %cst_4 = arith.constant dense<0.000000e+00> : vector<256xf32>
    %4 = vector.multi_reduction <add>, %3, %cst_4 [0] : vector<64x256xf32> to vector<256xf32>
    %5 = vector.shape_cast %4 : vector<256xf32> to vector<1x256xf32>
    %6 = arith.mulf %3, %3 : vector<64x256xf32>
    %cst_5 = arith.constant dense<0.000000e+00> : vector<256xf32>
    %7 = vector.multi_reduction <add>, %6, %cst_5 [0] : vector<64x256xf32> to vector<256xf32>
    %8 = vector.shape_cast %7 : vector<256xf32> to vector<1x256xf32>
    %cst_6 = arith.constant 1.562500e-02 : f32
    %9 = vector.broadcast %cst_6 : f32 to vector<1x256xf32>
    %10 = arith.mulf %5, %9 : vector<1x256xf32>
    %cst_7 = arith.constant 1.562500e-02 : f32
    %11 = vector.broadcast %cst_7 : f32 to vector<1x256xf32>
    %12 = arith.mulf %8, %11 : vector<1x256xf32>
    %13 = arith.mulf %10, %10 : vector<1x256xf32>
    %14 = arith.subf %12, %13 : vector<1x256xf32>
    %15 = vector.broadcast %10 : vector<1x256xf32> to vector<64x256xf32>
    %16 = arith.subf %3, %15 : vector<64x256xf32>
    %cst_8 = arith.constant 9.99999974E-6 : f32
    %17 = vector.broadcast %cst_8 : f32 to vector<1x256xf32>
    %18 = arith.addf %14, %17 : vector<1x256xf32>
    %19 = math.rsqrt %18 : vector<1x256xf32>
    %20 = vector.broadcast %19 : vector<1x256xf32> to vector<64x256xf32>
    %21 = arith.mulf %16, %20 : vector<64x256xf32>
    %cst_9 = arith.constant 0.000000e+00 : f32
    %22 = vector.broadcast %cst_9 : f32 to vector<64x256xf32>
    %23 = arith.cmpf oge, %21, %22 : vector<64x256xf32>
    %cst_10 = arith.constant 2.000000e-01 : f32
    %24 = vector.broadcast %cst_10 : f32 to vector<64x256xf32>
    %25 = arith.mulf %24, %21 : vector<64x256xf32>
    %26 = arith.select %23, %21, %25 : vector<64x256xi1>, vector<64x256xf32>
    %27 = arith.truncf %26 : vector<64x256xf32> to vector<64x256xbf16>
    %c0_11 = arith.constant 0 : index
    %c0_12 = arith.constant 0 : index
    %c0_13 = arith.constant 0 : index
    %28 = vector.load %arg4[%c0_11, %c0_12, %c0_13] : memref<1x64x256xbf16, #tpu.memory_space<vmem>>, vector<1x64x256xbf16>
    %29 = vector.shape_cast %28 : vector<1x64x256xbf16> to vector<64x256xbf16>
    %30 = vector.shape_cast %27 : vector<64x256xbf16> to vector<1x64x256xbf16>
    tpu.vector_store %arg4[%c0_11, %c0_12, %c0_13], %30 {strides = array<i32>} : memref<1x64x256xbf16, #tpu.memory_space<vmem>>, vector<1x64x256xbf16>,
    return
  }
  func.func @transform_0(%arg0: i32, %arg1: i32) -> (i32, i32, i32) {
    %c0_i32 = arith.constant 0 : i32
    %c0_i32_0 = arith.constant 0 : i32
    return %arg0, %c0_i32, %arg1 : i32, i32, i32
  }
  func.func @transform_1(%arg0: i32, %arg1: i32) -> (i32, i32) {
    %c0_i32 = arith.constant 0 : i32
    %c0_i32_0 = arith.constant 0 : i32
    return %arg1, %c0_i32 : i32, i32
  }
  func.func @transform_2(%arg0: i32, %arg1: i32) -> (i32, i32, i32) {
    %c0_i32 = arith.constant 0 : i32
    %c0_i32_0 = arith.constant 0 : i32
    %c0_i32_1 = arith.constant 0 : i32
    return %arg0, %c0_i32, %c0_i32_0 : i32, i32, i32
  }
}

module attributes {stable_mosaic.version = 11 : i64} {
  func.func @kernel(%arg0: i32, %arg1: i32, %arg2: memref<1x16x2048xbf16, #tpu.memory_space<vmem>>, %arg3: memref<2048x512xbf16, #tpu.memory_space<vmem>>, %arg4: memref<1x16x512xbf16, #tpu.memory_space<vmem>>, %arg5: memref<16x512xf32, #tpu.memory_space<vmem>>) attributes {dimension_semantics = [#tpu.dimension_semantics<parallel>, #tpu.dimension_semantics<arbitrary>], iteration_bounds = array<i64: 2, 2>, scalar_prefetch = 0 : i64, scratch_operands = 1 : i64, tpu.core_type = #tpu.core_type<tc>, window_params = [{transform_indices = @transform_0, window_bounds = array<i64: 1, 16, 2048>}, {transform_indices = @transform_1, window_bounds = array<i64: 2048, 512>}, {transform_indices = @transform_2, window_bounds = array<i64: 1, 16, 512>}]} {
    %c0_i32 = arith.constant 0 : i32
    %0 = arith.cmpi eq, %arg1, %c0_i32 : i32
    %1 = arith.extui %0 : i1 to i32
    %c0_i32_0 = arith.constant 0 : i32
    %2 = arith.cmpi ne, %1, %c0_i32_0 : i32
    scf.if %2 {
      %cst_10 = arith.constant 0.000000e+00 : f32
      %13 = vector.broadcast %cst_10 : f32 to vector<16x512xf32>
      %c0_11 = arith.constant 0 : index
      %c0_12 = arith.constant 0 : index
      %14 = vector.load %arg5[%c0_11, %c0_12] : memref<16x512xf32, #tpu.memory_space<vmem>>, vector<16x512xf32>
      tpu.vector_store %arg5[%c0_11, %c0_12], %13 {strides = array<i32>} : memref<16x512xf32, #tpu.memory_space<vmem>>, vector<16x512xf32>,
    } else {
    }
    %c0 = arith.constant 0 : index
    %c0_1 = arith.constant 0 : index
    %3 = vector.load %arg5[%c0, %c0_1] : memref<16x512xf32, #tpu.memory_space<vmem>>, vector<16x512xf32>
    %c0_2 = arith.constant 0 : index
    %c0_3 = arith.constant 0 : index
    %c0_4 = arith.constant 0 : index
    %4 = vector.load %arg2[%c0_2, %c0_3, %c0_4] : memref<1x16x2048xbf16, #tpu.memory_space<vmem>>, vector<1x16x2048xbf16>
    %5 = vector.shape_cast %4 : vector<1x16x2048xbf16> to vector<16x2048xbf16>
    %c0_5 = arith.constant 0 : index
    %c0_6 = arith.constant 0 : index
    %6 = vector.load %arg3[%c0_5, %c0_6] : memref<2048x512xbf16, #tpu.memory_space<vmem>>, vector<2048x512xbf16>
    %cst = arith.constant dense<0.000000e+00> : vector<16x512xf32>
    %7 = tpu.matmul %5, %6, %cst {dimension_numbers = #tpu.dot_dimension_numbers<[1], [0], [0], [1], [0, 0, 1, 1], [], []>} : vector<16x2048xbf16>, vector<2048x512xbf16>, vector<16x512xf32> -> vector<16x512xf32>
    %8 = arith.addf %3, %7 : vector<16x512xf32>
    %c0_7 = arith.constant 0 : index
    %c0_8 = arith.constant 0 : index
    %9 = vector.load %arg5[%c0_7, %c0_8] : memref<16x512xf32, #tpu.memory_space<vmem>>, vector<16x512xf32>
    tpu.vector_store %arg5[%c0_7, %c0_8], %8 {strides = array<i32>} : memref<16x512xf32, #tpu.memory_space<vmem>>, vector<16x512xf32>,
    %c1_i32 = arith.constant 1 : i32
    %10 = arith.cmpi eq, %arg1, %c1_i32 : i32
    %11 = arith.extui %10 : i1 to i32
    %c0_i32_9 = arith.constant 0 : i32
    %12 = arith.cmpi ne, %11, %c0_i32_9 : i32
    scf.if %12 {
      %c0_10 = arith.constant 0 : index
      %c0_11 = arith.constant 0 : index
      %13 = vector.load %arg5[%c0_10, %c0_11] : memref<16x512xf32, #tpu.memory_space<vmem>>, vector<16x512xf32>
      %cst_12 = arith.constant dense<0.000000e+00> : vector<512xf32>
      %14 = vector.multi_reduction <add>, %13, %cst_12 [0] : vector<16x512xf32> to vector<512xf32>
      %15 = vector.shape_cast %14 : vector<512xf32> to vector<1x512xf32>
      %16 = arith.mulf %13, %13 : vector<16x512xf32>
      %cst_13 = arith.constant dense<0.000000e+00> : vector<512xf32>
      %17 = vector.multi_reduction <add>, %16, %cst_13 [0] : vector<16x512xf32> to vector<512xf32>
      %18 = vector.shape_cast %17 : vector<512xf32> to vector<1x512xf32>
      %cst_14 = arith.constant 6.250000e-02 : f32
      %19 = vector.broadcast %cst_14 : f32 to vector<1x512xf32>
      %20 = arith.mulf %15, %19 : vector<1x512xf32>
      %cst_15 = arith.constant 6.250000e-02 : f32
      %21 = vector.broadcast %cst_15 : f32 to vector<1x512xf32>
      %22 = arith.mulf %18, %21 : vector<1x512xf32>
      %23 = arith.mulf %20, %20 : vector<1x512xf32>
      %24 = arith.subf %22, %23 : vector<1x512xf32>
      %25 = vector.broadcast %20 : vector<1x512xf32> to vector<16x512xf32>
      %26 = arith.subf %13, %25 : vector<16x512xf32>
      %cst_16 = arith.constant 9.99999974E-6 : f32
      %27 = vector.broadcast %cst_16 : f32 to vector<1x512xf32>
      %28 = arith.addf %24, %27 : vector<1x512xf32>
      %29 = math.rsqrt %28 : vector<1x512xf32>
      %30 = vector.broadcast %29 : vector<1x512xf32> to vector<16x512xf32>
      %31 = arith.mulf %26, %30 : vector<16x512xf32>
      %cst_17 = arith.constant 0.000000e+00 : f32
      %32 = vector.broadcast %cst_17 : f32 to vector<16x512xf32>
      %33 = arith.cmpf oge, %31, %32 : vector<16x512xf32>
      %cst_18 = arith.constant 2.000000e-01 : f32
      %34 = vector.broadcast %cst_18 : f32 to vector<16x512xf32>
      %35 = arith.mulf %34, %31 : vector<16x512xf32>
      %36 = arith.select %33, %31, %35 : vector<16x512xi1>, vector<16x512xf32>
      %37 = arith.truncf %36 : vector<16x512xf32> to vector<16x512xbf16>
      %c0_19 = arith.constant 0 : index
      %c0_20 = arith.constant 0 : index
      %c0_21 = arith.constant 0 : index
      %38 = vector.load %arg4[%c0_19, %c0_20, %c0_21] : memref<1x16x512xbf16, #tpu.memory_space<vmem>>, vector<1x16x512xbf16>
      %39 = vector.shape_cast %38 : vector<1x16x512xbf16> to vector<16x512xbf16>
      %40 = vector.shape_cast %37 : vector<16x512xbf16> to vector<1x16x512xbf16>
      tpu.vector_store %arg4[%c0_19, %c0_20, %c0_21], %40 {strides = array<i32>} : memref<1x16x512xbf16, #tpu.memory_space<vmem>>, vector<1x16x512xbf16>,
    } else {
    }
    return
  }
  func.func @transform_0(%arg0: i32, %arg1: i32) -> (i32, i32, i32) {
    %c0_i32 = arith.constant 0 : i32
    %c0_i32_0 = arith.constant 0 : i32
    return %arg0, %c0_i32, %arg1 : i32, i32, i32
  }
  func.func @transform_1(%arg0: i32, %arg1: i32) -> (i32, i32) {
    %c0_i32 = arith.constant 0 : i32
    %c0_i32_0 = arith.constant 0 : i32
    return %arg1, %c0_i32 : i32, i32
  }
  func.func @transform_2(%arg0: i32, %arg1: i32) -> (i32, i32, i32) {
    %c0_i32 = arith.constant 0 : i32
    %c0_i32_0 = arith.constant 0 : i32
    %c0_i32_1 = arith.constant 0 : i32
    return %arg0, %c0_i32, %c0_i32_0 : i32, i32, i32
  }
}

module attributes {stable_mosaic.version = 11 : i64} {
  func.func @kernel(%arg0: i32, %arg1: i32, %arg2: memref<1x16x2048xbf16, #tpu.memory_space<vmem>>, %arg3: memref<2048x512xbf16, #tpu.memory_space<vmem>>, %arg4: memref<1x16x512xbf16, #tpu.memory_space<vmem>>, %arg5: memref<16x512xf32, #tpu.memory_space<vmem>>) attributes {dimension_semantics = [#tpu.dimension_semantics<parallel>, #tpu.dimension_semantics<arbitrary>], iteration_bounds = array<i64: 2, 4>, scalar_prefetch = 0 : i64, scratch_operands = 1 : i64, tpu.core_type = #tpu.core_type<tc>, window_params = [{transform_indices = @transform_0, window_bounds = array<i64: 1, 16, 2048>}, {transform_indices = @transform_1, window_bounds = array<i64: 2048, 512>}, {transform_indices = @transform_2, window_bounds = array<i64: 1, 16, 512>}]} {
    %c0_i32 = arith.constant 0 : i32
    %0 = arith.cmpi eq, %arg1, %c0_i32 : i32
    %1 = arith.extui %0 : i1 to i32
    %c0_i32_0 = arith.constant 0 : i32
    %2 = arith.cmpi ne, %1, %c0_i32_0 : i32
    scf.if %2 {
      %cst_10 = arith.constant 0.000000e+00 : f32
      %13 = vector.broadcast %cst_10 : f32 to vector<16x512xf32>
      %c0_11 = arith.constant 0 : index
      %c0_12 = arith.constant 0 : index
      %14 = vector.load %arg5[%c0_11, %c0_12] : memref<16x512xf32, #tpu.memory_space<vmem>>, vector<16x512xf32>
      tpu.vector_store %arg5[%c0_11, %c0_12], %13 {strides = array<i32>} : memref<16x512xf32, #tpu.memory_space<vmem>>, vector<16x512xf32>,
    } else {
    }
    %c0 = arith.constant 0 : index
    %c0_1 = arith.constant 0 : index
    %3 = vector.load %arg5[%c0, %c0_1] : memref<16x512xf32, #tpu.memory_space<vmem>>, vector<16x512xf32>
    %c0_2 = arith.constant 0 : index
    %c0_3 = arith.constant 0 : index
    %c0_4 = arith.constant 0 : index
    %4 = vector.load %arg2[%c0_2, %c0_3, %c0_4] : memref<1x16x2048xbf16, #tpu.memory_space<vmem>>, vector<1x16x2048xbf16>
    %5 = vector.shape_cast %4 : vector<1x16x2048xbf16> to vector<16x2048xbf16>
    %c0_5 = arith.constant 0 : index
    %c0_6 = arith.constant 0 : index
    %6 = vector.load %arg3[%c0_5, %c0_6] : memref<2048x512xbf16, #tpu.memory_space<vmem>>, vector<2048x512xbf16>
    %cst = arith.constant dense<0.000000e+00> : vector<16x512xf32>
    %7 = tpu.matmul %5, %6, %cst {dimension_numbers = #tpu.dot_dimension_numbers<[1], [0], [0], [1], [0, 0, 1, 1], [], []>} : vector<16x2048xbf16>, vector<2048x512xbf16>, vector<16x512xf32> -> vector<16x512xf32>
    %8 = arith.addf %3, %7 : vector<16x512xf32>
    %c0_7 = arith.constant 0 : index
    %c0_8 = arith.constant 0 : index
    %9 = vector.load %arg5[%c0_7, %c0_8] : memref<16x512xf32, #tpu.memory_space<vmem>>, vector<16x512xf32>
    tpu.vector_store %arg5[%c0_7, %c0_8], %8 {strides = array<i32>} : memref<16x512xf32, #tpu.memory_space<vmem>>, vector<16x512xf32>,
    %c3_i32 = arith.constant 3 : i32
    %10 = arith.cmpi eq, %arg1, %c3_i32 : i32
    %11 = arith.extui %10 : i1 to i32
    %c0_i32_9 = arith.constant 0 : i32
    %12 = arith.cmpi ne, %11, %c0_i32_9 : i32
    scf.if %12 {
      %c0_10 = arith.constant 0 : index
      %c0_11 = arith.constant 0 : index
      %13 = vector.load %arg5[%c0_10, %c0_11] : memref<16x512xf32, #tpu.memory_space<vmem>>, vector<16x512xf32>
      %cst_12 = arith.constant dense<0.000000e+00> : vector<512xf32>
      %14 = vector.multi_reduction <add>, %13, %cst_12 [0] : vector<16x512xf32> to vector<512xf32>
      %15 = vector.shape_cast %14 : vector<512xf32> to vector<1x512xf32>
      %16 = arith.mulf %13, %13 : vector<16x512xf32>
      %cst_13 = arith.constant dense<0.000000e+00> : vector<512xf32>
      %17 = vector.multi_reduction <add>, %16, %cst_13 [0] : vector<16x512xf32> to vector<512xf32>
      %18 = vector.shape_cast %17 : vector<512xf32> to vector<1x512xf32>
      %cst_14 = arith.constant 0.111111112 : f32
      %19 = vector.broadcast %cst_14 : f32 to vector<1x512xf32>
      %20 = arith.mulf %15, %19 : vector<1x512xf32>
      %cst_15 = arith.constant 0.111111112 : f32
      %21 = vector.broadcast %cst_15 : f32 to vector<1x512xf32>
      %22 = arith.mulf %18, %21 : vector<1x512xf32>
      %23 = arith.mulf %20, %20 : vector<1x512xf32>
      %24 = arith.subf %22, %23 : vector<1x512xf32>
      %25 = vector.broadcast %20 : vector<1x512xf32> to vector<16x512xf32>
      %26 = arith.subf %13, %25 : vector<16x512xf32>
      %cst_16 = arith.constant 9.99999974E-6 : f32
      %27 = vector.broadcast %cst_16 : f32 to vector<1x512xf32>
      %28 = arith.addf %24, %27 : vector<1x512xf32>
      %29 = math.rsqrt %28 : vector<1x512xf32>
      %30 = vector.broadcast %29 : vector<1x512xf32> to vector<16x512xf32>
      %31 = arith.mulf %26, %30 : vector<16x512xf32>
      %cst_17 = arith.constant 0.000000e+00 : f32
      %32 = vector.broadcast %cst_17 : f32 to vector<16x512xf32>
      %33 = arith.cmpf oge, %31, %32 : vector<16x512xf32>
      %cst_18 = arith.constant 2.000000e-01 : f32
      %34 = vector.broadcast %cst_18 : f32 to vector<16x512xf32>
      %35 = arith.mulf %34, %31 : vector<16x512xf32>
      %36 = arith.select %33, %31, %35 : vector<16x512xi1>, vector<16x512xf32>
      %37 = arith.truncf %36 : vector<16x512xf32> to vector<16x512xbf16>
      %c0_19 = arith.constant 0 : index
      %c0_20 = arith.constant 0 : index
      %c0_21 = arith.constant 0 : index
      %38 = vector.load %arg4[%c0_19, %c0_20, %c0_21] : memref<1x16x512xbf16, #tpu.memory_space<vmem>>, vector<1x16x512xbf16>
      %39 = vector.shape_cast %38 : vector<1x16x512xbf16> to vector<16x512xbf16>
      %40 = vector.shape_cast %37 : vector<16x512xbf16> to vector<1x16x512xbf16>
      tpu.vector_store %arg4[%c0_19, %c0_20, %c0_21], %40 {strides = array<i32>} : memref<1x16x512xbf16, #tpu.memory_space<vmem>>, vector<1x16x512xbf16>,
    } else {
    }
    return
  }
  func.func @transform_0(%arg0: i32, %arg1: i32) -> (i32, i32, i32) {
    %c0_i32 = arith.constant 0 : i32
    %c0_i32_0 = arith.constant 0 : i32
    return %arg0, %c0_i32, %arg1 : i32, i32, i32
  }
  func.func @transform_1(%arg0: i32, %arg1: i32) -> (i32, i32) {
    %c0_i32 = arith.constant 0 : i32
    %c0_i32_0 = arith.constant 0 : i32
    return %arg1, %c0_i32 : i32, i32
  }
  func.func @transform_2(%arg0: i32, %arg1: i32) -> (i32, i32, i32) {
    %c0_i32 = arith.constant 0 : i32
    %c0_i32_0 = arith.constant 0 : i32
    %c0_i32_1 = arith.constant 0 : i32
    return %arg0, %c0_i32, %c0_i32_0 : i32, i32, i32
  }
}

module attributes {stable_mosaic.version = 11 : i64} {
  func.func @kernel(%arg0: i32, %arg1: i32, %arg2: memref<16x2048xbf16, #tpu.memory_space<vmem>>, %arg3: memref<2048x128xbf16, #tpu.memory_space<vmem>>, %arg4: memref<1x128xf32, #tpu.memory_space<vmem>>, %arg5: memref<16x128xf32, #tpu.memory_space<vmem>>, %arg6: memref<16x128xf32, #tpu.memory_space<vmem>>) attributes {dimension_semantics = [#tpu.dimension_semantics<parallel>, #tpu.dimension_semantics<arbitrary>], iteration_bounds = array<i64: 1, 4>, scalar_prefetch = 0 : i64, scratch_operands = 1 : i64, tpu.core_type = #tpu.core_type<tc>, window_params = [{transform_indices = @transform_0, window_bounds = array<i64: 16, 2048>}, {transform_indices = @transform_1, window_bounds = array<i64: 2048, 128>}, {pipeline_mode = #tpu.pipeline_mode<synchronous>, transform_indices = @transform_2, window_bounds = array<i64: 1, 128>}, {transform_indices = @transform_3, window_bounds = array<i64: 16, 128>}]} {
    %c0_i32 = arith.constant 0 : i32
    %0 = arith.cmpi eq, %arg1, %c0_i32 : i32
    %1 = arith.extui %0 : i1 to i32
    %c0_i32_0 = arith.constant 0 : i32
    %2 = arith.cmpi ne, %1, %c0_i32_0 : i32
    scf.if %2 {
      %cst_9 = arith.constant 0.000000e+00 : f32
      %12 = vector.broadcast %cst_9 : f32 to vector<16x128xf32>
      %c0_10 = arith.constant 0 : index
      %c0_11 = arith.constant 0 : index
      %13 = vector.load %arg6[%c0_10, %c0_11] : memref<16x128xf32, #tpu.memory_space<vmem>>, vector<16x128xf32>
      tpu.vector_store %arg6[%c0_10, %c0_11], %12 {strides = array<i32>} : memref<16x128xf32, #tpu.memory_space<vmem>>, vector<16x128xf32>,
    } else {
    }
    %c0 = arith.constant 0 : index
    %c0_1 = arith.constant 0 : index
    %3 = vector.load %arg6[%c0, %c0_1] : memref<16x128xf32, #tpu.memory_space<vmem>>, vector<16x128xf32>
    %c0_2 = arith.constant 0 : index
    %c0_3 = arith.constant 0 : index
    %4 = vector.load %arg2[%c0_2, %c0_3] : memref<16x2048xbf16, #tpu.memory_space<vmem>>, vector<16x2048xbf16>
    %c0_4 = arith.constant 0 : index
    %c0_5 = arith.constant 0 : index
    %5 = vector.load %arg3[%c0_4, %c0_5] : memref<2048x128xbf16, #tpu.memory_space<vmem>>, vector<2048x128xbf16>
    %cst = arith.constant dense<0.000000e+00> : vector<16x128xf32>
    %6 = tpu.matmul %4, %5, %cst {dimension_numbers = #tpu.dot_dimension_numbers<[1], [0], [0], [1], [0, 0, 1, 1], [], []>} : vector<16x2048xbf16>, vector<2048x128xbf16>, vector<16x128xf32> -> vector<16x128xf32>
    %7 = arith.addf %3, %6 : vector<16x128xf32>
    %c0_6 = arith.constant 0 : index
    %c0_7 = arith.constant 0 : index
    %8 = vector.load %arg6[%c0_6, %c0_7] : memref<16x128xf32, #tpu.memory_space<vmem>>, vector<16x128xf32>
    tpu.vector_store %arg6[%c0_6, %c0_7], %7 {strides = array<i32>} : memref<16x128xf32, #tpu.memory_space<vmem>>, vector<16x128xf32>,
    %c3_i32 = arith.constant 3 : i32
    %9 = arith.cmpi eq, %arg1, %c3_i32 : i32
    %10 = arith.extui %9 : i1 to i32
    %c0_i32_8 = arith.constant 0 : i32
    %11 = arith.cmpi ne, %10, %c0_i32_8 : i32
    scf.if %11 {
      %c0_9 = arith.constant 0 : index
      %c0_10 = arith.constant 0 : index
      %12 = vector.load %arg6[%c0_9, %c0_10] : memref<16x128xf32, #tpu.memory_space<vmem>>, vector<16x128xf32>
      %c0_11 = arith.constant 0 : index
      %c0_12 = arith.constant 0 : index
      %13 = vector.load %arg4[%c0_11, %c0_12] : memref<1x128xf32, #tpu.memory_space<vmem>>, vector<1x128xf32>
      %14 = vector.broadcast %13 : vector<1x128xf32> to vector<16x128xf32>
      %15 = arith.addf %12, %14 : vector<16x128xf32>
      %c0_13 = arith.constant 0 : index
      %c0_14 = arith.constant 0 : index
      %16 = vector.load %arg5[%c0_13, %c0_14] : memref<16x128xf32, #tpu.memory_space<vmem>>, vector<16x128xf32>
      tpu.vector_store %arg5[%c0_13, %c0_14], %15 {strides = array<i32>} : memref<16x128xf32, #tpu.memory_space<vmem>>, vector<16x128xf32>,
    } else {
    }
    return
  }
  func.func @transform_0(%arg0: i32, %arg1: i32) -> (i32, i32) {
    %c0_i32 = arith.constant 0 : i32
    return %arg0, %arg1 : i32, i32
  }
  func.func @transform_1(%arg0: i32, %arg1: i32) -> (i32, i32) {
    %c0_i32 = arith.constant 0 : i32
    %c0_i32_0 = arith.constant 0 : i32
    return %arg1, %c0_i32 : i32, i32
  }
  func.func @transform_2(%arg0: i32, %arg1: i32) -> (i32, i32) {
    %c0_i32 = arith.constant 0 : i32
    %c0_i32_0 = arith.constant 0 : i32
    %c0_i32_1 = arith.constant 0 : i32
    return %c0_i32, %c0_i32_0 : i32, i32
  }
  func.func @transform_3(%arg0: i32, %arg1: i32) -> (i32, i32) {
    %c0_i32 = arith.constant 0 : i32
    %c0_i32_0 = arith.constant 0 : i32
    return %arg0, %c0_i32 : i32, i32
  }
}

</mosaic_0001>

<bundles_post_ra>
// kernel: patch_discriminator70.6
= control target key start
LH: loop header
LB: loop body
LE: loop exit
PB: predicated region body
PF: predicated region fallthrough
CT: control target
= control target key end

     0   :  { %s3070_s12 = smov 0   ;;  %s3072_s13 = smov 0   ;;  %s3540_s0 = inlined_call_operand.vmem [shape: bf16[2048,384], index: 0, kind: input, shape index: {}]   ;;  %s3541_s1 = inlined_call_operand.vmem [shape: bf16[384,128], index: 1, kind: input, shape index: {}]   ;;  %s3542_s2 = inlined_call_operand.vmem [shape: f32[1,128], index: 2, kind: input, shape index: {}]   ;;  %s3543_s3 = inlined_call_operand.vmem [shape: bf16[2048,128], index: 3, kind: output, shape index: {}]  }
   0x1   :  { %s3074_s14 = smov 0  }
   0x2 LB: > { %s25_s15 = sadd.s32 1, %s3043_s13  ;;  %p2248_p0 = scmp.ge.s32.totalorder %s3047_s14, 1  ;;  %s3047_s14 = sphi %s3074_s14, %s13_s14   ;;  %s3043_s13 = sphi %s3072_s13, %s3545_s13   ;;  %s3039_s12 = sphi %s3070_s12, %s3544_s12  }
   0x3   : > { %p27_p1 = scmp.ge.s32.totalorder %s25_s15, 4  ;;  %p169_p2 = scmp.lt.s32.totalorder %s3047_s14, 5 }
   0x5   : > { %s3547_s15 = smov (%p27_p1, %s25_s15), 0  ;;  %p170_p3 = pnand %p2248_p0, %p169_p2 }
   0x6   : > { %v2873_v0 = vld [vmem:[%s3541_s1] sm:$0xff] (!%p170_p3)   ;;  %v3049_v1 = vmov (!%p170_p3), 0   ;;  %s2249_s18 = sshll.u32 (!%p170_p3), %s3039_s12, 6  ;;  %v2874_v2 = vld [vmem:[%s3541_s1 + $0x8] sm:$0xff] (!%p170_p3)   ;;  %v2875_v3 = vld [vmem:[%s3541_s1 + $0x10] sm:$0xff] (!%p170_p3)  }
   0x7   : > { %173 = sbr.rel (%p170_p3) target bundleno = 479 (0x1df), region = 32  ;;  %1067 = vmatprep.subr.bf16.mxu0 (!%p170_p3), %v3049_v1  ;;  %2815 = vmatprep.subr.bf16.mxu1 (!%p170_p3), %v3049_v1  ;;  %p205_p4 = scmp.lt.s32.totalorder (!%p170_p3), %s2249_s18, 255  ;;  %v2876_v4 = vld [vmem:[%s3541_s1 + $0x18] sm:$0xff] (!%p170_p3)   ;;  %v2877_v5 = vld [vmem:[%s3541_s1 + $0x20] sm:$0xff] (!%p170_p3)   ;;  %v2878_v7 = vld [vmem:[%s3541_s1 + $0x28] sm:$0xff] (!%p170_p3)  }
   0x8   : > { %1068 = vmatpush1.bf16.msra.mxu0 (!%p170_p3), %v2873_v0  ;;  %2831 = vmatpush1.bf16.msra.mxu1 (!%p170_p3), %v2873_v0  ;;  %v2879_v9 = vld [vmem:[%s3541_s1 + $0x30] sm:$0xff] (!%p170_p3)   ;;  %v2880_v10 = vld [vmem:[%s3541_s1 + $0x38] sm:$0xff] (!%p170_p3)   ;;  %v2881_v11 = vld [vmem:[%s3541_s1 + $0x40] sm:$0xff] (!%p170_p3)  }
   0x9   : > { %1069 = vmatprep.subr.bf16.mxu0 (!%p170_p3), %v3049_v1  ;;  %2816 = vmatprep.subr.bf16.mxu1 (!%p170_p3), %v3049_v1  ;;  %v2882_v12 = vld [vmem:[%s3541_s1 + $0x48] sm:$0xff] (!%p170_p3)   ;;  %v2883_v13 = vld [vmem:[%s3541_s1 + $0x50] sm:$0xff] (!%p170_p3)   ;;  %v2884_v14 = vld [vmem:[%s3541_s1 + $0x58] sm:$0xff] (!%p170_p3)  }
   0xa   : > { %v2885_v15 = vld [vmem:[%s3541_s1 + $0x60] sm:$0xff] (!%p170_p3)   ;;  %v2886_v16 = vld [vmem:[%s3541_s1 + $0x68] sm:$0xff] (!%p170_p3)   ;;  %v2887_v17 = vld [vmem:[%s3541_s1 + $0x70] sm:$0xff] (!%p170_p3)  }
   0xb   : > { %v2888_v18 = vld [vmem:[%s3541_s1 + $0x78] sm:$0xff] (!%p170_p3)   ;;  %v2895_v19 = vld [vmem:[%s3541_s1 + $0x80] sm:$0xff] (!%p170_p3)   ;;  %v2902_v24 = vld [vmem:[%s3541_s1 + $0x88] sm:$0xff] (!%p170_p3)  }
   0xc   : > { %1070 = vmatpush1.bf16.msra.mxu0 (!%p170_p3), %v2874_v2  ;;  %2832 = vmatpush1.bf16.msra.mxu1 (!%p170_p3), %v2874_v2  ;;  %v2909_v25 = vld [vmem:[%s3541_s1 + $0x90] sm:$0xff] (!%p170_p3)   ;;  %v2916_v30 = vld [vmem:[%s3541_s1 + $0x98] sm:$0xff] (!%p170_p3)   ;;  %v2923_v32 = vld [vmem:[%s3541_s1 + $0xa0] sm:$0xff] (!%p170_p3)  }
   0xd   : > { %1071 = vmatprep.subr.bf16.mxu0 (!%p170_p3), %v3049_v1  ;;  %2817 = vmatprep.subr.bf16.mxu1 (!%p170_p3), %v3049_v1  ;;  %v2930_v36 = vld [vmem:[%s3541_s1 + $0xa8] sm:$0xff] (!%p170_p3)   ;;  %v2937_v41 = vld [vmem:[%s3541_s1 + $0xb0] sm:$0xff] (!%p170_p3)   ;;  %v2944_v42 = vld [vmem:[%s3541_s1 + $0xb8] sm:$0xff] (!%p170_p3)  }
   0xe   : > { %s3549_s18 = smov (!%p205_p4, %s2249_s18), 255 }
   0xf   : > { %s2847_s25 = smul.u32 12, %s3549_s18 }
  0x10   : > { %1072 = vmatpush1.bf16.msra.mxu0 %v2875_v3  ;;  %2833 = vmatpush1.bf16.msra.mxu1 %v2875_v3 }
  0x11   : > { %1073 = vmatprep.subr.bf16.mxu0 %v3049_v1  ;;  %2818 = vmatprep.subr.bf16.mxu1 %v3049_v1  ;;  %s3117_s30 = scalar_lea.vmem %s3540_s0, %s2847_s25  ;;  %s2252_s25 = sshll.u32 %s3549_s18, 2 }
  0x12   : > { %v2891_v6 = vld [vmem:[%s3117_s30 + $0x4] ss:$12 sps:$4 sm:$0xff]   ;;  %v2889_v20 = vld [vmem:[%s3117_s30] ss:$12 sps:$4 sm:$0xff]   ;;  %v2896_v22 = vld [vmem:[%s3117_s30 + $0x1c] ss:$12 sps:$4 sm:$0xff]   ;;  %s3377_s28 = scalar_lea.vmem %s3543_s3, %s2252_s25 }
  0x13   : > { %v2894_v8 = vld [vmem:[%s3117_s30 + $0x244] ss:$12 sps:$4 sm:$0xff]   ;;  %1099 = vmatprep.mubr.bf16.mxu0 %v2891_v6  ;;  %v2892_v21 = vld [vmem:[%s3117_s30 + $0x240] ss:$12 sps:$4 sm:$0xff]   ;;  %v2898_v23 = vld [vmem:[%s3117_s30 + $0x25c] ss:$12 sps:$4 sm:$0xff]  }
  0x14   : > { %1074 = vmatpush1.bf16.msra.mxu0 %v2876_v4  ;;  %2834 = vmatpush1.bf16.msra.mxu1 %v2876_v4  ;;  %v2900_v26 = vld [vmem:[%s3117_s30 + $0x18] ss:$12 sps:$4 sm:$0xff]   ;;  %v2903_v28 = vld [vmem:[%s3117_s30 + $0x34] ss:$12 sps:$4 sm:$0xff]   ;;  %v2907_v31 = vld [vmem:[%s3117_s30 + $0x30] ss:$12 sps:$4 sm:$0xff]  }
  0x15   : > { %1075 = vmatprep.subr.bf16.mxu0 %v3049_v1  ;;  %2819 = vmatprep.subr.bf16.mxu1 %v3049_v1  ;;  %v2901_v27 = vld [vmem:[%s3117_s30 + $0x258] ss:$12 sps:$4 sm:$0xff]   ;;  %v2905_v29 = vld [vmem:[%s3117_s30 + $0x274] ss:$12 sps:$4 sm:$0xff]   ;;  %v2908_v33 = vld [vmem:[%s3117_s30 + $0x270] ss:$12 sps:$4 sm:$0xff]  }
  0x16   : > { %1291 = vmatprep.mubr.bf16.mxu1 %v2894_v8  ;;  %v2910_v34 = vld [vmem:[%s3117_s30 + $0x4c] ss:$12 sps:$4 sm:$0xff]   ;;  %v2914_v37 = vld [vmem:[%s3117_s30 + $0x48] ss:$12 sps:$4 sm:$0xff]   ;;  %v2917_v39 = vld [vmem:[%s3117_s30 + $0x64] ss:$12 sps:$4 sm:$0xff]  }
  0x17   : > { %v2912_v35 = vld [vmem:[%s3117_s30 + $0x28c] ss:$12 sps:$4 sm:$0xff]   ;;  %v2915_v38 = vld [vmem:[%s3117_s30 + $0x288] ss:$12 sps:$4 sm:$0xff]   ;;  %v2919_v40 = vld [vmem:[%s3117_s30 + $0x2a4] ss:$12 sps:$4 sm:$0xff]  }
  0x18   : > { %1076 = vmatpush1.bf16.msra.mxu0 %v2877_v5  ;;  %2835 = vmatpush1.bf16.msra.mxu1 %v2877_v5  ;;  %v2921_v43 = vld [vmem:[%s3117_s30 + $0x60] ss:$12 sps:$4 sm:$0xff]   ;;  %v2924_v45 = vld [vmem:[%s3117_s30 + $0x7c] ss:$12 sps:$4 sm:$0xff]   ;;  %v2928_v47 = vld [vmem:[%s3117_s30 + $0x78] ss:$12 sps:$4 sm:$0xff]  }
  0x19   : > { %1077 = vmatprep.subr.bf16.mxu0 %v3049_v1  ;;  %2820 = vmatprep.subr.bf16.mxu1 %v3049_v1  ;;  %v2922_v44 = vld [vmem:[%s3117_s30 + $0x2a0] ss:$12 sps:$4 sm:$0xff]   ;;  %v2926_v46 = vld [vmem:[%s3117_s30 + $0x2bc] ss:$12 sps:$4 sm:$0xff]   ;;  %v2929_v48 = vld [vmem:[%s3117_s30 + $0x2b8] ss:$12 sps:$4 sm:$0xff]  }
  0x1a   : > { %v2931_v49 = vld [vmem:[%s3117_s30 + $0x94] ss:$12 sps:$4 sm:$0xff]   ;;  %v2935_v51 = vld [vmem:[%s3117_s30 + $0x90] ss:$12 sps:$4 sm:$0xff]   ;;  %v2938_v53 = vld [vmem:[%s3117_s30 + $0xac] ss:$12 sps:$4 sm:$0xff]  }
  0x1b   : > { %v2933_v50 = vld [vmem:[%s3117_s30 + $0x2d4] ss:$12 sps:$4 sm:$0xff]   ;;  %v2936_v52 = vld [vmem:[%s3117_s30 + $0x2d0] ss:$12 sps:$4 sm:$0xff]   ;;  %v2940_v54 = vld [vmem:[%s3117_s30 + $0x2ec] ss:$12 sps:$4 sm:$0xff]  }
  0x1c   : > { %1078 = vmatpush1.bf16.msra.mxu0 %v2878_v7  ;;  %2836 = vmatpush1.bf16.msra.mxu1 %v2878_v7  ;;  %v2942_v55 = vld [vmem:[%s3117_s30 + $0xa8] ss:$12 sps:$4 sm:$0xff]   ;;  %v2945_v57 = vld [vmem:[%s3117_s30 + $0xc4] ss:$12 sps:$4 sm:$0xff]   ;;  %v2948_v59 = vld [vmem:[%s3117_s30 + $0xc0] ss:$12 sps:$4 sm:$0xff]  }
  0x1d   : > { %1079 = vmatprep.subr.bf16.mxu0 %v3049_v1  ;;  %2821 = vmatprep.subr.bf16.mxu1 %v3049_v1  ;;  %v2943_v56 = vld [vmem:[%s3117_s30 + $0x2e8] ss:$12 sps:$4 sm:$0xff]   ;;  %v2949_v60 = vld [vmem:[%s3117_s30 + $0x20] ss:$12 sps:$4 sm:$0xff]   ;;  %v2952_v62 = vld [vmem:[%s3117_s30 + $0x38] ss:$12 sps:$4 sm:$0xff]  }
  0x1e   : > { %v2947_v58 = vld [vmem:[%s3117_s30 + $0x8] ss:$12 sps:$4 sm:$0xff]   ;;  %v2953_v63 = vld [vmem:[%s3117_s30 + $0xd8] ss:$12 sps:$4 sm:$0xff]   ;;  %v2954_v0 = vld [vmem:[%s3117_s30 + $0x50] ss:$12 sps:$4 sm:$0xff]  }
  0x1f   : > { %v2950_v61 = vld [vmem:[%s3117_s30 + $0xdc] ss:$12 sps:$4 sm:$0xff]   ;;  %v2959_v4 = vld [vmem:[%s3117_s30 + $0x80] ss:$12 sps:$4 sm:$0xff]   ;;  %v2962_v6 = vld [vmem:[%s3117_s30 + $0x98] ss:$12 sps:$4 sm:$0xff]  }
  0x20   : > { %1080 = vmatpush1.bf16.msra.mxu0 %v2879_v9  ;;  %2837 = vmatpush1.bf16.msra.mxu1 %v2879_v9  ;;  %v2957_v2 = vld [vmem:[%s3117_s30 + $0x68] ss:$12 sps:$4 sm:$0xff]   ;;  %v2958_v3 = vld [vmem:[%s3117_s30 + $0xf0] ss:$12 sps:$4 sm:$0xff]   ;;  %v2960_v5 = vld [vmem:[%s3117_s30 + $0x10c] ss:$12 sps:$4 sm:$0xff]  }
  0x21   : > { %1081 = vmatprep.subr.bf16.mxu0 %v3049_v1  ;;  %2822 = vmatprep.subr.bf16.mxu1 %v3049_v1  ;;  %v2963_v7 = vld [vmem:[%s3117_s30 + $0x108] ss:$12 sps:$4 sm:$0xff]   ;;  %v2964_v8 = vld [vmem:[%s3117_s30 + $0xb0] ss:$12 sps:$4 sm:$0xff]  }
  0x22   : > { %v2965_v9 = vld [vmem:[%s3117_s30 + $0x124] ss:$12 sps:$4 sm:$0xff]  }
  0x24   : > { %1082 = vmatpush1.bf16.msra.mxu0 %v2880_v10  ;;  %2838 = vmatpush1.bf16.msra.mxu1 %v2880_v10  ;;  %v2967_v10 = vld [vmem:[%s3117_s30 + $0xc8] ss:$12 sps:$4 sm:$0xff]  }
  0x25   : > { %1083 = vmatprep.subr.bf16.mxu0 %v3049_v1  ;;  %2823 = vmatprep.subr.bf16.mxu1 %v3049_v1 }
  0x28   : > { %1084 = vmatpush1.bf16.msra.mxu0 %v2881_v11  ;;  %2839 = vmatpush1.bf16.msra.mxu1 %v2881_v11  ;;  %v2968_v11 = vld [vmem:[%s3117_s30 + $0x120] ss:$12 sps:$4 sm:$0xff]  }
  0x29   : > { %1085 = vmatprep.subr.bf16.mxu0 %v3049_v1  ;;  %2824 = vmatprep.subr.bf16.mxu1 %v3049_v1 }
  0x2c   : > { %1086 = vmatpush1.bf16.msra.mxu0 %v2882_v12  ;;  %2840 = vmatpush1.bf16.msra.mxu1 %v2882_v12  ;;  %v2969_v12 = vld [vmem:[%s3117_s30 + $0xe0] ss:$12 sps:$4 sm:$0xff]  }
  0x2d   : > { %1087 = vmatprep.subr.bf16.mxu0 %v3049_v1  ;;  %2825 = vmatprep.subr.bf16.mxu1 %v3049_v1 }
  0x30   : > { %1088 = vmatpush1.bf16.msra.mxu0 %v2883_v13  ;;  %2841 = vmatpush1.bf16.msra.mxu1 %v2883_v13  ;;  %v2970_v13 = vld [vmem:[%s3117_s30 + $0x13c] ss:$12 sps:$4 sm:$0xff]  }
  0x31   : > { %1089 = vmatprep.subr.bf16.mxu0 %v3049_v1  ;;  %2826 = vmatprep.subr.bf16.mxu1 %v3049_v1 }
  0x34   : > { %1090 = vmatpush1.bf16.msra.mxu0 %v2884_v14  ;;  %2842 = vmatpush1.bf16.msra.mxu1 %v2884_v14  ;;  %v2972_v14 = vld [vmem:[%s3117_s30 + $0xf8] ss:$12 sps:$4 sm:$0xff]  }
  0x35   : > { %1091 = vmatprep.subr.bf16.mxu0 %v3049_v1  ;;  %2827 = vmatprep.subr.bf16.mxu1 %v3049_v1 }
  0x38   : > { %1092 = vmatpush1.bf16.msra.mxu0 %v2885_v15  ;;  %2843 = vmatpush1.bf16.msra.mxu1 %v2885_v15  ;;  %v2973_v15 = vld [vmem:[%s3117_s30 + $0x138] ss:$12 sps:$4 sm:$0xff]  }
  0x39   : > { %1093 = vmatprep.subr.bf16.mxu0 %v3049_v1  ;;  %2828 = vmatprep.subr.bf16.mxu1 %v3049_v1 }
  0x3c   : > { %1094 = vmatpush1.bf16.msra.mxu0 %v2886_v16  ;;  %2844 = vmatpush1.bf16.msra.mxu1 %v2886_v16  ;;  %v2974_v16 = vld [vmem:[%s3117_s30 + $0x110] ss:$12 sps:$4 sm:$0xff]  }
  0x3d   : > { %1095 = vmatprep.subr.bf16.mxu0 %v3049_v1  ;;  %2829 = vmatprep.subr.bf16.mxu1 %v3049_v1 }
  0x40   : > { %1096 = vmatpush1.bf16.msra.mxu0 %v2887_v17  ;;  %2845 = vmatpush1.bf16.msra.mxu1 %v2887_v17  ;;  %v2975_v17 = vld [vmem:[%s3117_s30 + $0x154] ss:$12 sps:$4 sm:$0xff]  }
  0x41   : > { %1097 = vmatprep.subr.bf16.mxu0 %v3049_v1  ;;  %2830 = vmatprep.subr.bf16.mxu1 %v3049_v1  ;;  %v2955_v1 = vld [vmem:[%s3117_s30 + $0xf4] ss:$12 sps:$4 sm:$0xff]  }
  0x44   : > { %1098 = vmatpush1.bf16.msra.mxu0 %v2888_v18  ;;  %2846 = vmatpush1.bf16.msra.mxu1 %v2888_v18  ;;  %v2977_v18 = vld [vmem:[%s3117_s30 + $0x128] ss:$12 sps:$4 sm:$0xff]  }
  0x45   : > { %2735 = vmatprep.subr.bf16.mxu1 %v2895_v19 }
  0x47   : > { %1100 = vmatmul.mubr.bf16.vlgmr.msra.gmra.mrb[0].mxu0 %v2889_v20  ;;  %1292 = vmatmul.mubr.bf16.vlgmr.msra.gmra.mrb[0].mxu1 %v2892_v21  ;;  %v2979_v20 = vld [vmem:[%s3117_s30 + $0x140] ss:$12 sps:$4 sm:$0xff]  }
  0x48   : > { %2736 = vmatpush3.bf16.msra.mxu1 %v2895_v19  ;;  %1107 = vmatprep.mubr.bf16.mxu0 %v2896_v22  ;;  %v2978_v19 = vld [vmem:[%s3117_s30 + $0x150] ss:$12 sps:$4 sm:$0xff]   ;;  %v2980_v21 = vld [vmem:[%s3117_s30 + $0x16c] ss:$12 sps:$4 sm:$0xff]  }
  0x49   : > { %1299 = vmatprep.mubr.bf16.mxu1 %v2898_v23  ;;  %2737 = vmatprep.subr.bf16.mxu1 %v2902_v24  ;;  %v2982_v22 = vld [vmem:[%s3117_s30 + $0x158] ss:$12 sps:$4 sm:$0xff]   ;;  %v2983_v23 = vld [vmem:[%s3117_s30 + $0x168] ss:$12 sps:$4 sm:$0xff]  }
  0x4c   : > { %2738 = vmatpush3.bf16.msra.mxu1 %v2902_v24  ;;  %v2984_v24 = vld [vmem:[%s3117_s30 + $0x170] ss:$12 sps:$4 sm:$0xff]  }
  0x4d   : > { %2739 = vmatprep.subr.bf16.mxu1 %v2909_v25 }
  0x4f   : > { %1108 = vmatmul.mubr.bf16.gmra.mrb[4].mxu0 %v2900_v26  ;;  %1300 = vmatmul.mubr.bf16.gmra.mrb[4].mxu1 %v2901_v27  ;;  %v2987_v26 = vld [vmem:[%s3117_s30 + $0x188] ss:$12 sps:$4 sm:$0xff]   ;;  %v2988_v27 = vld [vmem:[%s3117_s30 + $0x180] ss:$12 sps:$4 sm:$0xff]  }
  0x50   : > { %1115 = vmatprep.mubr.bf16.mxu0 %v2903_v28  ;;  %1307 = vmatprep.mubr.bf16.mxu1 %v2905_v29  ;;  %v2989_v28 = vld [vmem:[%s3117_s30 + $0x1a0] ss:$12 sps:$4 sm:$0xff]   ;;  %v2990_v29 = vld [vmem:[%s3117_s30 + $0x19c] ss:$12 sps:$4 sm:$0xff]  }
  0x51   : > { %2740 = vmatpush3.bf16.msra.mxu1 %v2909_v25  ;;  %v2985_v25 = vld [vmem:[%s3117_s30 + $0x184] ss:$12 sps:$4 sm:$0xff]  }
  0x52   : > { %2741 = vmatprep.subr.bf16.mxu1 %v2916_v30 }
  0x55   : > { %2742 = vmatpush3.bf16.msra.mxu1 %v2916_v30  ;;  %v2992_v30 = vld [vmem:[%s3117_s30 + $0x1b8] ss:$12 sps:$4 sm:$0xff]  }
  0x56   : > { %2743 = vmatprep.subr.bf16.mxu1 %v2923_v32 }
  0x57   : > { %1116 = vmatmul.mubr.bf16.gmra.mrb[8].mxu0 %v2907_v31  ;;  %1308 = vmatmul.mubr.bf16.gmra.mrb[8].mxu1 %v2908_v33  ;;  %v2993_v31 = vld [vmem:[%s3117_s30 + $0x198] ss:$12 sps:$4 sm:$0xff]   ;;  %v2995_v33 = vld [vmem:[%s3117_s30 + $0x1b4] ss:$12 sps:$4 sm:$0xff]  }
  0x58   : > { %1123 = vmatprep.mubr.bf16.mxu0 %v2910_v34  ;;  %1315 = vmatprep.mubr.bf16.mxu1 %v2912_v35  ;;  %v2997_v34 = vld [vmem:[%s3117_s30 + $0x1e8] ss:$12 sps:$4 sm:$0xff]   ;;  %v2998_v35 = vld [vmem:[%s3117_s30 + $0x1b0] ss:$12 sps:$4 sm:$0xff]  }
  0x59   : > { %2744 = vmatpush3.bf16.msra.mxu1 %v2923_v32  ;;  %v2994_v32 = vld [vmem:[%s3117_s30 + $0x1d0] ss:$12 sps:$4 sm:$0xff]  }
  0x5a   : > { %2745 = vmatprep.subr.bf16.mxu1 %v2930_v36 }
  0x5d   : > { %2746 = vmatpush3.bf16.msra.mxu1 %v2930_v36  ;;  %v2999_v36 = vld [vmem:[%s3117_s30 + $0x200] ss:$12 sps:$4 sm:$0xff]  }
  0x5e   : > { %2747 = vmatprep.subr.bf16.mxu1 %v2937_v41 }
  0x5f   : > { %1124 = vmatmul.mubr.bf16.gmra.mrb[12].mxu0 %v2914_v37  ;;  %1316 = vmatmul.mubr.bf16.gmra.mrb[12].mxu1 %v2915_v38  ;;  %v3000_v37 = vld [vmem:[%s3117_s30 + $0x1cc] ss:$12 sps:$4 sm:$0xff]  }
  0x60   : > { %1131 = vmatprep.mubr.bf16.mxu0 %v2917_v39  ;;  %1323 = vmatprep.mubr.bf16.mxu1 %v2919_v40  ;;  %v3002_v38 = vld [vmem:[%s3117_s30 + $0x218] ss:$12 sps:$4 sm:$0xff]   ;;  %v3003_v39 = vld [vmem:[%s3117_s30 + $0x1c8] ss:$12 sps:$4 sm:$0xff]   ;;  %v3004_v40 = vld [vmem:[%s3117_s30 + $0x230] ss:$12 sps:$4 sm:$0xff]  }
  0x61   : > { %2748 = vmatpush3.bf16.msra.mxu1 %v2937_v41  ;;  %v3005_v41 = vld [vmem:[%s3117_s30 + $0x1e4] ss:$12 sps:$4 sm:$0xff]  }
  0x62   : > { %2749 = vmatprep.subr.bf16.mxu1 %v2944_v42 }
  0x65   : > { %2750 = vmatpush3.bf16.msra.mxu1 %v2944_v42  ;;  %v3007_v42 = vld [vmem:[%s3117_s30 + $0x248] ss:$12 sps:$4 sm:$0xff]  }
  0x67   : > { %1132 = vmatmul.mubr.bf16.gmra.mrb[16].mxu0 %v2921_v43  ;;  %1324 = vmatmul.mubr.bf16.gmra.mrb[16].mxu1 %v2922_v44  ;;  %v3008_v43 = vld [vmem:[%s3117_s30 + $0x1e0] ss:$12 sps:$4 sm:$0xff]  }
  0x68   : > { %1139 = vmatprep.mubr.bf16.mxu0 %v2924_v45  ;;  %1331 = vmatprep.mubr.bf16.mxu1 %v2926_v46  ;;  %v3009_v44 = vld [vmem:[%s3117_s30 + $0x260] ss:$12 sps:$4 sm:$0xff]   ;;  %v3010_v45 = vld [vmem:[%s3117_s30 + $0x1fc] ss:$12 sps:$4 sm:$0xff]   ;;  %v3012_v46 = vld [vmem:[%s3117_s30 + $0x278] ss:$12 sps:$4 sm:$0xff]  }
  0x6f   : > { %1140 = vmatmul.mubr.bf16.gmra.mrb[20].mxu0 %v2928_v47  ;;  %1332 = vmatmul.mubr.bf16.gmra.mrb[20].mxu1 %v2929_v48  ;;  %v3013_v47 = vld [vmem:[%s3117_s30 + $0x1f8] ss:$12 sps:$4 sm:$0xff]   ;;  %v3014_v48 = vld [vmem:[%s3117_s30 + $0x290] ss:$12 sps:$4 sm:$0xff]  }
  0x70   : > { %1147 = vmatprep.mubr.bf16.mxu0 %v2931_v49  ;;  %1339 = vmatprep.mubr.bf16.mxu1 %v2933_v50  ;;  %v3015_v49 = vld [vmem:[%s3117_s30 + $0x214] ss:$12 sps:$4 sm:$0xff]  }
  0x71   : > { %v3017_v50 = vld [vmem:[%s3117_s30 + $0x2a8] ss:$12 sps:$4 sm:$0xff]  }
  0x77   : > { %1148 = vmatmul.mubr.bf16.gmra.mrb[24].mxu0 %v2935_v51  ;;  %1340 = vmatmul.mubr.bf16.gmra.mrb[24].mxu1 %v2936_v52  ;;  %v3018_v51 = vld [vmem:[%s3117_s30 + $0x210] ss:$12 sps:$4 sm:$0xff]   ;;  %v3019_v52 = vld [vmem:[%s3117_s30 + $0x2c0] ss:$12 sps:$4 sm:$0xff]  }
  0x78   : > { %1155 = vmatprep.mubr.bf16.mxu0 %v2938_v53  ;;  %1347 = vmatprep.mubr.bf16.mxu1 %v2940_v54  ;;  %v3020_v53 = vld [vmem:[%s3117_s30 + $0x22c] ss:$12 sps:$4 sm:$0xff]  }
  0x79   : > { %v3022_v54 = vld [vmem:[%s3117_s30 + $0x2d8] ss:$12 sps:$4 sm:$0xff]  }
  0x7f   : > { %1156 = vmatmul.mubr.bf16.gmra.mrb[28].mxu0 %v2942_v55  ;;  %1348 = vmatmul.mubr.bf16.gmra.mrb[28].mxu1 %v2943_v56  ;;  %v3023_v55 = vld [vmem:[%s3117_s30 + $0x228] ss:$12 sps:$4 sm:$0xff]   ;;  %v3024_v56 = vld [vmem:[%s3117_s30 + $0x2f0] ss:$12 sps:$4 sm:$0xff]  }
  0x80   : > { %1163 = vmatprep.mubr.bf16.mxu0 %v2945_v57  ;;  %2751 = vmatprep.mubr.bf16.mxu1 %v2947_v58 }
  0x87   : > { %1164 = vmatmul.mubr.bf16.gmra.mrb[32].mxu0 %v2948_v59  ;;  %2752 = vmatmul.mubr.bf16.vlgmr.msra.gmra.mrb[32].mxu1 %v2949_v60 }
  0x88   : > { %1171 = vmatprep.mubr.bf16.mxu0 %v2950_v61  ;;  %2755 = vmatprep.mubr.bf16.mxu1 %v2952_v62 }
  0x8f   : > { %1172 = vmatmul.mubr.bf16.gmra.mrb[36].mxu0 %v2953_v63  ;;  %2756 = vmatmul.mubr.bf16.gmra.mrb[36].mxu1 %v2954_v0 }
  0x90   : > { %1179 = vmatprep.mubr.bf16.mxu0 %v2955_v1  ;;  %2759 = vmatprep.mubr.bf16.mxu1 %v2957_v2 }
  0x97   : > { %1180 = vmatmul.mubr.bf16.gmra.mrb[40].mxu0 %v2958_v3  ;;  %2760 = vmatmul.mubr.bf16.gmra.mrb[40].mxu1 %v2959_v4 }
  0x98   : > { %1187 = vmatprep.mubr.bf16.mxu0 %v2960_v5  ;;  %2763 = vmatprep.mubr.bf16.mxu1 %v2962_v6 }
  0x9f   : > { %1188 = vmatmul.mubr.bf16.gmra.mrb[44].mxu0 %v2963_v7  ;;  %2764 = vmatmul.mubr.bf16.gmra.mrb[44].mxu1 %v2964_v8 }
  0xa0   : > { %1195 = vmatprep.mubr.bf16.mxu0 %v2965_v9  ;;  %2767 = vmatprep.mubr.bf16.mxu1 %v2967_v10 }
  0xa7   : > { %1196 = vmatmul.mubr.bf16.gmra.mrb[48].mxu0 %v2968_v11  ;;  %2768 = vmatmul.mubr.bf16.gmra.mrb[48].mxu1 %v2969_v12 }
  0xa8   : > { %1203 = vmatprep.mubr.bf16.mxu0 %v2970_v13  ;;  %2771 = vmatprep.mubr.bf16.mxu1 %v2972_v14 }
  0xaf   : > { %1204 = vmatmul.mubr.bf16.gmra.mrb[52].mxu0 %v2973_v15  ;;  %2772 = vmatmul.mubr.bf16.gmra.mrb[52].mxu1 %v2974_v16 }
  0xb0   : > { %1211 = vmatprep.mubr.bf16.mxu0 %v2975_v17  ;;  %2775 = vmatprep.mubr.bf16.mxu1 %v2977_v18 }
  0xb7   : > { %1212 = vmatmul.mubr.bf16.gmra.mrb[56].mxu0 %v2978_v19  ;;  %2776 = vmatmul.mubr.bf16.gmra.mrb[56].mxu1 %v2979_v20 }
  0xb8   : > { %1219 = vmatprep.mubr.bf16.mxu0 %v2980_v21  ;;  %2779 = vmatprep.mubr.bf16.mxu1 %v2982_v22 }
  0xbf   : > { %1220 = vmatmul.mubr.bf16.gmra.mrb[60].mxu0 %v2983_v23  ;;  %2780 = vmatmul.mubr.bf16.gmra.mrb[60].mxu1 %v2984_v24 }
  0xc0   : > { %1227 = vmatprep.mubr.bf16.mxu0 %v2985_v25  ;;  %2783 = vmatprep.mubr.bf16.mxu1 %v2987_v26 }
  0xc7   : > { %1228 = vmatmul.mubr.bf16.gmra.mrb[64].mxu0 %v2988_v27  ;;  %2784 = vmatmul.mubr.bf16.gmra.mrb[64].mxu1 %v2989_v28 }
  0xc8   : > { %1235 = vmatprep.mubr.bf16.mxu0 %v2990_v29  ;;  %2787 = vmatprep.mubr.bf16.mxu1 %v2992_v30 }
  0xcf   : > { %1236 = vmatmul.mubr.bf16.gmra.mrb[68].mxu0 %v2993_v31  ;;  %2788 = vmatmul.mubr.bf16.gmra.mrb[68].mxu1 %v2994_v32 }
  0xd0   : > { %1243 = vmatprep.mubr.bf16.mxu0 %v2995_v33  ;;  %2791 = vmatprep.mubr.bf16.mxu1 %v2997_v34 }
  0xd7   : > { %1244 = vmatmul.mubr.bf16.gmra.mrb[72].mxu0 %v2998_v35  ;;  %2792 = vmatmul.mubr.bf16.gmra.mrb[72].mxu1 %v2999_v36 }
  0xd8   : > { %1251 = vmatprep.mubr.bf16.mxu0 %v3000_v37  ;;  %2795 = vmatprep.mubr.bf16.mxu1 %v3002_v38 }
  0xdf   : > { %1252 = vmatmul.mubr.bf16.gmra.mrb[76].mxu0 %v3003_v39  ;;  %2796 = vmatmul.mubr.bf16.gmra.mrb[76].mxu1 %v3004_v40 }
  0xe0   : > { %1259 = vmatprep.mubr.bf16.mxu0 %v3005_v41  ;;  %2799 = vmatprep.mubr.bf16.mxu1 %v3007_v42 }
  0xe7   : > { %1260 = vmatmul.mubr.bf16.gmra.mrb[80].mxu0 %v3008_v43  ;;  %2800 = vmatmul.mubr.bf16.gmra.mrb[80].mxu1 %v3009_v44 }
  0xe8   : > { %1267 = vmatprep.mubr.bf16.mxu0 %v3010_v45  ;;  %2803 = vmatprep.mubr.bf16.mxu1 %v3012_v46 }
  0xef   : > { %1268 = vmatmul.mubr.bf16.gmra.mrb[84].mxu0 %v3013_v47  ;;  %2804 = vmatmul.mubr.bf16.gmra.mrb[84].mxu1 %v3014_v48 }
  0xf0   : > { %1275 = vmatprep.mubr.bf16.mxu0 %v3015_v49  ;;  %2807 = vmatprep.mubr.bf16.mxu1 %v3017_v50 }
  0xf7   : > { %1276 = vmatmul.mubr.bf16.gmra.mrb[88].mxu0 %v3018_v51  ;;  %2808 = vmatmul.mubr.bf16.gmra.mrb[88].mxu1 %v3019_v52 }
  0xf8   : > { %1283 = vmatprep.mubr.bf16.mxu0 %v3020_v53  ;;  %2811 = vmatprep.mubr.bf16.mxu1 %v3022_v54 }
  0xff   : > { %1284 = vmatmul.mubr.bf16.gmra.mrb[92].mxu0 %v3023_v55  ;;  %2812 = vmatmul.mubr.bf16.gmra.mrb[92].mxu1 %v3024_v56 }
 0x11a   : > { %v3296_v57 = vpop.f32.mrb[0].mxu0  ;;  %v3298_v58 = vpop.f32.mrb[0].mxu1 }
 0x11b   : > { %v1103_v59 = vpop.f32.mrb[1].mxu0  ;;  %v1295_v60 = vpop.f32.mrb[1].mxu1 }
 0x11c   : > { %v3300_v61 = vpop.f32.mrb[2].mxu0  ;;  %v3302_v62 = vpop.f32.mrb[2].mxu1  ;;  %v3359_v59 = vld [vmem:[%s3542_s2] ss:$0 sm:$0xff] }
 0x11d   : > { %v1106_v63 = vpop.f32.mrb[3].mxu0  ;;  %v1298_v0 = vpop.f32.mrb[3].mxu1 }
 0x11e   : > { %v1102_v63 = vadd.f32 %v3359_v59, %v3296_v57 }
 0x122   : > { %v1109_v1 = vpop.f32.mrb[4].mxu0  ;;  %v3304_v2 = vpop.f32.mrb[4].mxu1 }
 0x123   : > { %v1111_v3 = vpop.f32.mrb[5].mxu0  ;;  %v1303_v4 = vpop.f32.mrb[5].mxu1  ;;  %v1110_v60 = vadd.f32 %v3359_v59, %v1109_v1 }
 0x124   : > { %v1112_v5 = vpop.f32.mrb[6].mxu0  ;;  %v3306_v6 = vpop.f32.mrb[6].mxu1 }
 0x125   : > { %v1114_v7 = vpop.f32.mrb[7].mxu0  ;;  %v1306_v8 = vpop.f32.mrb[7].mxu1  ;;  %v1113_v4 = vadd.f32 %v3359_v59, %v1112_v5 }
 0x12a   : > { %v3308_v9 = vpop.f32.mrb[8].mxu0  ;;  %v3310_v10 = vpop.f32.mrb[8].mxu1 }
 0x12b   : > { %v1119_v11 = vpop.f32.mrb[9].mxu0  ;;  %v1311_v12 = vpop.f32.mrb[9].mxu1 }
 0x12c   : > { %v3312_v13 = vpop.f32.mrb[10].mxu0  ;;  %v3314_v14 = vpop.f32.mrb[10].mxu1  ;;  %v1105_v12 = vadd.f32 %v3359_v59, %v3300_v61 }
 0x12d   : > { %v1122_v15 = vpop.f32.mrb[11].mxu0  ;;  %v1314_v16 = vpop.f32.mrb[11].mxu1 }
 0x132   : > { %v3316_v17 = vpop.f32.mrb[12].mxu0  ;;  %v3318_v18 = vpop.f32.mrb[12].mxu1 }
 0x133   : > { %v1127_v19 = vpop.f32.mrb[13].mxu0  ;;  %v1319_v20 = vpop.f32.mrb[13].mxu1  ;;  %v1126_v61 = vadd.f32 %v3359_v59, %v3316_v17 }
 0x134   : > { %v3320_v21 = vpop.f32.mrb[14].mxu0  ;;  %v3322_v22 = vpop.f32.mrb[14].mxu1 }
 0x135   : > { %v1130_v23 = vpop.f32.mrb[15].mxu0  ;;  %v1322_v24 = vpop.f32.mrb[15].mxu1  ;;  %v1129_v17 = vadd.f32 %v3359_v59, %v3320_v21 }
 0x13a   : > { %v3324_v25 = vpop.f32.mrb[16].mxu0  ;;  %v3326_v26 = vpop.f32.mrb[16].mxu1 }
 0x13b   : > { %v1135_v27 = vpop.f32.mrb[17].mxu0  ;;  %v1327_v28 = vpop.f32.mrb[17].mxu1 }
 0x13c   : > { %v3328_v29 = vpop.f32.mrb[18].mxu0  ;;  %v3330_v30 = vpop.f32.mrb[18].mxu1 }
 0x13d   : > { %v1138_v31 = vpop.f32.mrb[19].mxu0  ;;  %v1330_v32 = vpop.f32.mrb[19].mxu1 }
 0x142   : > { %v3332_v33 = vpop.f32.mrb[20].mxu0  ;;  %v3334_v34 = vpop.f32.mrb[20].mxu1 }
 0x143   : > { %v1143_v35 = vpop.f32.mrb[21].mxu0  ;;  %v1335_v36 = vpop.f32.mrb[21].mxu1 }
 0x144   : > { %v3336_v37 = vpop.f32.mrb[22].mxu0  ;;  %v3338_v38 = vpop.f32.mrb[22].mxu1  ;;  %v1118_v35 = vadd.f32 %v3359_v59, %v3308_v9 }
 0x145   : > { %v1146_v39 = vpop.f32.mrb[23].mxu0  ;;  %v1338_v40 = vpop.f32.mrb[23].mxu1 }
 0x14a   : > { %v3340_v41 = vpop.f32.mrb[24].mxu0  ;;  %v3342_v42 = vpop.f32.mrb[24].mxu1 }
 0x14b   : > { %v1151_v43 = vpop.f32.mrb[25].mxu0  ;;  %v1343_v44 = vpop.f32.mrb[25].mxu1 }
 0x14c   : > { %v3344_v45 = vpop.f32.mrb[26].mxu0  ;;  %v3346_v46 = vpop.f32.mrb[26].mxu1 }
 0x14d   : > { %v1154_v47 = vpop.f32.mrb[27].mxu0  ;;  %v1346_v48 = vpop.f32.mrb[27].mxu1 }
 0x152   : > { %v3348_v49 = vpop.f32.mrb[28].mxu0  ;;  %v3350_v50 = vpop.f32.mrb[28].mxu1 }
 0x153   : > { %v1159_v51 = vpop.f32.mrb[29].mxu0  ;;  %v1351_v52 = vpop.f32.mrb[29].mxu1 }
 0x154   : > { %v3352_v53 = vpop.f32.mrb[30].mxu0  ;;  %v3354_v54 = vpop.f32.mrb[30].mxu1 }
 0x155   : > { %v1162_v55 = vpop.f32.mrb[31].mxu0  ;;  %v1354_v56 = vpop.f32.mrb[31].mxu1 }
 0x156   : > { %v1121_v55 = vadd.f32 %v3359_v59, %v3312_v13  ;;  %v1142_v13 = vadd.f32 %v3359_v59, %v3332_v33  ;;  %v1137_v33 = vadd.f32 %v3359_v59, %v3328_v29  ;;  %v1158_v29 = vadd.f32 %v3359_v59, %v3348_v49 }
 0x157   : > { %v1153_v49 = vadd.f32 %v3359_v59, %v3344_v45 }
 0x15a   : > { %v3364_v0 = vpop.f32.mrb[32].mxu0  ;;  %v2753_v3 = vpop.f32.mrb[32].mxu1 }
 0x15b   : > { %v1399_v7 = vadd.f32 %v2753_v3, %v1110_v60  ;;  %v1167_v8 = vpop.f32.mrb[33].mxu0  ;;  %v1390_v11 = vpop.f32.mrb[33].mxu1 }
 0x15c   : > { %v1391_v15 = vadd.f32 %v1390_v11, %v1102_v63  ;;  %v3369_v16 = vpop.f32.mrb[34].mxu0  ;;  %v2754_v19 = vpop.f32.mrb[34].mxu1 }
 0x15d   : > { %v1711_v1 = vmul.f32 0.2, %v1399_v7  ;;  %v1402_v20 = vadd.f32 %v2754_v19, %v1113_v4  ;;  %v1170_v23 = vpop.f32.mrb[35].mxu0  ;;  %v1393_v57 = vpop.f32.mrb[35].mxu1  ;;  %vm1647_vm0 = vcmp.ge.f32.partialorder %v1399_v7, 0.0 }
 0x15e   : > { %v1709_v24 = vmul.f32 0.2, %v1391_v15  ;;  %v1394_v27 = vadd.f32 %v1393_v57, %v1105_v12  ;;  %vm1645_vm1 = vcmp.ge.f32.partialorder %v1391_v15, 0.0 }
 0x15f   : > { %vm1648_vm2 = vcmp.ge.f32.partialorder %v1402_v20, 0.0  ;;  %v1712_v5 = vmul.f32 0.2, %v1402_v20  ;;  %v1775_v31 = vsel %vm1647_vm0, %v1399_v7, %v1711_v1  ;;  %v1134_v1 = vadd.f32 %v3359_v59, %v3324_v25 }
 0x160   : > { %vm1646_vm3 = vcmp.ge.f32.partialorder %v1394_v27, 0.0  ;;  %v1710_v28 = vmul.f32 0.2, %v1394_v27  ;;  %v1773_v36 = vsel %vm1645_vm1, %v1391_v15, %v1709_v24 }
 0x161   : > { %v1776_v32 = vsel %vm1648_vm2, %v1402_v20, %v1712_v5  ;;  %v1145_v5 = vadd.f32 %v3359_v59, %v3336_v37 }
 0x162   : > { %v2512_v39 = vpack.c.bf16 %v1776_v32, %v1775_v31  ;;  %v1774_v40 = vsel %vm1646_vm3, %v1394_v27, %v1710_v28  ;;  %v3381_v43 = vpop.f32.mrb[36].mxu0  ;;  %v2757_v44 = vpop.f32.mrb[36].mxu1 }
 0x163   : > { %v2507_v47 = vpack.c.bf16 %v1774_v40, %v1773_v36  ;;  %v1415_v48 = vadd.f32 %v2757_v44, %v1126_v61  ;;  %v1175_v51 = vpop.f32.mrb[37].mxu0  ;;  %v1406_v52 = vpop.f32.mrb[37].mxu1  ;;  %v1174_v45 = vadd.f32 %v3359_v59, %v3381_v43  ;;  %v1169_v43 = vadd.f32 %v3359_v59, %v3369_v16 }
 0x164   : > { %2664 = vst [vmem:[%s3377_s28 + $0x8] sm:$0xff] %v2512_v39   ;;  %v1407_v56 = vadd.f32 %v1406_v52, %v1118_v35  ;;  %v3388_v9 = vpop.f32.mrb[38].mxu0  ;;  %v2758_v60 = vpop.f32.mrb[38].mxu1 }
 0x165   : > { %2508 = vst [vmem:[%s3377_s28] sm:$0xff] %v2507_v47   ;;  %v1715_v63 = vmul.f32 0.2, %v1415_v48  ;;  %v1418_v3 = vadd.f32 %v2758_v60, %v1129_v17  ;;  %v1178_v4 = vpop.f32.mrb[39].mxu0  ;;  %v1409_v7 = vpop.f32.mrb[39].mxu1  ;;  %vm1651_vm4 = vcmp.ge.f32.partialorder %v1415_v48, 0.0 }
 0x166   : > { %v1713_v8 = vmul.f32 0.2, %v1407_v56  ;;  %v1410_v21 = vadd.f32 %v1409_v7, %v1121_v55  ;;  %vm1649_vm5 = vcmp.ge.f32.partialorder %v1407_v56, 0.0 }
 0x167   : > { %vm1652_vm6 = vcmp.ge.f32.partialorder %v1418_v3, 0.0  ;;  %v1716_v11 = vmul.f32 0.2, %v1418_v3  ;;  %v1779_v15 = vsel %vm1651_vm4, %v1415_v48, %v1715_v63 }
 0x168   : > { %vm1650_vm7 = vcmp.ge.f32.partialorder %v1410_v21, 0.0  ;;  %v1714_v12 = vmul.f32 0.2, %v1410_v21  ;;  %v1777_v20 = vsel %vm1649_vm5, %v1407_v56, %v1713_v8  ;;  %v1150_v56 = vadd.f32 %v3359_v59, %v3340_v41 }
 0x169   : > { %v1780_v19 = vsel %vm1652_vm6, %v1418_v3, %v1716_v11  ;;  %v1161_v8 = vadd.f32 %v3359_v59, %v3352_v53 }
 0x16a   : > { %v2522_v23 = vpack.c.bf16 %v1780_v19, %v1779_v15  ;;  %v1778_v57 = vsel %vm1650_vm7, %v1410_v21, %v1714_v12  ;;  %v3395_v24 = vpop.f32.mrb[40].mxu0  ;;  %v2761_v27 = vpop.f32.mrb[40].mxu1 }
 0x16b   : > { %v2517_v28 = vpack.c.bf16 %v1778_v57, %v1777_v20  ;;  %v1431_v61 = vadd.f32 %v2761_v27, %v1142_v13  ;;  %v1183_v31 = vpop.f32.mrb[41].mxu0  ;;  %v1422_v32 = vpop.f32.mrb[41].mxu1 }
 0x16c   : > { %2666 = vst [vmem:[%s3377_s28 + $0x18] sm:$0xff] %v2522_v23   ;;  %v1423_v35 = vadd.f32 %v1422_v32, %v1134_v1  ;;  %v3402_v25 = vpop.f32.mrb[42].mxu0  ;;  %v2762_v36 = vpop.f32.mrb[42].mxu1  ;;  %v1166_v32 = vadd.f32 %v3359_v59, %v3364_v0 }
 0x16d   : > { %2665 = vst [vmem:[%s3377_s28 + $0x10] sm:$0xff] %v2517_v28   ;;  %v1719_v39 = vmul.f32 0.2, %v1431_v61  ;;  %v1434_v40 = vadd.f32 %v2762_v36, %v1145_v5  ;;  %v1186_v44 = vpop.f32.mrb[43].mxu0  ;;  %v1425_v17 = vpop.f32.mrb[43].mxu1  ;;  %vm1655_vm8 = vcmp.ge.f32.partialorder %v1431_v61, 0.0 }
 0x16e   : > { %v1717_v47 = vmul.f32 0.2, %v1423_v35  ;;  %v1426_v37 = vadd.f32 %v1425_v17, %v1137_v33  ;;  %vm1653_vm9 = vcmp.ge.f32.partialorder %v1423_v35, 0.0  ;;  %v1177_v44 = vadd.f32 %v3359_v59, %v3388_v9 }
 0x16f   : > { %vm1656_vm10 = vcmp.ge.f32.partialorder %v1434_v40, 0.0  ;;  %v1720_v48 = vmul.f32 0.2, %v1434_v40  ;;  %v1783_v52 = vsel %vm1655_vm8, %v1431_v61, %v1719_v39 }
 0x170   : > { %vm1654_vm11 = vcmp.ge.f32.partialorder %v1426_v37, 0.0  ;;  %v1718_v51 = vmul.f32 0.2, %v1426_v37  ;;  %v1781_v60 = vsel %vm1653_vm9, %v1423_v35, %v1717_v47 }
 0x171   : > { %v1784_v55 = vsel %vm1656_vm10, %v1434_v40, %v1720_v48 }
 0x172   : > { %v2532_v63 = vpack.c.bf16 %v1784_v55, %v1783_v52  ;;  %v1782_v3 = vsel %vm1654_vm11, %v1426_v37, %v1718_v51  ;;  %v1189_v4 = vpop.f32.mrb[44].mxu0  ;;  %v2765_v7 = vpop.f32.mrb[44].mxu1 }
 0x173   : > { %v2527_v21 = vpack.c.bf16 %v1782_v3, %v1781_v60  ;;  %v1447_v11 = vadd.f32 %v2765_v7, %v1158_v29  ;;  %v1191_v12 = vpop.f32.mrb[45].mxu0  ;;  %v1438_v13 = vpop.f32.mrb[45].mxu1  ;;  %v1190_v16 = vadd.f32 %v3359_v59, %v1189_v4  ;;  %v1185_v4 = vadd.f32 %v3359_v59, %v3402_v25 }
 0x174   : > { %2668 = vst [vmem:[%s3377_s28 + $0x28] sm:$0xff] %v2532_v63   ;;  %v1439_v15 = vadd.f32 %v1438_v13, %v1150_v56  ;;  %v1192_v19 = vpop.f32.mrb[46].mxu0  ;;  %v2766_v41 = vpop.f32.mrb[46].mxu1 }
 0x175   : > { %2667 = vst [vmem:[%s3377_s28 + $0x20] sm:$0xff] %v2527_v21   ;;  %v1723_v1 = vmul.f32 0.2, %v1447_v11  ;;  %v1450_v20 = vadd.f32 %v2766_v41, %v1161_v8  ;;  %v1194_v23 = vpop.f32.mrb[47].mxu0  ;;  %v1441_v57 = vpop.f32.mrb[47].mxu1  ;;  %vm1659_vm12 = vcmp.ge.f32.partialorder %v1447_v11, 0.0 }
 0x176   : > { %v1721_v27 = vmul.f32 0.2, %v1439_v15  ;;  %v1442_v5 = vadd.f32 %v1441_v57, %v1153_v49  ;;  %vm1657_vm13 = vcmp.ge.f32.partialorder %v1439_v15, 0.0 }
 0x177   : > { %vm1660_vm14 = vcmp.ge.f32.partialorder %v1450_v20, 0.0  ;;  %v1724_v53 = vmul.f32 0.2, %v1450_v20  ;;  %v1787_v61 = vsel %vm1659_vm12, %v1447_v11, %v1723_v1  ;;  %v1182_v11 = vadd.f32 %v3359_v59, %v3395_v24 }
 0x178   : > { %vm1658_vm15 = vcmp.ge.f32.partialorder %v1442_v5, 0.0  ;;  %v1722_v28 = vmul.f32 0.2, %v1442_v5  ;;  %v1785_v33 = vsel %vm1657_vm13, %v1439_v15, %v1721_v27  ;;  %v1193_v1 = vadd.f32 %v3359_v59, %v1192_v19 }
 0x179   : > { %v1788_v31 = vsel %vm1660_vm14, %v1450_v20, %v1724_v53 }
 0x17a   : > { %v2542_v35 = vpack.c.bf16 %v1788_v31, %v1787_v61  ;;  %v1786_v36 = vsel %vm1658_vm15, %v1442_v5, %v1722_v28  ;;  %v1197_v39 = vpop.f32.mrb[48].mxu0  ;;  %v2769_v40 = vpop.f32.mrb[48].mxu1 }
 0x17b   : > { %v2537_v17 = vpack.c.bf16 %v1786_v36, %v1785_v33  ;;  %v1463_v47 = vadd.f32 %v2769_v40, %v1174_v45  ;;  %v1199_v37 = vpop.f32.mrb[49].mxu0  ;;  %v1454_v48 = vpop.f32.mrb[49].mxu1 }
 0x17c   : > { %2670 = vst [vmem:[%s3377_s28 + $0x38] sm:$0xff] %v2542_v35   ;;  %v1455_v51 = vadd.f32 %v1454_v48, %v1166_v32  ;;  %v1200_v29 = vpop.f32.mrb[50].mxu0  ;;  %v2770_v0 = vpop.f32.mrb[50].mxu1 }
 0x17d   : > { %2669 = vst [vmem:[%s3377_s28 + $0x30] sm:$0xff] %v2537_v17   ;;  %v1727_v52 = vmul.f32 0.2, %v1463_v47  ;;  %v1466_v55 = vadd.f32 %v2770_v0, %v1177_v44  ;;  %v1202_v56 = vpop.f32.mrb[51].mxu0  ;;  %v1457_v60 = vpop.f32.mrb[51].mxu1  ;;  %vm1663_vm0 = vcmp.ge.f32.partialorder %v1463_v47, 0.0  ;;  %v1198_v44 = vadd.f32 %v3359_v59, %v1197_v39 }
 0x17e   : > { %v1725_v63 = vmul.f32 0.2, %v1455_v51  ;;  %v1458_v3 = vadd.f32 %v1457_v60, %v1169_v43  ;;  %vm1661_vm1 = vcmp.ge.f32.partialorder %v1455_v51, 0.0  ;;  %v1201_v60 = vadd.f32 %v3359_v59, %v1200_v29 }
 0x17f   : > { %vm1664_vm2 = vcmp.ge.f32.partialorder %v1466_v55, 0.0  ;;  %v1728_v9 = vmul.f32 0.2, %v1466_v55  ;;  %v1791_v8 = vsel %vm1663_vm0, %v1463_v47, %v1727_v52 }
 0x180   : > { %vm1662_vm3 = vcmp.ge.f32.partialorder %v1458_v3, 0.0  ;;  %v1726_v7 = vmul.f32 0.2, %v1458_v3  ;;  %v1789_v12 = vsel %vm1661_vm1, %v1455_v51, %v1725_v63 }
 0x181   : > { %v1792_v21 = vsel %vm1664_vm2, %v1466_v55, %v1728_v9 }
 0x182   : > { %v2552_v13 = vpack.c.bf16 %v1792_v21, %v1791_v8  ;;  %v1790_v49 = vsel %vm1662_vm3, %v1458_v3, %v1726_v7  ;;  %v1205_v15 = vpop.f32.mrb[52].mxu0  ;;  %v2773_v41 = vpop.f32.mrb[52].mxu1 }
 0x183   : > { %v2547_v20 = vpack.c.bf16 %v1790_v49, %v1789_v12  ;;  %v1479_v23 = vadd.f32 %v2773_v41, %v1190_v16  ;;  %v1207_v57 = vpop.f32.mrb[53].mxu0  ;;  %v1470_v27 = vpop.f32.mrb[53].mxu1  ;;  %v1206_v25 = vadd.f32 %v3359_v59, %v1205_v15 }
 0x184   : > { %2672 = vst [vmem:[%s3377_s28 + $0x48] sm:$0xff] %v2552_v13   ;;  %v1471_v5 = vadd.f32 %v1470_v27, %v1182_v11  ;;  %v1208_v53 = vpop.f32.mrb[54].mxu0  ;;  %v2774_v28 = vpop.f32.mrb[54].mxu1 }
 0x185   : > { %2671 = vst [vmem:[%s3377_s28 + $0x40] sm:$0xff] %v2547_v20   ;;  %v1731_v24 = vmul.f32 0.2, %v1479_v23  ;;  %v1482_v45 = vadd.f32 %v2774_v28, %v1193_v1  ;;  %v1210_v61 = vpop.f32.mrb[55].mxu0  ;;  %v1473_v31 = vpop.f32.mrb[55].mxu1  ;;  %vm1667_vm4 = vcmp.ge.f32.partialorder %v1479_v23, 0.0  ;;  %v1209_v51 = vadd.f32 %v3359_v59, %v1208_v53 }
 0x186   : > { %v1729_v32 = vmul.f32 0.2, %v1471_v5  ;;  %v1474_v33 = vadd.f32 %v1473_v31, %v1185_v4  ;;  %vm1665_vm5 = vcmp.ge.f32.partialorder %v1471_v5, 0.0 }
 0x187   : > { %vm1668_vm6 = vcmp.ge.f32.partialorder %v1482_v45, 0.0  ;;  %v1732_v19 = vmul.f32 0.2, %v1482_v45  ;;  %v1795_v36 = vsel %vm1667_vm4, %v1479_v23, %v1731_v24 }
 0x188   : > { %vm1666_vm7 = vcmp.ge.f32.partialorder %v1474_v33, 0.0  ;;  %v1730_v35 = vmul.f32 0.2, %v1474_v33  ;;  %v1793_v17 = vsel %vm1665_vm5, %v1471_v5, %v1729_v32 }
 0x189   : > { %v1796_v40 = vsel %vm1668_vm6, %v1482_v45, %v1732_v19 }
 0x18a   : > { %v2562_v47 = vpack.c.bf16 %v1796_v40, %v1795_v36  ;;  %v1794_v37 = vsel %vm1666_vm7, %v1474_v33, %v1730_v35  ;;  %v1213_v48 = vpop.f32.mrb[56].mxu0  ;;  %v2777_v43 = vpop.f32.mrb[56].mxu1 }
 0x18b   : > { %v2557_v0 = vpack.c.bf16 %v1794_v37, %v1793_v17  ;;  %v1495_v52 = vadd.f32 %v2777_v43, %v1206_v25  ;;  %v1215_v55 = vpop.f32.mrb[57].mxu0  ;;  %v1486_v56 = vpop.f32.mrb[57].mxu1  ;;  %v1214_v15 = vadd.f32 %v3359_v59, %v1213_v48 }
 0x18c   : > { %2674 = vst [vmem:[%s3377_s28 + $0x58] sm:$0xff] %v2562_v47   ;;  %v1487_v63 = vadd.f32 %v1486_v56, %v1198_v44  ;;  %v1216_v3 = vpop.f32.mrb[58].mxu0  ;;  %v2778_v9 = vpop.f32.mrb[58].mxu1 }
 0x18d   : > { %2673 = vst [vmem:[%s3377_s28 + $0x50] sm:$0xff] %v2557_v0   ;;  %v1735_v39 = vmul.f32 0.2, %v1495_v52  ;;  %v1498_v7 = vadd.f32 %v2778_v9, %v1209_v51  ;;  %v1218_v16 = vpop.f32.mrb[59].mxu0  ;;  %v1489_v8 = vpop.f32.mrb[59].mxu1  ;;  %vm1671_vm8 = vcmp.ge.f32.partialorder %v1495_v52, 0.0  ;;  %v1217_v28 = vadd.f32 %v3359_v59, %v1216_v3 }
 0x18e   : > { %v1733_v21 = vmul.f32 0.2, %v1487_v63  ;;  %v1490_v11 = vadd.f32 %v1489_v8, %v1201_v60  ;;  %vm1669_vm9 = vcmp.ge.f32.partialorder %v1487_v63, 0.0 }
 0x18f   : > { %vm1672_vm10 = vcmp.ge.f32.partialorder %v1498_v7, 0.0  ;;  %v1736_v12 = vmul.f32 0.2, %v1498_v7  ;;  %v1799_v49 = vsel %vm1671_vm8, %v1495_v52, %v1735_v39 }
 0x190   : > { %vm1670_vm11 = vcmp.ge.f32.partialorder %v1490_v11, 0.0  ;;  %v1734_v13 = vmul.f32 0.2, %v1490_v11  ;;  %v1797_v41 = vsel %vm1669_vm9, %v1487_v63, %v1733_v21 }
 0x191   : > { %v1800_v29 = vsel %vm1672_vm10, %v1498_v7, %v1736_v12 }
 0x192   : > { %v2572_v1 = vpack.c.bf16 %v1800_v29, %v1799_v49  ;;  %v1798_v20 = vsel %vm1670_vm11, %v1490_v11, %v1734_v13  ;;  %v1221_v23 = vpop.f32.mrb[60].mxu0  ;;  %v2781_v57 = vpop.f32.mrb[60].mxu1 }
 0x193   : > { %v2567_v27 = vpack.c.bf16 %v1798_v20, %v1797_v41  ;;  %v1222_v4 = vadd.f32 %v3359_v59, %v1221_v23  ;;  %v1223_v5 = vpop.f32.mrb[61].mxu0  ;;  %v1502_v53 = vpop.f32.mrb[61].mxu1 }
 0x194   : > { %2676 = vst [vmem:[%s3377_s28 + $0x68] sm:$0xff] %v2572_v1   ;;  %v1503_v24 = vadd.f32 %v1502_v53, %v1214_v15  ;;  %v1224_v45 = vpop.f32.mrb[62].mxu0  ;;  %v2782_v61 = vpop.f32.mrb[62].mxu1 }
 0x195   : > { %2675 = vst [vmem:[%s3377_s28 + $0x60] sm:$0xff] %v2567_v27   ;;  %v1511_v31 = vadd.f32 %v2781_v57, %v1222_v4  ;;  %v1225_v32 = vadd.f32 %v3359_v59, %v1224_v45  ;;  %v1226_v33 = vpop.f32.mrb[63].mxu0  ;;  %v1505_v19 = vpop.f32.mrb[63].mxu1 }
 0x196   : > { %v1737_v35 = vmul.f32 0.2, %v1503_v24  ;;  %v1506_v25 = vadd.f32 %v1505_v19, %v1217_v28  ;;  %vm1673_vm12 = vcmp.ge.f32.partialorder %v1503_v24, 0.0 }
 0x197   : > { %v1739_v36 = vmul.f32 0.2, %v1511_v31  ;;  %v1514_v40 = vadd.f32 %v2782_v61, %v1225_v32  ;;  %vm1675_vm13 = vcmp.ge.f32.partialorder %v1511_v31, 0.0 }
 0x198   : > { %vm1674_vm14 = vcmp.ge.f32.partialorder %v1506_v25, 0.0  ;;  %v1738_v44 = vmul.f32 0.2, %v1506_v25  ;;  %v1801_v47 = vsel %vm1673_vm12, %v1503_v24, %v1737_v35 }
 0x199   : > { %vm1676_vm15 = vcmp.ge.f32.partialorder %v1514_v40, 0.0  ;;  %v1740_v17 = vmul.f32 0.2, %v1514_v40  ;;  %v1803_v51 = vsel %vm1675_vm13, %v1511_v31, %v1739_v36 }
 0x19a   : > { %v1802_v37 = vsel %vm1674_vm14, %v1506_v25, %v1738_v44  ;;  %v1229_v48 = vpop.f32.mrb[64].mxu0  ;;  %v2785_v43 = vpop.f32.mrb[64].mxu1 }
 0x19b   : > { %v1804_v0 = vsel %vm1676_vm15, %v1514_v40, %v1740_v17  ;;  %v2577_v52 = vpack.c.bf16 %v1802_v37, %v1801_v47  ;;  %v1230_v55 = vadd.f32 %v3359_v59, %v1229_v48  ;;  %v1231_v56 = vpop.f32.mrb[65].mxu0  ;;  %v1518_v60 = vpop.f32.mrb[65].mxu1 }
 0x19c   : > { %v2582_v63 = vpack.c.bf16 %v1804_v0, %v1803_v51  ;;  %v1232_v3 = vpop.f32.mrb[66].mxu0  ;;  %v2786_v9 = vpop.f32.mrb[66].mxu1 }
 0x19d   : > { %2677 = vst [vmem:[%s3377_s28 + $0x70] sm:$0xff] %v2577_v52   ;;  %v1519_v39 = vadd.f32 %v1518_v60, %v1230_v55  ;;  %v1233_v7 = vadd.f32 %v3359_v59, %v1232_v3  ;;  %v1234_v16 = vpop.f32.mrb[67].mxu0  ;;  %v1521_v8 = vpop.f32.mrb[67].mxu1 }
 0x19e   : > { %2678 = vst [vmem:[%s3377_s28 + $0x78] sm:$0xff] %v2582_v63  }
 0x19f   : > { %v1741_v21 = vmul.f32 0.2, %v1519_v39  ;;  %v1522_v11 = vadd.f32 %v1521_v8, %v1233_v7  ;;  %vm1677_vm0 = vcmp.ge.f32.partialorder %v1519_v39, 0.0 }
 0x1a1   : > { %vm1678_vm1 = vcmp.ge.f32.partialorder %v1522_v11, 0.0  ;;  %v1742_v12 = vmul.f32 0.2, %v1522_v11  ;;  %v1805_v29 = vsel %vm1677_vm0, %v1519_v39, %v1741_v21 }
 0x1a2   : > { %v1237_v13 = vpop.f32.mrb[68].mxu0  ;;  %v2789_v49 = vpop.f32.mrb[68].mxu1 }
 0x1a3   : > { %v1806_v15 = vsel %vm1678_vm1, %v1522_v11, %v1742_v12  ;;  %v1238_v41 = vadd.f32 %v3359_v59, %v1237_v13  ;;  %v1239_v1 = vpop.f32.mrb[69].mxu0  ;;  %v1534_v20 = vpop.f32.mrb[69].mxu1 }
 0x1a4   : > { %v2587_v23 = vpack.c.bf16 %v1806_v15, %v1805_v29  ;;  %v1240_v57 = vpop.f32.mrb[70].mxu0  ;;  %v2790_v27 = vpop.f32.mrb[70].mxu1 }
 0x1a5   : > { %v1527_v4 = vadd.f32 %v2785_v43, %v1238_v41  ;;  %v1241_v5 = vadd.f32 %v3359_v59, %v1240_v57  ;;  %v1242_v53 = vpop.f32.mrb[71].mxu0  ;;  %v1537_v28 = vpop.f32.mrb[71].mxu1  ;;  %v1302_v41 = vadd.f32 %v3359_v59, %v3304_v2  ;;  %v1305_v2 = vadd.f32 %v3359_v59, %v3306_v6 }
 0x1a6   : > { %2679 = vst [vmem:[%s3377_s28 + $0x80] sm:$0xff] %v2587_v23  }
 0x1a7   : > { %v1743_v24 = vmul.f32 0.2, %v1527_v4  ;;  %v1530_v45 = vadd.f32 %v2786_v9, %v1241_v5  ;;  %vm1679_vm2 = vcmp.ge.f32.partialorder %v1527_v4, 0.0 }
 0x1a9   : > { %vm1680_vm3 = vcmp.ge.f32.partialorder %v1530_v45, 0.0  ;;  %v1744_v61 = vmul.f32 0.2, %v1530_v45  ;;  %v1807_v33 = vsel %vm1679_vm2, %v1527_v4, %v1743_v24 }
 0x1aa   : > { %v1245_v31 = vpop.f32.mrb[72].mxu0  ;;  %v3452_v32 = vpop.f32.mrb[72].mxu1 }
 0x1ab   : > { %v1808_v19 = vsel %vm1680_vm3, %v1530_v45, %v1744_v61  ;;  %v1246_v35 = vadd.f32 %v3359_v59, %v1245_v31  ;;  %v1247_v25 = vpop.f32.mrb[73].mxu0  ;;  %v1550_v36 = vpop.f32.mrb[73].mxu1  ;;  %v1310_v45 = vadd.f32 %v3359_v59, %v3310_v10 }
 0x1ac   : > { %v2592_v40 = vpack.c.bf16 %v1808_v19, %v1807_v33  ;;  %v1248_v44 = vpop.f32.mrb[74].mxu0  ;;  %v3455_v17 = vpop.f32.mrb[74].mxu1  ;;  %v1313_v33 = vadd.f32 %v3359_v59, %v3314_v14 }
 0x1ad   : > { %v1535_v47 = vadd.f32 %v1534_v20, %v1246_v35  ;;  %v1249_v37 = vadd.f32 %v3359_v59, %v1248_v44  ;;  %v1250_v48 = vpop.f32.mrb[75].mxu0  ;;  %v1553_v43 = vpop.f32.mrb[75].mxu1  ;;  %v1294_v20 = vadd.f32 %v3359_v59, %v3298_v58 }
 0x1ae   : > { %2680 = vst [vmem:[%s3377_s28 + $0x88] sm:$0xff] %v2592_v40  }
 0x1af   : > { %v1745_v51 = vmul.f32 0.2, %v1535_v47  ;;  %v1538_v0 = vadd.f32 %v1537_v28, %v1249_v37  ;;  %vm1681_vm4 = vcmp.ge.f32.partialorder %v1535_v47, 0.0 }
 0x1b1   : > { %vm1682_vm5 = vcmp.ge.f32.partialorder %v1538_v0, 0.0  ;;  %v1746_v52 = vmul.f32 0.2, %v1538_v0  ;;  %v1809_v60 = vsel %vm1681_vm4, %v1535_v47, %v1745_v51  ;;  %v1318_v51 = vadd.f32 %v3359_v59, %v3318_v18 }
 0x1b2   : > { %v1253_v55 = vpop.f32.mrb[76].mxu0  ;;  %v3459_v56 = vpop.f32.mrb[76].mxu1 }
 0x1b3   : > { %v1810_v63 = vsel %vm1682_vm5, %v1538_v0, %v1746_v52  ;;  %v1254_v3 = vadd.f32 %v3359_v59, %v1253_v55  ;;  %v1255_v9 = vpop.f32.mrb[77].mxu0  ;;  %v3462_v39 = vpop.f32.mrb[77].mxu1 }
 0x1b4   : > { %v2597_v7 = vpack.c.bf16 %v1810_v63, %v1809_v60  ;;  %v1256_v16 = vpop.f32.mrb[78].mxu0  ;;  %v3464_v8 = vpop.f32.mrb[78].mxu1 }
 0x1b5   : > { %v1543_v21 = vadd.f32 %v2789_v49, %v1254_v3  ;;  %v1257_v11 = vadd.f32 %v3359_v59, %v1256_v16  ;;  %v1258_v12 = vpop.f32.mrb[79].mxu0  ;;  %v3467_v13 = vpop.f32.mrb[79].mxu1  ;;  %v1297_v49 = vadd.f32 %v3359_v59, %v3302_v62 }
 0x1b6   : > { %2681 = vst [vmem:[%s3377_s28 + $0x90] sm:$0xff] %v2597_v7  }
 0x1b7   : > { %v1747_v29 = vmul.f32 0.2, %v1543_v21  ;;  %v1546_v15 = vadd.f32 %v2790_v27, %v1257_v11  ;;  %vm1683_vm6 = vcmp.ge.f32.partialorder %v1543_v21, 0.0 }
 0x1b9   : > { %vm1684_vm7 = vcmp.ge.f32.partialorder %v1546_v15, 0.0  ;;  %v1748_v1 = vmul.f32 0.2, %v1546_v15  ;;  %v1811_v4 = vsel %vm1683_vm6, %v1543_v21, %v1747_v29 }
 0x1ba   : > { %v1261_v23 = vpop.f32.mrb[80].mxu0  ;;  %v2801_v57 = vpop.f32.mrb[80].mxu1 }
 0x1bb   : > { %v1812_v5 = vsel %vm1684_vm7, %v1546_v15, %v1748_v1  ;;  %v1262_v53 = vadd.f32 %v3359_v59, %v1261_v23  ;;  %v1591_v27 = vadd.f32 %v2801_v57, %v1302_v41  ;;  %v1263_v28 = vpop.f32.mrb[81].mxu0  ;;  %v1582_v24 = vpop.f32.mrb[81].mxu1 }
 0x1bc   : > { %v2602_v58 = vpack.c.bf16 %v1812_v5, %v1811_v4  ;;  %v1583_v61 = vadd.f32 %v1582_v24, %v1294_v20  ;;  %v1264_v31 = vpop.f32.mrb[82].mxu0  ;;  %v2802_v62 = vpop.f32.mrb[82].mxu1  ;;  %v1334_v28 = vadd.f32 %v3359_v59, %v3334_v34 }
 0x1bd   : > { %v1551_v19 = vadd.f32 %v1550_v36, %v1262_v53  ;;  %vm1695_vm8 = vcmp.ge.f32.partialorder %v1591_v27, 0.0  ;;  %v1265_v35 = vadd.f32 %v3359_v59, %v1264_v31  ;;  %v1266_v25 = vpop.f32.mrb[83].mxu0  ;;  %v1585_v40 = vpop.f32.mrb[83].mxu1  ;;  %v1759_v44 = vmul.f32 0.2, %v1591_v27 }
 0x1be   : > { %2682 = vst [vmem:[%s3377_s28 + $0x98] sm:$0xff] %v2602_v58   ;;  %v1757_v47 = vmul.f32 0.2, %v1583_v61  ;;  %v1594_v6 = vadd.f32 %v2802_v62, %v1305_v2  ;;  %v1586_v37 = vadd.f32 %v1585_v40, %v1297_v49  ;;  %vm1693_vm10 = vcmp.ge.f32.partialorder %v1583_v61, 0.0 }
 0x1bf   : > { %vm1685_vm9 = vcmp.ge.f32.partialorder %v1551_v19, 0.0  ;;  %v1749_v10 = vmul.f32 0.2, %v1551_v19  ;;  %v1554_v48 = vadd.f32 %v1553_v43, %v1265_v35  ;;  %v1321_v36 = vadd.f32 %v3359_v59, %v3322_v22 }
 0x1c0   : > { %vm1696_vm11 = vcmp.ge.f32.partialorder %v1594_v6, 0.0  ;;  %v1760_v14 = vmul.f32 0.2, %v1594_v6  ;;  %vm1694_vm12 = vcmp.ge.f32.partialorder %v1586_v37, 0.0  ;;  %v1758_v52 = vmul.f32 0.2, %v1586_v37 }
 0x1c1   : > { %vm1686_vm13 = vcmp.ge.f32.partialorder %v1554_v48, 0.0  ;;  %v1750_v0 = vmul.f32 0.2, %v1554_v48  ;;  %v1813_v55 = vsel %vm1685_vm9, %v1551_v19, %v1749_v10  ;;  %v1823_v60 = vsel %vm1695_vm8, %v1591_v27, %v1759_v44 }
 0x1c2   : > { %v1821_v63 = vsel %vm1693_vm10, %v1583_v61, %v1757_v47  ;;  %v1824_v3 = vsel %vm1696_vm11, %v1594_v6, %v1760_v14  ;;  %v1269_v9 = vpop.f32.mrb[84].mxu0  ;;  %v2805_v43 = vpop.f32.mrb[84].mxu1  ;;  %v1822_v18 = vsel %vm1694_vm12, %v1586_v37, %v1758_v52  ;;  %v1326_v49 = vadd.f32 %v3359_v59, %v3326_v26 }
 0x1c3   : > { %v1814_v7 = vsel %vm1686_vm13, %v1554_v48, %v1750_v0  ;;  %v2632_v16 = vpack.c.bf16 %v1824_v3, %v1823_v60  ;;  %v1270_v21 = vadd.f32 %v3359_v59, %v1269_v9  ;;  %v1271_v11 = vpop.f32.mrb[85].mxu0  ;;  %v1598_v12 = vpop.f32.mrb[85].mxu1  ;;  %v2627_v29 = vpack.c.bf16 %v1822_v18, %v1821_v63 }
 0x1c4   : > { %v2607_v22 = vpack.c.bf16 %v1814_v7, %v1813_v55  ;;  %v1607_v15 = vadd.f32 %v2805_v43, %v1318_v51  ;;  %v1599_v41 = vadd.f32 %v1598_v12, %v1310_v45  ;;  %v1272_v1 = vpop.f32.mrb[86].mxu0  ;;  %v2806_v20 = vpop.f32.mrb[86].mxu1  ;;  %v1329_v27 = vadd.f32 %v3359_v59, %v3330_v30 }
 0x1c5   : > { %2688 = vst [vmem:[%s3377_s28 + $0xc8] sm:$0xff] %v2632_v16   ;;  %v1559_v23 = vadd.f32 %v3452_v32, %v1270_v21  ;;  %v1273_v57 = vadd.f32 %v3359_v59, %v1272_v1  ;;  %v1610_v4 = vadd.f32 %v2806_v20, %v1321_v36  ;;  %v1274_v5 = vpop.f32.mrb[87].mxu0  ;;  %v1601_v53 = vpop.f32.mrb[87].mxu1  ;;  %2687 = vst [vmem:[%s3377_s28 + $0xc0] sm:$0xff] %v2627_v29  }
 0x1c6   : > { %2683 = vst [vmem:[%s3377_s28 + $0xa0] sm:$0xff] %v2607_v22   ;;  %vm1699_vm14 = vcmp.ge.f32.partialorder %v1607_v15, 0.0  ;;  %v1763_v24 = vmul.f32 0.2, %v1607_v15  ;;  %v1337_v32 = vadd.f32 %v3359_v59, %v3338_v38  ;;  %v1761_v45 = vmul.f32 0.2, %v1599_v41 }
 0x1c7   : > { %vm1687_vm15 = vcmp.ge.f32.partialorder %v1559_v23, 0.0  ;;  %v1751_v26 = vmul.f32 0.2, %v1559_v23  ;;  %v1562_v2 = vadd.f32 %v3455_v17, %v1273_v57  ;;  %vm1700_vm0 = vcmp.ge.f32.partialorder %v1610_v4, 0.0 }
 0x1c8   : > { %v1764_v58 = vmul.f32 0.2, %v1610_v4  ;;  %v1602_v61 = vadd.f32 %v1601_v53, %v1313_v33  ;;  %v1827_v31 = vsel %vm1699_vm14, %v1607_v15, %v1763_v24  ;;  %vm1697_vm1 = vcmp.ge.f32.partialorder %v1599_v41, 0.0 }
 0x1c9   : > { %vm1688_vm2 = vcmp.ge.f32.partialorder %v1562_v2, 0.0  ;;  %v1752_v30 = vmul.f32 0.2, %v1562_v2  ;;  %v1815_v34 = vsel %vm1687_vm15, %v1559_v23, %v1751_v26  ;;  %v1825_v33 = vsel %vm1697_vm1, %v1599_v41, %v1761_v45 }
 0x1ca   : > { %v1828_v62 = vsel %vm1700_vm0, %v1610_v4, %v1764_v58  ;;  %vm1698_vm3 = vcmp.ge.f32.partialorder %v1602_v61, 0.0  ;;  %v1762_v19 = vmul.f32 0.2, %v1602_v61  ;;  %v1277_v35 = vpop.f32.mrb[88].mxu0  ;;  %v2809_v25 = vpop.f32.mrb[88].mxu1  ;;  %v1342_v36 = vadd.f32 %v3359_v59, %v3342_v42 }
 0x1cb   : > { %v1816_v40 = vsel %vm1688_vm2, %v1562_v2, %v1752_v30  ;;  %v2642_v17 = vpack.c.bf16 %v1828_v62, %v1827_v31  ;;  %v1278_v44 = vadd.f32 %v3359_v59, %v1277_v35  ;;  %v1623_v47 = vadd.f32 %v2809_v25, %v1334_v28  ;;  %v1279_v38 = vpop.f32.mrb[89].mxu0  ;;  %v1614_v6 = vpop.f32.mrb[89].mxu1 }
 0x1cc   : > { %v2612_v37 = vpack.c.bf16 %v1816_v40, %v1815_v34  ;;  %v1826_v10 = vsel %vm1698_vm3, %v1602_v61, %v1762_v19  ;;  %v1615_v48 = vadd.f32 %v1614_v6, %v1326_v49  ;;  %v1280_v51 = vpop.f32.mrb[90].mxu0  ;;  %v2810_v14 = vpop.f32.mrb[90].mxu1  ;;  %v1350_v7 = vadd.f32 %v3359_v59, %v3350_v50 }
 0x1cd   : > { %2690 = vst [vmem:[%s3377_s28 + $0xd8] sm:$0xff] %v2642_v17   ;;  %v2637_v0 = vpack.c.bf16 %v1826_v10, %v1825_v33  ;;  %v1567_v52 = vadd.f32 %v3462_v39, %v1278_v44  ;;  %v1767_v55 = vmul.f32 0.2, %v1623_v47  ;;  %v1282_v60 = vpop.f32.mrb[91].mxu0  ;;  %v1617_v63 = vpop.f32.mrb[91].mxu1  ;;  %vm1703_vm4 = vcmp.ge.f32.partialorder %v1623_v47, 0.0 }
 0x1ce   : > { %2684 = vst [vmem:[%s3377_s28 + $0xa8] sm:$0xff] %v2612_v37   ;;  %v1765_v3 = vmul.f32 0.2, %v1615_v48  ;;  %v1281_v9 = vadd.f32 %v3359_v59, %v1280_v51  ;;  %v1626_v43 = vadd.f32 %v2810_v14, %v1337_v32  ;;  %v1353_v16 = vadd.f32 %v3359_v59, %v3354_v54 }
 0x1cf   : > { %2689 = vst [vmem:[%s3377_s28 + $0xd0] sm:$0xff] %v2637_v0   ;;  %vm1701_vm5 = vcmp.ge.f32.partialorder %v1615_v48, 0.0  ;;  %v1618_v42 = vadd.f32 %v1617_v63, %v1329_v27  ;;  %v1753_v18 = vmul.f32 0.2, %v1567_v52  ;;  %vm1689_vm7 = vcmp.ge.f32.partialorder %v1567_v52, 0.0 }
 0x1d0   : > { %v1570_v39 = vadd.f32 %v3467_v13, %v1281_v9  ;;  %vm1704_vm6 = vcmp.ge.f32.partialorder %v1626_v43, 0.0  ;;  %v1768_v21 = vmul.f32 0.2, %v1626_v43  ;;  %v1831_v11 = vsel %vm1703_vm4, %v1623_v47, %v1767_v55 }
 0x1d1   : > { %vm1702_vm8 = vcmp.ge.f32.partialorder %v1618_v42, 0.0  ;;  %v1766_v12 = vmul.f32 0.2, %v1618_v42  ;;  %v1829_v22 = vsel %vm1701_vm5, %v1615_v48, %v1765_v3  ;;  %v1817_v57 = vsel %vm1689_vm7, %v1567_v52, %v1753_v18 }
 0x1d2   : > { %vm1690_vm9 = vcmp.ge.f32.partialorder %v1570_v39, 0.0  ;;  %v1754_v29 = vmul.f32 0.2, %v1570_v39  ;;  %v1832_v15 = vsel %vm1704_vm6, %v1626_v43, %v1768_v21  ;;  %v1285_v50 = vpop.f32.mrb[92].mxu0  ;;  %v2813_v41 = vpop.f32.mrb[92].mxu1  ;;  %v1345_v24 = vadd.f32 %v3359_v59, %v3346_v46 }
 0x1d3   : > { %v2652_v54 = vpack.c.bf16 %v1832_v15, %v1831_v11  ;;  %v1830_v1 = vsel %vm1702_vm8, %v1618_v42, %v1766_v12  ;;  %v1286_v20 = vadd.f32 %v3359_v59, %v1285_v50  ;;  %v1639_v49 = vadd.f32 %v2813_v41, %v1350_v7  ;;  %v1287_v13 = vpop.f32.mrb[93].mxu0  ;;  %v1630_v23 = vpop.f32.mrb[93].mxu1 }
 0x1d4   : > { %v1818_v4 = vsel %vm1690_vm9, %v1570_v39, %v1754_v29  ;;  %v2647_v5 = vpack.c.bf16 %v1830_v1, %v1829_v22  ;;  %v1631_v53 = vadd.f32 %v1630_v23, %v1342_v36  ;;  %v1288_v27 = vpop.f32.mrb[94].mxu0  ;;  %v2814_v28 = vpop.f32.mrb[94].mxu1 }
 0x1d5   : > { %v2617_v26 = vpack.c.bf16 %v1818_v4, %v1817_v57  ;;  %2692 = vst [vmem:[%s3377_s28 + $0xe8] sm:$0xff] %v2652_v54   ;;  %v1575_v2 = vadd.f32 %v3459_v56, %v1286_v20  ;;  %v1290_v32 = vpop.f32.mrb[95].mxu0  ;;  %v1633_v45 = vpop.f32.mrb[95].mxu1  ;;  %v1771_v58 = vmul.f32 0.2, %v1639_v49  ;;  %v1289_v61 = vadd.f32 %v3359_v59, %v1288_v27 }
 0x1d6   : > { %2691 = vst [vmem:[%s3377_s28 + $0xe0] sm:$0xff] %v2647_v5   ;;  %v1642_v31 = vadd.f32 %v2814_v28, %v1353_v16  ;;  %vm1707_vm10 = vcmp.ge.f32.partialorder %v1639_v49, 0.0  ;;  %vm1705_vm11 = vcmp.ge.f32.partialorder %v1631_v53, 0.0  ;;  %v1769_v30 = vmul.f32 0.2, %v1631_v53 }
 0x1d7   : > { %2685 = vst [vmem:[%s3377_s28 + $0xb0] sm:$0xff] %v2617_v26   ;;  %v1634_v34 = vadd.f32 %v1633_v45, %v1345_v24  ;;  %v1755_v62 = vmul.f32 0.2, %v1575_v2  ;;  %v1578_v19 = vadd.f32 %v3464_v8, %v1289_v61  ;;  %vm1691_vm13 = vcmp.ge.f32.partialorder %v1575_v2, 0.0 }
 0x1d8   : > { %vm1708_vm12 = vcmp.ge.f32.partialorder %v1642_v31, 0.0  ;;  %v1772_v46 = vmul.f32 0.2, %v1642_v31  ;;  %v1835_v35 = vsel %vm1707_vm10, %v1639_v49, %v1771_v58  ;;  %v1833_v40 = vsel %vm1705_vm11, %v1631_v53, %v1769_v30 }
 0x1d9   : > { %vm1706_vm14 = vcmp.ge.f32.partialorder %v1634_v34, 0.0  ;;  %v1770_v56 = vmul.f32 0.2, %v1634_v34  ;;  %vm1692_vm15 = vcmp.ge.f32.partialorder %v1578_v19, 0.0  ;;  %v1756_v59 = vmul.f32 0.2, %v1578_v19 }
 0x1da   : > { %v1836_v25 = vsel %vm1708_vm12, %v1642_v31, %v1772_v46  ;;  %v1819_v47 = vsel %vm1691_vm13, %v1575_v2, %v1755_v62 }
 0x1db   : > { %v2662_v17 = vpack.c.bf16 %v1836_v25, %v1835_v35  ;;  %v1834_v44 = vsel %vm1706_vm14, %v1634_v34, %v1770_v56  ;;  %v1820_v38 = vsel %vm1692_vm15, %v1578_v19, %v1756_v59 }
 0x1dc   : > { %v2657_v6 = vpack.c.bf16 %v1834_v44, %v1833_v40  ;;  %v2622_v33 = vpack.c.bf16 %v1820_v38, %v1819_v47 }
 0x1dd   : > { %2694 = vst [vmem:[%s3377_s28 + $0xf8] sm:$0xff] %v2662_v17  }
 0x1de   : > { %2693 = vst [vmem:[%s3377_s28 + $0xf0] sm:$0xff] %v2657_v6   ;;  %2686 = vst [vmem:[%s3377_s28 + $0xb8] sm:$0xff] %v2622_v33  }
 0x1df PF: > { %s13_s14 = sadd.s32 1, %s3047_s14   ;;  %s3544_s12 = smov %s3043_s13 }
 0x1e0   : > { %p10_p5 = scmp.ge.s32.totalorder %s13_s14, 6   ;;  %s3545_s13 = smov %s3547_s15 }
 0x1e2   :  { %12 = sbr.rel (!%p10_p5) target bundleno = 2 (0x2), region = 65 }

// kernel: patch_discriminator70.7
= control target key start
LH: loop header
LB: loop body
LE: loop exit
PB: predicated region body
PF: predicated region fallthrough
CT: control target
= control target key end

     0   :  { %v4832_v0 = vmov 0   ;;  %s6063_s1 = inlined_call_operand.vmem [shape: bf16[1024,128], index: 1, kind: input, shape index: {}]   ;;  %s6064_s0 = inlined_call_operand.vmem [shape: bf16[512,1024], index: 0, kind: input, shape index: {}]   ;;  %s6065_s2 = inlined_call_operand.vmem [shape: f32[1,128], index: 2, kind: input, shape index: {}]   ;;  %s6066_s3 = inlined_call_operand.vmem [shape: bf16[512,128], index: 3, kind: output, shape index: {}]  }
   0x1   :  { %2070 = vmatprep.subr.bf16.mxu1 %v4832_v0  ;;  %2648 = vmatprep.subr.bf16.mxu0 %v4832_v0  ;;  %v4767_v1 = vld [vmem:[%s6063_s1] sm:$0xff]   ;;  %v4769_v3 = vld [vmem:[%s6063_s1 + $0x8] sm:$0xff]   ;;  %v4771_v5 = vld [vmem:[%s6063_s1 + $0x10] sm:$0xff]  }
   0x2   :  { %v4768_v2 = vld [vmem:[%s6063_s1 + $0x100] sm:$0xff]   ;;  %2071 = vmatpush1.bf16.msra.mxu1 %v4767_v1  ;;  %v4770_v4 = vld [vmem:[%s6063_s1 + $0x108] sm:$0xff]   ;;  %v4772_v6 = vld [vmem:[%s6063_s1 + $0x110] sm:$0xff]  }
   0x3   :  { %2649 = vmatpush1.bf16.msra.mxu0 %v4768_v2  ;;  %2072 = vmatprep.subr.bf16.mxu1 %v4832_v0  ;;  %v4773_v7 = vld [vmem:[%s6063_s1 + $0x18] sm:$0xff]   ;;  %v4775_v9 = vld [vmem:[%s6063_s1 + $0x20] sm:$0xff]   ;;  %v4777_v11 = vld [vmem:[%s6063_s1 + $0x28] sm:$0xff]  }
   0x4   :  { %2650 = vmatprep.subr.bf16.mxu0 %v4832_v0  ;;  %v4774_v8 = vld [vmem:[%s6063_s1 + $0x118] sm:$0xff]   ;;  %v4776_v10 = vld [vmem:[%s6063_s1 + $0x120] sm:$0xff]   ;;  %v4778_v12 = vld [vmem:[%s6063_s1 + $0x128] sm:$0xff]  }
   0x5   :  { %v4779_v13 = vld [vmem:[%s6063_s1 + $0x30] sm:$0xff]   ;;  %v4781_v15 = vld [vmem:[%s6063_s1 + $0x38] sm:$0xff]   ;;  %v4783_v17 = vld [vmem:[%s6063_s1 + $0x40] sm:$0xff]  }
   0x6   :  { %2073 = vmatpush1.bf16.msra.mxu1 %v4769_v3  ;;  %v4780_v14 = vld [vmem:[%s6063_s1 + $0x130] sm:$0xff]   ;;  %v4782_v16 = vld [vmem:[%s6063_s1 + $0x138] sm:$0xff]   ;;  %v4784_v18 = vld [vmem:[%s6063_s1 + $0x140] sm:$0xff]  }
   0x7   :  { %2651 = vmatpush1.bf16.msra.mxu0 %v4770_v4  ;;  %2074 = vmatprep.subr.bf16.mxu1 %v4832_v0  ;;  %v4928_v19 = vld [vmem:[%s6064_s0] sm:$0xff]  ;;  %v4938_v21 = vld [vmem:[%s6064_s0 + $0x10] sm:$0xff]  ;;  %v4785_v24 = vld [vmem:[%s6063_s1 + $0x48] sm:$0xff]  }
   0x8   :  { %2652 = vmatprep.subr.bf16.mxu0 %v4832_v0  ;;  %v4933_v20 = vld [vmem:[%s6064_s0 + $0x20] sm:$0xff]  ;;  %v4945_v23 = vld [vmem:[%s6064_s0 + $0x30] sm:$0xff]  ;;  %v4786_v26 = vld [vmem:[%s6063_s1 + $0x148] sm:$0xff]  }
   0x9   :  { %v3744_v22 = vcombine.high %v4928_v19, %v4933_v20  ;;  %v3748_v25 = vcombine.high %v4938_v21, %v4945_v23  ;;  %v4787_v27 = vld [vmem:[%s6063_s1 + $0x50] sm:$0xff]   ;;  %v4789_v29 = vld [vmem:[%s6063_s1 + $0x58] sm:$0xff]   ;;  %v4791_v31 = vld [vmem:[%s6063_s1 + $0x60] sm:$0xff]   ;;  %v3743_v42 = vcombine.low %v4928_v19, %v4933_v20  ;;  %v3747_v44 = vcombine.low %v4938_v21, %v4945_v23 }
   0xa   :  { %2075 = vmatpush1.bf16.msra.mxu1 %v4771_v5  ;;  %v4788_v28 = vld [vmem:[%s6063_s1 + $0x150] sm:$0xff]   ;;  %v4790_v30 = vld [vmem:[%s6063_s1 + $0x158] sm:$0xff]   ;;  %v4792_v32 = vld [vmem:[%s6063_s1 + $0x160] sm:$0xff]  }
   0xb   :  { %2653 = vmatpush1.bf16.msra.mxu0 %v4772_v6  ;;  %2076 = vmatprep.subr.bf16.mxu1 %v4832_v0  ;;  %v4793_v33 = vld [vmem:[%s6063_s1 + $0x68] sm:$0xff]   ;;  %v4795_v35 = vld [vmem:[%s6063_s1 + $0x70] sm:$0xff]   ;;  %v4797_v37 = vld [vmem:[%s6063_s1 + $0x78] sm:$0xff]  }
   0xc   :  { %2654 = vmatprep.subr.bf16.mxu0 %v4832_v0  ;;  %2102 = vmatprep.mubr.bf16.mxu1 %v3744_v22  ;;  %v4794_v34 = vld [vmem:[%s6063_s1 + $0x168] sm:$0xff]   ;;  %v4796_v36 = vld [vmem:[%s6063_s1 + $0x170] sm:$0xff]   ;;  %v4798_v38 = vld [vmem:[%s6063_s1 + $0x178] sm:$0xff]  }
   0xd   :  { %2680 = vmatprep.mubr.bf16.mxu0 %v3748_v25  ;;  %v23_v39 = vld [vmem:[%s6064_s0 + $0x40] sm:$0xff]  ;;  %v25_v41 = vld [vmem:[%s6064_s0 + $0x50] sm:$0xff]  ;;  %v4801_v51 = vld [vmem:[%s6063_s1 + $0x88] sm:$0xff]  }
   0xe   :  { %2077 = vmatpush1.bf16.msra.mxu1 %v4773_v7  ;;  %v27_v40 = vld [vmem:[%s6064_s0 + $0x60] sm:$0xff]  ;;  %v29_v43 = vld [vmem:[%s6064_s0 + $0x70] sm:$0xff]  ;;  %v4802_v52 = vld [vmem:[%s6063_s1 + $0x188] sm:$0xff]  }
   0xf   :  { %2655 = vmatpush1.bf16.msra.mxu0 %v4774_v8  ;;  %2078 = vmatprep.subr.bf16.mxu1 %v4832_v0  ;;  %v4799_v45 = vld [vmem:[%s6063_s1 + $0x80] sm:$0xff]   ;;  %v3752_v47 = vcombine.high %v23_v39, %v27_v40  ;;  %v3756_v48 = vcombine.high %v25_v41, %v29_v43  ;;  %v33_v53 = vld [vmem:[%s6064_s0 + $0x90] sm:$0xff]  ;;  %v3751_v55 = vcombine.low %v23_v39, %v27_v40  ;;  %v4805_v2 = vld [vmem:[%s6063_s1 + $0x98] sm:$0xff]  }
  0x10   :  { %2656 = vmatprep.subr.bf16.mxu0 %v4832_v0  ;;  %v4800_v46 = vld [vmem:[%s6063_s1 + $0x180] sm:$0xff]   ;;  %v37_v54 = vld [vmem:[%s6064_s0 + $0xb0] sm:$0xff]  ;;  %v3755_v56 = vcombine.low %v25_v41, %v29_v43  ;;  %v4806_v3 = vld [vmem:[%s6063_s1 + $0x198] sm:$0xff]  }
  0x11   :  { %v31_v49 = vld [vmem:[%s6064_s0 + $0x80] sm:$0xff]  ;;  %v3764_v58 = vcombine.high %v33_v53, %v37_v54  ;;  %v4803_v59 = vld [vmem:[%s6063_s1 + $0x90] sm:$0xff]   ;;  %v3763_v6 = vcombine.low %v33_v53, %v37_v54  ;;  %v4818_v39 = vld [vmem:[%s6063_s1 + $0x1c8] sm:$0xff]  }
  0x12   :  { %2079 = vmatpush1.bf16.msra.mxu1 %v4775_v9  ;;  %v35_v50 = vld [vmem:[%s6064_s0 + $0xa0] sm:$0xff]  ;;  %v4804_v60 = vld [vmem:[%s6063_s1 + $0x190] sm:$0xff]   ;;  %v4821_v54 = vld [vmem:[%s6063_s1 + $0xd8] sm:$0xff]  }
  0x13   :  { %2657 = vmatpush1.bf16.msra.mxu0 %v4776_v10  ;;  %2080 = vmatprep.subr.bf16.mxu1 %v4832_v0  ;;  %v3760_v57 = vcombine.high %v31_v49, %v35_v50  ;;  %v39_v61 = vld [vmem:[%s6064_s0 + $0xc0] sm:$0xff]  ;;  %v41_v63 = vld [vmem:[%s6064_s0 + $0xd0] sm:$0xff]  ;;  %v3759_v4 = vcombine.low %v31_v49, %v35_v50 }
  0x14   :  { %2658 = vmatprep.subr.bf16.mxu0 %v4832_v0  ;;  %v43_v62 = vld [vmem:[%s6064_s0 + $0xe0] sm:$0xff]  ;;  %v45_v1 = vld [vmem:[%s6064_s0 + $0xf0] sm:$0xff] }
  0x15   :  { %v4807_v5 = vld [vmem:[%s6063_s1 + $0xa0] sm:$0xff]   ;;  %v3768_v7 = vcombine.high %v39_v61, %v43_v62  ;;  %v3772_v9 = vcombine.high %v41_v63, %v45_v1  ;;  %v4811_v20 = vld [vmem:[%s6063_s1 + $0xb0] sm:$0xff]  }
  0x16   :  { %2081 = vmatpush1.bf16.msra.mxu1 %v4777_v11  ;;  %v4808_v8 = vld [vmem:[%s6063_s1 + $0x1a0] sm:$0xff]   ;;  %v4812_v21 = vld [vmem:[%s6063_s1 + $0x1b0] sm:$0xff]  }
  0x17   :  { %2659 = vmatpush1.bf16.msra.mxu0 %v4778_v12  ;;  %2082 = vmatprep.subr.bf16.mxu1 %v4832_v0  ;;  %v47_v10 = vld [vmem:[%s6064_s0 + $0x100] sm:$0xff]  ;;  %v49_v12 = vld [vmem:[%s6064_s0 + $0x110] sm:$0xff] }
  0x18   :  { %2660 = vmatprep.subr.bf16.mxu0 %v4832_v0  ;;  %v51_v11 = vld [vmem:[%s6064_s0 + $0x120] sm:$0xff]  ;;  %v57_v25 = vld [vmem:[%s6064_s0 + $0x150] sm:$0xff] }
  0x19   :  { %v55_v22 = vld [vmem:[%s6064_s0 + $0x140] sm:$0xff]  ;;  %v77_v49 = vld [vmem:[%s6064_s0 + $0x1f0] sm:$0xff] }
  0x1a   :  { %2083 = vmatpush1.bf16.msra.mxu1 %v4779_v13  ;;  %v53_v13 = vld [vmem:[%s6064_s0 + $0x130] sm:$0xff]  ;;  %v59_v23 = vld [vmem:[%s6064_s0 + $0x160] sm:$0xff] }
  0x1b   :  { %2661 = vmatpush1.bf16.msra.mxu0 %v4780_v14  ;;  %2084 = vmatprep.subr.bf16.mxu1 %v4832_v0  ;;  %v4809_v14 = vld [vmem:[%s6063_s1 + $0xa8] sm:$0xff]   ;;  %v3780_v19 = vcombine.high %v49_v12, %v53_v13  ;;  %v3783_v40 = vcombine.low %v55_v22, %v59_v23 }
  0x1c   :  { %2662 = vmatprep.subr.bf16.mxu0 %v4832_v0 }
  0x1e   :  { %2085 = vmatpush1.bf16.msra.mxu1 %v4781_v15  ;;  %v4810_v15 = vld [vmem:[%s6063_s1 + $0x1a8] sm:$0xff]  }
  0x1f   :  { %2663 = vmatpush1.bf16.msra.mxu0 %v4782_v16  ;;  %2086 = vmatprep.subr.bf16.mxu1 %v4832_v0  ;;  %v3767_v16 = vcombine.low %v39_v61, %v43_v62 }
  0x20   :  { %2664 = vmatprep.subr.bf16.mxu0 %v4832_v0 }
  0x22   :  { %2087 = vmatpush1.bf16.msra.mxu1 %v4783_v17  ;;  %v3771_v17 = vcombine.low %v41_v63, %v45_v1  ;;  %v87_v1 = vld [vmem:[%s6064_s0 + $0x240] sm:$0xff] }
  0x23   :  { %2665 = vmatpush1.bf16.msra.mxu0 %v4784_v18  ;;  %2088 = vmatprep.subr.bf16.mxu1 %v4832_v0  ;;  %v3776_v18 = vcombine.high %v47_v10, %v51_v11 }
  0x24   :  { %2666 = vmatprep.subr.bf16.mxu0 %v4832_v0 }
  0x26   :  { %2089 = vmatpush1.bf16.msra.mxu1 %v4785_v24  ;;  %v4813_v24 = vld [vmem:[%s6063_s1 + $0xb8] sm:$0xff]  }
  0x27   :  { %2667 = vmatpush1.bf16.msra.mxu0 %v4786_v26  ;;  %2090 = vmatprep.subr.bf16.mxu1 %v4832_v0  ;;  %v61_v26 = vld [vmem:[%s6064_s0 + $0x170] sm:$0xff] }
  0x28   :  { %2668 = vmatprep.subr.bf16.mxu0 %v4832_v0  ;;  %v3787_v41 = vcombine.low %v57_v25, %v61_v26 }
  0x2a   :  { %2091 = vmatpush1.bf16.msra.mxu1 %v4787_v27  ;;  %v4814_v27 = vld [vmem:[%s6063_s1 + $0x1b8] sm:$0xff]  }
  0x2b   :  { %2669 = vmatpush1.bf16.msra.mxu0 %v4788_v28  ;;  %2092 = vmatprep.subr.bf16.mxu1 %v4832_v0  ;;  %v3775_v28 = vcombine.low %v47_v10, %v51_v11  ;;  %v4824_v10 = vld [vmem:[%s6063_s1 + $0x1e0] sm:$0xff]  }
  0x2c   :  { %2670 = vmatprep.subr.bf16.mxu0 %v4832_v0  ;;  %v95_v11 = vld [vmem:[%s6064_s0 + $0x280] sm:$0xff] }
  0x2e   :  { %2093 = vmatpush1.bf16.msra.mxu1 %v4789_v29  ;;  %v3779_v29 = vcombine.low %v49_v12, %v53_v13  ;;  %v99_v12 = vld [vmem:[%s6064_s0 + $0x2a0] sm:$0xff]  ;;  %v97_v13 = vld [vmem:[%s6064_s0 + $0x290] sm:$0xff] }
  0x2f   :  { %2671 = vmatpush1.bf16.msra.mxu0 %v4790_v30  ;;  %2094 = vmatprep.subr.bf16.mxu1 %v4832_v0  ;;  %v3784_v30 = vcombine.high %v55_v22, %v59_v23  ;;  %v109_v22 = vld [vmem:[%s6064_s0 + $0x2f0] sm:$0xff]  ;;  %v3823_v23 = vcombine.low %v95_v11, %v99_v12 }
  0x30   :  { %2672 = vmatprep.subr.bf16.mxu0 %v4832_v0 }
  0x32   :  { %2095 = vmatpush1.bf16.msra.mxu1 %v4791_v31  ;;  %v3788_v31 = vcombine.high %v57_v25, %v61_v26 }
  0x33   :  { %2673 = vmatpush1.bf16.msra.mxu0 %v4792_v32  ;;  %2096 = vmatprep.subr.bf16.mxu1 %v4832_v0  ;;  %v4815_v32 = vld [vmem:[%s6063_s1 + $0xc0] sm:$0xff]  }
  0x34   :  { %2674 = vmatprep.subr.bf16.mxu0 %v4832_v0 }
  0x36   :  { %2097 = vmatpush1.bf16.msra.mxu1 %v4793_v33  ;;  %v4816_v33 = vld [vmem:[%s6063_s1 + $0x1c0] sm:$0xff]  }
  0x37   :  { %2675 = vmatpush1.bf16.msra.mxu0 %v4794_v34  ;;  %2098 = vmatprep.subr.bf16.mxu1 %v4832_v0  ;;  %v63_v34 = vld [vmem:[%s6064_s0 + $0x180] sm:$0xff] }
  0x38   :  { %2676 = vmatprep.subr.bf16.mxu0 %v4832_v0 }
  0x3a   :  { %2099 = vmatpush1.bf16.msra.mxu1 %v4795_v35  ;;  %v67_v35 = vld [vmem:[%s6064_s0 + $0x1a0] sm:$0xff] }
  0x3b   :  { %2677 = vmatpush1.bf16.msra.mxu0 %v4796_v36  ;;  %2100 = vmatprep.subr.bf16.mxu1 %v4832_v0  ;;  %v4817_v36 = vld [vmem:[%s6063_s1 + $0xc8] sm:$0xff]   ;;  %v3791_v50 = vcombine.low %v63_v34, %v67_v35 }
  0x3c   :  { %2678 = vmatprep.subr.bf16.mxu0 %v4832_v0 }
  0x3e   :  { %2101 = vmatpush1.bf16.msra.mxu1 %v4797_v37  ;;  %v65_v37 = vld [vmem:[%s6064_s0 + $0x190] sm:$0xff] }
  0x3f   :  { %2679 = vmatpush1.bf16.msra.mxu0 %v4798_v38  ;;  %2359 = vmatprep.subr.bf16.mxu1 %v4832_v0  ;;  %v69_v38 = vld [vmem:[%s6064_s0 + $0x1b0] sm:$0xff] }
  0x40   :  { %2937 = vmatprep.subr.bf16.mxu0 %v4832_v0  ;;  %v3796_v43 = vcombine.high %v65_v37, %v69_v38 }
  0x41   :  { %2103 = vmatmul.mubr.bf16.vlgmr.msra.gmra.mrb[0].mxu1 %v3743_v42  ;;  %v3792_v42 = vcombine.high %v63_v34, %v67_v35 }
  0x42   :  { %2681 = vmatmul.mubr.bf16.vlgmr.msra.gmra.mrb[0].mxu0 %v3747_v44  ;;  %2360 = vmatpush1.bf16.msra.mxu1 %v4799_v45  ;;  %v4819_v44 = vld [vmem:[%s6063_s1 + $0xd0] sm:$0xff]  }
  0x43   :  { %2938 = vmatpush1.bf16.msra.mxu0 %v4800_v46  ;;  %2110 = vmatprep.mubr.bf16.mxu1 %v3752_v47  ;;  %v4820_v45 = vld [vmem:[%s6063_s1 + $0x1d0] sm:$0xff]   ;;  %v71_v46 = vld [vmem:[%s6064_s0 + $0x1c0] sm:$0xff] }
  0x44   :  { %2688 = vmatprep.mubr.bf16.mxu0 %v3756_v48  ;;  %2361 = vmatprep.subr.bf16.mxu1 %v4832_v0  ;;  %v75_v47 = vld [vmem:[%s6064_s0 + $0x1e0] sm:$0xff]  ;;  %v73_v48 = vld [vmem:[%s6064_s0 + $0x1d0] sm:$0xff] }
  0x45   :  { %2939 = vmatprep.subr.bf16.mxu0 %v4832_v0  ;;  %v3804_v53 = vcombine.high %v73_v48, %v77_v49  ;;  %v3803_v61 = vcombine.low %v73_v48, %v77_v49  ;;  %v131_v48 = vld [vmem:[%s6064_s0 + $0x3a0] sm:$0xff]  ;;  %v129_v49 = vld [vmem:[%s6064_s0 + $0x390] sm:$0xff] }
  0x46   :  { %2362 = vmatpush1.bf16.msra.mxu1 %v4801_v51  ;;  %v3795_v51 = vcombine.low %v65_v37, %v69_v38  ;;  %v119_v37 = vld [vmem:[%s6064_s0 + $0x340] sm:$0xff] }
  0x47   :  { %2940 = vmatpush1.bf16.msra.mxu0 %v4802_v52  ;;  %2363 = vmatprep.subr.bf16.mxu1 %v4832_v0  ;;  %v3800_v52 = vcombine.high %v71_v46, %v75_v47  ;;  %v123_v38 = vld [vmem:[%s6064_s0 + $0x360] sm:$0xff] }
  0x48   :  { %2941 = vmatprep.subr.bf16.mxu0 %v4832_v0 }
  0x49   :  { %2111 = vmatmul.mubr.bf16.gmra.mrb[4].mxu1 %v3751_v55  ;;  %v4822_v55 = vld [vmem:[%s6063_s1 + $0x1d8] sm:$0xff]  }
  0x4a   :  { %2689 = vmatmul.mubr.bf16.gmra.mrb[4].mxu0 %v3755_v56  ;;  %2118 = vmatprep.mubr.bf16.mxu1 %v3760_v57  ;;  %v79_v56 = vld [vmem:[%s6064_s0 + $0x200] sm:$0xff] }
  0x4b   :  { %2696 = vmatprep.mubr.bf16.mxu0 %v3764_v58  ;;  %2364 = vmatpush1.bf16.msra.mxu1 %v4803_v59  ;;  %v83_v57 = vld [vmem:[%s6064_s0 + $0x220] sm:$0xff]  ;;  %v81_v58 = vld [vmem:[%s6064_s0 + $0x210] sm:$0xff] }
  0x4c   :  { %2942 = vmatpush1.bf16.msra.mxu0 %v4804_v60  ;;  %2365 = vmatprep.subr.bf16.mxu1 %v4832_v0  ;;  %v85_v59 = vld [vmem:[%s6064_s0 + $0x230] sm:$0xff]  ;;  %v3799_v60 = vcombine.low %v71_v46, %v75_v47  ;;  %v3808_v62 = vcombine.high %v79_v56, %v83_v57  ;;  %v127_v47 = vld [vmem:[%s6064_s0 + $0x380] sm:$0xff] }
  0x4d   :  { %2943 = vmatprep.subr.bf16.mxu0 %v4832_v0  ;;  %v3812_v63 = vcombine.high %v81_v58, %v85_v59  ;;  %v4828_v46 = vld [vmem:[%s6063_s1 + $0x1f0] sm:$0xff]  }
  0x4f   :  { %2366 = vmatpush1.bf16.msra.mxu1 %v4805_v2  ;;  %v91_v2 = vld [vmem:[%s6064_s0 + $0x260] sm:$0xff] }
  0x50   :  { %2944 = vmatpush1.bf16.msra.mxu0 %v4806_v3  ;;  %2367 = vmatprep.subr.bf16.mxu1 %v4832_v0  ;;  %v89_v3 = vld [vmem:[%s6064_s0 + $0x250] sm:$0xff] }
  0x51   :  { %2119 = vmatmul.mubr.bf16.gmra.mrb[8].mxu1 %v3759_v4  ;;  %2945 = vmatprep.subr.bf16.mxu0 %v4832_v0  ;;  %v93_v4 = vld [vmem:[%s6064_s0 + $0x270] sm:$0xff] }
  0x52   :  { %2697 = vmatmul.mubr.bf16.gmra.mrb[8].mxu0 %v3763_v6  ;;  %2126 = vmatprep.mubr.bf16.mxu1 %v3768_v7  ;;  %v3811_v6 = vcombine.low %v81_v58, %v85_v59  ;;  %v3816_v7 = vcombine.high %v87_v1, %v91_v2  ;;  %v3855_v58 = vcombine.low %v127_v47, %v131_v48 }
  0x53   :  { %2704 = vmatprep.mubr.bf16.mxu0 %v3772_v9  ;;  %2368 = vmatpush1.bf16.msra.mxu1 %v4807_v5  ;;  %v3807_v5 = vcombine.low %v79_v56, %v83_v57  ;;  %v4823_v9 = vld [vmem:[%s6063_s1 + $0xe0] sm:$0xff]   ;;  %v137_v57 = vld [vmem:[%s6064_s0 + $0x3d0] sm:$0xff] }
  0x54   :  { %2946 = vmatpush1.bf16.msra.mxu0 %v4808_v8  ;;  %2369 = vmatprep.subr.bf16.mxu1 %v4832_v0  ;;  %v3820_v8 = vcombine.high %v89_v3, %v93_v4  ;;  %v139_v56 = vld [vmem:[%s6064_s0 + $0x3e0] sm:$0xff] }
  0x55   :  { %2947 = vmatprep.subr.bf16.mxu0 %v4832_v0 }
  0x57   :  { %2370 = vmatpush1.bf16.msra.mxu1 %v4809_v14  ;;  %v101_v14 = vld [vmem:[%s6064_s0 + $0x2b0] sm:$0xff] }
  0x58   :  { %2948 = vmatpush1.bf16.msra.mxu0 %v4810_v15  ;;  %2371 = vmatprep.subr.bf16.mxu1 %v4832_v0  ;;  %v3815_v15 = vcombine.low %v87_v1, %v91_v2  ;;  %v143_v1 = vld [vmem:[%s6064_s0 + $0x400] sm:$0xff] }
  0x59   :  { %2127 = vmatmul.mubr.bf16.gmra.mrb[12].mxu1 %v3767_v16  ;;  %2949 = vmatprep.subr.bf16.mxu0 %v4832_v0  ;;  %v3819_v16 = vcombine.low %v89_v3, %v93_v4  ;;  %v147_v2 = vld [vmem:[%s6064_s0 + $0x420] sm:$0xff]  ;;  %v145_v3 = vld [vmem:[%s6064_s0 + $0x410] sm:$0xff] }
  0x5a   :  { %2705 = vmatmul.mubr.bf16.gmra.mrb[12].mxu0 %v3771_v17  ;;  %2134 = vmatprep.mubr.bf16.mxu1 %v3776_v18  ;;  %v3824_v17 = vcombine.high %v95_v11, %v99_v12  ;;  %v3828_v18 = vcombine.high %v97_v13, %v101_v14  ;;  %v149_v4 = vld [vmem:[%s6064_s0 + $0x430] sm:$0xff] }
  0x5b   :  { %2712 = vmatprep.mubr.bf16.mxu0 %v3780_v19  ;;  %2372 = vmatpush1.bf16.msra.mxu1 %v4811_v20  ;;  %v103_v19 = vld [vmem:[%s6064_s0 + $0x2c0] sm:$0xff]  ;;  %v153_v11 = vld [vmem:[%s6064_s0 + $0x450] sm:$0xff] }
  0x5c   :  { %2950 = vmatpush1.bf16.msra.mxu0 %v4812_v21  ;;  %2373 = vmatprep.subr.bf16.mxu1 %v4832_v0  ;;  %v107_v20 = vld [vmem:[%s6064_s0 + $0x2e0] sm:$0xff]  ;;  %v105_v21 = vld [vmem:[%s6064_s0 + $0x2d0] sm:$0xff] }
  0x5d   :  { %2951 = vmatprep.subr.bf16.mxu0 %v4832_v0  ;;  %v3832_v25 = vcombine.high %v103_v19, %v107_v20  ;;  %v3836_v26 = vcombine.high %v105_v21, %v109_v22  ;;  %v3835_v34 = vcombine.low %v105_v21, %v109_v22  ;;  %v157_v12 = vld [vmem:[%s6064_s0 + $0x470] sm:$0xff] }
  0x5e   :  { %v3883_v22 = vcombine.low %v153_v11, %v157_v12 }
  0x5f   :  { %2374 = vmatpush1.bf16.msra.mxu1 %v4813_v24  ;;  %v3827_v24 = vcombine.low %v97_v13, %v101_v14  ;;  %v3871_v13 = vcombine.low %v143_v1, %v147_v2  ;;  %v3875_v14 = vcombine.low %v145_v3, %v149_v4 }
  0x60   :  { %2952 = vmatpush1.bf16.msra.mxu0 %v4814_v27  ;;  %2375 = vmatprep.subr.bf16.mxu1 %v4832_v0  ;;  %v4825_v27 = vld [vmem:[%s6063_s1 + $0xe8] sm:$0xff]  }
  0x61   :  { %2135 = vmatmul.mubr.bf16.gmra.mrb[16].mxu1 %v3775_v28  ;;  %2953 = vmatprep.subr.bf16.mxu0 %v4832_v0  ;;  %v4826_v28 = vld [vmem:[%s6063_s1 + $0x1e8] sm:$0xff]  }
  0x62   :  { %2713 = vmatmul.mubr.bf16.gmra.mrb[16].mxu0 %v3779_v29  ;;  %2142 = vmatprep.mubr.bf16.mxu1 %v3784_v30  ;;  %v111_v29 = vld [vmem:[%s6064_s0 + $0x300] sm:$0xff] }
  0x63   :  { %2720 = vmatprep.mubr.bf16.mxu0 %v3788_v31  ;;  %2376 = vmatpush1.bf16.msra.mxu1 %v4815_v32  ;;  %v115_v30 = vld [vmem:[%s6064_s0 + $0x320] sm:$0xff]  ;;  %v113_v31 = vld [vmem:[%s6064_s0 + $0x310] sm:$0xff] }
  0x64   :  { %2954 = vmatpush1.bf16.msra.mxu0 %v4816_v33  ;;  %2377 = vmatprep.subr.bf16.mxu1 %v4832_v0  ;;  %v117_v32 = vld [vmem:[%s6064_s0 + $0x330] sm:$0xff]  ;;  %v3831_v33 = vcombine.low %v103_v19, %v107_v20  ;;  %v3840_v35 = vcombine.high %v111_v29, %v115_v30 }
  0x65   :  { %2955 = vmatprep.subr.bf16.mxu0 %v4832_v0  ;;  %v161_v19 = vld [vmem:[%s6064_s0 + $0x490] sm:$0xff] }
  0x66   :  { %v165_v20 = vld [vmem:[%s6064_s0 + $0x4b0] sm:$0xff] }
  0x67   :  { %2378 = vmatpush1.bf16.msra.mxu1 %v4817_v36  ;;  %v3844_v36 = vcombine.high %v113_v31, %v117_v32 }
  0x68   :  { %2956 = vmatpush1.bf16.msra.mxu0 %v4818_v39  ;;  %2379 = vmatprep.subr.bf16.mxu1 %v4832_v0  ;;  %v121_v39 = vld [vmem:[%s6064_s0 + $0x350] sm:$0xff] }
  0x69   :  { %2143 = vmatmul.mubr.bf16.gmra.mrb[20].mxu1 %v3783_v40  ;;  %2957 = vmatprep.subr.bf16.mxu0 %v4832_v0  ;;  %v125_v40 = vld [vmem:[%s6064_s0 + $0x370] sm:$0xff] }
  0x6a   :  { %2721 = vmatmul.mubr.bf16.gmra.mrb[20].mxu0 %v3787_v41  ;;  %2150 = vmatprep.mubr.bf16.mxu1 %v3792_v42  ;;  %v3839_v41 = vcombine.low %v111_v29, %v115_v30  ;;  %v3843_v42 = vcombine.low %v113_v31, %v117_v32  ;;  %v3891_v30 = vcombine.low %v161_v19, %v165_v20 }
  0x6b   :  { %2728 = vmatprep.mubr.bf16.mxu0 %v3796_v43  ;;  %2380 = vmatpush1.bf16.msra.mxu1 %v4819_v44  ;;  %v3848_v43 = vcombine.high %v119_v37, %v123_v38  ;;  %v3852_v44 = vcombine.high %v121_v39, %v125_v40 }
  0x6c   :  { %2958 = vmatpush1.bf16.msra.mxu0 %v4820_v45  ;;  %2381 = vmatprep.subr.bf16.mxu1 %v4832_v0  ;;  %v4827_v45 = vld [vmem:[%s6063_s1 + $0xf0] sm:$0xff]  }
  0x6d   :  { %2959 = vmatprep.subr.bf16.mxu0 %v4832_v0 }
  0x6f   :  { %2382 = vmatpush1.bf16.msra.mxu1 %v4821_v54 }
  0x70   :  { %2960 = vmatpush1.bf16.msra.mxu0 %v4822_v55  ;;  %2383 = vmatprep.subr.bf16.mxu1 %v4832_v0  ;;  %v135_v55 = vld [vmem:[%s6064_s0 + $0x3c0] sm:$0xff] }
  0x71   :  { %2151 = vmatmul.mubr.bf16.gmra.mrb[24].mxu1 %v3791_v50  ;;  %2961 = vmatprep.subr.bf16.mxu0 %v4832_v0  ;;  %v133_v50 = vld [vmem:[%s6064_s0 + $0x3b0] sm:$0xff] }
  0x72   :  { %2729 = vmatmul.mubr.bf16.gmra.mrb[24].mxu0 %v3795_v51  ;;  %2158 = vmatprep.mubr.bf16.mxu1 %v3800_v52  ;;  %v3847_v51 = vcombine.low %v119_v37, %v123_v38  ;;  %v3851_v52 = vcombine.low %v121_v39, %v125_v40  ;;  %v3860_v54 = vcombine.high %v129_v49, %v133_v50 }
  0x73   :  { %2736 = vmatprep.mubr.bf16.mxu0 %v3804_v53  ;;  %2384 = vmatpush1.bf16.msra.mxu1 %v4823_v9  ;;  %v3856_v53 = vcombine.high %v127_v47, %v131_v48  ;;  %v3859_v59 = vcombine.low %v129_v49, %v133_v50  ;;  %v151_v9 = vld [vmem:[%s6064_s0 + $0x440] sm:$0xff] }
  0x74   :  { %2962 = vmatpush1.bf16.msra.mxu0 %v4824_v10  ;;  %2385 = vmatprep.subr.bf16.mxu1 %v4832_v0  ;;  %v155_v10 = vld [vmem:[%s6064_s0 + $0x460] sm:$0xff] }
  0x75   :  { %2963 = vmatprep.subr.bf16.mxu0 %v4832_v0  ;;  %v3879_v21 = vcombine.low %v151_v9, %v155_v10  ;;  %v191_v49 = vld [vmem:[%s6064_s0 + $0x580] sm:$0xff] }
  0x76   :  { %v195_v50 = vld [vmem:[%s6064_s0 + $0x5a0] sm:$0xff] }
  0x77   :  { %2386 = vmatpush1.bf16.msra.mxu1 %v4825_v27  ;;  %v169_v27 = vld [vmem:[%s6064_s0 + $0x4d0] sm:$0xff] }
  0x78   :  { %2964 = vmatpush1.bf16.msra.mxu0 %v4826_v28  ;;  %2387 = vmatprep.subr.bf16.mxu1 %v4832_v0  ;;  %v173_v28 = vld [vmem:[%s6064_s0 + $0x4f0] sm:$0xff] }
  0x79   :  { %2159 = vmatmul.mubr.bf16.gmra.mrb[28].mxu1 %v3799_v60  ;;  %2965 = vmatprep.subr.bf16.mxu0 %v4832_v0  ;;  %v3864_v60 = vcombine.high %v135_v55, %v139_v56  ;;  %v3900_v32 = vcombine.high %v169_v27, %v173_v28  ;;  %v3899_v38 = vcombine.low %v169_v27, %v173_v28  ;;  %v233_v27 = vld [vmem:[%s6064_s0 + $0x6d0] sm:$0xff] }
  0x7a   :  { %2737 = vmatmul.mubr.bf16.gmra.mrb[28].mxu0 %v3803_v61  ;;  %2166 = vmatprep.mubr.bf16.mxu1 %v3808_v62  ;;  %v4829_v62 = vld [vmem:[%s6063_s1 + $0xf8] sm:$0xff]   ;;  %v237_v28 = vld [vmem:[%s6064_s0 + $0x6f0] sm:$0xff] }
  0x7b   :  { %2744 = vmatprep.mubr.bf16.mxu0 %v3812_v63  ;;  %2388 = vmatpush1.bf16.msra.mxu1 %v4827_v45  ;;  %v4830_v63 = vld [vmem:[%s6063_s1 + $0x1f8] sm:$0xff]  }
  0x7c   :  { %2966 = vmatpush1.bf16.msra.mxu0 %v4828_v46  ;;  %2389 = vmatprep.subr.bf16.mxu1 %v4832_v0 }
  0x7d   :  { %2967 = vmatprep.subr.bf16.mxu0 %v4832_v0  ;;  %v141_v0 = vld [vmem:[%s6064_s0 + $0x3f0] sm:$0xff] }
  0x7e   :  { %v3868_v61 = vcombine.high %v137_v57, %v141_v0 }
  0x7f   :  { %2390 = vmatpush1.bf16.msra.mxu1 %v4829_v62 }
  0x80   :  { %2968 = vmatpush1.bf16.msra.mxu0 %v4830_v63 }
  0x81   :  { %2167 = vmatmul.mubr.bf16.gmra.mrb[32].mxu1 %v3807_v5  ;;  %v3863_v5 = vcombine.low %v135_v55, %v139_v56  ;;  %v3920_v55 = vcombine.high %v191_v49, %v195_v50 }
  0x82   :  { %2745 = vmatmul.mubr.bf16.gmra.mrb[32].mxu0 %v3811_v6  ;;  %2174 = vmatprep.mubr.bf16.mxu1 %v3816_v7  ;;  %v3867_v6 = vcombine.low %v137_v57, %v141_v0  ;;  %v3872_v7 = vcombine.high %v143_v1, %v147_v2  ;;  %v199_v57 = vld [vmem:[%s6064_s0 + $0x5c0] sm:$0xff] }
  0x83   :  { %2752 = vmatprep.mubr.bf16.mxu0 %v3820_v8  ;;  %v3876_v8 = vcombine.high %v145_v3, %v149_v4  ;;  %v203_v0 = vld [vmem:[%s6064_s0 + $0x5e0] sm:$0xff]  ;;  %v209_v3 = vld [vmem:[%s6064_s0 + $0x610] sm:$0xff] }
  0x84   :  { %v3928_v62 = vcombine.high %v199_v57, %v203_v0  ;;  %v207_v1 = vld [vmem:[%s6064_s0 + $0x600] sm:$0xff]  ;;  %v213_v4 = vld [vmem:[%s6064_s0 + $0x630] sm:$0xff] }
  0x85   :  { %v211_v2 = vld [vmem:[%s6064_s0 + $0x620] sm:$0xff] }
  0x89   :  { %2175 = vmatmul.mubr.bf16.gmra.mrb[36].mxu1 %v3815_v15  ;;  %v3880_v15 = vcombine.high %v151_v9, %v155_v10  ;;  %v215_v9 = vld [vmem:[%s6064_s0 + $0x640] sm:$0xff] }
  0x8a   :  { %2753 = vmatmul.mubr.bf16.gmra.mrb[36].mxu0 %v3819_v16  ;;  %2182 = vmatprep.mubr.bf16.mxu1 %v3824_v17  ;;  %v3884_v16 = vcombine.high %v153_v11, %v157_v12  ;;  %v159_v17 = vld [vmem:[%s6064_s0 + $0x480] sm:$0xff]  ;;  %v217_v11 = vld [vmem:[%s6064_s0 + $0x650] sm:$0xff] }
  0x8b   :  { %2760 = vmatprep.mubr.bf16.mxu0 %v3828_v18  ;;  %v163_v18 = vld [vmem:[%s6064_s0 + $0x4a0] sm:$0xff]  ;;  %v221_v12 = vld [vmem:[%s6064_s0 + $0x670] sm:$0xff] }
  0x8c   :  { %v3887_v29 = vcombine.low %v159_v17, %v163_v18  ;;  %v219_v10 = vld [vmem:[%s6064_s0 + $0x660] sm:$0xff] }
  0x91   :  { %2183 = vmatmul.mubr.bf16.gmra.mrb[40].mxu1 %v3823_v23  ;;  %v3888_v23 = vcombine.high %v159_v17, %v163_v18  ;;  %v223_v17 = vld [vmem:[%s6064_s0 + $0x680] sm:$0xff] }
  0x92   :  { %2761 = vmatmul.mubr.bf16.gmra.mrb[40].mxu0 %v3827_v24  ;;  %2190 = vmatprep.mubr.bf16.mxu1 %v3832_v25  ;;  %v3892_v24 = vcombine.high %v161_v19, %v165_v20  ;;  %v167_v25 = vld [vmem:[%s6064_s0 + $0x4c0] sm:$0xff]  ;;  %v225_v19 = vld [vmem:[%s6064_s0 + $0x690] sm:$0xff] }
  0x93   :  { %2768 = vmatprep.mubr.bf16.mxu0 %v3836_v26  ;;  %v171_v26 = vld [vmem:[%s6064_s0 + $0x4e0] sm:$0xff]  ;;  %v229_v20 = vld [vmem:[%s6064_s0 + $0x6b0] sm:$0xff] }
  0x94   :  { %v3896_v31 = vcombine.high %v167_v25, %v171_v26  ;;  %v3895_v37 = vcombine.low %v167_v25, %v171_v26  ;;  %v227_v18 = vld [vmem:[%s6064_s0 + $0x6a0] sm:$0xff] }
  0x95   :  { %v231_v25 = vld [vmem:[%s6064_s0 + $0x6c0] sm:$0xff] }
  0x96   :  { %v235_v26 = vld [vmem:[%s6064_s0 + $0x6e0] sm:$0xff] }
  0x99   :  { %2191 = vmatmul.mubr.bf16.gmra.mrb[44].mxu1 %v3831_v33  ;;  %v175_v33 = vld [vmem:[%s6064_s0 + $0x500] sm:$0xff] }
  0x9a   :  { %2769 = vmatmul.mubr.bf16.gmra.mrb[44].mxu0 %v3835_v34  ;;  %2198 = vmatprep.mubr.bf16.mxu1 %v3840_v35  ;;  %v179_v34 = vld [vmem:[%s6064_s0 + $0x520] sm:$0xff]  ;;  %v177_v35 = vld [vmem:[%s6064_s0 + $0x510] sm:$0xff] }
  0x9b   :  { %2776 = vmatprep.mubr.bf16.mxu0 %v3844_v36  ;;  %v181_v36 = vld [vmem:[%s6064_s0 + $0x530] sm:$0xff]  ;;  %v3904_v39 = vcombine.high %v175_v33, %v179_v34  ;;  %v3903_v45 = vcombine.low %v175_v33, %v179_v34  ;;  %v239_v33 = vld [vmem:[%s6064_s0 + $0x700] sm:$0xff] }
  0x9c   :  { %v3908_v40 = vcombine.high %v177_v35, %v181_v36  ;;  %v3907_v46 = vcombine.low %v177_v35, %v181_v36  ;;  %v243_v34 = vld [vmem:[%s6064_s0 + $0x720] sm:$0xff]  ;;  %v241_v35 = vld [vmem:[%s6064_s0 + $0x710] sm:$0xff] }
  0x9d   :  { %v245_v36 = vld [vmem:[%s6064_s0 + $0x730] sm:$0xff] }
  0xa1   :  { %2199 = vmatmul.mubr.bf16.gmra.mrb[48].mxu1 %v3839_v41  ;;  %v183_v41 = vld [vmem:[%s6064_s0 + $0x540] sm:$0xff] }
  0xa2   :  { %2777 = vmatmul.mubr.bf16.gmra.mrb[48].mxu0 %v3843_v42  ;;  %2206 = vmatprep.mubr.bf16.mxu1 %v3848_v43  ;;  %v187_v42 = vld [vmem:[%s6064_s0 + $0x560] sm:$0xff]  ;;  %v185_v43 = vld [vmem:[%s6064_s0 + $0x550] sm:$0xff] }
  0xa3   :  { %2784 = vmatprep.mubr.bf16.mxu0 %v3852_v44  ;;  %v189_v44 = vld [vmem:[%s6064_s0 + $0x570] sm:$0xff]  ;;  %v3912_v47 = vcombine.high %v183_v41, %v187_v42 }
  0xa4   :  { %v3916_v48 = vcombine.high %v185_v43, %v189_v44 }
  0xa9   :  { %2207 = vmatmul.mubr.bf16.gmra.mrb[52].mxu1 %v3847_v51  ;;  %v193_v51 = vld [vmem:[%s6064_s0 + $0x590] sm:$0xff] }
  0xaa   :  { %2785 = vmatmul.mubr.bf16.gmra.mrb[52].mxu0 %v3851_v52  ;;  %2214 = vmatprep.mubr.bf16.mxu1 %v3856_v53  ;;  %v197_v52 = vld [vmem:[%s6064_s0 + $0x5b0] sm:$0xff]  ;;  %v3911_v53 = vcombine.low %v183_v41, %v187_v42  ;;  %v247_v41 = vld [vmem:[%s6064_s0 + $0x740] sm:$0xff] }
  0xab   :  { %2792 = vmatprep.mubr.bf16.mxu0 %v3860_v54  ;;  %v3915_v54 = vcombine.low %v185_v43, %v189_v44  ;;  %v3924_v56 = vcombine.high %v193_v51, %v197_v52  ;;  %v251_v42 = vld [vmem:[%s6064_s0 + $0x760] sm:$0xff]  ;;  %v249_v43 = vld [vmem:[%s6064_s0 + $0x750] sm:$0xff] }
  0xac   :  { %v253_v44 = vld [vmem:[%s6064_s0 + $0x770] sm:$0xff] }
  0xb1   :  { %2215 = vmatmul.mubr.bf16.gmra.mrb[56].mxu1 %v3855_v58  ;;  %v201_v58 = vld [vmem:[%s6064_s0 + $0x5d0] sm:$0xff] }
  0xb2   :  { %2793 = vmatmul.mubr.bf16.gmra.mrb[56].mxu0 %v3859_v59  ;;  %2222 = vmatprep.mubr.bf16.mxu1 %v3864_v60  ;;  %v205_v59 = vld [vmem:[%s6064_s0 + $0x5f0] sm:$0xff]  ;;  %v3919_v60 = vcombine.low %v191_v49, %v195_v50  ;;  %v255_v49 = vld [vmem:[%s6064_s0 + $0x780] sm:$0xff] }
  0xb3   :  { %2800 = vmatprep.mubr.bf16.mxu0 %v3868_v61  ;;  %v3923_v61 = vcombine.low %v193_v51, %v197_v52  ;;  %v3932_v63 = vcombine.high %v201_v58, %v205_v59  ;;  %v259_v50 = vld [vmem:[%s6064_s0 + $0x7a0] sm:$0xff]  ;;  %v257_v51 = vld [vmem:[%s6064_s0 + $0x790] sm:$0xff] }
  0xb4   :  { %v261_v52 = vld [vmem:[%s6064_s0 + $0x7b0] sm:$0xff] }
  0xb9   :  { %2223 = vmatmul.mubr.bf16.gmra.mrb[60].mxu1 %v3863_v5  ;;  %v3927_v5 = vcombine.low %v199_v57, %v203_v0  ;;  %v263_v57 = vld [vmem:[%s6064_s0 + $0x7c0] sm:$0xff] }
  0xba   :  { %2801 = vmatmul.mubr.bf16.gmra.mrb[60].mxu0 %v3867_v6  ;;  %2230 = vmatprep.mubr.bf16.mxu1 %v3872_v7  ;;  %v3931_v6 = vcombine.low %v201_v58, %v205_v59  ;;  %v3936_v7 = vcombine.high %v207_v1, %v211_v2  ;;  %v267_v0 = vld [vmem:[%s6064_s0 + $0x7e0] sm:$0xff]  ;;  %v265_v58 = vld [vmem:[%s6064_s0 + $0x7d0] sm:$0xff] }
  0xbb   :  { %2808 = vmatprep.mubr.bf16.mxu0 %v3876_v8  ;;  %v3940_v8 = vcombine.high %v209_v3, %v213_v4  ;;  %v269_v59 = vld [vmem:[%s6064_s0 + $0x7f0] sm:$0xff] }
  0xc1   :  { %2231 = vmatmul.mubr.bf16.gmra.mrb[64].mxu1 %v3871_v13  ;;  %v3935_v13 = vcombine.low %v207_v1, %v211_v2  ;;  %v16_v1 = vld [vmem:[%s6064_s0 + $0x8] sm:$0xff] }
  0xc2   :  { %2809 = vmatmul.mubr.bf16.gmra.mrb[64].mxu0 %v3875_v14  ;;  %2238 = vmatprep.mubr.bf16.mxu1 %v3880_v15  ;;  %v3939_v14 = vcombine.low %v209_v3, %v213_v4  ;;  %v3944_v15 = vcombine.high %v215_v9, %v219_v10  ;;  %v20_v2 = vld [vmem:[%s6064_s0 + $0x28] sm:$0xff]  ;;  %v18_v3 = vld [vmem:[%s6064_s0 + $0x18] sm:$0xff] }
  0xc3   :  { %2816 = vmatprep.mubr.bf16.mxu0 %v3884_v16  ;;  %v3948_v16 = vcombine.high %v217_v11, %v221_v12  ;;  %v22_v4 = vld [vmem:[%s6064_s0 + $0x38] sm:$0xff] }
  0xc9   :  { %2239 = vmatmul.mubr.bf16.gmra.mrb[68].mxu1 %v3879_v21  ;;  %v3943_v21 = vcombine.low %v215_v9, %v219_v10  ;;  %v24_v9 = vld [vmem:[%s6064_s0 + $0x48] sm:$0xff] }
  0xca   :  { %2817 = vmatmul.mubr.bf16.gmra.mrb[68].mxu0 %v3883_v22  ;;  %2246 = vmatprep.mubr.bf16.mxu1 %v3888_v23  ;;  %v3947_v22 = vcombine.low %v217_v11, %v221_v12  ;;  %v3952_v23 = vcombine.high %v223_v17, %v227_v18  ;;  %v28_v10 = vld [vmem:[%s6064_s0 + $0x68] sm:$0xff]  ;;  %v26_v11 = vld [vmem:[%s6064_s0 + $0x58] sm:$0xff] }
  0xcb   :  { %2824 = vmatprep.mubr.bf16.mxu0 %v3892_v24  ;;  %v3956_v24 = vcombine.high %v225_v19, %v229_v20  ;;  %v30_v12 = vld [vmem:[%s6064_s0 + $0x78] sm:$0xff] }
  0xd1   :  { %2247 = vmatmul.mubr.bf16.gmra.mrb[72].mxu1 %v3887_v29  ;;  %v3951_v29 = vcombine.low %v223_v17, %v227_v18  ;;  %v32_v17 = vld [vmem:[%s6064_s0 + $0x88] sm:$0xff] }
  0xd2   :  { %2825 = vmatmul.mubr.bf16.gmra.mrb[72].mxu0 %v3891_v30  ;;  %2254 = vmatprep.mubr.bf16.mxu1 %v3896_v31  ;;  %v3955_v30 = vcombine.low %v225_v19, %v229_v20  ;;  %v3960_v31 = vcombine.high %v231_v25, %v235_v26  ;;  %v36_v18 = vld [vmem:[%s6064_s0 + $0xa8] sm:$0xff]  ;;  %v34_v19 = vld [vmem:[%s6064_s0 + $0x98] sm:$0xff] }
  0xd3   :  { %2832 = vmatprep.mubr.bf16.mxu0 %v3900_v32  ;;  %v3964_v32 = vcombine.high %v233_v27, %v237_v28  ;;  %v38_v20 = vld [vmem:[%s6064_s0 + $0xb8] sm:$0xff] }
  0xd9   :  { %2255 = vmatmul.mubr.bf16.gmra.mrb[76].mxu1 %v3895_v37  ;;  %v3959_v37 = vcombine.low %v231_v25, %v235_v26  ;;  %v40_v25 = vld [vmem:[%s6064_s0 + $0xc8] sm:$0xff] }
  0xda   :  { %2833 = vmatmul.mubr.bf16.gmra.mrb[76].mxu0 %v3899_v38  ;;  %2262 = vmatprep.mubr.bf16.mxu1 %v3904_v39  ;;  %v3963_v38 = vcombine.low %v233_v27, %v237_v28  ;;  %v3968_v39 = vcombine.high %v239_v33, %v243_v34  ;;  %v44_v26 = vld [vmem:[%s6064_s0 + $0xe8] sm:$0xff]  ;;  %v42_v27 = vld [vmem:[%s6064_s0 + $0xd8] sm:$0xff] }
  0xdb   :  { %2840 = vmatprep.mubr.bf16.mxu0 %v3908_v40  ;;  %v3972_v40 = vcombine.high %v241_v35, %v245_v36  ;;  %v46_v28 = vld [vmem:[%s6064_s0 + $0xf8] sm:$0xff] }
  0xe1   :  { %2263 = vmatmul.mubr.bf16.gmra.mrb[80].mxu1 %v3903_v45  ;;  %v3967_v45 = vcombine.low %v239_v33, %v243_v34  ;;  %v48_v33 = vld [vmem:[%s6064_s0 + $0x108] sm:$0xff] }
  0xe2   :  { %2841 = vmatmul.mubr.bf16.gmra.mrb[80].mxu0 %v3907_v46  ;;  %2270 = vmatprep.mubr.bf16.mxu1 %v3912_v47  ;;  %v3971_v46 = vcombine.low %v241_v35, %v245_v36  ;;  %v3976_v47 = vcombine.high %v247_v41, %v251_v42  ;;  %v52_v34 = vld [vmem:[%s6064_s0 + $0x128] sm:$0xff]  ;;  %v50_v35 = vld [vmem:[%s6064_s0 + $0x118] sm:$0xff] }
  0xe3   :  { %2848 = vmatprep.mubr.bf16.mxu0 %v3916_v48  ;;  %v3980_v48 = vcombine.high %v249_v43, %v253_v44  ;;  %v54_v36 = vld [vmem:[%s6064_s0 + $0x138] sm:$0xff] }
  0xe9   :  { %2271 = vmatmul.mubr.bf16.gmra.mrb[84].mxu1 %v3911_v53  ;;  %v3975_v53 = vcombine.low %v247_v41, %v251_v42  ;;  %v56_v41 = vld [vmem:[%s6064_s0 + $0x148] sm:$0xff] }
  0xea   :  { %2849 = vmatmul.mubr.bf16.gmra.mrb[84].mxu0 %v3915_v54  ;;  %2278 = vmatprep.mubr.bf16.mxu1 %v3920_v55  ;;  %v3979_v54 = vcombine.low %v249_v43, %v253_v44  ;;  %v3984_v55 = vcombine.high %v255_v49, %v259_v50  ;;  %v60_v42 = vld [vmem:[%s6064_s0 + $0x168] sm:$0xff]  ;;  %v58_v43 = vld [vmem:[%s6064_s0 + $0x158] sm:$0xff] }
  0xeb   :  { %2856 = vmatprep.mubr.bf16.mxu0 %v3924_v56  ;;  %v3988_v56 = vcombine.high %v257_v51, %v261_v52  ;;  %v62_v44 = vld [vmem:[%s6064_s0 + $0x178] sm:$0xff] }
  0xf1   :  { %2279 = vmatmul.mubr.bf16.gmra.mrb[88].mxu1 %v3919_v60  ;;  %v3983_v60 = vcombine.low %v255_v49, %v259_v50  ;;  %v64_v49 = vld [vmem:[%s6064_s0 + $0x188] sm:$0xff] }
  0xf2   :  { %2857 = vmatmul.mubr.bf16.gmra.mrb[88].mxu0 %v3923_v61  ;;  %2286 = vmatprep.mubr.bf16.mxu1 %v3928_v62  ;;  %v3987_v61 = vcombine.low %v257_v51, %v261_v52  ;;  %v3992_v62 = vcombine.high %v263_v57, %v267_v0  ;;  %v68_v50 = vld [vmem:[%s6064_s0 + $0x1a8] sm:$0xff]  ;;  %v66_v51 = vld [vmem:[%s6064_s0 + $0x198] sm:$0xff] }
  0xf3   :  { %2864 = vmatprep.mubr.bf16.mxu0 %v3932_v63  ;;  %v3996_v63 = vcombine.high %v265_v58, %v269_v59  ;;  %v70_v52 = vld [vmem:[%s6064_s0 + $0x1b8] sm:$0xff] }
  0xf9   :  { %2287 = vmatmul.mubr.bf16.gmra.mrb[92].mxu1 %v3927_v5  ;;  %v3991_v5 = vcombine.low %v263_v57, %v267_v0  ;;  %v72_v57 = vld [vmem:[%s6064_s0 + $0x1c8] sm:$0xff] }
  0xfa   :  { %2865 = vmatmul.mubr.bf16.gmra.mrb[92].mxu0 %v3931_v6  ;;  %2294 = vmatprep.mubr.bf16.mxu1 %v3936_v7  ;;  %v3995_v6 = vcombine.low %v265_v58, %v269_v59  ;;  %v3746_v7 = vcombine.high %v16_v1, %v20_v2  ;;  %v76_v0 = vld [vmem:[%s6064_s0 + $0x1e8] sm:$0xff]  ;;  %v74_v58 = vld [vmem:[%s6064_s0 + $0x1d8] sm:$0xff] }
  0xfb   :  { %2872 = vmatprep.mubr.bf16.mxu0 %v3940_v8  ;;  %v3750_v8 = vcombine.high %v18_v3, %v22_v4  ;;  %v78_v59 = vld [vmem:[%s6064_s0 + $0x1f8] sm:$0xff] }
 0x101   :  { %2295 = vmatmul.mubr.bf16.gmra.mrb[96].mxu1 %v3935_v13  ;;  %v3745_v13 = vcombine.low %v16_v1, %v20_v2  ;;  %v80_v1 = vld [vmem:[%s6064_s0 + $0x208] sm:$0xff] }
 0x102   :  { %2873 = vmatmul.mubr.bf16.gmra.mrb[96].mxu0 %v3939_v14  ;;  %2302 = vmatprep.mubr.bf16.mxu1 %v3944_v15  ;;  %v3749_v14 = vcombine.low %v18_v3, %v22_v4  ;;  %v3754_v15 = vcombine.high %v24_v9, %v28_v10  ;;  %v84_v2 = vld [vmem:[%s6064_s0 + $0x228] sm:$0xff]  ;;  %v82_v3 = vld [vmem:[%s6064_s0 + $0x218] sm:$0xff] }
 0x103   :  { %2880 = vmatprep.mubr.bf16.mxu0 %v3948_v16  ;;  %v3758_v16 = vcombine.high %v26_v11, %v30_v12  ;;  %v86_v4 = vld [vmem:[%s6064_s0 + $0x238] sm:$0xff] }
 0x109   :  { %2303 = vmatmul.mubr.bf16.gmra.mrb[100].mxu1 %v3943_v21  ;;  %v3753_v21 = vcombine.low %v24_v9, %v28_v10  ;;  %v88_v9 = vld [vmem:[%s6064_s0 + $0x248] sm:$0xff] }
 0x10a   :  { %2881 = vmatmul.mubr.bf16.gmra.mrb[100].mxu0 %v3947_v22  ;;  %2310 = vmatprep.mubr.bf16.mxu1 %v3952_v23  ;;  %v3757_v22 = vcombine.low %v26_v11, %v30_v12  ;;  %v3762_v23 = vcombine.high %v32_v17, %v36_v18  ;;  %v92_v10 = vld [vmem:[%s6064_s0 + $0x268] sm:$0xff]  ;;  %v90_v11 = vld [vmem:[%s6064_s0 + $0x258] sm:$0xff] }
 0x10b   :  { %2888 = vmatprep.mubr.bf16.mxu0 %v3956_v24  ;;  %v3766_v24 = vcombine.high %v34_v19, %v38_v20  ;;  %v94_v12 = vld [vmem:[%s6064_s0 + $0x278] sm:$0xff] }
 0x111   :  { %2311 = vmatmul.mubr.bf16.gmra.mrb[104].mxu1 %v3951_v29  ;;  %v3761_v29 = vcombine.low %v32_v17, %v36_v18  ;;  %v96_v17 = vld [vmem:[%s6064_s0 + $0x288] sm:$0xff] }
 0x112   :  { %2889 = vmatmul.mubr.bf16.gmra.mrb[104].mxu0 %v3955_v30  ;;  %2318 = vmatprep.mubr.bf16.mxu1 %v3960_v31  ;;  %v3765_v30 = vcombine.low %v34_v19, %v38_v20  ;;  %v3770_v31 = vcombine.high %v40_v25, %v44_v26  ;;  %v100_v18 = vld [vmem:[%s6064_s0 + $0x2a8] sm:$0xff]  ;;  %v98_v19 = vld [vmem:[%s6064_s0 + $0x298] sm:$0xff] }
 0x113   :  { %2896 = vmatprep.mubr.bf16.mxu0 %v3964_v32  ;;  %v3774_v32 = vcombine.high %v42_v27, %v46_v28  ;;  %v102_v20 = vld [vmem:[%s6064_s0 + $0x2b8] sm:$0xff] }
 0x119   :  { %2319 = vmatmul.mubr.bf16.gmra.mrb[108].mxu1 %v3959_v37  ;;  %v3769_v37 = vcombine.low %v40_v25, %v44_v26  ;;  %v104_v25 = vld [vmem:[%s6064_s0 + $0x2c8] sm:$0xff] }
 0x11a   :  { %2897 = vmatmul.mubr.bf16.gmra.mrb[108].mxu0 %v3963_v38  ;;  %2326 = vmatprep.mubr.bf16.mxu1 %v3968_v39  ;;  %v3773_v38 = vcombine.low %v42_v27, %v46_v28  ;;  %v3778_v39 = vcombine.high %v48_v33, %v52_v34  ;;  %v108_v26 = vld [vmem:[%s6064_s0 + $0x2e8] sm:$0xff]  ;;  %v106_v27 = vld [vmem:[%s6064_s0 + $0x2d8] sm:$0xff] }
 0x11b   :  { %2904 = vmatprep.mubr.bf16.mxu0 %v3972_v40  ;;  %v3782_v40 = vcombine.high %v50_v35, %v54_v36  ;;  %v110_v28 = vld [vmem:[%s6064_s0 + $0x2f8] sm:$0xff] }
 0x121   :  { %2327 = vmatmul.mubr.bf16.gmra.mrb[112].mxu1 %v3967_v45  ;;  %v3777_v45 = vcombine.low %v48_v33, %v52_v34  ;;  %v112_v33 = vld [vmem:[%s6064_s0 + $0x308] sm:$0xff] }
 0x122   :  { %2905 = vmatmul.mubr.bf16.gmra.mrb[112].mxu0 %v3971_v46  ;;  %2334 = vmatprep.mubr.bf16.mxu1 %v3976_v47  ;;  %v3781_v46 = vcombine.low %v50_v35, %v54_v36  ;;  %v3786_v47 = vcombine.high %v56_v41, %v60_v42  ;;  %v116_v34 = vld [vmem:[%s6064_s0 + $0x328] sm:$0xff]  ;;  %v114_v35 = vld [vmem:[%s6064_s0 + $0x318] sm:$0xff] }
 0x123   :  { %2912 = vmatprep.mubr.bf16.mxu0 %v3980_v48  ;;  %v3790_v48 = vcombine.high %v58_v43, %v62_v44  ;;  %v118_v36 = vld [vmem:[%s6064_s0 + $0x338] sm:$0xff] }
 0x129   :  { %2335 = vmatmul.mubr.bf16.gmra.mrb[116].mxu1 %v3975_v53  ;;  %v3785_v53 = vcombine.low %v56_v41, %v60_v42  ;;  %v120_v41 = vld [vmem:[%s6064_s0 + $0x348] sm:$0xff] }
 0x12a   :  { %2913 = vmatmul.mubr.bf16.gmra.mrb[116].mxu0 %v3979_v54  ;;  %2342 = vmatprep.mubr.bf16.mxu1 %v3984_v55  ;;  %v3789_v54 = vcombine.low %v58_v43, %v62_v44  ;;  %v3794_v55 = vcombine.high %v64_v49, %v68_v50  ;;  %v124_v42 = vld [vmem:[%s6064_s0 + $0x368] sm:$0xff]  ;;  %v122_v43 = vld [vmem:[%s6064_s0 + $0x358] sm:$0xff] }
 0x12b   :  { %2920 = vmatprep.mubr.bf16.mxu0 %v3988_v56  ;;  %v3798_v56 = vcombine.high %v66_v51, %v70_v52  ;;  %v126_v44 = vld [vmem:[%s6064_s0 + $0x378] sm:$0xff] }
 0x131   :  { %2343 = vmatmul.mubr.bf16.gmra.mrb[120].mxu1 %v3983_v60  ;;  %v3793_v60 = vcombine.low %v64_v49, %v68_v50  ;;  %v128_v49 = vld [vmem:[%s6064_s0 + $0x388] sm:$0xff] }
 0x132   :  { %2921 = vmatmul.mubr.bf16.gmra.mrb[120].mxu0 %v3987_v61  ;;  %2350 = vmatprep.mubr.bf16.mxu1 %v3992_v62  ;;  %v3797_v61 = vcombine.low %v66_v51, %v70_v52  ;;  %v3802_v62 = vcombine.high %v72_v57, %v76_v0  ;;  %v132_v50 = vld [vmem:[%s6064_s0 + $0x3a8] sm:$0xff]  ;;  %v130_v51 = vld [vmem:[%s6064_s0 + $0x398] sm:$0xff] }
 0x133   :  { %2928 = vmatprep.mubr.bf16.mxu0 %v3996_v63  ;;  %v3806_v63 = vcombine.high %v74_v58, %v78_v59  ;;  %v134_v52 = vld [vmem:[%s6064_s0 + $0x3b8] sm:$0xff] }
 0x139   :  { %2351 = vmatmul.mubr.bf16.gmra.mrb[124].mxu1 %v3991_v5  ;;  %v3801_v5 = vcombine.low %v72_v57, %v76_v0  ;;  %v136_v57 = vld [vmem:[%s6064_s0 + $0x3c8] sm:$0xff] }
 0x13a   :  { %2929 = vmatmul.mubr.bf16.gmra.mrb[124].mxu0 %v3995_v6  ;;  %2391 = vmatprep.mubr.bf16.mxu1 %v3746_v7  ;;  %v3805_v6 = vcombine.low %v74_v58, %v78_v59  ;;  %v3810_v7 = vcombine.high %v80_v1, %v84_v2  ;;  %v140_v0 = vld [vmem:[%s6064_s0 + $0x3e8] sm:$0xff]  ;;  %v138_v58 = vld [vmem:[%s6064_s0 + $0x3d8] sm:$0xff] }
 0x13b   :  { %2969 = vmatprep.mubr.bf16.mxu0 %v3750_v8  ;;  %v3814_v8 = vcombine.high %v82_v3, %v86_v4  ;;  %v142_v59 = vld [vmem:[%s6064_s0 + $0x3f8] sm:$0xff] }
 0x141   :  { %2392 = vmatmul.mubr.bf16.vlgmr.msra.gmra.mrb[0].mxu1 %v3745_v13  ;;  %v3809_v13 = vcombine.low %v80_v1, %v84_v2  ;;  %v144_v1 = vld [vmem:[%s6064_s0 + $0x408] sm:$0xff] }
 0x142   :  { %2970 = vmatmul.mubr.bf16.vlgmr.msra.gmra.mrb[0].mxu0 %v3749_v14  ;;  %2399 = vmatprep.mubr.bf16.mxu1 %v3754_v15  ;;  %v3813_v14 = vcombine.low %v82_v3, %v86_v4  ;;  %v3818_v15 = vcombine.high %v88_v9, %v92_v10  ;;  %v148_v2 = vld [vmem:[%s6064_s0 + $0x428] sm:$0xff]  ;;  %v146_v3 = vld [vmem:[%s6064_s0 + $0x418] sm:$0xff] }
 0x143   :  { %2977 = vmatprep.mubr.bf16.mxu0 %v3758_v16  ;;  %v3822_v16 = vcombine.high %v90_v11, %v94_v12  ;;  %v150_v4 = vld [vmem:[%s6064_s0 + $0x438] sm:$0xff] }
 0x149   :  { %2400 = vmatmul.mubr.bf16.gmra.mrb[4].mxu1 %v3753_v21  ;;  %v3817_v21 = vcombine.low %v88_v9, %v92_v10  ;;  %v152_v9 = vld [vmem:[%s6064_s0 + $0x448] sm:$0xff] }
 0x14a   :  { %2978 = vmatmul.mubr.bf16.gmra.mrb[4].mxu0 %v3757_v22  ;;  %2407 = vmatprep.mubr.bf16.mxu1 %v3762_v23  ;;  %v3821_v22 = vcombine.low %v90_v11, %v94_v12  ;;  %v3826_v23 = vcombine.high %v96_v17, %v100_v18  ;;  %v156_v10 = vld [vmem:[%s6064_s0 + $0x468] sm:$0xff]  ;;  %v154_v11 = vld [vmem:[%s6064_s0 + $0x458] sm:$0xff] }
 0x14b   :  { %2985 = vmatprep.mubr.bf16.mxu0 %v3766_v24  ;;  %v3830_v24 = vcombine.high %v98_v19, %v102_v20  ;;  %v158_v12 = vld [vmem:[%s6064_s0 + $0x478] sm:$0xff] }
 0x151   :  { %2408 = vmatmul.mubr.bf16.gmra.mrb[8].mxu1 %v3761_v29  ;;  %v3825_v29 = vcombine.low %v96_v17, %v100_v18  ;;  %v160_v17 = vld [vmem:[%s6064_s0 + $0x488] sm:$0xff] }
 0x152   :  { %2986 = vmatmul.mubr.bf16.gmra.mrb[8].mxu0 %v3765_v30  ;;  %2415 = vmatprep.mubr.bf16.mxu1 %v3770_v31  ;;  %v3829_v30 = vcombine.low %v98_v19, %v102_v20  ;;  %v3834_v31 = vcombine.high %v104_v25, %v108_v26  ;;  %v164_v18 = vld [vmem:[%s6064_s0 + $0x4a8] sm:$0xff]  ;;  %v162_v19 = vld [vmem:[%s6064_s0 + $0x498] sm:$0xff] }
 0x153   :  { %2993 = vmatprep.mubr.bf16.mxu0 %v3774_v32  ;;  %v3838_v32 = vcombine.high %v106_v27, %v110_v28  ;;  %v166_v20 = vld [vmem:[%s6064_s0 + $0x4b8] sm:$0xff] }
 0x159   :  { %2416 = vmatmul.mubr.bf16.gmra.mrb[12].mxu1 %v3769_v37  ;;  %v3833_v37 = vcombine.low %v104_v25, %v108_v26  ;;  %v168_v25 = vld [vmem:[%s6064_s0 + $0x4c8] sm:$0xff] }
 0x15a   :  { %2994 = vmatmul.mubr.bf16.gmra.mrb[12].mxu0 %v3773_v38  ;;  %2423 = vmatprep.mubr.bf16.mxu1 %v3778_v39  ;;  %v3837_v38 = vcombine.low %v106_v27, %v110_v28  ;;  %v3842_v39 = vcombine.high %v112_v33, %v116_v34  ;;  %v172_v26 = vld [vmem:[%s6064_s0 + $0x4e8] sm:$0xff]  ;;  %v170_v27 = vld [vmem:[%s6064_s0 + $0x4d8] sm:$0xff] }
 0x15b   :  { %3001 = vmatprep.mubr.bf16.mxu0 %v3782_v40  ;;  %v3846_v40 = vcombine.high %v114_v35, %v118_v36  ;;  %v174_v28 = vld [vmem:[%s6064_s0 + $0x4f8] sm:$0xff] }
 0x161   :  { %2424 = vmatmul.mubr.bf16.gmra.mrb[16].mxu1 %v3777_v45  ;;  %v3841_v45 = vcombine.low %v112_v33, %v116_v34  ;;  %v176_v33 = vld [vmem:[%s6064_s0 + $0x508] sm:$0xff] }
 0x162   :  { %3002 = vmatmul.mubr.bf16.gmra.mrb[16].mxu0 %v3781_v46  ;;  %2431 = vmatprep.mubr.bf16.mxu1 %v3786_v47  ;;  %v3845_v46 = vcombine.low %v114_v35, %v118_v36  ;;  %v3850_v47 = vcombine.high %v120_v41, %v124_v42  ;;  %v180_v34 = vld [vmem:[%s6064_s0 + $0x528] sm:$0xff]  ;;  %v178_v35 = vld [vmem:[%s6064_s0 + $0x518] sm:$0xff] }
 0x163   :  { %3009 = vmatprep.mubr.bf16.mxu0 %v3790_v48  ;;  %v3854_v48 = vcombine.high %v122_v43, %v126_v44  ;;  %v182_v36 = vld [vmem:[%s6064_s0 + $0x538] sm:$0xff] }
 0x169   :  { %2432 = vmatmul.mubr.bf16.gmra.mrb[20].mxu1 %v3785_v53  ;;  %v3849_v53 = vcombine.low %v120_v41, %v124_v42  ;;  %v184_v41 = vld [vmem:[%s6064_s0 + $0x548] sm:$0xff] }
 0x16a   :  { %3010 = vmatmul.mubr.bf16.gmra.mrb[20].mxu0 %v3789_v54  ;;  %2439 = vmatprep.mubr.bf16.mxu1 %v3794_v55  ;;  %v3853_v54 = vcombine.low %v122_v43, %v126_v44  ;;  %v3858_v55 = vcombine.high %v128_v49, %v132_v50  ;;  %v188_v42 = vld [vmem:[%s6064_s0 + $0x568] sm:$0xff]  ;;  %v186_v43 = vld [vmem:[%s6064_s0 + $0x558] sm:$0xff] }
 0x16b   :  { %3017 = vmatprep.mubr.bf16.mxu0 %v3798_v56  ;;  %v3862_v56 = vcombine.high %v130_v51, %v134_v52  ;;  %v190_v44 = vld [vmem:[%s6064_s0 + $0x578] sm:$0xff] }
 0x171   :  { %2440 = vmatmul.mubr.bf16.gmra.mrb[24].mxu1 %v3793_v60  ;;  %v3857_v60 = vcombine.low %v128_v49, %v132_v50  ;;  %v192_v49 = vld [vmem:[%s6064_s0 + $0x588] sm:$0xff] }
 0x172   :  { %3018 = vmatmul.mubr.bf16.gmra.mrb[24].mxu0 %v3797_v61  ;;  %2447 = vmatprep.mubr.bf16.mxu1 %v3802_v62  ;;  %v3861_v61 = vcombine.low %v130_v51, %v134_v52  ;;  %v3866_v62 = vcombine.high %v136_v57, %v140_v0  ;;  %v196_v50 = vld [vmem:[%s6064_s0 + $0x5a8] sm:$0xff]  ;;  %v194_v51 = vld [vmem:[%s6064_s0 + $0x598] sm:$0xff] }
 0x173   :  { %3025 = vmatprep.mubr.bf16.mxu0 %v3806_v63  ;;  %v3870_v63 = vcombine.high %v138_v58, %v142_v59  ;;  %v198_v52 = vld [vmem:[%s6064_s0 + $0x5b8] sm:$0xff] }
 0x179   :  { %2448 = vmatmul.mubr.bf16.gmra.mrb[28].mxu1 %v3801_v5  ;;  %v3865_v5 = vcombine.low %v136_v57, %v140_v0  ;;  %v200_v57 = vld [vmem:[%s6064_s0 + $0x5c8] sm:$0xff] }
 0x17a   :  { %3026 = vmatmul.mubr.bf16.gmra.mrb[28].mxu0 %v3805_v6  ;;  %2455 = vmatprep.mubr.bf16.mxu1 %v3810_v7  ;;  %v3869_v6 = vcombine.low %v138_v58, %v142_v59  ;;  %v3874_v7 = vcombine.high %v144_v1, %v148_v2  ;;  %v204_v0 = vld [vmem:[%s6064_s0 + $0x5e8] sm:$0xff]  ;;  %v202_v58 = vld [vmem:[%s6064_s0 + $0x5d8] sm:$0xff] }
 0x17b   :  { %3033 = vmatprep.mubr.bf16.mxu0 %v3814_v8  ;;  %v3878_v8 = vcombine.high %v146_v3, %v150_v4  ;;  %v206_v59 = vld [vmem:[%s6064_s0 + $0x5f8] sm:$0xff] }
 0x181   :  { %2456 = vmatmul.mubr.bf16.gmra.mrb[32].mxu1 %v3809_v13  ;;  %v3873_v13 = vcombine.low %v144_v1, %v148_v2  ;;  %v208_v1 = vld [vmem:[%s6064_s0 + $0x608] sm:$0xff] }
 0x182   :  { %3034 = vmatmul.mubr.bf16.gmra.mrb[32].mxu0 %v3813_v14  ;;  %2463 = vmatprep.mubr.bf16.mxu1 %v3818_v15  ;;  %v3877_v14 = vcombine.low %v146_v3, %v150_v4  ;;  %v3882_v15 = vcombine.high %v152_v9, %v156_v10  ;;  %v212_v2 = vld [vmem:[%s6064_s0 + $0x628] sm:$0xff]  ;;  %v210_v3 = vld [vmem:[%s6064_s0 + $0x618] sm:$0xff] }
 0x183   :  { %3041 = vmatprep.mubr.bf16.mxu0 %v3822_v16  ;;  %v3886_v16 = vcombine.high %v154_v11, %v158_v12  ;;  %v214_v4 = vld [vmem:[%s6064_s0 + $0x638] sm:$0xff] }
 0x189   :  { %2464 = vmatmul.mubr.bf16.gmra.mrb[36].mxu1 %v3817_v21  ;;  %v3881_v21 = vcombine.low %v152_v9, %v156_v10  ;;  %v216_v9 = vld [vmem:[%s6064_s0 + $0x648] sm:$0xff] }
 0x18a   :  { %3042 = vmatmul.mubr.bf16.gmra.mrb[36].mxu0 %v3821_v22  ;;  %2471 = vmatprep.mubr.bf16.mxu1 %v3826_v23  ;;  %v3885_v22 = vcombine.low %v154_v11, %v158_v12  ;;  %v3890_v23 = vcombine.high %v160_v17, %v164_v18  ;;  %v220_v10 = vld [vmem:[%s6064_s0 + $0x668] sm:$0xff]  ;;  %v218_v11 = vld [vmem:[%s6064_s0 + $0x658] sm:$0xff] }
 0x18b   :  { %3049 = vmatprep.mubr.bf16.mxu0 %v3830_v24  ;;  %v3894_v24 = vcombine.high %v162_v19, %v166_v20  ;;  %v222_v12 = vld [vmem:[%s6064_s0 + $0x678] sm:$0xff] }
 0x191   :  { %2472 = vmatmul.mubr.bf16.gmra.mrb[40].mxu1 %v3825_v29  ;;  %v3889_v29 = vcombine.low %v160_v17, %v164_v18  ;;  %v224_v17 = vld [vmem:[%s6064_s0 + $0x688] sm:$0xff] }
 0x192   :  { %3050 = vmatmul.mubr.bf16.gmra.mrb[40].mxu0 %v3829_v30  ;;  %2479 = vmatprep.mubr.bf16.mxu1 %v3834_v31  ;;  %v3893_v30 = vcombine.low %v162_v19, %v166_v20  ;;  %v3898_v31 = vcombine.high %v168_v25, %v172_v26  ;;  %v228_v18 = vld [vmem:[%s6064_s0 + $0x6a8] sm:$0xff]  ;;  %v226_v19 = vld [vmem:[%s6064_s0 + $0x698] sm:$0xff] }
 0x193   :  { %3057 = vmatprep.mubr.bf16.mxu0 %v3838_v32  ;;  %v3902_v32 = vcombine.high %v170_v27, %v174_v28  ;;  %v230_v20 = vld [vmem:[%s6064_s0 + $0x6b8] sm:$0xff] }
 0x199   :  { %2480 = vmatmul.mubr.bf16.gmra.mrb[44].mxu1 %v3833_v37  ;;  %v3897_v37 = vcombine.low %v168_v25, %v172_v26  ;;  %v232_v25 = vld [vmem:[%s6064_s0 + $0x6c8] sm:$0xff] }
 0x19a   :  { %3058 = vmatmul.mubr.bf16.gmra.mrb[44].mxu0 %v3837_v38  ;;  %2487 = vmatprep.mubr.bf16.mxu1 %v3842_v39  ;;  %v3901_v38 = vcombine.low %v170_v27, %v174_v28  ;;  %v3906_v39 = vcombine.high %v176_v33, %v180_v34  ;;  %v236_v26 = vld [vmem:[%s6064_s0 + $0x6e8] sm:$0xff]  ;;  %v234_v27 = vld [vmem:[%s6064_s0 + $0x6d8] sm:$0xff] }
 0x19b   :  { %3065 = vmatprep.mubr.bf16.mxu0 %v3846_v40  ;;  %v3910_v40 = vcombine.high %v178_v35, %v182_v36  ;;  %v238_v28 = vld [vmem:[%s6064_s0 + $0x6f8] sm:$0xff] }
 0x1a1   :  { %2488 = vmatmul.mubr.bf16.gmra.mrb[48].mxu1 %v3841_v45  ;;  %v3905_v45 = vcombine.low %v176_v33, %v180_v34  ;;  %v5848_v33 = vld [vmem:[%s6065_s2] ss:$0 sm:$0xff]  ;;  %v240_v34 = vld [vmem:[%s6064_s0 + $0x708] sm:$0xff] }
 0x1a2   :  { %3066 = vmatmul.mubr.bf16.gmra.mrb[48].mxu0 %v3845_v46  ;;  %2495 = vmatprep.mubr.bf16.mxu1 %v3850_v47  ;;  %v3909_v46 = vcombine.low %v178_v35, %v182_v36  ;;  %v3914_v47 = vcombine.high %v184_v41, %v188_v42  ;;  %v244_v35 = vld [vmem:[%s6064_s0 + $0x728] sm:$0xff] }
 0x1a3   :  { %3073 = vmatprep.mubr.bf16.mxu0 %v3854_v48  ;;  %v3918_v48 = vcombine.high %v186_v43, %v190_v44 }
 0x1a9   :  { %2496 = vmatmul.mubr.bf16.gmra.mrb[52].mxu1 %v3849_v53  ;;  %v3913_v53 = vcombine.low %v184_v41, %v188_v42  ;;  %v3961_v42 = vcombine.low %v232_v25, %v236_v26 }
 0x1aa   :  { %3074 = vmatmul.mubr.bf16.gmra.mrb[52].mxu0 %v3853_v54  ;;  %2503 = vmatprep.mubr.bf16.mxu1 %v3858_v55  ;;  %v3917_v54 = vcombine.low %v186_v43, %v190_v44  ;;  %v3922_v55 = vcombine.high %v192_v49, %v196_v50 }
 0x1ab   :  { %3081 = vmatprep.mubr.bf16.mxu0 %v3862_v56  ;;  %v3926_v56 = vcombine.high %v194_v51, %v198_v52 }
 0x1b1   :  { %2504 = vmatmul.mubr.bf16.gmra.mrb[56].mxu1 %v3857_v60  ;;  %v3921_v60 = vcombine.low %v192_v49, %v196_v50 }
 0x1b2   :  { %3082 = vmatmul.mubr.bf16.gmra.mrb[56].mxu0 %v3861_v61  ;;  %2511 = vmatprep.mubr.bf16.mxu1 %v3866_v62  ;;  %v3925_v61 = vcombine.low %v194_v51, %v198_v52  ;;  %v3930_v62 = vcombine.high %v200_v57, %v204_v0 }
 0x1b3   :  { %3089 = vmatprep.mubr.bf16.mxu0 %v3870_v63  ;;  %v3934_v63 = vcombine.high %v202_v58, %v206_v59 }
 0x1b9   :  { %2512 = vmatmul.mubr.bf16.gmra.mrb[60].mxu1 %v3865_v5  ;;  %v3929_v5 = vcombine.low %v200_v57, %v204_v0  ;;  %v252_v57 = vld [vmem:[%s6064_s0 + $0x768] sm:$0xff] }
 0x1ba   :  { %3090 = vmatmul.mubr.bf16.gmra.mrb[60].mxu0 %v3869_v6  ;;  %2519 = vmatprep.mubr.bf16.mxu1 %v3874_v7  ;;  %v3933_v6 = vcombine.low %v202_v58, %v206_v59  ;;  %v3938_v7 = vcombine.high %v208_v1, %v212_v2  ;;  %v250_v58 = vld [vmem:[%s6064_s0 + $0x758] sm:$0xff] }
 0x1bb   :  { %3097 = vmatprep.mubr.bf16.mxu0 %v3878_v8  ;;  %v3942_v8 = vcombine.high %v210_v3, %v214_v4  ;;  %v254_v59 = vld [vmem:[%s6064_s0 + $0x778] sm:$0xff] }
 0x1c1   :  { %2520 = vmatmul.mubr.bf16.gmra.mrb[64].mxu1 %v3873_v13  ;;  %v3937_v13 = vcombine.low %v208_v1, %v212_v2  ;;  %v3969_v2 = vcombine.low %v240_v34, %v244_v35 }
 0x1c2   :  { %3098 = vmatmul.mubr.bf16.gmra.mrb[64].mxu0 %v3877_v14  ;;  %2527 = vmatprep.mubr.bf16.mxu1 %v3882_v15  ;;  %v3941_v14 = vcombine.low %v210_v3, %v214_v4  ;;  %v3946_v15 = vcombine.high %v216_v9, %v220_v10 }
 0x1c3   :  { %3105 = vmatprep.mubr.bf16.mxu0 %v3886_v16  ;;  %v3950_v16 = vcombine.high %v218_v11, %v222_v12 }
 0x1c9   :  { %2528 = vmatmul.mubr.bf16.gmra.mrb[68].mxu1 %v3881_v21  ;;  %v3945_v21 = vcombine.low %v216_v9, %v220_v10 }
 0x1ca   :  { %3106 = vmatmul.mubr.bf16.gmra.mrb[68].mxu0 %v3885_v22  ;;  %2535 = vmatprep.mubr.bf16.mxu1 %v3890_v23  ;;  %v3949_v22 = vcombine.low %v218_v11, %v222_v12  ;;  %v3954_v23 = vcombine.high %v224_v17, %v228_v18  ;;  %v3982_v12 = vcombine.high %v250_v58, %v254_v59 }
 0x1cb   :  { %3113 = vmatprep.mubr.bf16.mxu0 %v3894_v24  ;;  %v3958_v24 = vcombine.high %v226_v19, %v230_v20 }
 0x1d1   :  { %2536 = vmatmul.mubr.bf16.gmra.mrb[72].mxu1 %v3889_v29  ;;  %v3953_v29 = vcombine.low %v224_v17, %v228_v18  ;;  %v256_v17 = vld [vmem:[%s6064_s0 + $0x788] sm:$0xff] }
 0x1d2   :  { %3114 = vmatmul.mubr.bf16.gmra.mrb[72].mxu0 %v3893_v30  ;;  %2543 = vmatprep.mubr.bf16.mxu1 %v3898_v31  ;;  %v3957_v30 = vcombine.low %v226_v19, %v230_v20  ;;  %v3962_v31 = vcombine.high %v232_v25, %v236_v26  ;;  %v260_v18 = vld [vmem:[%s6064_s0 + $0x7a8] sm:$0xff]  ;;  %v258_v20 = vld [vmem:[%s6064_s0 + $0x798] sm:$0xff] }
 0x1d3   :  { %3121 = vmatprep.mubr.bf16.mxu0 %v3902_v32  ;;  %v3966_v32 = vcombine.high %v234_v27, %v238_v28 }
 0x1d9   :  { %2544 = vmatmul.mubr.bf16.gmra.mrb[76].mxu1 %v3897_v37  ;;  %v242_v37 = vld [vmem:[%s6064_s0 + $0x718] sm:$0xff] }
 0x1da   :  { %3122 = vmatmul.mubr.bf16.gmra.mrb[76].mxu0 %v3901_v38  ;;  %2551 = vmatprep.mubr.bf16.mxu1 %v3906_v39  ;;  %v246_v38 = vld [vmem:[%s6064_s0 + $0x738] sm:$0xff] }
 0x1db   :  { %3129 = vmatprep.mubr.bf16.mxu0 %v3910_v40  ;;  %v3974_v51 = vcombine.high %v242_v37, %v246_v38 }
 0x1e1   :  { %2552 = vmatmul.mubr.bf16.gmra.mrb[80].mxu1 %v3905_v45  ;;  %v3965_v45 = vcombine.low %v234_v27, %v238_v28 }
 0x1e2   :  { %3130 = vmatmul.mubr.bf16.gmra.mrb[80].mxu0 %v3909_v46  ;;  %2559 = vmatprep.mubr.bf16.mxu1 %v3914_v47  ;;  %v3970_v46 = vcombine.high %v240_v34, %v244_v35 }
 0x1e3   :  { %3137 = vmatprep.mubr.bf16.mxu0 %v3918_v48 }
 0x1e9   :  { %2560 = vmatmul.mubr.bf16.gmra.mrb[84].mxu1 %v3913_v53 }
 0x1ea   :  { %3138 = vmatmul.mubr.bf16.gmra.mrb[84].mxu0 %v3917_v54  ;;  %2567 = vmatprep.mubr.bf16.mxu1 %v3922_v55 }
 0x1eb   :  { %3145 = vmatprep.mubr.bf16.mxu0 %v3926_v56  ;;  %v248_v56 = vld [vmem:[%s6064_s0 + $0x748] sm:$0xff] }
 0x1ec   :  { %v3977_v27 = vcombine.low %v248_v56, %v252_v57 }
 0x1f1   :  { %2568 = vmatmul.mubr.bf16.gmra.mrb[88].mxu1 %v3921_v60 }
 0x1f2   :  { %3146 = vmatmul.mubr.bf16.gmra.mrb[88].mxu0 %v3925_v61  ;;  %2575 = vmatprep.mubr.bf16.mxu1 %v3930_v62 }
 0x1f3   :  { %3153 = vmatprep.mubr.bf16.mxu0 %v3934_v63 }
 0x1f9   :  { %2576 = vmatmul.mubr.bf16.gmra.mrb[92].mxu1 %v3929_v5 }
 0x1fa   :  { %3154 = vmatmul.mubr.bf16.gmra.mrb[92].mxu0 %v3933_v6  ;;  %2583 = vmatprep.mubr.bf16.mxu1 %v3938_v7  ;;  %v3973_v6 = vcombine.low %v242_v37, %v246_v38  ;;  %v3978_v7 = vcombine.high %v248_v56, %v252_v57 }
 0x1fb   :  { %3161 = vmatprep.mubr.bf16.mxu0 %v3942_v8 }
 0x201   :  { %2584 = vmatmul.mubr.bf16.gmra.mrb[96].mxu1 %v3937_v13 }
 0x202   :  { %3162 = vmatmul.mubr.bf16.gmra.mrb[96].mxu0 %v3941_v14  ;;  %2591 = vmatprep.mubr.bf16.mxu1 %v3946_v15 }
 0x203   :  { %3169 = vmatprep.mubr.bf16.mxu0 %v3950_v16 }
 0x209   :  { %2592 = vmatmul.mubr.bf16.gmra.mrb[100].mxu1 %v3945_v21  ;;  %v262_v21 = vld [vmem:[%s6064_s0 + $0x7b8] sm:$0xff] }
 0x20a   :  { %3170 = vmatmul.mubr.bf16.gmra.mrb[100].mxu0 %v3949_v22  ;;  %2599 = vmatprep.mubr.bf16.mxu1 %v3954_v23  ;;  %v3990_v38 = vcombine.high %v258_v20, %v262_v21  ;;  %v3989_v57 = vcombine.low %v258_v20, %v262_v21 }
 0x20b   :  { %3177 = vmatprep.mubr.bf16.mxu0 %v3958_v24 }
 0x211   :  { %2600 = vmatmul.mubr.bf16.gmra.mrb[104].mxu1 %v3953_v29 }
 0x212   :  { %3178 = vmatmul.mubr.bf16.gmra.mrb[104].mxu0 %v3957_v30  ;;  %2607 = vmatprep.mubr.bf16.mxu1 %v3962_v31  ;;  %v3981_v31 = vcombine.low %v250_v58, %v254_v59 }
 0x213   :  { %3185 = vmatprep.mubr.bf16.mxu0 %v3966_v32  ;;  %v3986_v32 = vcombine.high %v256_v17, %v260_v18 }
 0x214   :  { %v2393_v36 = vpop.f32.mrb[0].mxu1 }
 0x215   :  { %v4382_v39 = vadd.f32 %v5848_v33, %v2393_v36  ;;  %v2971_v40 = vpop.f32.mrb[0].mxu0  ;;  %v2395_v41 = vpop.f32.mrb[1].mxu1 }
 0x216   :  { %v2973_v43 = vpop.f32.mrb[1].mxu0  ;;  %v2396_v44 = vpop.f32.mrb[2].mxu1 }
 0x217   :  { %v4383_v47 = vadd.f32 %v4382_v39, %v2971_v40  ;;  %v4384_v48 = vadd.f32 %v5848_v33, %v2396_v44  ;;  %v2974_v49 = vpop.f32.mrb[2].mxu0  ;;  %v2398_v50 = vpop.f32.mrb[3].mxu1  ;;  %v264_v43 = vld [vmem:[%s6064_s0 + $0x7c8] sm:$0xff] }
 0x218   :  { %v2976_v52 = vpop.f32.mrb[3].mxu0  ;;  %v268_v44 = vld [vmem:[%s6064_s0 + $0x7e8] sm:$0xff] }
 0x219   :  { %v3290_v53 = vmul.f32 0.2, %v4383_v47  ;;  %v4385_v54 = vadd.f32 %v4384_v48, %v2974_v49  ;;  %2608 = vmatmul.mubr.bf16.gmra.mrb[108].mxu1 %v3961_v42  ;;  %vm3226_vm0 = vcmp.ge.f32.partialorder %v4383_v47, 0.0 }
 0x21a   :  { %3186 = vmatmul.mubr.bf16.gmra.mrb[108].mxu0 %v3965_v45  ;;  %2615 = vmatprep.mubr.bf16.mxu1 %v3970_v46  ;;  %v266_v46 = vld [vmem:[%s6064_s0 + $0x7d8] sm:$0xff] }
 0x21b   :  { %vm3227_vm1 = vcmp.ge.f32.partialorder %v4385_v54, 0.0  ;;  %v3291_v55 = vmul.f32 0.2, %v4385_v54  ;;  %3193 = vmatprep.mubr.bf16.mxu0 %v3974_v51  ;;  %v3354_v60 = vsel %vm3226_vm0, %v4383_v47, %v3290_v53  ;;  %v270_v47 = vld [vmem:[%s6064_s0 + $0x7f8] sm:$0xff]  ;;  %v3985_v53 = vcombine.low %v256_v17, %v260_v18 }
 0x21c   :  { %v2401_v0 = vpop.f32.mrb[4].mxu1 }
 0x21d   :  { %v3355_v61 = vsel %vm3227_vm1, %v4385_v54, %v3291_v55  ;;  %v4386_v62 = vadd.f32 %v5848_v33, %v2401_v0  ;;  %v2979_v63 = vpop.f32.mrb[4].mxu0  ;;  %v2403_v1 = vpop.f32.mrb[5].mxu1  ;;  %v3994_v0 = vcombine.high %v264_v43, %v268_v44 }
 0x21e   :  { %v4194_v3 = vpack.c.bf16 %v3355_v61, %v3354_v60  ;;  %v2981_v4 = vpop.f32.mrb[5].mxu0  ;;  %v2404_v5 = vpop.f32.mrb[6].mxu1 }
 0x21f   :  { %v4387_v8 = vadd.f32 %v4386_v62, %v2979_v63  ;;  %v4388_v9 = vadd.f32 %v5848_v33, %v2404_v5  ;;  %v2982_v10 = vpop.f32.mrb[6].mxu0  ;;  %v2406_v11 = vpop.f32.mrb[7].mxu1  ;;  %v3998_v62 = vcombine.high %v266_v46, %v270_v47 }
 0x220   :  { %4195 = vst [vmem:[%s6066_s3] sm:$0xff] %v4194_v3   ;;  %v2984_v13 = vpop.f32.mrb[7].mxu0 }
 0x221   :  { %v3292_v14 = vmul.f32 0.2, %v4387_v8  ;;  %v4389_v15 = vadd.f32 %v4388_v9, %v2982_v10  ;;  %2616 = vmatmul.mubr.bf16.gmra.mrb[112].mxu1 %v3969_v2  ;;  %vm3228_vm2 = vcmp.ge.f32.partialorder %v4387_v8, 0.0  ;;  %v3993_v10 = vcombine.low %v264_v43, %v268_v44 }
 0x222   :  { %3194 = vmatmul.mubr.bf16.gmra.mrb[112].mxu0 %v3973_v6  ;;  %2623 = vmatprep.mubr.bf16.mxu1 %v3978_v7 }
 0x223   :  { %vm3229_vm3 = vcmp.ge.f32.partialorder %v4389_v15, 0.0  ;;  %v3293_v16 = vmul.f32 0.2, %v4389_v15  ;;  %3201 = vmatprep.mubr.bf16.mxu0 %v3982_v12  ;;  %v3356_v22 = vsel %vm3228_vm2, %v4387_v8, %v3292_v14  ;;  %v3997_v14 = vcombine.low %v266_v46, %v270_v47 }
 0x224   :  { %v2409_v19 = vpop.f32.mrb[8].mxu1 }
 0x225   :  { %v3357_v23 = vsel %vm3229_vm3, %v4389_v15, %v3293_v16  ;;  %v4390_v24 = vadd.f32 %v5848_v33, %v2409_v19  ;;  %v2987_v25 = vpop.f32.mrb[8].mxu0  ;;  %v2411_v26 = vpop.f32.mrb[9].mxu1 }
 0x226   :  { %v4199_v28 = vpack.c.bf16 %v3357_v23, %v3356_v22  ;;  %v2989_v29 = vpop.f32.mrb[9].mxu0  ;;  %v2412_v30 = vpop.f32.mrb[10].mxu1 }
 0x227   :  { %v4391_v34 = vadd.f32 %v4390_v24, %v2987_v25  ;;  %v4392_v35 = vadd.f32 %v5848_v33, %v2412_v30  ;;  %v2990_v36 = vpop.f32.mrb[10].mxu0  ;;  %v2414_v37 = vpop.f32.mrb[11].mxu1 }
 0x228   :  { %4351 = vst [vmem:[%s6066_s3 + $0x8] sm:$0xff] %v4199_v28   ;;  %v2992_v39 = vpop.f32.mrb[11].mxu0 }
 0x229   :  { %v3294_v40 = vmul.f32 0.2, %v4391_v34  ;;  %v4393_v41 = vadd.f32 %v4392_v35, %v2990_v36  ;;  %2624 = vmatmul.mubr.bf16.gmra.mrb[116].mxu1 %v3977_v27  ;;  %vm3230_vm4 = vcmp.ge.f32.partialorder %v4391_v34, 0.0 }
 0x22a   :  { %3202 = vmatmul.mubr.bf16.gmra.mrb[116].mxu0 %v3981_v31  ;;  %2631 = vmatprep.mubr.bf16.mxu1 %v3986_v32 }
 0x22b   :  { %vm3231_vm5 = vcmp.ge.f32.partialorder %v4393_v41, 0.0  ;;  %v3295_v42 = vmul.f32 0.2, %v4393_v41  ;;  %3209 = vmatprep.mubr.bf16.mxu0 %v3990_v38  ;;  %v3358_v48 = vsel %vm3230_vm4, %v4391_v34, %v3294_v40 }
 0x22c   :  { %v2417_v45 = vpop.f32.mrb[12].mxu1 }
 0x22d   :  { %v3359_v49 = vsel %vm3231_vm5, %v4393_v41, %v3295_v42  ;;  %v4394_v50 = vadd.f32 %v5848_v33, %v2417_v45  ;;  %v2995_v51 = vpop.f32.mrb[12].mxu0  ;;  %v2419_v52 = vpop.f32.mrb[13].mxu1 }
 0x22e   :  { %v4204_v54 = vpack.c.bf16 %v3359_v49, %v3358_v48  ;;  %v2997_v55 = vpop.f32.mrb[13].mxu0  ;;  %v2420_v56 = vpop.f32.mrb[14].mxu1 }
 0x22f   :  { %v4395_v58 = vadd.f32 %v4394_v50, %v2995_v51  ;;  %v4396_v59 = vadd.f32 %v5848_v33, %v2420_v56  ;;  %v2998_v60 = vpop.f32.mrb[14].mxu0  ;;  %v2422_v61 = vpop.f32.mrb[15].mxu1 }
 0x230   :  { %4352 = vst [vmem:[%s6066_s3 + $0x10] sm:$0xff] %v4204_v54   ;;  %v3000_v63 = vpop.f32.mrb[15].mxu0 }
 0x231   :  { %v3296_v1 = vmul.f32 0.2, %v4395_v58  ;;  %v4397_v2 = vadd.f32 %v4396_v59, %v2998_v60  ;;  %2632 = vmatmul.mubr.bf16.gmra.mrb[120].mxu1 %v3985_v53  ;;  %vm3232_vm6 = vcmp.ge.f32.partialorder %v4395_v58, 0.0 }
 0x232   :  { %3210 = vmatmul.mubr.bf16.gmra.mrb[120].mxu0 %v3989_v57  ;;  %2639 = vmatprep.mubr.bf16.mxu1 %v3994_v0 }
 0x233   :  { %vm3233_vm7 = vcmp.ge.f32.partialorder %v4397_v2, 0.0  ;;  %v3297_v3 = vmul.f32 0.2, %v4397_v2  ;;  %3217 = vmatprep.mubr.bf16.mxu0 %v3998_v62  ;;  %v3360_v5 = vsel %vm3232_vm6, %v4395_v58, %v3296_v1 }
 0x234   :  { %v2425_v4 = vpop.f32.mrb[16].mxu1 }
 0x235   :  { %v3361_v6 = vsel %vm3233_vm7, %v4397_v2, %v3297_v3  ;;  %v4398_v7 = vadd.f32 %v5848_v33, %v2425_v4  ;;  %v3003_v8 = vpop.f32.mrb[16].mxu0  ;;  %v2427_v9 = vpop.f32.mrb[17].mxu1 }
 0x236   :  { %v4209_v11 = vpack.c.bf16 %v3361_v6, %v3360_v5  ;;  %v3005_v12 = vpop.f32.mrb[17].mxu0  ;;  %v2428_v13 = vpop.f32.mrb[18].mxu1 }
 0x237   :  { %v4399_v15 = vadd.f32 %v4398_v7, %v3003_v8  ;;  %v4400_v16 = vadd.f32 %v5848_v33, %v2428_v13  ;;  %v3006_v17 = vpop.f32.mrb[18].mxu0  ;;  %v2430_v18 = vpop.f32.mrb[19].mxu1 }
 0x238   :  { %4353 = vst [vmem:[%s6066_s3 + $0x18] sm:$0xff] %v4209_v11   ;;  %v3008_v19 = vpop.f32.mrb[19].mxu0 }
 0x239   :  { %v3298_v20 = vmul.f32 0.2, %v4399_v15  ;;  %v4401_v21 = vadd.f32 %v4400_v16, %v3006_v17  ;;  %2640 = vmatmul.mubr.bf16.gmra.mrb[124].mxu1 %v3993_v10  ;;  %vm3234_vm8 = vcmp.ge.f32.partialorder %v4399_v15, 0.0 }
 0x23a   :  { %3218 = vmatmul.mubr.bf16.gmra.mrb[124].mxu0 %v3997_v14 }
 0x23b   :  { %vm3235_vm9 = vcmp.ge.f32.partialorder %v4401_v21, 0.0  ;;  %v3299_v22 = vmul.f32 0.2, %v4401_v21  ;;  %v3362_v24 = vsel %vm3234_vm8, %v4399_v15, %v3298_v20 }
 0x23c   :  { %v2433_v23 = vpop.f32.mrb[20].mxu1 }
 0x23d   :  { %v3363_v25 = vsel %vm3235_vm9, %v4401_v21, %v3299_v22  ;;  %v4402_v26 = vadd.f32 %v5848_v33, %v2433_v23  ;;  %v3011_v27 = vpop.f32.mrb[20].mxu0  ;;  %v2435_v28 = vpop.f32.mrb[21].mxu1 }
 0x23e   :  { %v4214_v29 = vpack.c.bf16 %v3363_v25, %v3362_v24  ;;  %v3013_v30 = vpop.f32.mrb[21].mxu0  ;;  %v2436_v31 = vpop.f32.mrb[22].mxu1 }
 0x23f   :  { %v4403_v32 = vadd.f32 %v4402_v26, %v3011_v27  ;;  %v4404_v34 = vadd.f32 %v5848_v33, %v2436_v31  ;;  %v3014_v35 = vpop.f32.mrb[22].mxu0  ;;  %v2438_v36 = vpop.f32.mrb[23].mxu1 }
 0x240   :  { %4354 = vst [vmem:[%s6066_s3 + $0x20] sm:$0xff] %v4214_v29   ;;  %v3016_v37 = vpop.f32.mrb[23].mxu0 }
 0x241   :  { %v3300_v38 = vmul.f32 0.2, %v4403_v32  ;;  %v4405_v39 = vadd.f32 %v4404_v34, %v3014_v35  ;;  %vm3236_vm10 = vcmp.ge.f32.partialorder %v4403_v32, 0.0 }
 0x243   :  { %vm3237_vm11 = vcmp.ge.f32.partialorder %v4405_v39, 0.0  ;;  %v3301_v40 = vmul.f32 0.2, %v4405_v39  ;;  %v3364_v42 = vsel %vm3236_vm10, %v4403_v32, %v3300_v38 }
 0x244   :  { %v2441_v41 = vpop.f32.mrb[24].mxu1 }
 0x245   :  { %v3365_v43 = vsel %vm3237_vm11, %v4405_v39, %v3301_v40  ;;  %v4406_v44 = vadd.f32 %v5848_v33, %v2441_v41  ;;  %v3019_v45 = vpop.f32.mrb[24].mxu0  ;;  %v2443_v46 = vpop.f32.mrb[25].mxu1 }
 0x246   :  { %v4219_v47 = vpack.c.bf16 %v3365_v43, %v3364_v42  ;;  %v3021_v48 = vpop.f32.mrb[25].mxu0  ;;  %v2444_v49 = vpop.f32.mrb[26].mxu1 }
 0x247   :  { %v4407_v50 = vadd.f32 %v4406_v44, %v3019_v45  ;;  %v4408_v51 = vadd.f32 %v5848_v33, %v2444_v49  ;;  %v3022_v52 = vpop.f32.mrb[26].mxu0  ;;  %v2446_v53 = vpop.f32.mrb[27].mxu1 }
 0x248   :  { %4355 = vst [vmem:[%s6066_s3 + $0x28] sm:$0xff] %v4219_v47   ;;  %v3024_v54 = vpop.f32.mrb[27].mxu0 }
 0x249   :  { %v3302_v55 = vmul.f32 0.2, %v4407_v50  ;;  %v4409_v56 = vadd.f32 %v4408_v51, %v3022_v52  ;;  %vm3238_vm12 = vcmp.ge.f32.partialorder %v4407_v50, 0.0 }
 0x24b   :  { %vm3239_vm13 = vcmp.ge.f32.partialorder %v4409_v56, 0.0  ;;  %v3303_v57 = vmul.f32 0.2, %v4409_v56  ;;  %v3366_v58 = vsel %vm3238_vm12, %v4407_v50, %v3302_v55 }
 0x24c   :  { %v2449_v0 = vpop.f32.mrb[28].mxu1 }
 0x24d   :  { %v3367_v59 = vsel %vm3239_vm13, %v4409_v56, %v3303_v57  ;;  %v4410_v60 = vadd.f32 %v5848_v33, %v2449_v0  ;;  %v3027_v61 = vpop.f32.mrb[28].mxu0  ;;  %v2451_v62 = vpop.f32.mrb[29].mxu1 }
 0x24e   :  { %v4224_v63 = vpack.c.bf16 %v3367_v59, %v3366_v58  ;;  %v3029_v1 = vpop.f32.mrb[29].mxu0  ;;  %v2452_v2 = vpop.f32.mrb[30].mxu1 }
 0x24f   :  { %v4411_v3 = vadd.f32 %v4410_v60, %v3027_v61  ;;  %v4412_v4 = vadd.f32 %v5848_v33, %v2452_v2  ;;  %v3030_v5 = vpop.f32.mrb[30].mxu0  ;;  %v2454_v6 = vpop.f32.mrb[31].mxu1 }
 0x250   :  { %4356 = vst [vmem:[%s6066_s3 + $0x30] sm:$0xff] %v4224_v63   ;;  %v3032_v7 = vpop.f32.mrb[31].mxu0 }
 0x251   :  { %v3304_v8 = vmul.f32 0.2, %v4411_v3  ;;  %v4413_v9 = vadd.f32 %v4412_v4, %v3030_v5  ;;  %vm3240_vm14 = vcmp.ge.f32.partialorder %v4411_v3, 0.0 }
 0x253   :  { %vm3241_vm15 = vcmp.ge.f32.partialorder %v4413_v9, 0.0  ;;  %v3305_v10 = vmul.f32 0.2, %v4413_v9  ;;  %v3368_v12 = vsel %vm3240_vm14, %v4411_v3, %v3304_v8 }
 0x254   :  { %v2457_v11 = vpop.f32.mrb[32].mxu1 }
 0x255   :  { %v3369_v13 = vsel %vm3241_vm15, %v4413_v9, %v3305_v10  ;;  %v4414_v14 = vadd.f32 %v5848_v33, %v2457_v11  ;;  %v3035_v15 = vpop.f32.mrb[32].mxu0  ;;  %v2459_v16 = vpop.f32.mrb[33].mxu1 }
 0x256   :  { %v4229_v17 = vpack.c.bf16 %v3369_v13, %v3368_v12  ;;  %v3037_v18 = vpop.f32.mrb[33].mxu0  ;;  %v2460_v19 = vpop.f32.mrb[34].mxu1 }
 0x257   :  { %v4415_v20 = vadd.f32 %v4414_v14, %v3035_v15  ;;  %v4416_v21 = vadd.f32 %v5848_v33, %v2460_v19  ;;  %v3038_v22 = vpop.f32.mrb[34].mxu0  ;;  %v2462_v23 = vpop.f32.mrb[35].mxu1 }
 0x258   :  { %4357 = vst [vmem:[%s6066_s3 + $0x38] sm:$0xff] %v4229_v17   ;;  %v3040_v24 = vpop.f32.mrb[35].mxu0 }
 0x259   :  { %v3306_v25 = vmul.f32 0.2, %v4415_v20  ;;  %v4417_v26 = vadd.f32 %v4416_v21, %v3038_v22  ;;  %vm3242_vm0 = vcmp.ge.f32.partialorder %v4415_v20, 0.0 }
 0x25b   :  { %vm3243_vm1 = vcmp.ge.f32.partialorder %v4417_v26, 0.0  ;;  %v3307_v27 = vmul.f32 0.2, %v4417_v26  ;;  %v3370_v29 = vsel %vm3242_vm0, %v4415_v20, %v3306_v25 }
 0x25c   :  { %v2465_v28 = vpop.f32.mrb[36].mxu1 }
 0x25d   :  { %v3371_v30 = vsel %vm3243_vm1, %v4417_v26, %v3307_v27  ;;  %v4418_v31 = vadd.f32 %v5848_v33, %v2465_v28  ;;  %v3043_v32 = vpop.f32.mrb[36].mxu0  ;;  %v2467_v34 = vpop.f32.mrb[37].mxu1 }
 0x25e   :  { %v4234_v35 = vpack.c.bf16 %v3371_v30, %v3370_v29  ;;  %v3045_v36 = vpop.f32.mrb[37].mxu0  ;;  %v2468_v37 = vpop.f32.mrb[38].mxu1 }
 0x25f   :  { %v4419_v38 = vadd.f32 %v4418_v31, %v3043_v32  ;;  %v4420_v39 = vadd.f32 %v5848_v33, %v2468_v37  ;;  %v3046_v40 = vpop.f32.mrb[38].mxu0  ;;  %v2470_v41 = vpop.f32.mrb[39].mxu1 }
 0x260   :  { %4358 = vst [vmem:[%s6066_s3 + $0x40] sm:$0xff] %v4234_v35   ;;  %v3048_v42 = vpop.f32.mrb[39].mxu0 }
 0x261   :  { %v3308_v43 = vmul.f32 0.2, %v4419_v38  ;;  %v4421_v44 = vadd.f32 %v4420_v39, %v3046_v40  ;;  %vm3244_vm2 = vcmp.ge.f32.partialorder %v4419_v38, 0.0 }
 0x263   :  { %vm3245_vm3 = vcmp.ge.f32.partialorder %v4421_v44, 0.0  ;;  %v3309_v45 = vmul.f32 0.2, %v4421_v44  ;;  %v3372_v47 = vsel %vm3244_vm2, %v4419_v38, %v3308_v43 }
 0x264   :  { %v2473_v46 = vpop.f32.mrb[40].mxu1 }
 0x265   :  { %v3373_v48 = vsel %vm3245_vm3, %v4421_v44, %v3309_v45  ;;  %v4422_v49 = vadd.f32 %v5848_v33, %v2473_v46  ;;  %v3051_v50 = vpop.f32.mrb[40].mxu0  ;;  %v2475_v51 = vpop.f32.mrb[41].mxu1 }
 0x266   :  { %v4239_v52 = vpack.c.bf16 %v3373_v48, %v3372_v47  ;;  %v3053_v53 = vpop.f32.mrb[41].mxu0  ;;  %v2476_v54 = vpop.f32.mrb[42].mxu1 }
 0x267   :  { %v4423_v55 = vadd.f32 %v4422_v49, %v3051_v50  ;;  %v4424_v56 = vadd.f32 %v5848_v33, %v2476_v54  ;;  %v3054_v57 = vpop.f32.mrb[42].mxu0  ;;  %v2478_v0 = vpop.f32.mrb[43].mxu1 }
 0x268   :  { %4359 = vst [vmem:[%s6066_s3 + $0x48] sm:$0xff] %v4239_v52   ;;  %v3056_v58 = vpop.f32.mrb[43].mxu0 }
 0x269   :  { %v3310_v59 = vmul.f32 0.2, %v4423_v55  ;;  %v4425_v60 = vadd.f32 %v4424_v56, %v3054_v57  ;;  %vm3246_vm4 = vcmp.ge.f32.partialorder %v4423_v55, 0.0 }
 0x26b   :  { %vm3247_vm5 = vcmp.ge.f32.partialorder %v4425_v60, 0.0  ;;  %v3311_v61 = vmul.f32 0.2, %v4425_v60  ;;  %v3374_v63 = vsel %vm3246_vm4, %v4423_v55, %v3310_v59 }
 0x26c   :  { %v2481_v62 = vpop.f32.mrb[44].mxu1 }
 0x26d   :  { %v3375_v1 = vsel %vm3247_vm5, %v4425_v60, %v3311_v61  ;;  %v4426_v2 = vadd.f32 %v5848_v33, %v2481_v62  ;;  %v3059_v3 = vpop.f32.mrb[44].mxu0  ;;  %v2483_v4 = vpop.f32.mrb[45].mxu1 }
 0x26e   :  { %v4244_v5 = vpack.c.bf16 %v3375_v1, %v3374_v63  ;;  %v3061_v6 = vpop.f32.mrb[45].mxu0  ;;  %v2484_v7 = vpop.f32.mrb[46].mxu1 }
 0x26f   :  { %v4427_v8 = vadd.f32 %v4426_v2, %v3059_v3  ;;  %v4428_v9 = vadd.f32 %v5848_v33, %v2484_v7  ;;  %v3062_v10 = vpop.f32.mrb[46].mxu0  ;;  %v2486_v11 = vpop.f32.mrb[47].mxu1 }
 0x270   :  { %4360 = vst [vmem:[%s6066_s3 + $0x50] sm:$0xff] %v4244_v5   ;;  %v3064_v12 = vpop.f32.mrb[47].mxu0 }
 0x271   :  { %v3312_v13 = vmul.f32 0.2, %v4427_v8  ;;  %v4429_v14 = vadd.f32 %v4428_v9, %v3062_v10  ;;  %vm3248_vm6 = vcmp.ge.f32.partialorder %v4427_v8, 0.0 }
 0x273   :  { %vm3249_vm7 = vcmp.ge.f32.partialorder %v4429_v14, 0.0  ;;  %v3313_v15 = vmul.f32 0.2, %v4429_v14  ;;  %v3376_v17 = vsel %vm3248_vm6, %v4427_v8, %v3312_v13 }
 0x274   :  { %v2489_v16 = vpop.f32.mrb[48].mxu1 }
 0x275   :  { %v3377_v18 = vsel %vm3249_vm7, %v4429_v14, %v3313_v15  ;;  %v4430_v19 = vadd.f32 %v5848_v33, %v2489_v16  ;;  %v3067_v20 = vpop.f32.mrb[48].mxu0  ;;  %v2491_v21 = vpop.f32.mrb[49].mxu1 }
 0x276   :  { %v4249_v22 = vpack.c.bf16 %v3377_v18, %v3376_v17  ;;  %v3069_v23 = vpop.f32.mrb[49].mxu0  ;;  %v2492_v24 = vpop.f32.mrb[50].mxu1 }
 0x277   :  { %v4431_v25 = vadd.f32 %v4430_v19, %v3067_v20  ;;  %v4432_v26 = vadd.f32 %v5848_v33, %v2492_v24  ;;  %v3070_v27 = vpop.f32.mrb[50].mxu0  ;;  %v2494_v28 = vpop.f32.mrb[51].mxu1 }
 0x278   :  { %4361 = vst [vmem:[%s6066_s3 + $0x58] sm:$0xff] %v4249_v22   ;;  %v3072_v29 = vpop.f32.mrb[51].mxu0 }
 0x279   :  { %v3314_v30 = vmul.f32 0.2, %v4431_v25  ;;  %v4433_v31 = vadd.f32 %v4432_v26, %v3070_v27  ;;  %vm3250_vm8 = vcmp.ge.f32.partialorder %v4431_v25, 0.0 }
 0x27b   :  { %vm3251_vm9 = vcmp.ge.f32.partialorder %v4433_v31, 0.0  ;;  %v3315_v32 = vmul.f32 0.2, %v4433_v31  ;;  %v3378_v35 = vsel %vm3250_vm8, %v4431_v25, %v3314_v30 }
 0x27c   :  { %v2497_v34 = vpop.f32.mrb[52].mxu1 }
 0x27d   :  { %v3379_v36 = vsel %vm3251_vm9, %v4433_v31, %v3315_v32  ;;  %v4434_v37 = vadd.f32 %v5848_v33, %v2497_v34  ;;  %v3075_v38 = vpop.f32.mrb[52].mxu0  ;;  %v2499_v39 = vpop.f32.mrb[53].mxu1 }
 0x27e   :  { %v4254_v40 = vpack.c.bf16 %v3379_v36, %v3378_v35  ;;  %v3077_v41 = vpop.f32.mrb[53].mxu0  ;;  %v2500_v42 = vpop.f32.mrb[54].mxu1 }
 0x27f   :  { %v4435_v43 = vadd.f32 %v4434_v37, %v3075_v38  ;;  %v4436_v44 = vadd.f32 %v5848_v33, %v2500_v42  ;;  %v3078_v45 = vpop.f32.mrb[54].mxu0  ;;  %v2502_v46 = vpop.f32.mrb[55].mxu1 }
 0x280   :  { %4362 = vst [vmem:[%s6066_s3 + $0x60] sm:$0xff] %v4254_v40   ;;  %v3080_v47 = vpop.f32.mrb[55].mxu0 }
 0x281   :  { %v3316_v48 = vmul.f32 0.2, %v4435_v43  ;;  %v4437_v49 = vadd.f32 %v4436_v44, %v3078_v45  ;;  %vm3252_vm10 = vcmp.ge.f32.partialorder %v4435_v43, 0.0 }
 0x283   :  { %vm3253_vm11 = vcmp.ge.f32.partialorder %v4437_v49, 0.0  ;;  %v3317_v50 = vmul.f32 0.2, %v4437_v49  ;;  %v3380_v52 = vsel %vm3252_vm10, %v4435_v43, %v3316_v48 }
 0x284   :  { %v2505_v51 = vpop.f32.mrb[56].mxu1 }
 0x285   :  { %v3381_v53 = vsel %vm3253_vm11, %v4437_v49, %v3317_v50  ;;  %v4438_v54 = vadd.f32 %v5848_v33, %v2505_v51  ;;  %v3083_v55 = vpop.f32.mrb[56].mxu0  ;;  %v2507_v56 = vpop.f32.mrb[57].mxu1 }
 0x286   :  { %v4259_v57 = vpack.c.bf16 %v3381_v53, %v3380_v52  ;;  %v3085_v0 = vpop.f32.mrb[57].mxu0  ;;  %v2508_v58 = vpop.f32.mrb[58].mxu1 }
 0x287   :  { %v4439_v59 = vadd.f32 %v4438_v54, %v3083_v55  ;;  %v4440_v60 = vadd.f32 %v5848_v33, %v2508_v58  ;;  %v3086_v61 = vpop.f32.mrb[58].mxu0  ;;  %v2510_v62 = vpop.f32.mrb[59].mxu1 }
 0x288   :  { %4363 = vst [vmem:[%s6066_s3 + $0x68] sm:$0xff] %v4259_v57   ;;  %v3088_v63 = vpop.f32.mrb[59].mxu0 }
 0x289   :  { %v3318_v1 = vmul.f32 0.2, %v4439_v59  ;;  %v4441_v2 = vadd.f32 %v4440_v60, %v3086_v61  ;;  %vm3254_vm12 = vcmp.ge.f32.partialorder %v4439_v59, 0.0 }
 0x28b   :  { %vm3255_vm13 = vcmp.ge.f32.partialorder %v4441_v2, 0.0  ;;  %v3319_v3 = vmul.f32 0.2, %v4441_v2  ;;  %v3382_v5 = vsel %vm3254_vm12, %v4439_v59, %v3318_v1 }
 0x28c   :  { %v2513_v4 = vpop.f32.mrb[60].mxu1 }
 0x28d   :  { %v3383_v6 = vsel %vm3255_vm13, %v4441_v2, %v3319_v3  ;;  %v4442_v7 = vadd.f32 %v5848_v33, %v2513_v4  ;;  %v3091_v8 = vpop.f32.mrb[60].mxu0  ;;  %v2515_v9 = vpop.f32.mrb[61].mxu1 }
 0x28e   :  { %v4264_v10 = vpack.c.bf16 %v3383_v6, %v3382_v5  ;;  %v3093_v11 = vpop.f32.mrb[61].mxu0  ;;  %v2516_v12 = vpop.f32.mrb[62].mxu1 }
 0x28f   :  { %v4443_v13 = vadd.f32 %v4442_v7, %v3091_v8  ;;  %v4444_v14 = vadd.f32 %v5848_v33, %v2516_v12  ;;  %v3094_v15 = vpop.f32.mrb[62].mxu0  ;;  %v2518_v16 = vpop.f32.mrb[63].mxu1 }
 0x290   :  { %4364 = vst [vmem:[%s6066_s3 + $0x70] sm:$0xff] %v4264_v10   ;;  %v3096_v17 = vpop.f32.mrb[63].mxu0 }
 0x291   :  { %v3320_v18 = vmul.f32 0.2, %v4443_v13  ;;  %v4445_v19 = vadd.f32 %v4444_v14, %v3094_v15  ;;  %vm3256_vm14 = vcmp.ge.f32.partialorder %v4443_v13, 0.0 }
 0x293   :  { %vm3257_vm15 = vcmp.ge.f32.partialorder %v4445_v19, 0.0  ;;  %v3321_v20 = vmul.f32 0.2, %v4445_v19  ;;  %v3384_v22 = vsel %vm3256_vm14, %v4443_v13, %v3320_v18 }
 0x294   :  { %v2521_v21 = vpop.f32.mrb[64].mxu1 }
 0x295   :  { %v3385_v23 = vsel %vm3257_vm15, %v4445_v19, %v3321_v20  ;;  %v4446_v24 = vadd.f32 %v5848_v33, %v2521_v21  ;;  %v3099_v25 = vpop.f32.mrb[64].mxu0  ;;  %v2523_v26 = vpop.f32.mrb[65].mxu1 }
 0x296   :  { %v4269_v27 = vpack.c.bf16 %v3385_v23, %v3384_v22  ;;  %v3101_v28 = vpop.f32.mrb[65].mxu0  ;;  %v2524_v29 = vpop.f32.mrb[66].mxu1 }
 0x297   :  { %v4447_v30 = vadd.f32 %v4446_v24, %v3099_v25  ;;  %v4448_v31 = vadd.f32 %v5848_v33, %v2524_v29  ;;  %v3102_v32 = vpop.f32.mrb[66].mxu0  ;;  %v2526_v34 = vpop.f32.mrb[67].mxu1 }
 0x298   :  { %4365 = vst [vmem:[%s6066_s3 + $0x78] sm:$0xff] %v4269_v27   ;;  %v3104_v35 = vpop.f32.mrb[67].mxu0 }
 0x299   :  { %v3322_v36 = vmul.f32 0.2, %v4447_v30  ;;  %v4449_v37 = vadd.f32 %v4448_v31, %v3102_v32  ;;  %vm3258_vm0 = vcmp.ge.f32.partialorder %v4447_v30, 0.0 }
 0x29b   :  { %vm3259_vm1 = vcmp.ge.f32.partialorder %v4449_v37, 0.0  ;;  %v3323_v38 = vmul.f32 0.2, %v4449_v37  ;;  %v3386_v40 = vsel %vm3258_vm0, %v4447_v30, %v3322_v36 }
 0x29c   :  { %v2529_v39 = vpop.f32.mrb[68].mxu1 }
 0x29d   :  { %v3387_v41 = vsel %vm3259_vm1, %v4449_v37, %v3323_v38  ;;  %v4450_v42 = vadd.f32 %v5848_v33, %v2529_v39  ;;  %v3107_v43 = vpop.f32.mrb[68].mxu0  ;;  %v2531_v44 = vpop.f32.mrb[69].mxu1 }
 0x29e   :  { %v4274_v45 = vpack.c.bf16 %v3387_v41, %v3386_v40  ;;  %v3109_v46 = vpop.f32.mrb[69].mxu0  ;;  %v2532_v47 = vpop.f32.mrb[70].mxu1 }
 0x29f   :  { %v4451_v48 = vadd.f32 %v4450_v42, %v3107_v43  ;;  %v4452_v49 = vadd.f32 %v5848_v33, %v2532_v47  ;;  %v3110_v50 = vpop.f32.mrb[70].mxu0  ;;  %v2534_v51 = vpop.f32.mrb[71].mxu1 }
 0x2a0   :  { %4366 = vst [vmem:[%s6066_s3 + $0x80] sm:$0xff] %v4274_v45   ;;  %v3112_v52 = vpop.f32.mrb[71].mxu0 }
 0x2a1   :  { %v3324_v53 = vmul.f32 0.2, %v4451_v48  ;;  %v4453_v54 = vadd.f32 %v4452_v49, %v3110_v50  ;;  %vm3260_vm2 = vcmp.ge.f32.partialorder %v4451_v48, 0.0 }
 0x2a3   :  { %vm3261_vm3 = vcmp.ge.f32.partialorder %v4453_v54, 0.0  ;;  %v3325_v55 = vmul.f32 0.2, %v4453_v54  ;;  %v3388_v57 = vsel %vm3260_vm2, %v4451_v48, %v3324_v53 }
 0x2a4   :  { %v2537_v56 = vpop.f32.mrb[72].mxu1 }
 0x2a5   :  { %v3389_v0 = vsel %vm3261_vm3, %v4453_v54, %v3325_v55  ;;  %v4454_v58 = vadd.f32 %v5848_v33, %v2537_v56  ;;  %v3115_v59 = vpop.f32.mrb[72].mxu0  ;;  %v2539_v60 = vpop.f32.mrb[73].mxu1 }
 0x2a6   :  { %v4279_v61 = vpack.c.bf16 %v3389_v0, %v3388_v57  ;;  %v3117_v62 = vpop.f32.mrb[73].mxu0  ;;  %v2540_v63 = vpop.f32.mrb[74].mxu1 }
 0x2a7   :  { %v4455_v1 = vadd.f32 %v4454_v58, %v3115_v59  ;;  %v4456_v2 = vadd.f32 %v5848_v33, %v2540_v63  ;;  %v3118_v3 = vpop.f32.mrb[74].mxu0  ;;  %v2542_v4 = vpop.f32.mrb[75].mxu1 }
 0x2a8   :  { %4367 = vst [vmem:[%s6066_s3 + $0x88] sm:$0xff] %v4279_v61   ;;  %v3120_v5 = vpop.f32.mrb[75].mxu0 }
 0x2a9   :  { %v3326_v6 = vmul.f32 0.2, %v4455_v1  ;;  %v4457_v7 = vadd.f32 %v4456_v2, %v3118_v3  ;;  %vm3262_vm4 = vcmp.ge.f32.partialorder %v4455_v1, 0.0 }
 0x2ab   :  { %vm3263_vm5 = vcmp.ge.f32.partialorder %v4457_v7, 0.0  ;;  %v3327_v8 = vmul.f32 0.2, %v4457_v7  ;;  %v3390_v10 = vsel %vm3262_vm4, %v4455_v1, %v3326_v6 }
 0x2ac   :  { %v2545_v9 = vpop.f32.mrb[76].mxu1 }
 0x2ad   :  { %v3391_v11 = vsel %vm3263_vm5, %v4457_v7, %v3327_v8  ;;  %v4458_v12 = vadd.f32 %v5848_v33, %v2545_v9  ;;  %v3123_v13 = vpop.f32.mrb[76].mxu0  ;;  %v2547_v14 = vpop.f32.mrb[77].mxu1 }
 0x2ae   :  { %v4284_v15 = vpack.c.bf16 %v3391_v11, %v3390_v10  ;;  %v3125_v16 = vpop.f32.mrb[77].mxu0  ;;  %v2548_v17 = vpop.f32.mrb[78].mxu1 }
 0x2af   :  { %v4459_v18 = vadd.f32 %v4458_v12, %v3123_v13  ;;  %v4460_v19 = vadd.f32 %v5848_v33, %v2548_v17  ;;  %v3126_v20 = vpop.f32.mrb[78].mxu0  ;;  %v2550_v21 = vpop.f32.mrb[79].mxu1  ;;  %v6013_v17 = vld [vmem:[%s6065_s2] ss:$0 sm:$0xff] }
 0x2b0   :  { %4368 = vst [vmem:[%s6066_s3 + $0x90] sm:$0xff] %v4284_v15   ;;  %v3128_v22 = vpop.f32.mrb[79].mxu0 }
 0x2b1   :  { %v3328_v23 = vmul.f32 0.2, %v4459_v18  ;;  %v4461_v24 = vadd.f32 %v4460_v19, %v3126_v20  ;;  %vm3264_vm6 = vcmp.ge.f32.partialorder %v4459_v18, 0.0 }
 0x2b3   :  { %vm3265_vm7 = vcmp.ge.f32.partialorder %v4461_v24, 0.0  ;;  %v3329_v25 = vmul.f32 0.2, %v4461_v24  ;;  %v3392_v27 = vsel %vm3264_vm6, %v4459_v18, %v3328_v23 }
 0x2b4   :  { %v2553_v26 = vpop.f32.mrb[80].mxu1 }
 0x2b5   :  { %v3393_v28 = vsel %vm3265_vm7, %v4461_v24, %v3329_v25  ;;  %v4462_v29 = vadd.f32 %v5848_v33, %v2553_v26  ;;  %v3131_v30 = vpop.f32.mrb[80].mxu0  ;;  %v2555_v31 = vpop.f32.mrb[81].mxu1 }
 0x2b6   :  { %v4289_v32 = vpack.c.bf16 %v3393_v28, %v3392_v27  ;;  %v3133_v34 = vpop.f32.mrb[81].mxu0  ;;  %v2556_v35 = vpop.f32.mrb[82].mxu1 }
 0x2b7   :  { %v4463_v36 = vadd.f32 %v4462_v29, %v3131_v30  ;;  %v4464_v37 = vadd.f32 %v5848_v33, %v2556_v35  ;;  %v3134_v38 = vpop.f32.mrb[82].mxu0  ;;  %v2558_v39 = vpop.f32.mrb[83].mxu1 }
 0x2b8   :  { %4369 = vst [vmem:[%s6066_s3 + $0x98] sm:$0xff] %v4289_v32   ;;  %v3136_v40 = vpop.f32.mrb[83].mxu0 }
 0x2b9   :  { %v3330_v41 = vmul.f32 0.2, %v4463_v36  ;;  %v4465_v42 = vadd.f32 %v4464_v37, %v3134_v38  ;;  %vm3266_vm8 = vcmp.ge.f32.partialorder %v4463_v36, 0.0 }
 0x2bb   :  { %vm3267_vm9 = vcmp.ge.f32.partialorder %v4465_v42, 0.0  ;;  %v3331_v43 = vmul.f32 0.2, %v4465_v42  ;;  %v3394_v45 = vsel %vm3266_vm8, %v4463_v36, %v3330_v41 }
 0x2bc   :  { %v2561_v44 = vpop.f32.mrb[84].mxu1 }
 0x2bd   :  { %v3395_v46 = vsel %vm3267_vm9, %v4465_v42, %v3331_v43  ;;  %v4466_v47 = vadd.f32 %v5848_v33, %v2561_v44  ;;  %v3139_v48 = vpop.f32.mrb[84].mxu0  ;;  %v2563_v49 = vpop.f32.mrb[85].mxu1 }
 0x2be   :  { %v4294_v50 = vpack.c.bf16 %v3395_v46, %v3394_v45  ;;  %v3141_v51 = vpop.f32.mrb[85].mxu0  ;;  %v2564_v52 = vpop.f32.mrb[86].mxu1 }
 0x2bf   :  { %v4467_v53 = vadd.f32 %v4466_v47, %v3139_v48  ;;  %v4468_v54 = vadd.f32 %v5848_v33, %v2564_v52  ;;  %v3142_v55 = vpop.f32.mrb[86].mxu0  ;;  %v2566_v56 = vpop.f32.mrb[87].mxu1 }
 0x2c0   :  { %4370 = vst [vmem:[%s6066_s3 + $0xa0] sm:$0xff] %v4294_v50   ;;  %v3144_v57 = vpop.f32.mrb[87].mxu0 }
 0x2c1   :  { %v3332_v0 = vmul.f32 0.2, %v4467_v53  ;;  %v4469_v58 = vadd.f32 %v4468_v54, %v3142_v55  ;;  %vm3268_vm10 = vcmp.ge.f32.partialorder %v4467_v53, 0.0 }
 0x2c3   :  { %vm3269_vm11 = vcmp.ge.f32.partialorder %v4469_v58, 0.0  ;;  %v3333_v59 = vmul.f32 0.2, %v4469_v58  ;;  %v3396_v61 = vsel %vm3268_vm10, %v4467_v53, %v3332_v0 }
 0x2c4   :  { %v2569_v60 = vpop.f32.mrb[88].mxu1 }
 0x2c5   :  { %v3397_v62 = vsel %vm3269_vm11, %v4469_v58, %v3333_v59  ;;  %v4470_v63 = vadd.f32 %v5848_v33, %v2569_v60  ;;  %v3147_v1 = vpop.f32.mrb[88].mxu0  ;;  %v2571_v2 = vpop.f32.mrb[89].mxu1 }
 0x2c6   :  { %v4299_v3 = vpack.c.bf16 %v3397_v62, %v3396_v61  ;;  %v3149_v4 = vpop.f32.mrb[89].mxu0  ;;  %v2572_v5 = vpop.f32.mrb[90].mxu1 }
 0x2c7   :  { %v4471_v6 = vadd.f32 %v4470_v63, %v3147_v1  ;;  %v4472_v7 = vadd.f32 %v5848_v33, %v2572_v5  ;;  %v3150_v8 = vpop.f32.mrb[90].mxu0  ;;  %v2574_v9 = vpop.f32.mrb[91].mxu1 }
 0x2c8   :  { %4371 = vst [vmem:[%s6066_s3 + $0xa8] sm:$0xff] %v4299_v3   ;;  %v3152_v10 = vpop.f32.mrb[91].mxu0 }
 0x2c9   :  { %v3334_v11 = vmul.f32 0.2, %v4471_v6  ;;  %v4473_v12 = vadd.f32 %v4472_v7, %v3150_v8  ;;  %vm3270_vm12 = vcmp.ge.f32.partialorder %v4471_v6, 0.0 }
 0x2cb   :  { %vm3271_vm13 = vcmp.ge.f32.partialorder %v4473_v12, 0.0  ;;  %v3335_v13 = vmul.f32 0.2, %v4473_v12  ;;  %v3398_v15 = vsel %vm3270_vm12, %v4471_v6, %v3334_v11 }
 0x2cc   :  { %v2577_v14 = vpop.f32.mrb[92].mxu1 }
 0x2cd   :  { %v3399_v16 = vsel %vm3271_vm13, %v4473_v12, %v3335_v13  ;;  %v4474_v33 = vadd.f32 %v6013_v17, %v2577_v14  ;;  %v3155_v18 = vpop.f32.mrb[92].mxu0  ;;  %v2579_v19 = vpop.f32.mrb[93].mxu1 }
 0x2ce   :  { %v4304_v20 = vpack.c.bf16 %v3399_v16, %v3398_v15  ;;  %v3157_v21 = vpop.f32.mrb[93].mxu0  ;;  %v2580_v22 = vpop.f32.mrb[94].mxu1 }
 0x2cf   :  { %v4475_v23 = vadd.f32 %v4474_v33, %v3155_v18  ;;  %v4476_v24 = vadd.f32 %v6013_v17, %v2580_v22  ;;  %v3158_v25 = vpop.f32.mrb[94].mxu0  ;;  %v2582_v26 = vpop.f32.mrb[95].mxu1 }
 0x2d0   :  { %4372 = vst [vmem:[%s6066_s3 + $0xb0] sm:$0xff] %v4304_v20   ;;  %v3160_v27 = vpop.f32.mrb[95].mxu0 }
 0x2d1   :  { %v3336_v28 = vmul.f32 0.2, %v4475_v23  ;;  %v4477_v29 = vadd.f32 %v4476_v24, %v3158_v25  ;;  %vm3272_vm14 = vcmp.ge.f32.partialorder %v4475_v23, 0.0 }
 0x2d3   :  { %vm3273_vm15 = vcmp.ge.f32.partialorder %v4477_v29, 0.0  ;;  %v3337_v30 = vmul.f32 0.2, %v4477_v29  ;;  %v3400_v32 = vsel %vm3272_vm14, %v4475_v23, %v3336_v28 }
 0x2d4   :  { %v2585_v31 = vpop.f32.mrb[96].mxu1 }
 0x2d5   :  { %v3401_v34 = vsel %vm3273_vm15, %v4477_v29, %v3337_v30  ;;  %v4478_v35 = vadd.f32 %v6013_v17, %v2585_v31  ;;  %v3163_v36 = vpop.f32.mrb[96].mxu0  ;;  %v2587_v37 = vpop.f32.mrb[97].mxu1 }
 0x2d6   :  { %v4309_v38 = vpack.c.bf16 %v3401_v34, %v3400_v32  ;;  %v3165_v39 = vpop.f32.mrb[97].mxu0  ;;  %v2588_v40 = vpop.f32.mrb[98].mxu1 }
 0x2d7   :  { %v4479_v41 = vadd.f32 %v4478_v35, %v3163_v36  ;;  %v4480_v42 = vadd.f32 %v6013_v17, %v2588_v40  ;;  %v3166_v43 = vpop.f32.mrb[98].mxu0  ;;  %v2590_v44 = vpop.f32.mrb[99].mxu1 }
 0x2d8   :  { %4373 = vst [vmem:[%s6066_s3 + $0xb8] sm:$0xff] %v4309_v38   ;;  %v3168_v45 = vpop.f32.mrb[99].mxu0 }
 0x2d9   :  { %v3338_v46 = vmul.f32 0.2, %v4479_v41  ;;  %v4481_v47 = vadd.f32 %v4480_v42, %v3166_v43  ;;  %vm3274_vm0 = vcmp.ge.f32.partialorder %v4479_v41, 0.0 }
 0x2db   :  { %vm3275_vm1 = vcmp.ge.f32.partialorder %v4481_v47, 0.0  ;;  %v3339_v48 = vmul.f32 0.2, %v4481_v47  ;;  %v3402_v50 = vsel %vm3274_vm0, %v4479_v41, %v3338_v46 }
 0x2dc   :  { %v2593_v49 = vpop.f32.mrb[100].mxu1 }
 0x2dd   :  { %v3403_v51 = vsel %vm3275_vm1, %v4481_v47, %v3339_v48  ;;  %v4482_v52 = vadd.f32 %v6013_v17, %v2593_v49  ;;  %v3171_v53 = vpop.f32.mrb[100].mxu0  ;;  %v2595_v54 = vpop.f32.mrb[101].mxu1 }
 0x2de   :  { %v4314_v55 = vpack.c.bf16 %v3403_v51, %v3402_v50  ;;  %v3173_v56 = vpop.f32.mrb[101].mxu0  ;;  %v2596_v57 = vpop.f32.mrb[102].mxu1 }
 0x2df   :  { %v4483_v0 = vadd.f32 %v4482_v52, %v3171_v53  ;;  %v4484_v58 = vadd.f32 %v6013_v17, %v2596_v57  ;;  %v3174_v59 = vpop.f32.mrb[102].mxu0  ;;  %v2598_v60 = vpop.f32.mrb[103].mxu1 }
 0x2e0   :  { %4374 = vst [vmem:[%s6066_s3 + $0xc0] sm:$0xff] %v4314_v55   ;;  %v3176_v61 = vpop.f32.mrb[103].mxu0 }
 0x2e1   :  { %v3340_v62 = vmul.f32 0.2, %v4483_v0  ;;  %v4485_v63 = vadd.f32 %v4484_v58, %v3174_v59  ;;  %vm3276_vm2 = vcmp.ge.f32.partialorder %v4483_v0, 0.0 }
 0x2e3   :  { %vm3277_vm3 = vcmp.ge.f32.partialorder %v4485_v63, 0.0  ;;  %v3341_v1 = vmul.f32 0.2, %v4485_v63  ;;  %v3404_v3 = vsel %vm3276_vm2, %v4483_v0, %v3340_v62 }
 0x2e4   :  { %v2601_v2 = vpop.f32.mrb[104].mxu1 }
 0x2e5   :  { %v3405_v4 = vsel %vm3277_vm3, %v4485_v63, %v3341_v1  ;;  %v4486_v5 = vadd.f32 %v6013_v17, %v2601_v2  ;;  %v3179_v6 = vpop.f32.mrb[104].mxu0  ;;  %v2603_v7 = vpop.f32.mrb[105].mxu1 }
 0x2e6   :  { %v4319_v8 = vpack.c.bf16 %v3405_v4, %v3404_v3  ;;  %v3181_v9 = vpop.f32.mrb[105].mxu0  ;;  %v2604_v10 = vpop.f32.mrb[106].mxu1 }
 0x2e7   :  { %v4487_v11 = vadd.f32 %v4486_v5, %v3179_v6  ;;  %v4488_v12 = vadd.f32 %v6013_v17, %v2604_v10  ;;  %v3182_v13 = vpop.f32.mrb[106].mxu0  ;;  %v2606_v14 = vpop.f32.mrb[107].mxu1 }
 0x2e8   :  { %4375 = vst [vmem:[%s6066_s3 + $0xc8] sm:$0xff] %v4319_v8   ;;  %v3184_v15 = vpop.f32.mrb[107].mxu0 }
 0x2e9   :  { %v3342_v16 = vmul.f32 0.2, %v4487_v11  ;;  %v4489_v33 = vadd.f32 %v4488_v12, %v3182_v13  ;;  %vm3278_vm4 = vcmp.ge.f32.partialorder %v4487_v11, 0.0 }
 0x2eb   :  { %vm3279_vm5 = vcmp.ge.f32.partialorder %v4489_v33, 0.0  ;;  %v3343_v18 = vmul.f32 0.2, %v4489_v33  ;;  %v3406_v20 = vsel %vm3278_vm4, %v4487_v11, %v3342_v16 }
 0x2ec   :  { %v2609_v19 = vpop.f32.mrb[108].mxu1 }
 0x2ed   :  { %v3407_v21 = vsel %vm3279_vm5, %v4489_v33, %v3343_v18  ;;  %v4490_v22 = vadd.f32 %v6013_v17, %v2609_v19  ;;  %v3187_v23 = vpop.f32.mrb[108].mxu0  ;;  %v2611_v24 = vpop.f32.mrb[109].mxu1 }
 0x2ee   :  { %v4324_v25 = vpack.c.bf16 %v3407_v21, %v3406_v20  ;;  %v3189_v26 = vpop.f32.mrb[109].mxu0  ;;  %v2612_v27 = vpop.f32.mrb[110].mxu1 }
 0x2ef   :  { %v4491_v28 = vadd.f32 %v4490_v22, %v3187_v23  ;;  %v4492_v29 = vadd.f32 %v6013_v17, %v2612_v27  ;;  %v3190_v30 = vpop.f32.mrb[110].mxu0  ;;  %v2614_v31 = vpop.f32.mrb[111].mxu1 }
 0x2f0   :  { %4376 = vst [vmem:[%s6066_s3 + $0xd0] sm:$0xff] %v4324_v25   ;;  %v3192_v32 = vpop.f32.mrb[111].mxu0 }
 0x2f1   :  { %v3344_v34 = vmul.f32 0.2, %v4491_v28  ;;  %v4493_v35 = vadd.f32 %v4492_v29, %v3190_v30  ;;  %vm3280_vm6 = vcmp.ge.f32.partialorder %v4491_v28, 0.0 }
 0x2f3   :  { %vm3281_vm7 = vcmp.ge.f32.partialorder %v4493_v35, 0.0  ;;  %v3345_v36 = vmul.f32 0.2, %v4493_v35  ;;  %v3408_v38 = vsel %vm3280_vm6, %v4491_v28, %v3344_v34 }
 0x2f4   :  { %v2617_v37 = vpop.f32.mrb[112].mxu1 }
 0x2f5   :  { %v3409_v39 = vsel %vm3281_vm7, %v4493_v35, %v3345_v36  ;;  %v4494_v40 = vadd.f32 %v6013_v17, %v2617_v37  ;;  %v3195_v41 = vpop.f32.mrb[112].mxu0  ;;  %v2619_v42 = vpop.f32.mrb[113].mxu1 }
 0x2f6   :  { %v4329_v43 = vpack.c.bf16 %v3409_v39, %v3408_v38  ;;  %v3197_v44 = vpop.f32.mrb[113].mxu0  ;;  %v2620_v45 = vpop.f32.mrb[114].mxu1 }
 0x2f7   :  { %v4495_v46 = vadd.f32 %v4494_v40, %v3195_v41  ;;  %v4496_v47 = vadd.f32 %v6013_v17, %v2620_v45  ;;  %v3198_v48 = vpop.f32.mrb[114].mxu0  ;;  %v2622_v49 = vpop.f32.mrb[115].mxu1 }
 0x2f8   :  { %4377 = vst [vmem:[%s6066_s3 + $0xd8] sm:$0xff] %v4329_v43   ;;  %v3200_v50 = vpop.f32.mrb[115].mxu0 }
 0x2f9   :  { %v3346_v51 = vmul.f32 0.2, %v4495_v46  ;;  %v4497_v52 = vadd.f32 %v4496_v47, %v3198_v48  ;;  %vm3282_vm8 = vcmp.ge.f32.partialorder %v4495_v46, 0.0 }
 0x2fb   :  { %vm3283_vm9 = vcmp.ge.f32.partialorder %v4497_v52, 0.0  ;;  %v3347_v53 = vmul.f32 0.2, %v4497_v52  ;;  %v3410_v55 = vsel %vm3282_vm8, %v4495_v46, %v3346_v51 }
 0x2fc   :  { %v2625_v54 = vpop.f32.mrb[116].mxu1 }
 0x2fd   :  { %v3411_v56 = vsel %vm3283_vm9, %v4497_v52, %v3347_v53  ;;  %v4498_v57 = vadd.f32 %v6013_v17, %v2625_v54  ;;  %v3203_v0 = vpop.f32.mrb[116].mxu0  ;;  %v2627_v58 = vpop.f32.mrb[117].mxu1 }
 0x2fe   :  { %v4334_v59 = vpack.c.bf16 %v3411_v56, %v3410_v55  ;;  %v3205_v60 = vpop.f32.mrb[117].mxu0  ;;  %v2628_v61 = vpop.f32.mrb[118].mxu1 }
 0x2ff   :  { %v4499_v62 = vadd.f32 %v4498_v57, %v3203_v0  ;;  %v4500_v63 = vadd.f32 %v6013_v17, %v2628_v61  ;;  %v3206_v1 = vpop.f32.mrb[118].mxu0  ;;  %v2630_v2 = vpop.f32.mrb[119].mxu1 }
 0x300   :  { %4378 = vst [vmem:[%s6066_s3 + $0xe0] sm:$0xff] %v4334_v59   ;;  %v3208_v3 = vpop.f32.mrb[119].mxu0 }
 0x301   :  { %v3348_v4 = vmul.f32 0.2, %v4499_v62  ;;  %v4501_v5 = vadd.f32 %v4500_v63, %v3206_v1  ;;  %vm3284_vm10 = vcmp.ge.f32.partialorder %v4499_v62, 0.0 }
 0x303   :  { %vm3285_vm11 = vcmp.ge.f32.partialorder %v4501_v5, 0.0  ;;  %v3349_v6 = vmul.f32 0.2, %v4501_v5  ;;  %v3412_v8 = vsel %vm3284_vm10, %v4499_v62, %v3348_v4 }
 0x304   :  { %v2633_v7 = vpop.f32.mrb[120].mxu1 }
 0x305   :  { %v3413_v9 = vsel %vm3285_vm11, %v4501_v5, %v3349_v6  ;;  %v4502_v10 = vadd.f32 %v6013_v17, %v2633_v7  ;;  %v3211_v11 = vpop.f32.mrb[120].mxu0  ;;  %v2635_v12 = vpop.f32.mrb[121].mxu1 }
 0x306   :  { %v4339_v13 = vpack.c.bf16 %v3413_v9, %v3412_v8  ;;  %v3213_v14 = vpop.f32.mrb[121].mxu0  ;;  %v2636_v15 = vpop.f32.mrb[122].mxu1 }
 0x307   :  { %v4503_v16 = vadd.f32 %v4502_v10, %v3211_v11  ;;  %v4504_v33 = vadd.f32 %v6013_v17, %v2636_v15  ;;  %v3214_v18 = vpop.f32.mrb[122].mxu0  ;;  %v2638_v19 = vpop.f32.mrb[123].mxu1 }
 0x308   :  { %4379 = vst [vmem:[%s6066_s3 + $0xe8] sm:$0xff] %v4339_v13   ;;  %v3216_v20 = vpop.f32.mrb[123].mxu0 }
 0x309   :  { %v3350_v21 = vmul.f32 0.2, %v4503_v16  ;;  %v4505_v22 = vadd.f32 %v4504_v33, %v3214_v18  ;;  %vm3286_vm12 = vcmp.ge.f32.partialorder %v4503_v16, 0.0 }
 0x30b   :  { %vm3287_vm13 = vcmp.ge.f32.partialorder %v4505_v22, 0.0  ;;  %v3351_v23 = vmul.f32 0.2, %v4505_v22  ;;  %v3414_v25 = vsel %vm3286_vm12, %v4503_v16, %v3350_v21 }
 0x30c   :  { %v2641_v24 = vpop.f32.mrb[124].mxu1 }
 0x30d   :  { %v3415_v26 = vsel %vm3287_vm13, %v4505_v22, %v3351_v23  ;;  %v4506_v27 = vadd.f32 %v6013_v17, %v2641_v24  ;;  %v3219_v28 = vpop.f32.mrb[124].mxu0  ;;  %v2643_v29 = vpop.f32.mrb[125].mxu1 }
 0x30e   :  { %v4344_v30 = vpack.c.bf16 %v3415_v26, %v3414_v25  ;;  %v3221_v31 = vpop.f32.mrb[125].mxu0  ;;  %v2644_v32 = vpop.f32.mrb[126].mxu1 }
 0x30f   :  { %v4507_v34 = vadd.f32 %v4506_v27, %v3219_v28  ;;  %v4508_v35 = vadd.f32 %v6013_v17, %v2644_v32  ;;  %v3222_v36 = vpop.f32.mrb[126].mxu0  ;;  %v2646_v37 = vpop.f32.mrb[127].mxu1 }
 0x310   :  { %4380 = vst [vmem:[%s6066_s3 + $0xf0] sm:$0xff] %v4344_v30   ;;  %v3224_v38 = vpop.f32.mrb[127].mxu0 }
 0x311   :  { %v3352_v39 = vmul.f32 0.2, %v4507_v34  ;;  %v4509_v40 = vadd.f32 %v4508_v35, %v3222_v36  ;;  %vm3288_vm14 = vcmp.ge.f32.partialorder %v4507_v34, 0.0 }
 0x313   :  { %vm3289_vm15 = vcmp.ge.f32.partialorder %v4509_v40, 0.0  ;;  %v3353_v41 = vmul.f32 0.2, %v4509_v40  ;;  %v3416_v42 = vsel %vm3288_vm14, %v4507_v34, %v3352_v39 }
 0x315   :  { %v3417_v43 = vsel %vm3289_vm15, %v4509_v40, %v3353_v41 }
 0x316   :  { %v4349_v44 = vpack.c.bf16 %v3417_v43, %v3416_v42 }
 0x318   :  { %4381 = vst [vmem:[%s6066_s3 + $0xf8] sm:$0xff] %v4349_v44  }

// kernel: patch_discriminator70.8
= control target key start
LH: loop header
LB: loop body
LE: loop exit
PB: predicated region body
PF: predicated region fallthrough
CT: control target
= control target key end

     0   :  { %s3915_s9 = smov 0   ;;  %s3917_s10 = smov 0   ;;  %s4952_s0 = inlined_call_operand.vmem [shape: bf16[2,64,2048], index: 0, kind: input, shape index: {}]   ;;  %s4953_s1 = inlined_call_operand.vmem [shape: bf16[2048,256], index: 1, kind: input, shape index: {}]   ;;  %s4954_s2 = inlined_call_operand.vmem [shape: bf16[2,64,256], index: 2, kind: output, shape index: {}]  }
   0x1   :  { %s3919_s11 = smov 0  }
   0x2 LB: > { %s24_s12 = sadd.s32 1, %s3894_s10  ;;  %p3007_p0 = scmp.ge.s32.totalorder %s3898_s11, 1  ;;  %s3898_s11 = sphi %s3919_s11, %s12_s11   ;;  %s3894_s10 = sphi %s3917_s10, %s4956_s10   ;;  %s3890_s9 = sphi %s3915_s9, %s4955_s9  }
   0x3   : > { %p26_p1 = scmp.ge.s32.totalorder %s24_s12, 2  ;;  %p143_p2 = scmp.lt.s32.totalorder %s3898_s11, 3 }
   0x5   : > { %s4958_s12 = smov (%p26_p1, %s24_s12), 0  ;;  %p144_p3 = pnand %p3007_p0, %p143_p2 }
   0x6   : > { %v3488_v0 = vld [vmem:[%s4953_s1 + $0x4] ss:$8 sps:$4 sm:$0xff] (!%p144_p3)   ;;  %v3492_v2 = vld [vmem:[%s4953_s1] ss:$8 sps:$4 sm:$0xff] (!%p144_p3)   ;;  %v3494_v4 = vld [vmem:[%s4953_s1 + $0x14] ss:$8 sps:$4 sm:$0xff] (!%p144_p3)  }
   0x7   : > { %147 = sbr.rel (%p144_p3) target bundleno = 559 (0x22f), region = 28  ;;  %v3490_v1 = vld [vmem:[%s4953_s1 + $0x404] ss:$8 sps:$4 sm:$0xff] (!%p144_p3)   ;;  %2117 = vmatprep.subr.bf16.mxu1 (!%p144_p3), %v3488_v0  ;;  %v3493_v3 = vld [vmem:[%s4953_s1 + $0x400] ss:$8 sps:$4 sm:$0xff] (!%p144_p3)   ;;  %p176_p4 = scmp.lt.s32.totalorder (!%p144_p3), %s3890_s9, 1 }
   0x8   : > { %2409 = vmatprep.subr.bf16.mxu0 (!%p144_p3), %v3490_v1  ;;  %2118 = vmatpush1.bf16.msra.mxu1 (!%p144_p3), %v3492_v2  ;;  %v3496_v5 = vld [vmem:[%s4953_s1 + $0x414] ss:$8 sps:$4 sm:$0xff] (!%p144_p3)   ;;  %v3498_v6 = vld [vmem:[%s4953_s1 + $0x10] ss:$8 sps:$4 sm:$0xff] (!%p144_p3)   ;;  %v3500_v8 = vld [vmem:[%s4953_s1 + $0x24] ss:$8 sps:$4 sm:$0xff] (!%p144_p3)  }
   0x9   : > { %2410 = vmatpush1.bf16.msra.mxu0 (!%p144_p3), %v3493_v3  ;;  %2119 = vmatprep.subr.bf16.mxu1 (!%p144_p3), %v3494_v4  ;;  %v3499_v7 = vld [vmem:[%s4953_s1 + $0x410] ss:$8 sps:$4 sm:$0xff] (!%p144_p3)   ;;  %v3502_v9 = vld [vmem:[%s4953_s1 + $0x424] ss:$8 sps:$4 sm:$0xff] (!%p144_p3)   ;;  %v3504_v10 = vld [vmem:[%s4953_s1 + $0x20] ss:$8 sps:$4 sm:$0xff] (!%p144_p3)  }
   0xa   : > { %2411 = vmatprep.subr.bf16.mxu0 (!%p144_p3), %v3496_v5  ;;  %v3505_v11 = vld [vmem:[%s4953_s1 + $0x420] ss:$8 sps:$4 sm:$0xff] (!%p144_p3)   ;;  %v3506_v12 = vld [vmem:[%s4953_s1 + $0x34] ss:$8 sps:$4 sm:$0xff] (!%p144_p3)   ;;  %v3510_v14 = vld [vmem:[%s4953_s1 + $0x30] ss:$8 sps:$4 sm:$0xff] (!%p144_p3)  }
   0xb   : > { %v3508_v13 = vld [vmem:[%s4953_s1 + $0x434] ss:$8 sps:$4 sm:$0xff] (!%p144_p3)   ;;  %v3511_v15 = vld [vmem:[%s4953_s1 + $0x430] ss:$8 sps:$4 sm:$0xff] (!%p144_p3)   ;;  %v3512_v16 = vld [vmem:[%s4953_s1 + $0x44] ss:$8 sps:$4 sm:$0xff] (!%p144_p3)  }
   0xc   : > { %2120 = vmatpush1.bf16.msra.mxu1 (!%p144_p3), %v3498_v6  ;;  %v3514_v17 = vld [vmem:[%s4953_s1 + $0x444] ss:$8 sps:$4 sm:$0xff] (!%p144_p3)   ;;  %v3516_v18 = vld [vmem:[%s4953_s1 + $0x40] ss:$8 sps:$4 sm:$0xff] (!%p144_p3)   ;;  %v3518_v20 = vld [vmem:[%s4953_s1 + $0x54] ss:$8 sps:$4 sm:$0xff] (!%p144_p3)  }
   0xd   : > { %2412 = vmatpush1.bf16.msra.mxu0 (!%p144_p3), %v3499_v7  ;;  %2121 = vmatprep.subr.bf16.mxu1 (!%p144_p3), %v3500_v8  ;;  %v3517_v19 = vld [vmem:[%s4953_s1 + $0x440] ss:$8 sps:$4 sm:$0xff] (!%p144_p3)   ;;  %v3520_v21 = vld [vmem:[%s4953_s1 + $0x454] ss:$8 sps:$4 sm:$0xff] (!%p144_p3)   ;;  %v3522_v22 = vld [vmem:[%s4953_s1 + $0x50] ss:$8 sps:$4 sm:$0xff] (!%p144_p3)  }
   0xe   : > { %2413 = vmatprep.subr.bf16.mxu0 %v3502_v9  ;;  %v3523_v23 = vld [vmem:[%s4953_s1 + $0x450] ss:$8 sps:$4 sm:$0xff]   ;;  %v3524_v24 = vld [vmem:[%s4953_s1 + $0x64] ss:$8 sps:$4 sm:$0xff]   ;;  %v3528_v26 = vld [vmem:[%s4953_s1 + $0x60] ss:$8 sps:$4 sm:$0xff]  }
   0xf   : > { %v3526_v25 = vld [vmem:[%s4953_s1 + $0x464] ss:$8 sps:$4 sm:$0xff]   ;;  %v3529_v27 = vld [vmem:[%s4953_s1 + $0x460] ss:$8 sps:$4 sm:$0xff]   ;;  %v3530_v28 = vld [vmem:[%s4953_s1 + $0x74] ss:$8 sps:$4 sm:$0xff]  }
  0x10   : > { %2122 = vmatpush1.bf16.msra.mxu1 %v3504_v10  ;;  %v3532_v29 = vld [vmem:[%s4953_s1 + $0x474] ss:$8 sps:$4 sm:$0xff]   ;;  %v3534_v30 = vld [vmem:[%s4953_s1 + $0x70] ss:$8 sps:$4 sm:$0xff]   ;;  %v3536_v32 = vld [vmem:[%s4953_s1 + $0x84] ss:$8 sps:$4 sm:$0xff]  }
  0x11   : > { %2414 = vmatpush1.bf16.msra.mxu0 %v3505_v11  ;;  %2123 = vmatprep.subr.bf16.mxu1 %v3506_v12  ;;  %v3535_v31 = vld [vmem:[%s4953_s1 + $0x470] ss:$8 sps:$4 sm:$0xff]   ;;  %v3538_v33 = vld [vmem:[%s4953_s1 + $0x484] ss:$8 sps:$4 sm:$0xff]   ;;  %v3540_v34 = vld [vmem:[%s4953_s1 + $0x80] ss:$8 sps:$4 sm:$0xff]  }
  0x12   : > { %2415 = vmatprep.subr.bf16.mxu0 %v3508_v13  ;;  %v3541_v35 = vld [vmem:[%s4953_s1 + $0x480] ss:$8 sps:$4 sm:$0xff]   ;;  %v3542_v36 = vld [vmem:[%s4953_s1 + $0x94] ss:$8 sps:$4 sm:$0xff]   ;;  %s4960_s9 = smov (!%p176_p4, %s3890_s9), 1 }
  0x13   : > { %v3544_v37 = vld [vmem:[%s4953_s1 + $0x494] ss:$8 sps:$4 sm:$0xff]   ;;  %v3546_v38 = vld [vmem:[%s4953_s1 + $0x90] ss:$8 sps:$4 sm:$0xff]   ;;  %v3548_v40 = vld [vmem:[%s4953_s1 + $0xa4] ss:$8 sps:$4 sm:$0xff]  }
  0x14   : > { %2124 = vmatpush1.bf16.msra.mxu1 %v3510_v14  ;;  %v3547_v39 = vld [vmem:[%s4953_s1 + $0x490] ss:$8 sps:$4 sm:$0xff]   ;;  %s3342_s23 = sshll.u32 %s4960_s9, 9  ;;  %v3550_v41 = vld [vmem:[%s4953_s1 + $0x4a4] ss:$8 sps:$4 sm:$0xff]  }
  0x15   : > { %2416 = vmatpush1.bf16.msra.mxu0 %v3511_v15  ;;  %2125 = vmatprep.subr.bf16.mxu1 %v3512_v16  ;;  %v3552_v42 = vld [vmem:[%s4953_s1 + $0xa0] ss:$8 sps:$4 sm:$0xff]   ;;  %s4075_s4 = scalar_lea.vmem %s4952_s0, %s3342_s23  ;;  %v3554_v44 = vld [vmem:[%s4953_s1 + $0xb4] ss:$8 sps:$4 sm:$0xff]   ;;  %v3558_v46 = vld [vmem:[%s4953_s1 + $0xb0] ss:$8 sps:$4 sm:$0xff]  }
  0x16   : > { %2417 = vmatprep.subr.bf16.mxu0 %v3514_v17  ;;  %v3553_v43 = vld [vmem:[%s4953_s1 + $0x4a0] ss:$8 sps:$4 sm:$0xff]   ;;  %v3556_v45 = vld [vmem:[%s4953_s1 + $0x4b4] ss:$8 sps:$4 sm:$0xff]   ;;  %v3559_v47 = vld [vmem:[%s4953_s1 + $0x4b0] ss:$8 sps:$4 sm:$0xff]  }
  0x17   : > { %v197_v48 = vld [vmem:[%s4075_s4] sm:$0xff]  ;;  %v3566_v58 = vld [vmem:[%s4953_s1 + $0xd4] ss:$8 sps:$4 sm:$0xff]   ;;  %v3570_v60 = vld [vmem:[%s4953_s1 + $0xd0] ss:$8 sps:$4 sm:$0xff]  }
  0x18   : > { %2126 = vmatpush1.bf16.msra.mxu1 %v3516_v18  ;;  %v205_v49 = vld [vmem:[%s4075_s4 + $0x40] sm:$0xff]  ;;  %v3568_v59 = vld [vmem:[%s4953_s1 + $0x4d4] ss:$8 sps:$4 sm:$0xff]   ;;  %v3571_v61 = vld [vmem:[%s4953_s1 + $0x4d0] ss:$8 sps:$4 sm:$0xff]  }
  0x19   : > { %2418 = vmatpush1.bf16.msra.mxu0 %v3517_v19  ;;  %2127 = vmatprep.subr.bf16.mxu1 %v3518_v20  ;;  %v3560_v50 = vld [vmem:[%s4953_s1 + $0xc4] ss:$8 sps:$4 sm:$0xff]   ;;  %v3013_v52 = vcombine.high %v197_v48, %v205_v49  ;;  %v3564_v56 = vld [vmem:[%s4953_s1 + $0xc0] ss:$8 sps:$4 sm:$0xff]   ;;  %v3578_v2 = vld [vmem:[%s4953_s1 + $0xf4] ss:$8 sps:$4 sm:$0xff]   ;;  %v3012_v8 = vcombine.low %v197_v48, %v205_v49 }
  0x1a   : > { %2419 = vmatprep.subr.bf16.mxu0 %v3520_v21  ;;  %v3562_v51 = vld [vmem:[%s4953_s1 + $0x4c4] ss:$8 sps:$4 sm:$0xff]   ;;  %v3565_v57 = vld [vmem:[%s4953_s1 + $0x4c0] ss:$8 sps:$4 sm:$0xff]   ;;  %v3580_v3 = vld [vmem:[%s4953_s1 + $0x4f4] ss:$8 sps:$4 sm:$0xff]  }
  0x1b   : > { %v201_v53 = vld [vmem:[%s4075_s4 + $0x20] sm:$0xff]  ;;  %2149 = vmatprep.mubr.bf16.mxu1 %v3013_v52  ;;  %v3582_v4 = vld [vmem:[%s4953_s1 + $0xf0] ss:$8 sps:$4 sm:$0xff]   ;;  %v3592_v12 = vld [vmem:[%s4953_s1 + $0x114] ss:$8 sps:$4 sm:$0xff]  }
  0x1c   : > { %2128 = vmatpush1.bf16.msra.mxu1 %v3522_v22  ;;  %v209_v54 = vld [vmem:[%s4075_s4 + $0x60] sm:$0xff]  ;;  %v3583_v5 = vld [vmem:[%s4953_s1 + $0x4f0] ss:$8 sps:$4 sm:$0xff]   ;;  %v3595_v13 = vld [vmem:[%s4953_s1 + $0x514] ss:$8 sps:$4 sm:$0xff]  }
  0x1d   : > { %2420 = vmatpush1.bf16.msra.mxu0 %v3523_v23  ;;  %2129 = vmatprep.subr.bf16.mxu1 %v3524_v24  ;;  %v3021_v55 = vcombine.high %v201_v53, %v209_v54  ;;  %v3572_v62 = vld [vmem:[%s4953_s1 + $0xe4] ss:$8 sps:$4 sm:$0xff]   ;;  %v3576_v0 = vld [vmem:[%s4953_s1 + $0xe0] ss:$8 sps:$4 sm:$0xff]   ;;  %v3020_v10 = vcombine.low %v201_v53, %v209_v54  ;;  %v3590_v14 = vld [vmem:[%s4953_s1 + $0x110] ss:$8 sps:$4 sm:$0xff]  }
  0x1e   : > { %2421 = vmatprep.subr.bf16.mxu0 %v3526_v25  ;;  %v3574_v63 = vld [vmem:[%s4953_s1 + $0x4e4] ss:$8 sps:$4 sm:$0xff]   ;;  %v3577_v1 = vld [vmem:[%s4953_s1 + $0x4e0] ss:$8 sps:$4 sm:$0xff]   ;;  %v3593_v15 = vld [vmem:[%s4953_s1 + $0x510] ss:$8 sps:$4 sm:$0xff]  }
  0x1f   : > { %2441 = vmatprep.mubr.bf16.mxu0 %v3021_v55  ;;  %v3586_v6 = vld [vmem:[%s4953_s1 + $0x104] ss:$8 sps:$4 sm:$0xff]   ;;  %v3584_v9 = vld [vmem:[%s4953_s1 + $0x100] ss:$8 sps:$4 sm:$0xff]   ;;  %v3604_v22 = vld [vmem:[%s4953_s1 + $0x134] ss:$8 sps:$4 sm:$0xff]  }
  0x20   : > { %2130 = vmatpush1.bf16.msra.mxu1 %v3528_v26  ;;  %v3589_v7 = vld [vmem:[%s4953_s1 + $0x504] ss:$8 sps:$4 sm:$0xff]   ;;  %v3587_v11 = vld [vmem:[%s4953_s1 + $0x500] ss:$8 sps:$4 sm:$0xff]   ;;  %v3607_v23 = vld [vmem:[%s4953_s1 + $0x534] ss:$8 sps:$4 sm:$0xff]  }
  0x21   : > { %2422 = vmatpush1.bf16.msra.mxu0 %v3529_v27  ;;  %2131 = vmatprep.subr.bf16.mxu1 %v3530_v28  ;;  %v3598_v16 = vld [vmem:[%s4953_s1 + $0x124] ss:$8 sps:$4 sm:$0xff]   ;;  %v3596_v18 = vld [vmem:[%s4953_s1 + $0x120] ss:$8 sps:$4 sm:$0xff]  }
  0x22   : > { %2423 = vmatprep.subr.bf16.mxu0 %v3532_v29  ;;  %v3601_v17 = vld [vmem:[%s4953_s1 + $0x524] ss:$8 sps:$4 sm:$0xff]   ;;  %v3599_v19 = vld [vmem:[%s4953_s1 + $0x520] ss:$8 sps:$4 sm:$0xff]   ;;  %v3602_v29 = vld [vmem:[%s4953_s1 + $0x130] ss:$8 sps:$4 sm:$0xff]  }
  0x23   : > { %v213_v20 = vld [vmem:[%s4075_s4 + $0x80] sm:$0xff] }
  0x24   : > { %2132 = vmatpush1.bf16.msra.mxu1 %v3534_v30  ;;  %v221_v21 = vld [vmem:[%s4075_s4 + $0xc0] sm:$0xff]  ;;  %v3605_v30 = vld [vmem:[%s4953_s1 + $0x530] ss:$8 sps:$4 sm:$0xff]  }
  0x25   : > { %2424 = vmatpush1.bf16.msra.mxu0 %v3535_v31  ;;  %2133 = vmatprep.subr.bf16.mxu1 %v3536_v32  ;;  %v3029_v24 = vcombine.high %v213_v20, %v221_v21  ;;  %v217_v25 = vld [vmem:[%s4075_s4 + $0xa0] sm:$0xff]  ;;  %v3028_v26 = vcombine.low %v213_v20, %v221_v21  ;;  %v3650_v20 = vld [vmem:[%s4953_s1 + $0x1b0] ss:$8 sps:$4 sm:$0xff]  }
  0x26   : > { %2425 = vmatprep.subr.bf16.mxu0 %v3538_v33  ;;  %v225_v27 = vld [vmem:[%s4075_s4 + $0xe0] sm:$0xff]  ;;  %v3653_v21 = vld [vmem:[%s4953_s1 + $0x5b0] ss:$8 sps:$4 sm:$0xff]  }
  0x27   : > { %v3037_v28 = vcombine.high %v217_v25, %v225_v27  ;;  %v3036_v31 = vcombine.low %v217_v25, %v225_v27  ;;  %v3610_v32 = vld [vmem:[%s4953_s1 + $0x144] ss:$8 sps:$4 sm:$0xff]   ;;  %v3620_v55 = vld [vmem:[%s4953_s1 + $0x160] ss:$8 sps:$4 sm:$0xff]   ;;  %v3667_v27 = vld [vmem:[%s4953_s1 + $0x5d4] ss:$8 sps:$4 sm:$0xff]  }
  0x28   : > { %2134 = vmatpush1.bf16.msra.mxu1 %v3540_v34  ;;  %v3613_v33 = vld [vmem:[%s4953_s1 + $0x544] ss:$8 sps:$4 sm:$0xff]   ;;  %v3659_v25 = vld [vmem:[%s4953_s1 + $0x5c0] ss:$8 sps:$4 sm:$0xff]  }
  0x29   : > { %2426 = vmatpush1.bf16.msra.mxu0 %v3541_v35  ;;  %2135 = vmatprep.subr.bf16.mxu1 %v3542_v36  ;;  %v229_v34 = vld [vmem:[%s4075_s4 + $0x100] sm:$0xff] }
  0x2a   : > { %2427 = vmatprep.subr.bf16.mxu0 %v3544_v37  ;;  %v237_v35 = vld [vmem:[%s4075_s4 + $0x140] sm:$0xff] }
  0x2b   : > { %v3608_v36 = vld [vmem:[%s4953_s1 + $0x140] ss:$8 sps:$4 sm:$0xff]   ;;  %v3045_v37 = vcombine.high %v229_v34, %v237_v35 }
  0x2c   : > { %2136 = vmatpush1.bf16.msra.mxu1 %v3546_v38  ;;  %v3611_v38 = vld [vmem:[%s4953_s1 + $0x540] ss:$8 sps:$4 sm:$0xff]  }
  0x2d   : > { %2428 = vmatpush1.bf16.msra.mxu0 %v3547_v39  ;;  %2137 = vmatprep.subr.bf16.mxu1 %v3548_v40  ;;  %v233_v39 = vld [vmem:[%s4075_s4 + $0x120] sm:$0xff] }
  0x2e   : > { %2429 = vmatprep.subr.bf16.mxu0 %v3550_v41  ;;  %v241_v40 = vld [vmem:[%s4075_s4 + $0x160] sm:$0xff]  ;;  %v3044_v41 = vcombine.low %v229_v34, %v237_v35  ;;  %v3676_v34 = vld [vmem:[%s4953_s1 + $0x1f4] ss:$8 sps:$4 sm:$0xff]  }
  0x2f   : > { %v245_v48 = vld [vmem:[%s4075_s4 + $0x180] sm:$0xff]  ;;  %v3679_v35 = vld [vmem:[%s4953_s1 + $0x5f4] ss:$8 sps:$4 sm:$0xff]  }
  0x30   : > { %2138 = vmatpush1.bf16.msra.mxu1 %v3552_v42  ;;  %v3616_v42 = vld [vmem:[%s4953_s1 + $0x154] ss:$8 sps:$4 sm:$0xff]   ;;  %v253_v49 = vld [vmem:[%s4075_s4 + $0x1c0] sm:$0xff] }
  0x31   : > { %2430 = vmatpush1.bf16.msra.mxu0 %v3553_v43  ;;  %2139 = vmatprep.subr.bf16.mxu1 %v3554_v44  ;;  %v3053_v43 = vcombine.high %v233_v39, %v241_v40  ;;  %v3619_v44 = vld [vmem:[%s4953_s1 + $0x554] ss:$8 sps:$4 sm:$0xff]   ;;  %v3061_v52 = vcombine.high %v245_v48, %v253_v49  ;;  %v249_v53 = vld [vmem:[%s4075_s4 + $0x1a0] sm:$0xff] }
  0x32   : > { %2431 = vmatprep.subr.bf16.mxu0 %v3556_v45  ;;  %v3614_v45 = vld [vmem:[%s4953_s1 + $0x150] ss:$8 sps:$4 sm:$0xff]   ;;  %v257_v54 = vld [vmem:[%s4075_s4 + $0x1e0] sm:$0xff] }
  0x34   : > { %2140 = vmatpush1.bf16.msra.mxu1 %v3558_v46  ;;  %v3617_v46 = vld [vmem:[%s4953_s1 + $0x550] ss:$8 sps:$4 sm:$0xff]  }
  0x35   : > { %2432 = vmatpush1.bf16.msra.mxu0 %v3559_v47  ;;  %2141 = vmatprep.subr.bf16.mxu1 %v3560_v50  ;;  %v3052_v47 = vcombine.low %v233_v39, %v241_v40  ;;  %v3622_v50 = vld [vmem:[%s4953_s1 + $0x164] ss:$8 sps:$4 sm:$0xff]   ;;  %v3680_v40 = vld [vmem:[%s4953_s1 + $0x200] ss:$8 sps:$4 sm:$0xff]  }
  0x36   : > { %2433 = vmatprep.subr.bf16.mxu0 %v3562_v51  ;;  %v3625_v51 = vld [vmem:[%s4953_s1 + $0x564] ss:$8 sps:$4 sm:$0xff]  }
  0x37   : > { %v3685_v39 = vld [vmem:[%s4953_s1 + $0x604] ss:$8 sps:$4 sm:$0xff]  }
  0x38   : > { %2142 = vmatpush1.bf16.msra.mxu1 %v3564_v56  ;;  %v3623_v56 = vld [vmem:[%s4953_s1 + $0x560] ss:$8 sps:$4 sm:$0xff]  }
  0x39   : > { %2434 = vmatpush1.bf16.msra.mxu0 %v3565_v57  ;;  %2143 = vmatprep.subr.bf16.mxu1 %v3566_v58  ;;  %v3069_v57 = vcombine.high %v249_v53, %v257_v54  ;;  %v3060_v58 = vcombine.low %v245_v48, %v253_v49  ;;  %v3688_v48 = vld [vmem:[%s4953_s1 + $0x214] ss:$8 sps:$4 sm:$0xff]  }
  0x3a   : > { %2435 = vmatprep.subr.bf16.mxu0 %v3568_v59  ;;  %v3628_v59 = vld [vmem:[%s4953_s1 + $0x174] ss:$8 sps:$4 sm:$0xff]  }
  0x3b   : > { %v3691_v49 = vld [vmem:[%s4953_s1 + $0x614] ss:$8 sps:$4 sm:$0xff]  }
  0x3c   : > { %2144 = vmatpush1.bf16.msra.mxu1 %v3570_v60  ;;  %v3631_v60 = vld [vmem:[%s4953_s1 + $0x574] ss:$8 sps:$4 sm:$0xff]  }
  0x3d   : > { %2436 = vmatpush1.bf16.msra.mxu0 %v3571_v61  ;;  %2145 = vmatprep.subr.bf16.mxu1 %v3572_v62  ;;  %v3626_v61 = vld [vmem:[%s4953_s1 + $0x170] ss:$8 sps:$4 sm:$0xff]  }
  0x3e   : > { %2437 = vmatprep.subr.bf16.mxu0 %v3574_v63  ;;  %v3629_v62 = vld [vmem:[%s4953_s1 + $0x570] ss:$8 sps:$4 sm:$0xff]   ;;  %v4250_v63 = vld [vmem:[%s4075_s4 + $0x8] sm:$0xff] }
  0x40   : > { %2146 = vmatpush1.bf16.msra.mxu1 %v3576_v0  ;;  %v3068_v0 = vcombine.low %v249_v53, %v257_v54  ;;  %v3689_v53 = vld [vmem:[%s4953_s1 + $0x610] ss:$8 sps:$4 sm:$0xff]   ;;  %v3694_v54 = vld [vmem:[%s4953_s1 + $0x224] ss:$8 sps:$4 sm:$0xff]  }
  0x41   : > { %2438 = vmatpush1.bf16.msra.mxu0 %v3577_v1  ;;  %2147 = vmatprep.subr.bf16.mxu1 %v3578_v2  ;;  %v4253_v1 = vld [vmem:[%s4075_s4 + $0x48] sm:$0xff] }
  0x42   : > { %2439 = vmatprep.subr.bf16.mxu0 %v3580_v3  ;;  %v3634_v2 = vld [vmem:[%s4953_s1 + $0x184] ss:$8 sps:$4 sm:$0xff]  }
  0x43   : > { %v3637_v3 = vld [vmem:[%s4953_s1 + $0x584] ss:$8 sps:$4 sm:$0xff]  }
  0x44   : > { %2148 = vmatpush1.bf16.msra.mxu1 %v3582_v4  ;;  %v3015_v4 = vcombine.high %v4250_v63, %v4253_v1 }
  0x45   : > { %2440 = vmatpush1.bf16.msra.mxu0 %v3583_v5  ;;  %2190 = vmatprep.subr.bf16.mxu1 %v3586_v6  ;;  %v4264_v5 = vld [vmem:[%s4075_s4 + $0x28] sm:$0xff] }
  0x46   : > { %2482 = vmatprep.subr.bf16.mxu0 %v3589_v7  ;;  %v4267_v6 = vld [vmem:[%s4075_s4 + $0x68] sm:$0xff] }
  0x47   : > { %2150 = vmatmul.mubr.bf16.vlgmr.msra.gmra.mrb[0].mxu1 %v3012_v8  ;;  %v3023_v7 = vcombine.high %v4264_v5, %v4267_v6  ;;  %v3632_v8 = vld [vmem:[%s4953_s1 + $0x180] ss:$8 sps:$4 sm:$0xff]  }
  0x48   : > { %2442 = vmatmul.mubr.bf16.vlgmr.msra.gmra.mrb[0].mxu0 %v3020_v10  ;;  %2191 = vmatpush1.bf16.msra.mxu1 %v3584_v9  ;;  %v3635_v9 = vld [vmem:[%s4953_s1 + $0x580] ss:$8 sps:$4 sm:$0xff]   ;;  %v3640_v10 = vld [vmem:[%s4953_s1 + $0x194] ss:$8 sps:$4 sm:$0xff]  }
  0x49   : > { %2483 = vmatpush1.bf16.msra.mxu0 %v3587_v11  ;;  %2192 = vmatprep.subr.bf16.mxu1 %v3592_v12  ;;  %v3643_v11 = vld [vmem:[%s4953_s1 + $0x594] ss:$8 sps:$4 sm:$0xff]   ;;  %v3638_v12 = vld [vmem:[%s4953_s1 + $0x190] ss:$8 sps:$4 sm:$0xff]  }
  0x4a   : > { %2484 = vmatprep.subr.bf16.mxu0 %v3595_v13  ;;  %2159 = vmatprep.mubr.bf16.mxu1 %v3029_v24  ;;  %v3641_v13 = vld [vmem:[%s4953_s1 + $0x590] ss:$8 sps:$4 sm:$0xff]   ;;  %v3656_v24 = vld [vmem:[%s4953_s1 + $0x1c0] ss:$8 sps:$4 sm:$0xff]  }
  0x4b   : > { %2451 = vmatprep.mubr.bf16.mxu0 %v3037_v28  ;;  %v3662_v28 = vld [vmem:[%s4953_s1 + $0x1d0] ss:$8 sps:$4 sm:$0xff]  }
  0x4c   : > { %2193 = vmatpush1.bf16.msra.mxu1 %v3590_v14  ;;  %v3646_v14 = vld [vmem:[%s4953_s1 + $0x1a4] ss:$8 sps:$4 sm:$0xff]  }
  0x4d   : > { %2485 = vmatpush1.bf16.msra.mxu0 %v3593_v15  ;;  %2194 = vmatprep.subr.bf16.mxu1 %v3598_v16  ;;  %v3649_v15 = vld [vmem:[%s4953_s1 + $0x5a4] ss:$8 sps:$4 sm:$0xff]   ;;  %v3644_v16 = vld [vmem:[%s4953_s1 + $0x1a0] ss:$8 sps:$4 sm:$0xff]  }
  0x4e   : > { %2486 = vmatprep.subr.bf16.mxu0 %v3601_v17  ;;  %v3647_v17 = vld [vmem:[%s4953_s1 + $0x5a0] ss:$8 sps:$4 sm:$0xff]  }
  0x4f   : > { %2160 = vmatmul.mubr.bf16.gmra.mrb[4].mxu1 %v3028_v26  ;;  %v3664_v26 = vld [vmem:[%s4953_s1 + $0x1d4] ss:$8 sps:$4 sm:$0xff]  }
  0x50   : > { %2195 = vmatpush1.bf16.msra.mxu1 %v3596_v18  ;;  %2452 = vmatmul.mubr.bf16.gmra.mrb[4].mxu0 %v3036_v31  ;;  %v3652_v18 = vld [vmem:[%s4953_s1 + $0x1b4] ss:$8 sps:$4 sm:$0xff]   ;;  %v3673_v31 = vld [vmem:[%s4953_s1 + $0x5e4] ss:$8 sps:$4 sm:$0xff]  }
  0x51   : > { %2487 = vmatpush1.bf16.msra.mxu0 %v3599_v19  ;;  %2196 = vmatprep.subr.bf16.mxu1 %v3604_v22  ;;  %v3655_v19 = vld [vmem:[%s4953_s1 + $0x5b4] ss:$8 sps:$4 sm:$0xff]   ;;  %v3658_v22 = vld [vmem:[%s4953_s1 + $0x1c4] ss:$8 sps:$4 sm:$0xff]  }
  0x52   : > { %2488 = vmatprep.subr.bf16.mxu0 %v3607_v23  ;;  %2169 = vmatprep.mubr.bf16.mxu1 %v3045_v37  ;;  %v3661_v23 = vld [vmem:[%s4953_s1 + $0x5c4] ss:$8 sps:$4 sm:$0xff]   ;;  %v3677_v37 = vld [vmem:[%s4953_s1 + $0x5f0] ss:$8 sps:$4 sm:$0xff]  }
  0x53   : > { %2461 = vmatprep.mubr.bf16.mxu0 %v3053_v43  ;;  %v3014_v43 = vcombine.low %v4250_v63, %v4253_v1  ;;  %v242_v63 = vld [vmem:[%s4075_s4 + $0x168] sm:$0xff]  ;;  %v3703_v1 = vld [vmem:[%s4953_s1 + $0x634] ss:$8 sps:$4 sm:$0xff]  }
  0x54   : > { %2197 = vmatpush1.bf16.msra.mxu1 %v3602_v29  ;;  %v3665_v29 = vld [vmem:[%s4953_s1 + $0x5d0] ss:$8 sps:$4 sm:$0xff]  }
  0x55   : > { %2489 = vmatpush1.bf16.msra.mxu0 %v3605_v30  ;;  %2198 = vmatprep.subr.bf16.mxu1 %v3610_v32  ;;  %v3670_v30 = vld [vmem:[%s4953_s1 + $0x1e4] ss:$8 sps:$4 sm:$0xff]   ;;  %v3668_v32 = vld [vmem:[%s4953_s1 + $0x1e0] ss:$8 sps:$4 sm:$0xff]  }
  0x56   : > { %2490 = vmatprep.subr.bf16.mxu0 %v3613_v33  ;;  %v3671_v33 = vld [vmem:[%s4953_s1 + $0x5e0] ss:$8 sps:$4 sm:$0xff]  }
  0x57   : > { %2170 = vmatmul.mubr.bf16.gmra.mrb[8].mxu1 %v3044_v41  ;;  %v3683_v41 = vld [vmem:[%s4953_s1 + $0x600] ss:$8 sps:$4 sm:$0xff]  }
  0x58   : > { %2199 = vmatpush1.bf16.msra.mxu1 %v3608_v36  ;;  %2462 = vmatmul.mubr.bf16.gmra.mrb[8].mxu0 %v3052_v47  ;;  %v3674_v36 = vld [vmem:[%s4953_s1 + $0x1f0] ss:$8 sps:$4 sm:$0xff]   ;;  %v226_v47 = vld [vmem:[%s4075_s4 + $0xe8] sm:$0xff] }
  0x59   : > { %2491 = vmatpush1.bf16.msra.mxu0 %v3611_v38  ;;  %2200 = vmatprep.subr.bf16.mxu1 %v3616_v42  ;;  %v3682_v38 = vld [vmem:[%s4953_s1 + $0x204] ss:$8 sps:$4 sm:$0xff]  }
  0x5a   : > { %2492 = vmatprep.subr.bf16.mxu0 %v3619_v44  ;;  %2179 = vmatprep.mubr.bf16.mxu1 %v3061_v52  ;;  %v214_v42 = vld [vmem:[%s4075_s4 + $0x88] sm:$0xff]  ;;  %v3022_v44 = vcombine.low %v4264_v5, %v4267_v6  ;;  %v3686_v52 = vld [vmem:[%s4953_s1 + $0x210] ss:$8 sps:$4 sm:$0xff]  }
  0x5b   : > { %2471 = vmatprep.mubr.bf16.mxu0 %v3069_v57  ;;  %v3695_v57 = vld [vmem:[%s4953_s1 + $0x620] ss:$8 sps:$4 sm:$0xff]   ;;  %v3701_v5 = vld [vmem:[%s4953_s1 + $0x630] ss:$8 sps:$4 sm:$0xff]   ;;  %v3706_v6 = vld [vmem:[%s4953_s1 + $0x244] ss:$8 sps:$4 sm:$0xff]  }
  0x5c   : > { %2201 = vmatpush1.bf16.msra.mxu1 %v3614_v45  ;;  %v222_v45 = vld [vmem:[%s4075_s4 + $0xc8] sm:$0xff] }
  0x5d   : > { %2493 = vmatpush1.bf16.msra.mxu0 %v3617_v46  ;;  %2202 = vmatprep.subr.bf16.mxu1 %v3622_v50  ;;  %v218_v46 = vld [vmem:[%s4075_s4 + $0xa8] sm:$0xff]  ;;  %v3031_v50 = vcombine.high %v214_v42, %v222_v45 }
  0x5e   : > { %2494 = vmatprep.subr.bf16.mxu0 %v3625_v51  ;;  %v3039_v51 = vcombine.high %v218_v46, %v226_v47 }
  0x5f   : > { %2180 = vmatmul.mubr.bf16.gmra.mrb[12].mxu1 %v3060_v58  ;;  %v230_v58 = vld [vmem:[%s4075_s4 + $0x108] sm:$0xff] }
  0x60   : > { %2203 = vmatpush1.bf16.msra.mxu1 %v3620_v55  ;;  %2222 = vmatprep.mubr.bf16.mxu1 %v3015_v4  ;;  %v3697_v55 = vld [vmem:[%s4953_s1 + $0x624] ss:$8 sps:$4 sm:$0xff]   ;;  %v3698_v4 = vld [vmem:[%s4953_s1 + $0x230] ss:$8 sps:$4 sm:$0xff]  }
  0x61   : > { %2495 = vmatpush1.bf16.msra.mxu0 %v3623_v56  ;;  %2204 = vmatprep.subr.bf16.mxu1 %v3628_v59  ;;  %v3692_v56 = vld [vmem:[%s4953_s1 + $0x220] ss:$8 sps:$4 sm:$0xff]  }
  0x62   : > { %2496 = vmatprep.subr.bf16.mxu0 %v3631_v60  ;;  %2472 = vmatmul.mubr.bf16.gmra.mrb[12].mxu0 %v3068_v0  ;;  %v238_v59 = vld [vmem:[%s4075_s4 + $0x148] sm:$0xff]  ;;  %v3030_v60 = vcombine.low %v214_v42, %v222_v45  ;;  %v3700_v0 = vld [vmem:[%s4953_s1 + $0x234] ss:$8 sps:$4 sm:$0xff]   ;;  %v3737_v45 = vld [vmem:[%s4953_s1 + $0x690] ss:$8 sps:$4 sm:$0xff]  }
  0x63   : > { %2514 = vmatprep.mubr.bf16.mxu0 %v3023_v7  ;;  %v3709_v7 = vld [vmem:[%s4953_s1 + $0x644] ss:$8 sps:$4 sm:$0xff]   ;;  %v3736_v42 = vld [vmem:[%s4953_s1 + $0x294] ss:$8 sps:$4 sm:$0xff]  }
  0x64   : > { %2205 = vmatpush1.bf16.msra.mxu1 %v3626_v61  ;;  %v3038_v61 = vcombine.low %v218_v46, %v226_v47  ;;  %v3742_v46 = vld [vmem:[%s4953_s1 + $0x2a4] ss:$8 sps:$4 sm:$0xff]  }
  0x65   : > { %2497 = vmatpush1.bf16.msra.mxu0 %v3629_v62  ;;  %2206 = vmatprep.subr.bf16.mxu1 %v3634_v2  ;;  %v234_v62 = vld [vmem:[%s4075_s4 + $0x128] sm:$0xff]  ;;  %v3047_v2 = vcombine.high %v230_v58, %v238_v59 }
  0x66   : > { %2498 = vmatprep.subr.bf16.mxu0 %v3637_v3  ;;  %v3055_v3 = vcombine.high %v234_v62, %v242_v63  ;;  %v3745_v47 = vld [vmem:[%s4953_s1 + $0x6a4] ss:$8 sps:$4 sm:$0xff]  }
  0x68   : > { %2207 = vmatpush1.bf16.msra.mxu1 %v3632_v8  ;;  %v3704_v8 = vld [vmem:[%s4953_s1 + $0x240] ss:$8 sps:$4 sm:$0xff]  }
  0x69   : > { %2499 = vmatpush1.bf16.msra.mxu0 %v3635_v9  ;;  %2208 = vmatprep.subr.bf16.mxu1 %v3640_v10  ;;  %v3707_v9 = vld [vmem:[%s4953_s1 + $0x640] ss:$8 sps:$4 sm:$0xff]  }
  0x6a   : > { %2500 = vmatprep.subr.bf16.mxu0 %v3643_v11  ;;  %v246_v10 = vld [vmem:[%s4075_s4 + $0x188] sm:$0xff] }
  0x6b   : > { %v254_v11 = vld [vmem:[%s4075_s4 + $0x1c8] sm:$0xff] }
  0x6c   : > { %2209 = vmatpush1.bf16.msra.mxu1 %v3638_v12  ;;  %v3046_v12 = vcombine.low %v230_v58, %v238_v59  ;;  %v3760_v58 = vld [vmem:[%s4953_s1 + $0x2d4] ss:$8 sps:$4 sm:$0xff]  }
  0x6d   : > { %2501 = vmatpush1.bf16.msra.mxu0 %v3641_v13  ;;  %2210 = vmatprep.subr.bf16.mxu1 %v3646_v14  ;;  %v3054_v13 = vcombine.low %v234_v62, %v242_v63  ;;  %v250_v14 = vld [vmem:[%s4075_s4 + $0x1a8] sm:$0xff]  ;;  %v3763_v59 = vld [vmem:[%s4953_s1 + $0x6d4] ss:$8 sps:$4 sm:$0xff]  }
  0x6e   : > { %2502 = vmatprep.subr.bf16.mxu0 %v3649_v15  ;;  %v258_v15 = vld [vmem:[%s4075_s4 + $0x1e8] sm:$0xff] }
  0x6f   : > { %v3766_v62 = vld [vmem:[%s4953_s1 + $0x2e4] ss:$8 sps:$4 sm:$0xff]  }
  0x70   : > { %2211 = vmatpush1.bf16.msra.mxu1 %v3644_v16  ;;  %v3712_v16 = vld [vmem:[%s4953_s1 + $0x254] ss:$8 sps:$4 sm:$0xff]   ;;  %v3769_v63 = vld [vmem:[%s4953_s1 + $0x6e4] ss:$8 sps:$4 sm:$0xff]  }
  0x71   : > { %2503 = vmatpush1.bf16.msra.mxu0 %v3647_v17  ;;  %2212 = vmatprep.subr.bf16.mxu1 %v3652_v18  ;;  %v3715_v17 = vld [vmem:[%s4953_s1 + $0x654] ss:$8 sps:$4 sm:$0xff]   ;;  %v3063_v18 = vcombine.high %v246_v10, %v254_v11 }
  0x72   : > { %2504 = vmatprep.subr.bf16.mxu0 %v3655_v19  ;;  %v3071_v19 = vcombine.high %v250_v14, %v258_v15 }
  0x74   : > { %2213 = vmatpush1.bf16.msra.mxu1 %v3650_v20  ;;  %v3710_v20 = vld [vmem:[%s4953_s1 + $0x250] ss:$8 sps:$4 sm:$0xff]  }
  0x75   : > { %2505 = vmatpush1.bf16.msra.mxu0 %v3653_v21  ;;  %2214 = vmatprep.subr.bf16.mxu1 %v3658_v22  ;;  %v3713_v21 = vld [vmem:[%s4953_s1 + $0x650] ss:$8 sps:$4 sm:$0xff]   ;;  %v3718_v22 = vld [vmem:[%s4953_s1 + $0x264] ss:$8 sps:$4 sm:$0xff]  }
  0x76   : > { %2506 = vmatprep.subr.bf16.mxu0 %v3661_v23  ;;  %v3721_v23 = vld [vmem:[%s4953_s1 + $0x664] ss:$8 sps:$4 sm:$0xff]  }
  0x78   : > { %2215 = vmatpush1.bf16.msra.mxu1 %v3656_v24  ;;  %v3716_v24 = vld [vmem:[%s4953_s1 + $0x260] ss:$8 sps:$4 sm:$0xff]  }
  0x79   : > { %2507 = vmatpush1.bf16.msra.mxu0 %v3659_v25  ;;  %2216 = vmatprep.subr.bf16.mxu1 %v3664_v26  ;;  %v3719_v25 = vld [vmem:[%s4953_s1 + $0x660] ss:$8 sps:$4 sm:$0xff]   ;;  %v4462_v26 = vld [vmem:[%s4075_s4 + $0x10] sm:$0xff] }
  0x7a   : > { %2508 = vmatprep.subr.bf16.mxu0 %v3667_v27  ;;  %v4465_v27 = vld [vmem:[%s4075_s4 + $0x50] sm:$0xff] }
  0x7c   : > { %2217 = vmatpush1.bf16.msra.mxu1 %v3662_v28  ;;  %v3062_v28 = vcombine.low %v246_v10, %v254_v11  ;;  %v223_v11 = vld [vmem:[%s4075_s4 + $0xd0] sm:$0xff] }
  0x7d   : > { %2509 = vmatpush1.bf16.msra.mxu0 %v3665_v29  ;;  %2218 = vmatprep.subr.bf16.mxu1 %v3670_v30  ;;  %v3070_v29 = vcombine.low %v250_v14, %v258_v15  ;;  %v4468_v30 = vld [vmem:[%s4075_s4 + $0x30] sm:$0xff]  ;;  %v3776_v14 = vld [vmem:[%s4953_s1 + $0x300] ss:$8 sps:$4 sm:$0xff]  }
  0x7e   : > { %2510 = vmatprep.subr.bf16.mxu0 %v3673_v31  ;;  %v4471_v31 = vld [vmem:[%s4075_s4 + $0x70] sm:$0xff]  ;;  %v3779_v15 = vld [vmem:[%s4953_s1 + $0x700] ss:$8 sps:$4 sm:$0xff]  }
  0x7f   : > { %v3024_v10 = vcombine.low %v4468_v30, %v4471_v31 }
  0x80   : > { %2219 = vmatpush1.bf16.msra.mxu1 %v3668_v32  ;;  %v3724_v32 = vld [vmem:[%s4953_s1 + $0x274] ss:$8 sps:$4 sm:$0xff]  }
  0x81   : > { %2511 = vmatpush1.bf16.msra.mxu0 %v3671_v33  ;;  %2220 = vmatprep.subr.bf16.mxu1 %v3676_v34  ;;  %v3727_v33 = vld [vmem:[%s4953_s1 + $0x674] ss:$8 sps:$4 sm:$0xff]   ;;  %v3017_v34 = vcombine.high %v4462_v26, %v4465_v27 }
  0x82   : > { %2512 = vmatprep.subr.bf16.mxu0 %v3679_v35  ;;  %v3025_v35 = vcombine.high %v4468_v30, %v4471_v31  ;;  %v3788_v30 = vld [vmem:[%s4953_s1 + $0x320] ss:$8 sps:$4 sm:$0xff]  }
  0x83   : > { %v3791_v31 = vld [vmem:[%s4953_s1 + $0x720] ss:$8 sps:$4 sm:$0xff]  }
  0x84   : > { %2221 = vmatpush1.bf16.msra.mxu1 %v3674_v36  ;;  %v3722_v36 = vld [vmem:[%s4953_s1 + $0x270] ss:$8 sps:$4 sm:$0xff]  }
  0x85   : > { %2513 = vmatpush1.bf16.msra.mxu0 %v3677_v37  ;;  %2263 = vmatprep.subr.bf16.mxu1 %v3682_v38  ;;  %v3725_v37 = vld [vmem:[%s4953_s1 + $0x670] ss:$8 sps:$4 sm:$0xff]   ;;  %v3730_v38 = vld [vmem:[%s4953_s1 + $0x284] ss:$8 sps:$4 sm:$0xff]  }
  0x86   : > { %2555 = vmatprep.subr.bf16.mxu0 %v3685_v39  ;;  %v3733_v39 = vld [vmem:[%s4953_s1 + $0x684] ss:$8 sps:$4 sm:$0xff]  }
  0x87   : > { %2223 = vmatmul.mubr.bf16.vlgmr.msra.gmra.mrb[0].mxu1 %v3014_v43  ;;  %v3739_v43 = vld [vmem:[%s4953_s1 + $0x694] ss:$8 sps:$4 sm:$0xff]  }
  0x88   : > { %2515 = vmatmul.mubr.bf16.vlgmr.msra.gmra.mrb[0].mxu0 %v3022_v44  ;;  %2264 = vmatpush1.bf16.msra.mxu1 %v3680_v40  ;;  %v3728_v40 = vld [vmem:[%s4953_s1 + $0x280] ss:$8 sps:$4 sm:$0xff]   ;;  %v3734_v44 = vld [vmem:[%s4953_s1 + $0x290] ss:$8 sps:$4 sm:$0xff]  }
  0x89   : > { %2556 = vmatpush1.bf16.msra.mxu0 %v3683_v41  ;;  %2265 = vmatprep.subr.bf16.mxu1 %v3688_v48  ;;  %v3731_v41 = vld [vmem:[%s4953_s1 + $0x680] ss:$8 sps:$4 sm:$0xff]  }
  0x8a   : > { %2557 = vmatprep.subr.bf16.mxu0 %v3691_v49  ;;  %2232 = vmatprep.mubr.bf16.mxu1 %v3031_v50  ;;  %v3740_v48 = vld [vmem:[%s4953_s1 + $0x2a0] ss:$8 sps:$4 sm:$0xff]   ;;  %v3748_v50 = vld [vmem:[%s4953_s1 + $0x2b4] ss:$8 sps:$4 sm:$0xff]  }
  0x8b   : > { %2524 = vmatprep.mubr.bf16.mxu0 %v3039_v51  ;;  %v3743_v49 = vld [vmem:[%s4953_s1 + $0x6a0] ss:$8 sps:$4 sm:$0xff]   ;;  %v3751_v51 = vld [vmem:[%s4953_s1 + $0x6b4] ss:$8 sps:$4 sm:$0xff]  }
  0x8c   : > { %2266 = vmatpush1.bf16.msra.mxu1 %v3686_v52  ;;  %v3746_v52 = vld [vmem:[%s4953_s1 + $0x2b0] ss:$8 sps:$4 sm:$0xff]  }
  0x8d   : > { %2558 = vmatpush1.bf16.msra.mxu0 %v3689_v53  ;;  %2267 = vmatprep.subr.bf16.mxu1 %v3694_v54  ;;  %v3749_v53 = vld [vmem:[%s4953_s1 + $0x6b0] ss:$8 sps:$4 sm:$0xff]   ;;  %v3754_v54 = vld [vmem:[%s4953_s1 + $0x2c4] ss:$8 sps:$4 sm:$0xff]  }
  0x8e   : > { %2559 = vmatprep.subr.bf16.mxu0 %v3697_v55  ;;  %v3757_v55 = vld [vmem:[%s4953_s1 + $0x6c4] ss:$8 sps:$4 sm:$0xff]  }
  0x8f   : > { %2233 = vmatmul.mubr.bf16.gmra.mrb[4].mxu1 %v3030_v60  ;;  %v3758_v60 = vld [vmem:[%s4953_s1 + $0x2d0] ss:$8 sps:$4 sm:$0xff]  }
  0x90   : > { %2525 = vmatmul.mubr.bf16.gmra.mrb[4].mxu0 %v3038_v61  ;;  %2268 = vmatpush1.bf16.msra.mxu1 %v3692_v56  ;;  %v3752_v56 = vld [vmem:[%s4953_s1 + $0x2c0] ss:$8 sps:$4 sm:$0xff]   ;;  %v3761_v61 = vld [vmem:[%s4953_s1 + $0x6d0] ss:$8 sps:$4 sm:$0xff]  }
  0x91   : > { %2560 = vmatpush1.bf16.msra.mxu0 %v3695_v57  ;;  %2269 = vmatprep.subr.bf16.mxu1 %v3700_v0  ;;  %v3755_v57 = vld [vmem:[%s4953_s1 + $0x6c0] ss:$8 sps:$4 sm:$0xff]  }
  0x92   : > { %2561 = vmatprep.subr.bf16.mxu0 %v3703_v1  ;;  %2242 = vmatprep.mubr.bf16.mxu1 %v3047_v2  ;;  %v3764_v0 = vld [vmem:[%s4953_s1 + $0x2e0] ss:$8 sps:$4 sm:$0xff]   ;;  %v3772_v2 = vld [vmem:[%s4953_s1 + $0x2f4] ss:$8 sps:$4 sm:$0xff]  }
  0x93   : > { %2534 = vmatprep.mubr.bf16.mxu0 %v3055_v3  ;;  %v3767_v1 = vld [vmem:[%s4953_s1 + $0x6e0] ss:$8 sps:$4 sm:$0xff]   ;;  %v3775_v3 = vld [vmem:[%s4953_s1 + $0x6f4] ss:$8 sps:$4 sm:$0xff]  }
  0x94   : > { %2270 = vmatpush1.bf16.msra.mxu1 %v3698_v4  ;;  %v3770_v4 = vld [vmem:[%s4953_s1 + $0x2f0] ss:$8 sps:$4 sm:$0xff]  }
  0x95   : > { %2562 = vmatpush1.bf16.msra.mxu0 %v3701_v5  ;;  %2271 = vmatprep.subr.bf16.mxu1 %v3706_v6  ;;  %v3773_v5 = vld [vmem:[%s4953_s1 + $0x6f0] ss:$8 sps:$4 sm:$0xff]   ;;  %v3778_v6 = vld [vmem:[%s4953_s1 + $0x304] ss:$8 sps:$4 sm:$0xff]  }
  0x96   : > { %2563 = vmatprep.subr.bf16.mxu0 %v3709_v7  ;;  %v3781_v7 = vld [vmem:[%s4953_s1 + $0x704] ss:$8 sps:$4 sm:$0xff]  }
  0x97   : > { %2243 = vmatmul.mubr.bf16.gmra.mrb[8].mxu1 %v3046_v12  ;;  %v219_v12 = vld [vmem:[%s4075_s4 + $0xb0] sm:$0xff] }
  0x98   : > { %2535 = vmatmul.mubr.bf16.gmra.mrb[8].mxu0 %v3054_v13  ;;  %2272 = vmatpush1.bf16.msra.mxu1 %v3704_v8  ;;  %v215_v8 = vld [vmem:[%s4075_s4 + $0x90] sm:$0xff] }
  0x99   : > { %2564 = vmatpush1.bf16.msra.mxu0 %v3707_v9  ;;  %2273 = vmatprep.subr.bf16.mxu1 %v3712_v16  ;;  %v3016_v9 = vcombine.low %v4462_v26, %v4465_v27  ;;  %v227_v13 = vld [vmem:[%s4075_s4 + $0xf0] sm:$0xff] }
  0x9a   : > { %2565 = vmatprep.subr.bf16.mxu0 %v3715_v17  ;;  %2252 = vmatprep.mubr.bf16.mxu1 %v3063_v18  ;;  %v3784_v16 = vld [vmem:[%s4953_s1 + $0x314] ss:$8 sps:$4 sm:$0xff]   ;;  %v3033_v18 = vcombine.high %v215_v8, %v223_v11  ;;  %v3040_v26 = vcombine.low %v219_v12, %v227_v13 }
  0x9b   : > { %2544 = vmatprep.mubr.bf16.mxu0 %v3071_v19  ;;  %v3787_v17 = vld [vmem:[%s4953_s1 + $0x714] ss:$8 sps:$4 sm:$0xff]   ;;  %v3041_v19 = vcombine.high %v219_v12, %v227_v13  ;;  %v3830_v12 = vld [vmem:[%s4953_s1 + $0x390] ss:$8 sps:$4 sm:$0xff]  }
  0x9c   : > { %2274 = vmatpush1.bf16.msra.mxu1 %v3710_v20  ;;  %v3782_v20 = vld [vmem:[%s4953_s1 + $0x310] ss:$8 sps:$4 sm:$0xff]  }
  0x9d   : > { %2566 = vmatpush1.bf16.msra.mxu0 %v3713_v21  ;;  %2275 = vmatprep.subr.bf16.mxu1 %v3718_v22  ;;  %v3785_v21 = vld [vmem:[%s4953_s1 + $0x710] ss:$8 sps:$4 sm:$0xff]   ;;  %v3790_v22 = vld [vmem:[%s4953_s1 + $0x324] ss:$8 sps:$4 sm:$0xff]  }
  0x9e   : > { %2567 = vmatprep.subr.bf16.mxu0 %v3721_v23  ;;  %v3793_v23 = vld [vmem:[%s4953_s1 + $0x724] ss:$8 sps:$4 sm:$0xff]   ;;  %v239_v27 = vld [vmem:[%s4075_s4 + $0x150] sm:$0xff] }
  0x9f   : > { %2253 = vmatmul.mubr.bf16.gmra.mrb[12].mxu1 %v3062_v28  ;;  %v235_v28 = vld [vmem:[%s4075_s4 + $0x130] sm:$0xff] }
  0xa0   : > { %2545 = vmatmul.mubr.bf16.gmra.mrb[12].mxu0 %v3070_v29  ;;  %2276 = vmatpush1.bf16.msra.mxu1 %v3716_v24  ;;  %v231_v24 = vld [vmem:[%s4075_s4 + $0x110] sm:$0xff] }
  0xa1   : > { %2568 = vmatpush1.bf16.msra.mxu0 %v3719_v25  ;;  %2277 = vmatprep.subr.bf16.mxu1 %v3724_v32  ;;  %v3032_v25 = vcombine.low %v215_v8, %v223_v11  ;;  %v243_v29 = vld [vmem:[%s4075_s4 + $0x170] sm:$0xff]  ;;  %v3824_v8 = vld [vmem:[%s4953_s1 + $0x380] ss:$8 sps:$4 sm:$0xff]  }
  0xa2   : > { %2569 = vmatprep.subr.bf16.mxu0 %v3727_v33  ;;  %2295 = vmatprep.mubr.bf16.mxu1 %v3017_v34  ;;  %v3796_v32 = vld [vmem:[%s4953_s1 + $0x334] ss:$8 sps:$4 sm:$0xff]   ;;  %v3049_v34 = vcombine.high %v231_v24, %v239_v27  ;;  %v3833_v13 = vld [vmem:[%s4953_s1 + $0x790] ss:$8 sps:$4 sm:$0xff]  }
  0xa3   : > { %2587 = vmatprep.mubr.bf16.mxu0 %v3025_v35  ;;  %v3799_v33 = vld [vmem:[%s4953_s1 + $0x734] ss:$8 sps:$4 sm:$0xff]   ;;  %v3057_v35 = vcombine.high %v235_v28, %v243_v29 }
  0xa4   : > { %2278 = vmatpush1.bf16.msra.mxu1 %v3722_v36  ;;  %v3794_v36 = vld [vmem:[%s4953_s1 + $0x330] ss:$8 sps:$4 sm:$0xff]   ;;  %v3835_v11 = vld [vmem:[%s4953_s1 + $0x794] ss:$8 sps:$4 sm:$0xff]  }
  0xa5   : > { %2570 = vmatpush1.bf16.msra.mxu0 %v3725_v37  ;;  %2279 = vmatprep.subr.bf16.mxu1 %v3730_v38  ;;  %v3797_v37 = vld [vmem:[%s4953_s1 + $0x730] ss:$8 sps:$4 sm:$0xff]   ;;  %v3802_v38 = vld [vmem:[%s4953_s1 + $0x344] ss:$8 sps:$4 sm:$0xff]  }
  0xa6   : > { %2571 = vmatprep.subr.bf16.mxu0 %v3733_v39  ;;  %v3805_v39 = vld [vmem:[%s4953_s1 + $0x744] ss:$8 sps:$4 sm:$0xff]  }
  0xa8   : > { %2280 = vmatpush1.bf16.msra.mxu1 %v3728_v40  ;;  %v247_v40 = vld [vmem:[%s4075_s4 + $0x190] sm:$0xff] }
  0xa9   : > { %2572 = vmatpush1.bf16.msra.mxu0 %v3731_v41  ;;  %2281 = vmatprep.subr.bf16.mxu1 %v3736_v42  ;;  %v3048_v41 = vcombine.low %v231_v24, %v239_v27  ;;  %v3056_v42 = vcombine.low %v235_v28, %v243_v29  ;;  %v3848_v24 = vld [vmem:[%s4953_s1 + $0x3c0] ss:$8 sps:$4 sm:$0xff]   ;;  %v3859_v27 = vld [vmem:[%s4953_s1 + $0x7d4] ss:$8 sps:$4 sm:$0xff]   ;;  %v3854_v28 = vld [vmem:[%s4953_s1 + $0x3d0] ss:$8 sps:$4 sm:$0xff]  }
  0xaa   : > { %2573 = vmatprep.subr.bf16.mxu0 %v3739_v43  ;;  %v255_v43 = vld [vmem:[%s4075_s4 + $0x1d0] sm:$0xff] }
  0xab   : > { %v3857_v29 = vld [vmem:[%s4953_s1 + $0x7d0] ss:$8 sps:$4 sm:$0xff]  }
  0xac   : > { %2282 = vmatpush1.bf16.msra.mxu1 %v3734_v44  ;;  %v251_v44 = vld [vmem:[%s4075_s4 + $0x1b0] sm:$0xff] }
  0xad   : > { %2574 = vmatpush1.bf16.msra.mxu0 %v3737_v45  ;;  %2283 = vmatprep.subr.bf16.mxu1 %v3742_v46  ;;  %v259_v45 = vld [vmem:[%s4075_s4 + $0x1f0] sm:$0xff]  ;;  %v3800_v46 = vld [vmem:[%s4953_s1 + $0x340] ss:$8 sps:$4 sm:$0xff]  }
  0xae   : > { %2575 = vmatprep.subr.bf16.mxu0 %v3745_v47  ;;  %v3803_v47 = vld [vmem:[%s4953_s1 + $0x740] ss:$8 sps:$4 sm:$0xff]  }
  0xb0   : > { %2284 = vmatpush1.bf16.msra.mxu1 %v3740_v48  ;;  %v3808_v48 = vld [vmem:[%s4953_s1 + $0x354] ss:$8 sps:$4 sm:$0xff]  }
  0xb1   : > { %2576 = vmatpush1.bf16.msra.mxu0 %v3743_v49  ;;  %2285 = vmatprep.subr.bf16.mxu1 %v3748_v50  ;;  %v3811_v49 = vld [vmem:[%s4953_s1 + $0x754] ss:$8 sps:$4 sm:$0xff]   ;;  %v3065_v50 = vcombine.high %v247_v40, %v255_v43 }
  0xb2   : > { %2577 = vmatprep.subr.bf16.mxu0 %v3751_v51  ;;  %v3073_v51 = vcombine.high %v251_v44, %v259_v45 }
  0xb4   : > { %2286 = vmatpush1.bf16.msra.mxu1 %v3746_v52  ;;  %v3806_v52 = vld [vmem:[%s4953_s1 + $0x350] ss:$8 sps:$4 sm:$0xff]  }
  0xb5   : > { %2578 = vmatpush1.bf16.msra.mxu0 %v3749_v53  ;;  %2287 = vmatprep.subr.bf16.mxu1 %v3754_v54  ;;  %v3809_v53 = vld [vmem:[%s4953_s1 + $0x750] ss:$8 sps:$4 sm:$0xff]   ;;  %v3814_v54 = vld [vmem:[%s4953_s1 + $0x364] ss:$8 sps:$4 sm:$0xff]  }
  0xb6   : > { %2579 = vmatprep.subr.bf16.mxu0 %v3757_v55  ;;  %v3817_v55 = vld [vmem:[%s4953_s1 + $0x764] ss:$8 sps:$4 sm:$0xff]  }
  0xb8   : > { %2288 = vmatpush1.bf16.msra.mxu1 %v3752_v56  ;;  %v4680_v56 = vld [vmem:[%s4075_s4 + $0x18] sm:$0xff] }
  0xb9   : > { %2580 = vmatpush1.bf16.msra.mxu0 %v3755_v57  ;;  %2289 = vmatprep.subr.bf16.mxu1 %v3760_v58  ;;  %v3064_v57 = vcombine.low %v247_v40, %v255_v43  ;;  %v3072_v58 = vcombine.low %v251_v44, %v259_v45  ;;  %v220_v40 = vld [vmem:[%s4075_s4 + $0xb8] sm:$0xff] }
  0xba   : > { %2581 = vmatprep.subr.bf16.mxu0 %v3763_v59  ;;  %v4683_v59 = vld [vmem:[%s4075_s4 + $0x58] sm:$0xff] }
  0xbc   : > { %2290 = vmatpush1.bf16.msra.mxu1 %v3758_v60  ;;  %v4686_v60 = vld [vmem:[%s4075_s4 + $0x38] sm:$0xff] }
  0xbd   : > { %2582 = vmatpush1.bf16.msra.mxu0 %v3761_v61  ;;  %2291 = vmatprep.subr.bf16.mxu1 %v3766_v62  ;;  %v4689_v61 = vld [vmem:[%s4075_s4 + $0x78] sm:$0xff]  ;;  %v3812_v62 = vld [vmem:[%s4953_s1 + $0x360] ss:$8 sps:$4 sm:$0xff]  }
  0xbe   : > { %2583 = vmatprep.subr.bf16.mxu0 %v3769_v63  ;;  %v3815_v63 = vld [vmem:[%s4953_s1 + $0x760] ss:$8 sps:$4 sm:$0xff]   ;;  %v3026_v43 = vcombine.low %v4686_v60, %v4689_v61 }
  0xc0   : > { %2292 = vmatpush1.bf16.msra.mxu1 %v3764_v0  ;;  %v3820_v0 = vld [vmem:[%s4953_s1 + $0x374] ss:$8 sps:$4 sm:$0xff]  }
  0xc1   : > { %2584 = vmatpush1.bf16.msra.mxu0 %v3767_v1  ;;  %2293 = vmatprep.subr.bf16.mxu1 %v3772_v2  ;;  %v3823_v1 = vld [vmem:[%s4953_s1 + $0x774] ss:$8 sps:$4 sm:$0xff]   ;;  %v3019_v2 = vcombine.high %v4680_v56, %v4683_v59 }
  0xc2   : > { %2585 = vmatprep.subr.bf16.mxu0 %v3775_v3  ;;  %v3027_v3 = vcombine.high %v4686_v60, %v4689_v61 }
  0xc4   : > { %2294 = vmatpush1.bf16.msra.mxu1 %v3770_v4  ;;  %v3818_v4 = vld [vmem:[%s4953_s1 + $0x370] ss:$8 sps:$4 sm:$0xff]  }
  0xc5   : > { %2586 = vmatpush1.bf16.msra.mxu0 %v3773_v5  ;;  %2336 = vmatprep.subr.bf16.mxu1 %v3778_v6  ;;  %v3821_v5 = vld [vmem:[%s4953_s1 + $0x770] ss:$8 sps:$4 sm:$0xff]   ;;  %v3826_v6 = vld [vmem:[%s4953_s1 + $0x384] ss:$8 sps:$4 sm:$0xff]  }
  0xc6   : > { %2628 = vmatprep.subr.bf16.mxu0 %v3781_v7  ;;  %v3829_v7 = vld [vmem:[%s4953_s1 + $0x784] ss:$8 sps:$4 sm:$0xff]  }
  0xc7   : > { %2296 = vmatmul.mubr.bf16.vlgmr.msra.gmra.mrb[0].mxu1 %v3016_v9  ;;  %v3827_v9 = vld [vmem:[%s4953_s1 + $0x780] ss:$8 sps:$4 sm:$0xff]  }
  0xc8   : > { %2588 = vmatmul.mubr.bf16.vlgmr.msra.gmra.mrb[0].mxu0 %v3024_v10  ;;  %2337 = vmatpush1.bf16.msra.mxu1 %v3776_v14  ;;  %v3832_v10 = vld [vmem:[%s4953_s1 + $0x394] ss:$8 sps:$4 sm:$0xff]   ;;  %v3838_v14 = vld [vmem:[%s4953_s1 + $0x3a4] ss:$8 sps:$4 sm:$0xff]  }
  0xc9   : > { %2629 = vmatpush1.bf16.msra.mxu0 %v3779_v15  ;;  %2338 = vmatprep.subr.bf16.mxu1 %v3784_v16  ;;  %v3841_v15 = vld [vmem:[%s4953_s1 + $0x7a4] ss:$8 sps:$4 sm:$0xff]   ;;  %v3836_v16 = vld [vmem:[%s4953_s1 + $0x3a0] ss:$8 sps:$4 sm:$0xff]  }
  0xca   : > { %2630 = vmatprep.subr.bf16.mxu0 %v3787_v17  ;;  %2305 = vmatprep.mubr.bf16.mxu1 %v3033_v18  ;;  %v3839_v17 = vld [vmem:[%s4953_s1 + $0x7a0] ss:$8 sps:$4 sm:$0xff]   ;;  %v3844_v18 = vld [vmem:[%s4953_s1 + $0x3b4] ss:$8 sps:$4 sm:$0xff]  }
  0xcb   : > { %2597 = vmatprep.mubr.bf16.mxu0 %v3041_v19  ;;  %v3847_v19 = vld [vmem:[%s4953_s1 + $0x7b4] ss:$8 sps:$4 sm:$0xff]  }
  0xcc   : > { %2339 = vmatpush1.bf16.msra.mxu1 %v3782_v20  ;;  %v3842_v20 = vld [vmem:[%s4953_s1 + $0x3b0] ss:$8 sps:$4 sm:$0xff]  }
  0xcd   : > { %2631 = vmatpush1.bf16.msra.mxu0 %v3785_v21  ;;  %2340 = vmatprep.subr.bf16.mxu1 %v3790_v22  ;;  %v3845_v21 = vld [vmem:[%s4953_s1 + $0x7b0] ss:$8 sps:$4 sm:$0xff]   ;;  %v3850_v22 = vld [vmem:[%s4953_s1 + $0x3c4] ss:$8 sps:$4 sm:$0xff]  }
  0xce   : > { %2632 = vmatprep.subr.bf16.mxu0 %v3793_v23  ;;  %v3853_v23 = vld [vmem:[%s4953_s1 + $0x7c4] ss:$8 sps:$4 sm:$0xff]  }
  0xcf   : > { %2306 = vmatmul.mubr.bf16.gmra.mrb[4].mxu1 %v3032_v25  ;;  %v3851_v25 = vld [vmem:[%s4953_s1 + $0x7c0] ss:$8 sps:$4 sm:$0xff]  }
  0xd0   : > { %2598 = vmatmul.mubr.bf16.gmra.mrb[4].mxu0 %v3040_v26  ;;  %2341 = vmatpush1.bf16.msra.mxu1 %v3788_v30  ;;  %v3856_v26 = vld [vmem:[%s4953_s1 + $0x3d4] ss:$8 sps:$4 sm:$0xff]   ;;  %v3862_v30 = vld [vmem:[%s4953_s1 + $0x3e4] ss:$8 sps:$4 sm:$0xff]  }
  0xd1   : > { %2633 = vmatpush1.bf16.msra.mxu0 %v3791_v31  ;;  %2342 = vmatprep.subr.bf16.mxu1 %v3796_v32  ;;  %v3865_v31 = vld [vmem:[%s4953_s1 + $0x7e4] ss:$8 sps:$4 sm:$0xff]   ;;  %v3860_v32 = vld [vmem:[%s4953_s1 + $0x3e0] ss:$8 sps:$4 sm:$0xff]  }
  0xd2   : > { %2634 = vmatprep.subr.bf16.mxu0 %v3799_v33  ;;  %2315 = vmatprep.mubr.bf16.mxu1 %v3049_v34  ;;  %v3863_v33 = vld [vmem:[%s4953_s1 + $0x7e0] ss:$8 sps:$4 sm:$0xff]   ;;  %v3868_v34 = vld [vmem:[%s4953_s1 + $0x3f4] ss:$8 sps:$4 sm:$0xff]  }
  0xd3   : > { %2607 = vmatprep.mubr.bf16.mxu0 %v3057_v35  ;;  %v3871_v35 = vld [vmem:[%s4953_s1 + $0x7f4] ss:$8 sps:$4 sm:$0xff]  }
  0xd4   : > { %2343 = vmatpush1.bf16.msra.mxu1 %v3794_v36  ;;  %v3866_v36 = vld [vmem:[%s4953_s1 + $0x3f0] ss:$8 sps:$4 sm:$0xff]  }
  0xd5   : > { %2635 = vmatpush1.bf16.msra.mxu0 %v3797_v37  ;;  %2344 = vmatprep.subr.bf16.mxu1 %v3802_v38  ;;  %v3869_v37 = vld [vmem:[%s4953_s1 + $0x7f0] ss:$8 sps:$4 sm:$0xff]  }
  0xd6   : > { %2636 = vmatprep.subr.bf16.mxu0 %v3805_v39  ;;  %v216_v38 = vld [vmem:[%s4075_s4 + $0x98] sm:$0xff] }
  0xd7   : > { %2316 = vmatmul.mubr.bf16.gmra.mrb[8].mxu1 %v3048_v41  ;;  %v224_v39 = vld [vmem:[%s4075_s4 + $0xd8] sm:$0xff] }
  0xd8   : > { %2608 = vmatmul.mubr.bf16.gmra.mrb[8].mxu0 %v3056_v42  ;;  %2345 = vmatpush1.bf16.msra.mxu1 %v3800_v46  ;;  %v228_v41 = vld [vmem:[%s4075_s4 + $0xf8] sm:$0xff]  ;;  %v3018_v42 = vcombine.low %v4680_v56, %v4683_v59  ;;  %v3035_v44 = vcombine.high %v216_v38, %v224_v39 }
  0xd9   : > { %2637 = vmatpush1.bf16.msra.mxu0 %v3803_v47  ;;  %2346 = vmatprep.subr.bf16.mxu1 %v3808_v48  ;;  %v3043_v45 = vcombine.high %v220_v40, %v228_v41  ;;  %v232_v46 = vld [vmem:[%s4075_s4 + $0x118] sm:$0xff] }
  0xda   : > { %2638 = vmatprep.subr.bf16.mxu0 %v3811_v49  ;;  %2325 = vmatprep.mubr.bf16.mxu1 %v3065_v50  ;;  %v240_v47 = vld [vmem:[%s4075_s4 + $0x158] sm:$0xff]  ;;  %v3034_v50 = vcombine.low %v216_v38, %v224_v39 }
  0xdb   : > { %2617 = vmatprep.mubr.bf16.mxu0 %v3073_v51  ;;  %v236_v48 = vld [vmem:[%s4075_s4 + $0x138] sm:$0xff]  ;;  %v3042_v51 = vcombine.low %v220_v40, %v228_v41 }
  0xdc   : > { %2347 = vmatpush1.bf16.msra.mxu1 %v3806_v52  ;;  %v244_v49 = vld [vmem:[%s4075_s4 + $0x178] sm:$0xff]  ;;  %v3051_v52 = vcombine.high %v232_v46, %v240_v47 }
  0xdd   : > { %2639 = vmatpush1.bf16.msra.mxu0 %v3809_v53  ;;  %2348 = vmatprep.subr.bf16.mxu1 %v3814_v54  ;;  %v3059_v53 = vcombine.high %v236_v48, %v244_v49  ;;  %v248_v54 = vld [vmem:[%s4075_s4 + $0x198] sm:$0xff]  ;;  %v3058_v59 = vcombine.low %v236_v48, %v244_v49 }
  0xde   : > { %2640 = vmatprep.subr.bf16.mxu0 %v3817_v55  ;;  %v256_v55 = vld [vmem:[%s4075_s4 + $0x1d8] sm:$0xff] }
  0xdf   : > { %2326 = vmatmul.mubr.bf16.gmra.mrb[12].mxu1 %v3064_v57  ;;  %v252_v56 = vld [vmem:[%s4075_s4 + $0x1b8] sm:$0xff]  ;;  %v3067_v60 = vcombine.high %v248_v54, %v256_v55 }
  0xe0   : > { %2618 = vmatmul.mubr.bf16.gmra.mrb[12].mxu0 %v3072_v58  ;;  %2349 = vmatpush1.bf16.msra.mxu1 %v3812_v62  ;;  %v260_v57 = vld [vmem:[%s4075_s4 + $0x1f8] sm:$0xff]  ;;  %v3050_v58 = vcombine.low %v232_v46, %v240_v47  ;;  %v3066_v62 = vcombine.low %v248_v54, %v256_v55  ;;  %s3343_s4 = sshll.u32 %s4960_s9, 6 }
  0xe1   : > { %2641 = vmatpush1.bf16.msra.mxu0 %v3815_v63  ;;  %2350 = vmatprep.subr.bf16.mxu1 %v3820_v0  ;;  %v3075_v61 = vcombine.high %v252_v56, %v260_v57  ;;  %v3074_v63 = vcombine.low %v252_v56, %v260_v57  ;;  %s196_s21 = scalar_lea.vmem %s4954_s2, %s3343_s4 }
  0xe2   : > { %2642 = vmatprep.subr.bf16.mxu0 %v3823_v1  ;;  %2368 = vmatprep.mubr.bf16.mxu1 %v3019_v2 }
  0xe3   : > { %2660 = vmatprep.mubr.bf16.mxu0 %v3027_v3 }
  0xe4   : > { %2351 = vmatpush1.bf16.msra.mxu1 %v3818_v4 }
  0xe5   : > { %2643 = vmatpush1.bf16.msra.mxu0 %v3821_v5  ;;  %2352 = vmatprep.subr.bf16.mxu1 %v3826_v6 }
  0xe6   : > { %2644 = vmatprep.subr.bf16.mxu0 %v3829_v7 }
  0xe8   : > { %2353 = vmatpush1.bf16.msra.mxu1 %v3824_v8 }
  0xe9   : > { %2645 = vmatpush1.bf16.msra.mxu0 %v3827_v9  ;;  %2354 = vmatprep.subr.bf16.mxu1 %v3832_v10 }
  0xea   : > { %2646 = vmatprep.subr.bf16.mxu0 %v3835_v11 }
  0xec   : > { %2355 = vmatpush1.bf16.msra.mxu1 %v3830_v12 }
  0xed   : > { %2647 = vmatpush1.bf16.msra.mxu0 %v3833_v13  ;;  %2356 = vmatprep.subr.bf16.mxu1 %v3838_v14 }
  0xee   : > { %2648 = vmatprep.subr.bf16.mxu0 %v3841_v15 }
  0xf0   : > { %2357 = vmatpush1.bf16.msra.mxu1 %v3836_v16 }
  0xf1   : > { %2649 = vmatpush1.bf16.msra.mxu0 %v3839_v17  ;;  %2358 = vmatprep.subr.bf16.mxu1 %v3844_v18 }
  0xf2   : > { %2650 = vmatprep.subr.bf16.mxu0 %v3847_v19 }
  0xf4   : > { %2359 = vmatpush1.bf16.msra.mxu1 %v3842_v20 }
  0xf5   : > { %2651 = vmatpush1.bf16.msra.mxu0 %v3845_v21  ;;  %2360 = vmatprep.subr.bf16.mxu1 %v3850_v22 }
  0xf6   : > { %2652 = vmatprep.subr.bf16.mxu0 %v3853_v23 }
  0xf8   : > { %2361 = vmatpush1.bf16.msra.mxu1 %v3848_v24 }
  0xf9   : > { %2653 = vmatpush1.bf16.msra.mxu0 %v3851_v25  ;;  %2362 = vmatprep.subr.bf16.mxu1 %v3856_v26 }
  0xfa   : > { %2654 = vmatprep.subr.bf16.mxu0 %v3859_v27 }
  0xfc   : > { %2363 = vmatpush1.bf16.msra.mxu1 %v3854_v28 }
  0xfd   : > { %2655 = vmatpush1.bf16.msra.mxu0 %v3857_v29  ;;  %2364 = vmatprep.subr.bf16.mxu1 %v3862_v30 }
  0xfe   : > { %2656 = vmatprep.subr.bf16.mxu0 %v3865_v31 }
 0x100   : > { %2365 = vmatpush1.bf16.msra.mxu1 %v3860_v32 }
 0x101   : > { %2657 = vmatpush1.bf16.msra.mxu0 %v3863_v33  ;;  %2366 = vmatprep.subr.bf16.mxu1 %v3868_v34 }
 0x102   : > { %2658 = vmatprep.subr.bf16.mxu0 %v3871_v35 }
 0x104   : > { %2367 = vmatpush1.bf16.msra.mxu1 %v3866_v36 }
 0x105   : > { %2659 = vmatpush1.bf16.msra.mxu0 %v3869_v37 }
 0x107   : > { %2369 = vmatmul.mubr.bf16.vlgmr.msra.gmra.mrb[0].mxu1 %v3018_v42 }
 0x108   : > { %2661 = vmatmul.mubr.bf16.vlgmr.msra.gmra.mrb[0].mxu0 %v3026_v43  ;;  %2378 = vmatprep.mubr.bf16.mxu1 %v3035_v44 }
 0x109   : > { %2670 = vmatprep.mubr.bf16.mxu0 %v3043_v45 }
 0x10f   : > { %2379 = vmatmul.mubr.bf16.gmra.mrb[4].mxu1 %v3034_v50 }
 0x110   : > { %2671 = vmatmul.mubr.bf16.gmra.mrb[4].mxu0 %v3042_v51  ;;  %2388 = vmatprep.mubr.bf16.mxu1 %v3051_v52 }
 0x111   : > { %2680 = vmatprep.mubr.bf16.mxu0 %v3059_v53 }
 0x117   : > { %2389 = vmatmul.mubr.bf16.gmra.mrb[8].mxu1 %v3050_v58 }
 0x118   : > { %2681 = vmatmul.mubr.bf16.gmra.mrb[8].mxu0 %v3058_v59  ;;  %2398 = vmatprep.mubr.bf16.mxu1 %v3067_v60 }
 0x119   : > { %2690 = vmatprep.mubr.bf16.mxu0 %v3075_v61 }
 0x11f   : > { %2399 = vmatmul.mubr.bf16.gmra.mrb[12].mxu1 %v3066_v62 }
 0x120   : > { %2691 = vmatmul.mubr.bf16.gmra.mrb[12].mxu0 %v3074_v63 }
 0x1da   : > { %v2370_v0 = vpop.f32.mrb[0].mxu1 }
 0x1db   : > { %v2662_v1 = vpop.f32.mrb[0].mxu0  ;;  %v2372_v3 = vpop.f32.mrb[1].mxu1 }
 0x1dc   : > { %v4825_v2 = vadd.f32 %v2662_v1, %v2370_v0  ;;  %v2664_v4 = vpop.f32.mrb[1].mxu0  ;;  %v2374_v6 = vpop.f32.mrb[2].mxu1 }
 0x1dd   : > { %v4827_v5 = vadd.f32 %v2664_v4, %v2372_v3  ;;  %v2666_v7 = vpop.f32.mrb[2].mxu0  ;;  %v2376_v9 = vpop.f32.mrb[3].mxu1 }
 0x1de   : > { %v4829_v8 = vadd.f32 %v2666_v7, %v2374_v6  ;;  %v2668_v10 = vpop.f32.mrb[3].mxu0  ;;  %v2727_v12 = vmul.f32 %v4825_v2, %v4825_v2 }
 0x1df   : > { %v4831_v11 = vadd.f32 %v2668_v10, %v2376_v9  ;;  %v2728_v15 = vmul.f32 %v4827_v5, %v4827_v5 }
 0x1e0   : > { %v2701_v13 = vadd.f32 %v4829_v8, %v4825_v2  ;;  %v2729_v14 = vmul.f32 %v4829_v8, %v4829_v8 }
 0x1e1   : > { %v2714_v16 = vadd.f32 %v4831_v11, %v4827_v5  ;;  %v2730_v17 = vmul.f32 %v4831_v11, %v4831_v11 }
 0x1e2   : > { %v2743_v18 = vadd.f32 %v2729_v14, %v2727_v12  ;;  %v2380_v20 = vpop.f32.mrb[4].mxu1 }
 0x1e3   : > { %v2756_v19 = vadd.f32 %v2730_v17, %v2728_v15  ;;  %v2672_v21 = vpop.f32.mrb[4].mxu0  ;;  %v2382_v23 = vpop.f32.mrb[5].mxu1 }
 0x1e4   : > { %v4845_v22 = vadd.f32 %v2672_v21, %v2380_v20  ;;  %v2674_v24 = vpop.f32.mrb[5].mxu0  ;;  %v2384_v26 = vpop.f32.mrb[6].mxu1 }
 0x1e5   : > { %v4847_v25 = vadd.f32 %v2674_v24, %v2382_v23  ;;  %v2676_v27 = vpop.f32.mrb[6].mxu0  ;;  %v2386_v31 = vpop.f32.mrb[7].mxu1 }
 0x1e6   : > { %v2702_v28 = vadd.f32 %v4845_v22, %v2701_v13  ;;  %v2731_v29 = vmul.f32 %v4845_v22, %v4845_v22  ;;  %v4852_v30 = vadd.f32 %v2676_v27, %v2384_v26  ;;  %v2678_v32 = vpop.f32.mrb[7].mxu0 }
 0x1e7   : > { %v2715_v33 = vadd.f32 %v4847_v25, %v2714_v16  ;;  %v2732_v34 = vmul.f32 %v4847_v25, %v4847_v25  ;;  %v4857_v35 = vadd.f32 %v2678_v32, %v2386_v31 }
 0x1e8   : > { %v2744_v36 = vadd.f32 %v2743_v18, %v2731_v29  ;;  %v2703_v37 = vadd.f32 %v4852_v30, %v2702_v28  ;;  %v2733_v38 = vmul.f32 %v4852_v30, %v4852_v30 }
 0x1e9   : > { %v2757_v39 = vadd.f32 %v2756_v19, %v2732_v34  ;;  %v2716_v40 = vadd.f32 %v4857_v35, %v2715_v33  ;;  %v2734_v41 = vmul.f32 %v4857_v35, %v4857_v35 }
 0x1ea   : > { %v2745_v42 = vadd.f32 %v2744_v36, %v2733_v38  ;;  %v2390_v44 = vpop.f32.mrb[8].mxu1 }
 0x1eb   : > { %v2758_v43 = vadd.f32 %v2757_v39, %v2734_v41  ;;  %v2682_v45 = vpop.f32.mrb[8].mxu0  ;;  %v2392_v47 = vpop.f32.mrb[9].mxu1 }
 0x1ec   : > { %v4865_v46 = vadd.f32 %v2682_v45, %v2390_v44  ;;  %v2684_v48 = vpop.f32.mrb[9].mxu0  ;;  %v2394_v50 = vpop.f32.mrb[10].mxu1 }
 0x1ed   : > { %v4867_v49 = vadd.f32 %v2684_v48, %v2392_v47  ;;  %v2686_v51 = vpop.f32.mrb[10].mxu0  ;;  %v2396_v55 = vpop.f32.mrb[11].mxu1 }
 0x1ee   : > { %v2704_v52 = vadd.f32 %v4865_v46, %v2703_v37  ;;  %v2735_v53 = vmul.f32 %v4865_v46, %v4865_v46  ;;  %v4872_v54 = vadd.f32 %v2686_v51, %v2394_v50  ;;  %v2688_v56 = vpop.f32.mrb[11].mxu0 }
 0x1ef   : > { %v2717_v57 = vadd.f32 %v4867_v49, %v2716_v40  ;;  %v2736_v58 = vmul.f32 %v4867_v49, %v4867_v49  ;;  %v4877_v59 = vadd.f32 %v2688_v56, %v2396_v55 }
 0x1f0   : > { %v2746_v60 = vadd.f32 %v2745_v42, %v2735_v53  ;;  %v2705_v61 = vadd.f32 %v4872_v54, %v2704_v52  ;;  %v2737_v62 = vmul.f32 %v4872_v54, %v4872_v54 }
 0x1f1   : > { %v2759_v63 = vadd.f32 %v2758_v43, %v2736_v58  ;;  %v2718_v0 = vadd.f32 %v4877_v59, %v2717_v57  ;;  %v2738_v1 = vmul.f32 %v4877_v59, %v4877_v59 }
 0x1f2   : > { %v2747_v3 = vadd.f32 %v2746_v60, %v2737_v62  ;;  %v2400_v6 = vpop.f32.mrb[12].mxu1 }
 0x1f3   : > { %v2760_v4 = vadd.f32 %v2759_v63, %v2738_v1  ;;  %v2692_v7 = vpop.f32.mrb[12].mxu0  ;;  %v2402_v10 = vpop.f32.mrb[13].mxu1 }
 0x1f4   : > { %v4885_v9 = vadd.f32 %v2692_v7, %v2400_v6  ;;  %v2694_v12 = vpop.f32.mrb[13].mxu0  ;;  %v2404_v14 = vpop.f32.mrb[14].mxu1 }
 0x1f5   : > { %v4887_v13 = vadd.f32 %v2694_v12, %v2402_v10  ;;  %v2696_v15 = vpop.f32.mrb[14].mxu0  ;;  %v2406_v19 = vpop.f32.mrb[15].mxu1 }
 0x1f6   : > { %v2706_v16 = vadd.f32 %v4885_v9, %v2705_v61  ;;  %v2739_v17 = vmul.f32 %v4885_v9, %v4885_v9  ;;  %v4892_v18 = vadd.f32 %v2696_v15, %v2404_v14  ;;  %v2698_v20 = vpop.f32.mrb[15].mxu0 }
 0x1f7   : > { %v2719_v21 = vadd.f32 %v4887_v13, %v2718_v0  ;;  %v2740_v23 = vmul.f32 %v4887_v13, %v4887_v13  ;;  %v4897_v24 = vadd.f32 %v2698_v20, %v2406_v19 }
 0x1f8   : > { %v2748_v26 = vadd.f32 %v2747_v3, %v2739_v17  ;;  %v2707_v27 = vadd.f32 %v4892_v18, %v2706_v16  ;;  %v2741_v28 = vmul.f32 %v4892_v18, %v4892_v18 }
 0x1f9   : > { %v2761_v29 = vadd.f32 %v2760_v4, %v2740_v23  ;;  %v2720_v31 = vadd.f32 %v4897_v24, %v2719_v21  ;;  %v2742_v32 = vmul.f32 %v4897_v24, %v4897_v24 }
 0x1fa   : > { %v2708_v33 = vrot.slane %v2707_v27, 4  ;;  %v2749_v34 = vadd.f32 %v2748_v26, %v2741_v28 }
 0x1fb   : > { %v2721_v36 = vrot.slane %v2720_v31, 4  ;;  %v2762_v37 = vadd.f32 %v2761_v29, %v2742_v32 }
 0x1fc   : > { %v2709_v38 = vadd.f32 %v2708_v33, %v2707_v27  ;;  %v2750_v39 = vrot.slane %v2749_v34, 4 }
 0x1fd   : > { %v2722_v40 = vadd.f32 %v2721_v36, %v2720_v31  ;;  %v2763_v41 = vrot.slane %v2762_v37, 4 }
 0x1fe   : > { %v2710_v42 = vrot.slane %v2709_v38, 2  ;;  %v2751_v43 = vadd.f32 %v2750_v39, %v2749_v34 }
 0x1ff   : > { %v2723_v44 = vrot.slane %v2722_v40, 2  ;;  %v2764_v45 = vadd.f32 %v2763_v41, %v2762_v37 }
 0x200   : > { %v2711_v47 = vadd.f32 %v2710_v42, %v2709_v38  ;;  %v2752_v48 = vrot.slane %v2751_v43, 2 }
 0x201   : > { %v2724_v50 = vadd.f32 %v2723_v44, %v2722_v40  ;;  %v2765_v51 = vrot.slane %v2764_v45, 2 }
 0x202   : > { %v2712_v52 = vrot.slane %v2711_v47, 1  ;;  %v2753_v53 = vadd.f32 %v2752_v48, %v2751_v43 }
 0x203   : > { %v2725_v55 = vrot.slane %v2724_v50, 1  ;;  %v2766_v56 = vadd.f32 %v2765_v51, %v2764_v45 }
 0x204   : > { %v2713_v57 = vadd.f32 %v2712_v52, %v2711_v47  ;;  %v2754_v58 = vrot.slane %v2753_v53, 1 }
 0x205   : > { %v2726_v60 = vadd.f32 %v2725_v55, %v2724_v50  ;;  %v2767_v61 = vrot.slane %v2766_v56, 1 }
 0x206   : > { %v2755_v62 = vadd.f32 %v2754_v58, %v2753_v53  ;;  %v2769_v63 = vmul.f32 0.015625, %v2713_v57 }
 0x207   : > { %v2768_v0 = vadd.f32 %v2767_v61, %v2766_v56  ;;  %v2770_v1 = vmul.f32 0.015625, %v2726_v60 }
 0x208   : > { %v2771_v3 = vmul.f32 0.015625, %v2755_v62  ;;  %v2773_v4 = vmul.f32 %v2769_v63, %v2769_v63  ;;  %v2777_v6 = vsub.f32 %v4825_v2, %v2769_v63  ;;  %v2779_v7 = vsub.f32 %v4829_v8, %v2769_v63 }
 0x209   : > { %v2781_v10 = vsub.f32 %v4845_v22, %v2769_v63  ;;  %v2783_v12 = vsub.f32 %v4852_v30, %v2769_v63  ;;  %v2785_v14 = vsub.f32 %v4865_v46, %v2769_v63  ;;  %v2787_v15 = vsub.f32 %v4872_v54, %v2769_v63 }
 0x20a   : > { %v2775_v16 = vsub.f32 %v2771_v3, %v2773_v4  ;;  %v2789_v17 = vsub.f32 %v4885_v9, %v2769_v63  ;;  %v2791_v19 = vsub.f32 %v4892_v18, %v2769_v63  ;;  %v2772_v20 = vmul.f32 0.015625, %v2768_v0 }
 0x20b   : > { %v2774_v21 = vmul.f32 %v2770_v1, %v2770_v1  ;;  %v2778_v23 = vsub.f32 %v4827_v5, %v2770_v1  ;;  %v2780_v2 = vsub.f32 %v4831_v11, %v2770_v1  ;;  %v2782_v8 = vsub.f32 %v4847_v25, %v2770_v1 }
 0x20c   : > { %v2793_v22 = vadd.f32 1e-05, %v2775_v16  ;;  %v2784_v30 = vsub.f32 %v4857_v35, %v2770_v1  ;;  %v2786_v46 = vsub.f32 %v4867_v49, %v2770_v1  ;;  %v2788_v54 = vsub.f32 %v4877_v59, %v2770_v1 }
 0x20d   : > { %v2776_v26 = vsub.f32 %v2772_v20, %v2774_v21  ;;  %v2790_v9 = vsub.f32 %v4887_v13, %v2770_v1  ;;  %v2792_v18 = vsub.f32 %v4897_v24, %v2770_v1 }
 0x20e   : > { %3872 = vrsqrt.f32 %v2793_v22 }
 0x20f   : > { %v2794_v27 = vadd.f32 1e-05, %v2776_v26 }
 0x211   : > { %3874 = vrsqrt.f32 %v2794_v27 }
 0x218   : > { %v3873_v5 = vpop.eup %3872 }
 0x219   : > { %v2811_v28 = vmul.f32 %v3873_v5, %v2791_v19  ;;  %v2797_v11 = vmul.f32 %v3873_v5, %v2777_v6  ;;  %v2799_v29 = vmul.f32 %v3873_v5, %v2779_v7  ;;  %v2801_v25 = vmul.f32 %v3873_v5, %v2781_v10 }
 0x21a   : > { %v2803_v31 = vmul.f32 %v3873_v5, %v2783_v12  ;;  %v2805_v32 = vmul.f32 %v3873_v5, %v2785_v14  ;;  %v2807_v35 = vmul.f32 %v3873_v5, %v2787_v15  ;;  %v2809_v33 = vmul.f32 %v3873_v5, %v2789_v17 }
 0x21b   : > { %v3875_v49 = vpop.eup %3874  ;;  %vm2827_vm0 = vcmp.ge.f32.partialorder %v2811_v28, 0.0  ;;  %v2843_v59 = vmul.f32 0.2, %v2811_v28  ;;  %vm2813_vm1 = vcmp.ge.f32.partialorder %v2797_v11, 0.0  ;;  %vm2815_vm2 = vcmp.ge.f32.partialorder %v2799_v29, 0.0 }
 0x21c   : > { %v2798_v34 = vmul.f32 %v3875_v49, %v2778_v23  ;;  %v2800_v13 = vmul.f32 %v3875_v49, %v2780_v2  ;;  %v2802_v24 = vmul.f32 %v3875_v49, %v2782_v8  ;;  %v2804_v36 = vmul.f32 %v3875_v49, %v2784_v30 }
 0x21d   : > { %v2806_v37 = vmul.f32 %v3875_v49, %v2786_v46  ;;  %v2808_v38 = vmul.f32 %v3875_v49, %v2788_v54  ;;  %v2810_v39 = vmul.f32 %v3875_v49, %v2790_v9  ;;  %v2812_v40 = vmul.f32 %v3875_v49, %v2792_v18 }
 0x21e   : > { %vm2814_vm3 = vcmp.ge.f32.partialorder %v2798_v34, 0.0  ;;  %vm2816_vm4 = vcmp.ge.f32.partialorder %v2800_v13, 0.0  ;;  %vm2817_vm5 = vcmp.ge.f32.partialorder %v2801_v25, 0.0  ;;  %vm2818_vm6 = vcmp.ge.f32.partialorder %v2802_v24, 0.0 }
 0x21f   : > { %vm2819_vm7 = vcmp.ge.f32.partialorder %v2803_v31, 0.0  ;;  %vm2820_vm8 = vcmp.ge.f32.partialorder %v2804_v36, 0.0  ;;  %vm2821_vm9 = vcmp.ge.f32.partialorder %v2805_v32, 0.0  ;;  %vm2822_vm10 = vcmp.ge.f32.partialorder %v2806_v37, 0.0 }
 0x220   : > { %vm2823_vm11 = vcmp.ge.f32.partialorder %v2807_v35, 0.0  ;;  %vm2824_vm12 = vcmp.ge.f32.partialorder %v2808_v38, 0.0  ;;  %vm2825_vm13 = vcmp.ge.f32.partialorder %v2809_v33, 0.0  ;;  %vm2826_vm14 = vcmp.ge.f32.partialorder %v2810_v39, 0.0 }
 0x221   : > { %vm2828_vm15 = vcmp.ge.f32.partialorder %v2812_v40, 0.0  ;;  %v2829_v41 = vmul.f32 0.2, %v2797_v11  ;;  %v2830_v42 = vmul.f32 0.2, %v2798_v34  ;;  %v2859_v43 = vsel %vm2827_vm0, %v2811_v28, %v2843_v59 }
 0x222   : > { %v2831_v44 = vmul.f32 0.2, %v2799_v29  ;;  %v2832_v45 = vmul.f32 0.2, %v2800_v13  ;;  %v2833_v47 = vmul.f32 0.2, %v2801_v25 }
 0x223   : > { %v2834_v48 = vmul.f32 0.2, %v2802_v24  ;;  %v2835_v50 = vmul.f32 0.2, %v2803_v31  ;;  %v2836_v51 = vmul.f32 0.2, %v2804_v36  ;;  %v2845_v52 = vsel %vm2813_vm1, %v2797_v11, %v2829_v41 }
 0x224   : > { %v2837_v53 = vmul.f32 0.2, %v2805_v32  ;;  %v2838_v55 = vmul.f32 0.2, %v2806_v37  ;;  %v2839_v56 = vmul.f32 0.2, %v2807_v35  ;;  %v2846_v57 = vsel %vm2814_vm3, %v2798_v34, %v2830_v42 }
 0x225   : > { %v2840_v58 = vmul.f32 0.2, %v2808_v38  ;;  %v2841_v60 = vmul.f32 0.2, %v2809_v33  ;;  %v2842_v61 = vmul.f32 0.2, %v2810_v39  ;;  %v2847_v62 = vsel %vm2815_vm2, %v2799_v29, %v2831_v44 }
 0x226   : > { %v2844_v63 = vmul.f32 0.2, %v2812_v40  ;;  %v2848_v0 = vsel %vm2816_vm4, %v2800_v13, %v2832_v45  ;;  %v2849_v1 = vsel %vm2817_vm5, %v2801_v25, %v2833_v47  ;;  %v2850_v3 = vsel %vm2818_vm6, %v2802_v24, %v2834_v48 }
 0x227   : > { %v2851_v4 = vsel %vm2819_vm7, %v2803_v31, %v2835_v50  ;;  %v2852_v6 = vsel %vm2820_vm8, %v2804_v36, %v2836_v51  ;;  %v2853_v7 = vsel %vm2821_vm9, %v2805_v32, %v2837_v53  ;;  %v2854_v10 = vsel %vm2822_vm10, %v2806_v37, %v2838_v55 }
 0x228   : > { %v2855_v12 = vsel %vm2823_vm11, %v2807_v35, %v2839_v56  ;;  %v2856_v14 = vsel %vm2824_vm12, %v2808_v38, %v2840_v58  ;;  %v2857_v15 = vsel %vm2825_vm13, %v2809_v33, %v2841_v60  ;;  %v2858_v16 = vsel %vm2826_vm14, %v2810_v39, %v2842_v61 }
 0x229   : > { %v2860_v17 = vsel %vm2828_vm15, %v2812_v40, %v2844_v63  ;;  %v3344_v19 = vpack.c.bf16 %v2846_v57, %v2845_v52  ;;  %v3345_v20 = vpack.c.bf16 %v2848_v0, %v2847_v62  ;;  %v3346_v21 = vpack.c.bf16 %v2850_v3, %v2849_v1 }
 0x22a   : > { %v3347_v23 = vpack.c.bf16 %v2852_v6, %v2851_v4  ;;  %v3348_v2 = vpack.c.bf16 %v2854_v10, %v2853_v7  ;;  %v3349_v8 = vpack.c.bf16 %v2856_v14, %v2855_v12  ;;  %v3350_v22 = vpack.c.bf16 %v2858_v16, %v2857_v15 }
 0x22b   : > { %v3351_v30 = vpack.c.bf16 %v2860_v17, %v2859_v43  ;;  %2909 = vst [vmem:[%s196_s21] sm:$0xff] %v3344_v19  ;;  %2910 = vst [vmem:[%s196_s21 + $0x8] sm:$0xff] %v3345_v20 }
 0x22c   : > { %2911 = vst [vmem:[%s196_s21 + $0x10] sm:$0xff] %v3346_v21  ;;  %2912 = vst [vmem:[%s196_s21 + $0x18] sm:$0xff] %v3347_v23 }
 0x22d   : > { %2913 = vst [vmem:[%s196_s21 + $0x20] sm:$0xff] %v3348_v2  ;;  %2914 = vst [vmem:[%s196_s21 + $0x28] sm:$0xff] %v3349_v8 }
 0x22e   : > { %2915 = vst [vmem:[%s196_s21 + $0x30] sm:$0xff] %v3350_v22  ;;  %2916 = vst [vmem:[%s196_s21 + $0x38] sm:$0xff] %v3351_v30 }
 0x22f PF: > { %s12_s11 = sadd.s32 1, %s3898_s11   ;;  %s4955_s9 = smov %s3894_s10 }
 0x230   : > { %p9_p5 = scmp.ge.s32.totalorder %s12_s11, 4   ;;  %s4956_s10 = smov %s4958_s12 }
 0x232   :  { %11 = sbr.rel (!%p9_p5) target bundleno = 2 (0x2), region = 61 }

// kernel: patch_discriminator70.9
= control target key start
LH: loop header
LB: loop body
LE: loop exit
PB: predicated region body
PF: predicated region fallthrough
CT: control target
= control target key end

     0   :  { %7 = vsyncpa [#allocation4], 0  ;;  %s6738_s0 = inlined_call_operand.hbm [shape: bf16[2,16,4096], index: 0, kind: input, shape index: {}]   ;;  %s6739_s1 = inlined_call_operand.vmem [shape: bf16[4096,512], index: 1, kind: input, shape index: {}]   ;;  %s6740_s2 = inlined_call_operand.vmem [shape: bf16[2,16,512], index: 2, kind: output, shape index: {}]  }
   0x1   :  { %9 = vsyncpa [#allocation4 + $0x1], 0  ;;  %s5941_s9 = smov 0   ;;  %s5943_s10 = smov 0  }
   0x2   :  { %s5945_s11 = smov 0   ;;  %s5947_s12 = smov 0  }
   0x3   :  { %s5949_s13 = smov 0   ;;  %s5951_s14 = smov 0  }
   0x4   :  { %s5953_s15 = smov 0   ;;  %s5955_s16 = smov 0  }
   0x5 LB: > { %s4359_s17 = sadd.s32 4294967295, %s5919_s16   ;;  %s24_s18 = sadd.s32 1, %s5911_s14  ;;  %s5919_s16 = sphi %s5955_s16, %s15_s16   ;;  %s5915_s15 = sphi %s5953_s15, %s6750_s15   ;;  %s5911_s14 = sphi %s5951_s14, %s6749_s14   ;;  %s5907_s13 = sphi %s5949_s13, %s6748_s13   ;;  %s5903_s12 = sphi %s5947_s12, %s6747_s12   ;;  %s5899_s11 = sphi %s5945_s11, %s6746_s11   ;;  %s5895_s10 = sphi %s5943_s10, %s6745_s10   ;;  %s5891_s9 = sphi %s5941_s9, %s6744_s9  }
   0x6   : > { %p25_p0 = scmp.ge.s32.totalorder %s24_s18, 2  ;;  %s27_s19 = sadd.s32 1, %s5915_s15 }
   0x7   : > { %s36_s20 = sadd.s32 1, %s5899_s11  ;;  %p43_p1 = scmp.ne.s32.totalorder %s5899_s11, %s5895_s10 }
   0x8   : > { %s6752_s18 = smov (%p25_p0, %s24_s18), 0  ;;  %s6754_s19 = smov (!%p25_p0, %s27_s19), %s5915_s15 }
   0x9   : > { %s32_s21 = ssub.s32 %s5911_s14, %s6752_s18  ;;  %p44_p2 = scmp.eq.s32.totalorder %s5919_s16, 0 }
   0xa   : > { %p29_p3 = scmp.ge.s32.totalorder %s6754_s19, 2  ;;  %p49_p4 = scmp.ne.s32.totalorder %s5895_s10, %s5891_s9 }
   0xb   : > { %p5992_p5 = por %p44_p2, %p43_p1  ;;  %p50_p6 = scmp.eq.s32.totalorder %s4359_s17, 0 }
   0xc   : > { %s6756_s19 = smov (%p29_p3, %s6754_s19), 0  ;;  %p4978_p8 = scmp.lt.s32.totalorder %s5919_s16, 4 }
   0xd   : > { %p5998_p7 = por %p50_p6, %p49_p4  ;;  %s31_s24 = ssub.s32 %s5915_s15, %s6756_s19 }
   0xe   : > { %s33_s25 = sor.u32 %s32_s21, %s31_s24  ;;  %s125_s26 = sand.u32 1, %s5899_s11  }
   0xf   : > { %p34_p9 = scmp.eq.s32.totalorder %s33_s25, 0  ;;  %s4363_s27 = sshll.u32 %s125_s26, 7 }
  0x10   : > { %s4364_s28 = sshll.u32 %s5911_s14, 4  ;;  %s4365_s30 = sshll.u32 %s5915_s15, 6 }
  0x11   : > { %s6008_s29 = scalar_select %p34_p9, %s5899_s11, %s36_s20  }
  0x12   : > { %s135_s3 = sadd.s32 %s4365_s30, %s4364_s28  ;;  %s129_s4 = scalar_lea.vmem [#allocation3], %s4363_s27 }
  0x13   : > { %s138_s5 = sshll.u32 %s129_s4, 4  ;;  %s4366_s6 = sshll.u32 %s135_s3, 6  ;;  %s6011_s5 = int_to_ptr.vmem [resolvable:$true] %s138_s5 }
  0x14   : > { %s6016_s9 = scalar_lea.hbm %s6738_s0, %s4366_s6  ;;  %p6022_p10 = pnand %p4978_p8, %p5992_p5 }
  0x15   : > { %s6026_s20 = scalar_lea.sflag [#allocation4], %s125_s26  ;;  %s5823_s21 = scalar_lea.hbm %s6016_s9, 2048 }
  0x16   : > { %p5824_p11 = scmp.ne.s32.totalorder %s6016_s9, %s5823_s21  ;;  %p5825_p12 = pneg %p6022_p10 }
  0x17   : > { %s5828_s25 = scalar_lea.hbm %s6738_s0, 8192  ;;  %p5829_p1 = scmp.lt.u32.totalorder %s6016_s9, %s6738_s0 }
  0x18   : > { %p5826_p13 = pnand %p5825_p12, %p5824_p11  ;;  %p5830_p2 = scmp.lt.u32.totalorder %s5828_s25, %s5823_s21 }
  0x19   : > { %p5832_p4 = scmp.lt.u32.totalorder %s5823_s21, %s6016_s9 }
  0x1a   : > { %p5827_p0 = pneg %p5826_p13  ;;  %p5831_p3 = por %p5830_p2, %p5829_p1 }
  0x1c   : > { %p5833_p5 = por %p5832_p4, %p5831_p3 }
  0x1e   : > { %p5834_p6 = pnand %p5833_p5, %p5827_p0 }
  0x20   : > { %5837 = shalt.err (!%p5834_p6)
}
  0x21   : > { %s5838_s26 = scalar_lea.vmem %s6011_s5, 2048  ;;  %s5921_s30 = smov [#allocation3]  }
  0x22   : > { %p5839_p8 = scmp.ne.s32.totalorder %s6011_s5, %s5838_s26  ;;  %s5843_s3 = sshll.u32 %s5921_s30, 4  ;;  %s5844_s3 = int_to_ptr.vmem [resolvable:$false] %s5843_s3 }
  0x23   : > { %s5845_s4 = scalar_lea.vmem %s5844_s3, 4096  ;;  %p5846_p13 = scmp.lt.s32.totalorder %s6011_s5, %s5844_s3 }
  0x24   : > { %p5841_p9 = pnand %p5839_p8, %p5825_p12  ;;  %p5847_p1 = scmp.lt.s32.totalorder %s5845_s4, %s5838_s26 }
  0x26   : > { %p5842_p11 = pneg %p5841_p9  ;;  %p5848_p2 = por %p5847_p1, %p5846_p13 }
  0x28   : > { %p5849_p3 = pnand %p5848_p2, %p5842_p11 }
  0x2a   : > { %5852 = shalt.err (!%p5849_p3)
}
  0x2b   : > { %s5922_s6 = smov 2048   ;;  %s5923_s7 = smov 1024  }
  0x2c   : > { %s5924_s8 = smov 64   ;;  %p4367_p12 = scmp.ge.s32.totalorder %s5919_s16, 1 }
  0x2d   : > { %4977 = dma.hbm_to_vmem [thread:$0]  (!%p6022_p10), %s6016_s9, 2048, %s6011_s5, %s6026_s20, %s5922_s6, %s5923_s7, %s5924_s8  }
  0x2e   : > { %p156_p0 = scmp.lt.s32.totalorder %s5919_s16, 5 }
  0x30   : > { %p157_p4 = pnand %p4367_p12, %p156_p0 }
  0x31   : > { %s162_s21 = sand.u32 (!%p157_p4), 1, %s5895_s10  }
  0x32   : > { %160 = sbr.rel (%p157_p4) target bundleno = 855 (0x357), region = 28  ;;  %s4368_s22 = sshll.u32 (!%p157_p4), %s162_s21, 7 }
  0x33   : > { %s163_s24 = scalar_lea.sflag (!%p157_p4), [#allocation4], %s162_s21  ;;  %s6057_s25 = scalar_lea.vmem (!%p157_p4), [#allocation3], %s4368_s22 }
  0x39   : > { %5886 = dma.done.wait (%p5998_p7), %s163_s24, 2048  }
  0x3a   : > { %5888 = vsyncadd (%p5998_p7), %s163_s24, 4294965248  ;;  %s4369_s5 = sshll.u32 %s5903_s12, 8  ;;  %p201_p10 = scmp.lt.s32.totalorder %s5907_s13, 1 }
  0x3b   : > { %p195_p5 = scmp.lt.s32.totalorder %s4369_s5, 511  ;;  %p4374_p7 = scmp.ne.s32.totalorder %s5903_s12, 0 }
  0x3c   : > { %s6758_s13 = smov (!%p201_p10, %s5907_s13), 1  ;;  %v5925_v0 = vmov (!%p4374_p7), 0.0  }
  0x3d   : > { %s6760_s5 = smov (!%p195_p5, %s4369_s5), 511  ;;  %s4911_s9 = sshll.u32 %s6758_s13, 5  ;;  %210 = vst [vmem:[#allocation2] sm:$0xff] (!%p4374_p7), %v5925_v0  ;;  %211 = vst [vmem:[#allocation2 + $0x8] sm:$0xff] (!%p4374_p7), %v5925_v0 }
  0x3e   : > { %s4910_s17 = sshll.u32 %s6760_s5, 4  ;;  %s6069_s28 = scalar_lea.vmem %s6740_s2, %s4911_s9  ;;  %212 = vst [vmem:[#allocation2 + $0x10] sm:$0xff] (!%p4374_p7), %v5925_v0  ;;  %213 = vst [vmem:[#allocation2 + $0x18] sm:$0xff] (!%p4374_p7), %v5925_v0 }
  0x3f   : > { %s6074_s23 = scalar_lea.vmem %s6739_s1, %s4910_s17  ;;  %209 = sbr.rel (%p4374_p7) target bundleno = 70 (0x46), region = 36  ;;  %214 = vst [vmem:[#allocation2 + $0x20] sm:$0xff] (!%p4374_p7), %v5925_v0  ;;  %215 = vst [vmem:[#allocation2 + $0x28] sm:$0xff] (!%p4374_p7), %v5925_v0 }
  0x40   : > { %216 = vst [vmem:[#allocation2 + $0x30] sm:$0xff] (!%p4374_p7), %v5925_v0  ;;  %217 = vst [vmem:[#allocation2 + $0x38] sm:$0xff] (!%p4374_p7), %v5925_v0 }
  0x46 PF: > { %v5047_v1 = vld [vmem:[%s6074_s23 + $0x4] ss:$16 sps:$4 sm:$0xff]   ;;  %v5049_v2 = vld [vmem:[%s6074_s23 + $0xc] ss:$16 sps:$4 sm:$0xff]   ;;  %v5051_v3 = vld [vmem:[%s6074_s23] ss:$16 sps:$4 sm:$0xff]  }
  0x47   : > { %3394 = vmatprep.subr.bf16.mxu0 %v5047_v1  ;;  %v5052_v4 = vld [vmem:[%s6074_s23 + $0x8] ss:$16 sps:$4 sm:$0xff]   ;;  %3738 = vmatprep.subr.bf16.mxu1 %v5049_v2  ;;  %v5053_v5 = vld [vmem:[%s6074_s23 + $0x24] ss:$16 sps:$4 sm:$0xff]   ;;  %v5055_v6 = vld [vmem:[%s6074_s23 + $0x2c] ss:$16 sps:$4 sm:$0xff]  }
  0x48   : > { %3395 = vmatpush1.bf16.msra.mxu0 %v5051_v3  ;;  %3739 = vmatpush1.bf16.msra.mxu1 %v5052_v4  ;;  %v5057_v7 = vld [vmem:[%s6074_s23 + $0x20] ss:$16 sps:$4 sm:$0xff]   ;;  %v5058_v8 = vld [vmem:[%s6074_s23 + $0x28] ss:$16 sps:$4 sm:$0xff]   ;;  %v5059_v9 = vld [vmem:[%s6074_s23 + $0x44] ss:$16 sps:$4 sm:$0xff]  }
  0x49   : > { %3396 = vmatprep.subr.bf16.mxu0 %v5053_v5  ;;  %3740 = vmatprep.subr.bf16.mxu1 %v5055_v6  ;;  %v5061_v10 = vld [vmem:[%s6074_s23 + $0x4c] ss:$16 sps:$4 sm:$0xff]   ;;  %v5063_v11 = vld [vmem:[%s6074_s23 + $0x40] ss:$16 sps:$4 sm:$0xff]   ;;  %v5064_v12 = vld [vmem:[%s6074_s23 + $0x48] ss:$16 sps:$4 sm:$0xff]  }
  0x4a   : > { %v5065_v13 = vld [vmem:[%s6074_s23 + $0x64] ss:$16 sps:$4 sm:$0xff]   ;;  %v5067_v14 = vld [vmem:[%s6074_s23 + $0x6c] ss:$16 sps:$4 sm:$0xff]   ;;  %v5069_v15 = vld [vmem:[%s6074_s23 + $0x60] ss:$16 sps:$4 sm:$0xff]  }
  0x4b   : > { %v5070_v16 = vld [vmem:[%s6074_s23 + $0x68] ss:$16 sps:$4 sm:$0xff]   ;;  %v5071_v17 = vld [vmem:[%s6074_s23 + $0x84] ss:$16 sps:$4 sm:$0xff]   ;;  %v5073_v18 = vld [vmem:[%s6074_s23 + $0x8c] ss:$16 sps:$4 sm:$0xff]  }
  0x4c   : > { %3397 = vmatpush1.bf16.msra.mxu0 %v5057_v7  ;;  %3741 = vmatpush1.bf16.msra.mxu1 %v5058_v8  ;;  %v5075_v19 = vld [vmem:[%s6074_s23 + $0x80] ss:$16 sps:$4 sm:$0xff]   ;;  %v5076_v20 = vld [vmem:[%s6074_s23 + $0x88] ss:$16 sps:$4 sm:$0xff]   ;;  %v5077_v21 = vld [vmem:[%s6074_s23 + $0xa4] ss:$16 sps:$4 sm:$0xff]  }
  0x4d   : > { %3398 = vmatprep.subr.bf16.mxu0 %v5059_v9  ;;  %3742 = vmatprep.subr.bf16.mxu1 %v5061_v10  ;;  %v5079_v22 = vld [vmem:[%s6074_s23 + $0xac] ss:$16 sps:$4 sm:$0xff]   ;;  %v5081_v23 = vld [vmem:[%s6074_s23 + $0xa0] ss:$16 sps:$4 sm:$0xff]   ;;  %v5082_v24 = vld [vmem:[%s6074_s23 + $0xa8] ss:$16 sps:$4 sm:$0xff]  }
  0x4e   : > { %v5083_v25 = vld [vmem:[%s6074_s23 + $0xc4] ss:$16 sps:$4 sm:$0xff]   ;;  %v5085_v26 = vld [vmem:[%s6074_s23 + $0xcc] ss:$16 sps:$4 sm:$0xff]   ;;  %v5087_v27 = vld [vmem:[%s6074_s23 + $0xc0] ss:$16 sps:$4 sm:$0xff]  }
  0x4f   : > { %v5088_v28 = vld [vmem:[%s6074_s23 + $0xc8] ss:$16 sps:$4 sm:$0xff]   ;;  %v5089_v29 = vld [vmem:[%s6074_s23 + $0xe4] ss:$16 sps:$4 sm:$0xff]   ;;  %v5091_v30 = vld [vmem:[%s6074_s23 + $0xec] ss:$16 sps:$4 sm:$0xff]  }
  0x50   : > { %3399 = vmatpush1.bf16.msra.mxu0 %v5063_v11  ;;  %3743 = vmatpush1.bf16.msra.mxu1 %v5064_v12  ;;  %v5093_v31 = vld [vmem:[%s6074_s23 + $0xe0] ss:$16 sps:$4 sm:$0xff]   ;;  %v5094_v32 = vld [vmem:[%s6074_s23 + $0xe8] ss:$16 sps:$4 sm:$0xff]   ;;  %v5095_v33 = vld [vmem:[%s6074_s23 + $0x104] ss:$16 sps:$4 sm:$0xff]  }
  0x51   : > { %3400 = vmatprep.subr.bf16.mxu0 %v5065_v13  ;;  %3744 = vmatprep.subr.bf16.mxu1 %v5067_v14  ;;  %v5097_v34 = vld [vmem:[%s6074_s23 + $0x10c] ss:$16 sps:$4 sm:$0xff]   ;;  %v5099_v35 = vld [vmem:[%s6074_s23 + $0x100] ss:$16 sps:$4 sm:$0xff]   ;;  %v5100_v36 = vld [vmem:[%s6074_s23 + $0x108] ss:$16 sps:$4 sm:$0xff]  }
  0x52   : > { %v5101_v37 = vld [vmem:[%s6074_s23 + $0x124] ss:$16 sps:$4 sm:$0xff]   ;;  %v5103_v38 = vld [vmem:[%s6074_s23 + $0x12c] ss:$16 sps:$4 sm:$0xff]   ;;  %v5105_v39 = vld [vmem:[%s6074_s23 + $0x120] ss:$16 sps:$4 sm:$0xff]  }
  0x53   : > { %v5106_v40 = vld [vmem:[%s6074_s23 + $0x128] ss:$16 sps:$4 sm:$0xff]   ;;  %v5107_v41 = vld [vmem:[%s6074_s23 + $0x144] ss:$16 sps:$4 sm:$0xff]   ;;  %v5109_v42 = vld [vmem:[%s6074_s23 + $0x14c] ss:$16 sps:$4 sm:$0xff]  }
  0x54   : > { %3401 = vmatpush1.bf16.msra.mxu0 %v5069_v15  ;;  %3745 = vmatpush1.bf16.msra.mxu1 %v5070_v16  ;;  %v5111_v43 = vld [vmem:[%s6074_s23 + $0x140] ss:$16 sps:$4 sm:$0xff]   ;;  %v5112_v44 = vld [vmem:[%s6074_s23 + $0x148] ss:$16 sps:$4 sm:$0xff]   ;;  %v5113_v45 = vld [vmem:[%s6074_s23 + $0x164] ss:$16 sps:$4 sm:$0xff]  }
  0x55   : > { %3402 = vmatprep.subr.bf16.mxu0 %v5071_v17  ;;  %3746 = vmatprep.subr.bf16.mxu1 %v5073_v18  ;;  %v5115_v46 = vld [vmem:[%s6074_s23 + $0x16c] ss:$16 sps:$4 sm:$0xff]   ;;  %v226_v47 = vld [vmem:[%s6057_s25] sm:$0xff]  ;;  %v5118_v50 = vld [vmem:[%s6074_s23 + $0x168] ss:$16 sps:$4 sm:$0xff]   ;;  %p4903_p6 = scmp.ne.s32.totalorder %s5903_s12, 1 }
  0x56   : > { %v234_v48 = vld [vmem:[%s6057_s25 + $0x40] sm:$0xff]  ;;  %v5121_v53 = vld [vmem:[%s6074_s23 + $0x18c] ss:$16 sps:$4 sm:$0xff]   ;;  %v5124_v55 = vld [vmem:[%s6074_s23 + $0x188] ss:$16 sps:$4 sm:$0xff]  }
  0x57   : > { %v5117_v49 = vld [vmem:[%s6074_s23 + $0x160] ss:$16 sps:$4 sm:$0xff]   ;;  %v4376_v51 = vcombine.high %v226_v47, %v234_v48  ;;  %v5119_v52 = vld [vmem:[%s6074_s23 + $0x184] ss:$16 sps:$4 sm:$0xff]   ;;  %v5127_v57 = vld [vmem:[%s6074_s23 + $0x1ac] ss:$16 sps:$4 sm:$0xff]   ;;  %v4375_v6 = vcombine.low %v226_v47, %v234_v48 }
  0x58   : > { %3403 = vmatpush1.bf16.msra.mxu0 %v5075_v19  ;;  %3747 = vmatpush1.bf16.msra.mxu1 %v5076_v20  ;;  %v5123_v54 = vld [vmem:[%s6074_s23 + $0x180] ss:$16 sps:$4 sm:$0xff]   ;;  %v5125_v56 = vld [vmem:[%s6074_s23 + $0x1a4] ss:$16 sps:$4 sm:$0xff]   ;;  %v5130_v59 = vld [vmem:[%s6074_s23 + $0x1a8] ss:$16 sps:$4 sm:$0xff]  }
  0x59   : > { %3404 = vmatprep.subr.bf16.mxu0 %v5077_v21  ;;  %3748 = vmatprep.subr.bf16.mxu1 %v5079_v22  ;;  %v5129_v58 = vld [vmem:[%s6074_s23 + $0x1a0] ss:$16 sps:$4 sm:$0xff]   ;;  %v5131_v60 = vld [vmem:[%s6074_s23 + $0x1c4] ss:$16 sps:$4 sm:$0xff]   ;;  %v5133_v61 = vld [vmem:[%s6074_s23 + $0x1cc] ss:$16 sps:$4 sm:$0xff]  }
  0x5a   : > { %3426 = vmatprep.mubr.bf16.mxu0 %v4376_v51  ;;  %3770 = vmatprep.mubr.bf16.mxu1 %v4376_v51  ;;  %v5135_v62 = vld [vmem:[%s6074_s23 + $0x1c0] ss:$16 sps:$4 sm:$0xff]   ;;  %v5136_v63 = vld [vmem:[%s6074_s23 + $0x1c8] ss:$16 sps:$4 sm:$0xff]   ;;  %v5137_v0 = vld [vmem:[%s6074_s23 + $0x1e4] ss:$16 sps:$4 sm:$0xff]  }
  0x5b   : > { %v5139_v1 = vld [vmem:[%s6074_s23 + $0x1ec] ss:$16 sps:$4 sm:$0xff]   ;;  %v5141_v2 = vld [vmem:[%s6074_s23 + $0x1e0] ss:$16 sps:$4 sm:$0xff]   ;;  %v5142_v3 = vld [vmem:[%s6074_s23 + $0x1e8] ss:$16 sps:$4 sm:$0xff]  }
  0x5c   : > { %3405 = vmatpush1.bf16.msra.mxu0 %v5081_v23  ;;  %3749 = vmatpush1.bf16.msra.mxu1 %v5082_v24  ;;  %v5145_v4 = vld [vmem:[%s6074_s23 + $0x204] ss:$16 sps:$4 sm:$0xff]   ;;  %v5148_v5 = vld [vmem:[%s6074_s23 + $0x20c] ss:$16 sps:$4 sm:$0xff]   ;;  %v5143_v7 = vld [vmem:[%s6074_s23 + $0x200] ss:$16 sps:$4 sm:$0xff]  }
  0x5d   : > { %3406 = vmatprep.subr.bf16.mxu0 %v5083_v25  ;;  %3750 = vmatprep.subr.bf16.mxu1 %v5085_v26  ;;  %v5146_v8 = vld [vmem:[%s6074_s23 + $0x208] ss:$16 sps:$4 sm:$0xff]   ;;  %v5151_v9 = vld [vmem:[%s6074_s23 + $0x224] ss:$16 sps:$4 sm:$0xff]   ;;  %v5154_v10 = vld [vmem:[%s6074_s23 + $0x22c] ss:$16 sps:$4 sm:$0xff]  }
  0x5e   : > { %v5149_v11 = vld [vmem:[%s6074_s23 + $0x220] ss:$16 sps:$4 sm:$0xff]   ;;  %v5152_v12 = vld [vmem:[%s6074_s23 + $0x228] ss:$16 sps:$4 sm:$0xff]   ;;  %v5157_v13 = vld [vmem:[%s6074_s23 + $0x244] ss:$16 sps:$4 sm:$0xff]  }
  0x5f   : > { %v5160_v14 = vld [vmem:[%s6074_s23 + $0x24c] ss:$16 sps:$4 sm:$0xff]   ;;  %v5155_v15 = vld [vmem:[%s6074_s23 + $0x240] ss:$16 sps:$4 sm:$0xff]   ;;  %v5158_v16 = vld [vmem:[%s6074_s23 + $0x248] ss:$16 sps:$4 sm:$0xff]  }
  0x60   : > { %3407 = vmatpush1.bf16.msra.mxu0 %v5087_v27  ;;  %3751 = vmatpush1.bf16.msra.mxu1 %v5088_v28  ;;  %v5163_v17 = vld [vmem:[%s6074_s23 + $0x264] ss:$16 sps:$4 sm:$0xff]   ;;  %v5166_v18 = vld [vmem:[%s6074_s23 + $0x26c] ss:$16 sps:$4 sm:$0xff]   ;;  %v5161_v19 = vld [vmem:[%s6074_s23 + $0x260] ss:$16 sps:$4 sm:$0xff]  }
  0x61   : > { %3408 = vmatprep.subr.bf16.mxu0 %v5089_v29  ;;  %3752 = vmatprep.subr.bf16.mxu1 %v5091_v30  ;;  %v5164_v20 = vld [vmem:[%s6074_s23 + $0x268] ss:$16 sps:$4 sm:$0xff]   ;;  %v5169_v21 = vld [vmem:[%s6074_s23 + $0x284] ss:$16 sps:$4 sm:$0xff]   ;;  %v5172_v22 = vld [vmem:[%s6074_s23 + $0x28c] ss:$16 sps:$4 sm:$0xff]  }
  0x62   : > { %v5167_v23 = vld [vmem:[%s6074_s23 + $0x280] ss:$16 sps:$4 sm:$0xff]   ;;  %v5170_v24 = vld [vmem:[%s6074_s23 + $0x288] ss:$16 sps:$4 sm:$0xff]   ;;  %v5175_v25 = vld [vmem:[%s6074_s23 + $0x2a4] ss:$16 sps:$4 sm:$0xff]  }
  0x63   : > { %v5178_v26 = vld [vmem:[%s6074_s23 + $0x2ac] ss:$16 sps:$4 sm:$0xff]   ;;  %v5173_v27 = vld [vmem:[%s6074_s23 + $0x2a0] ss:$16 sps:$4 sm:$0xff]   ;;  %v5176_v28 = vld [vmem:[%s6074_s23 + $0x2a8] ss:$16 sps:$4 sm:$0xff]  }
  0x64   : > { %3409 = vmatpush1.bf16.msra.mxu0 %v5093_v31  ;;  %3753 = vmatpush1.bf16.msra.mxu1 %v5094_v32  ;;  %v5181_v29 = vld [vmem:[%s6074_s23 + $0x2c4] ss:$16 sps:$4 sm:$0xff]   ;;  %v5184_v30 = vld [vmem:[%s6074_s23 + $0x2cc] ss:$16 sps:$4 sm:$0xff]   ;;  %v5200_v47 = vld [vmem:[%s6074_s23 + $0x328] ss:$16 sps:$4 sm:$0xff]  }
  0x65   : > { %3410 = vmatprep.subr.bf16.mxu0 %v5095_v33  ;;  %3754 = vmatprep.subr.bf16.mxu1 %v5097_v34  ;;  %v6170_v31 = vld [vmem:[%s6057_s25 + $0x8] sm:$0xff]  ;;  %v5179_v33 = vld [vmem:[%s6074_s23 + $0x2c0] ss:$16 sps:$4 sm:$0xff]   ;;  %v5205_v48 = vld [vmem:[%s6074_s23 + $0x344] ss:$16 sps:$4 sm:$0xff]  }
  0x66   : > { %v6173_v32 = vld [vmem:[%s6057_s25 + $0x48] sm:$0xff] }
  0x67   : > { %v5182_v34 = vld [vmem:[%s6074_s23 + $0x2c8] ss:$16 sps:$4 sm:$0xff]  }
  0x68   : > { %3411 = vmatpush1.bf16.msra.mxu0 %v5099_v35  ;;  %3755 = vmatpush1.bf16.msra.mxu1 %v5100_v36  ;;  %v4378_v35 = vcombine.high %v6170_v31, %v6173_v32  ;;  %v5187_v36 = vld [vmem:[%s6074_s23 + $0x2e4] ss:$16 sps:$4 sm:$0xff]   ;;  %v5206_v51 = vld [vmem:[%s6074_s23 + $0x348] ss:$16 sps:$4 sm:$0xff]  }
  0x69   : > { %3412 = vmatprep.subr.bf16.mxu0 %v5101_v37  ;;  %3756 = vmatprep.subr.bf16.mxu1 %v5103_v38  ;;  %v5190_v37 = vld [vmem:[%s6074_s23 + $0x2ec] ss:$16 sps:$4 sm:$0xff]   ;;  %v5185_v38 = vld [vmem:[%s6074_s23 + $0x2e0] ss:$16 sps:$4 sm:$0xff]  }
  0x6c   : > { %3413 = vmatpush1.bf16.msra.mxu0 %v5105_v39  ;;  %3757 = vmatpush1.bf16.msra.mxu1 %v5106_v40  ;;  %v5188_v39 = vld [vmem:[%s6074_s23 + $0x2e8] ss:$16 sps:$4 sm:$0xff]   ;;  %v5193_v40 = vld [vmem:[%s6074_s23 + $0x304] ss:$16 sps:$4 sm:$0xff]  }
  0x6d   : > { %3414 = vmatprep.subr.bf16.mxu0 %v5107_v41  ;;  %3758 = vmatprep.subr.bf16.mxu1 %v5109_v42  ;;  %v5196_v41 = vld [vmem:[%s6074_s23 + $0x30c] ss:$16 sps:$4 sm:$0xff]   ;;  %v5191_v42 = vld [vmem:[%s6074_s23 + $0x300] ss:$16 sps:$4 sm:$0xff]  }
  0x70   : > { %3415 = vmatpush1.bf16.msra.mxu0 %v5111_v43  ;;  %3759 = vmatpush1.bf16.msra.mxu1 %v5112_v44  ;;  %v5194_v43 = vld [vmem:[%s6074_s23 + $0x308] ss:$16 sps:$4 sm:$0xff]   ;;  %v5199_v44 = vld [vmem:[%s6074_s23 + $0x324] ss:$16 sps:$4 sm:$0xff]  }
  0x71   : > { %3416 = vmatprep.subr.bf16.mxu0 %v5113_v45  ;;  %3760 = vmatprep.subr.bf16.mxu1 %v5115_v46  ;;  %v5202_v45 = vld [vmem:[%s6074_s23 + $0x32c] ss:$16 sps:$4 sm:$0xff]   ;;  %v5197_v46 = vld [vmem:[%s6074_s23 + $0x320] ss:$16 sps:$4 sm:$0xff]  }
  0x74   : > { %3417 = vmatpush1.bf16.msra.mxu0 %v5117_v49  ;;  %3761 = vmatpush1.bf16.msra.mxu1 %v5118_v50  ;;  %v5208_v49 = vld [vmem:[%s6074_s23 + $0x34c] ss:$16 sps:$4 sm:$0xff]   ;;  %v5203_v50 = vld [vmem:[%s6074_s23 + $0x340] ss:$16 sps:$4 sm:$0xff]  }
  0x75   : > { %3418 = vmatprep.subr.bf16.mxu0 %v5119_v52  ;;  %3762 = vmatprep.subr.bf16.mxu1 %v5121_v53  ;;  %v5211_v52 = vld [vmem:[%s6074_s23 + $0x364] ss:$16 sps:$4 sm:$0xff]   ;;  %v5214_v53 = vld [vmem:[%s6074_s23 + $0x36c] ss:$16 sps:$4 sm:$0xff]  }
  0x78   : > { %3419 = vmatpush1.bf16.msra.mxu0 %v5123_v54  ;;  %3763 = vmatpush1.bf16.msra.mxu1 %v5124_v55  ;;  %v5209_v54 = vld [vmem:[%s6074_s23 + $0x360] ss:$16 sps:$4 sm:$0xff]   ;;  %v5212_v55 = vld [vmem:[%s6074_s23 + $0x368] ss:$16 sps:$4 sm:$0xff]  }
  0x79   : > { %3420 = vmatprep.subr.bf16.mxu0 %v5125_v56  ;;  %3764 = vmatprep.subr.bf16.mxu1 %v5127_v57  ;;  %v5217_v56 = vld [vmem:[%s6074_s23 + $0x384] ss:$16 sps:$4 sm:$0xff]   ;;  %v5220_v57 = vld [vmem:[%s6074_s23 + $0x38c] ss:$16 sps:$4 sm:$0xff]  }
  0x7c   : > { %3421 = vmatpush1.bf16.msra.mxu0 %v5129_v58  ;;  %3765 = vmatpush1.bf16.msra.mxu1 %v5130_v59  ;;  %v5215_v58 = vld [vmem:[%s6074_s23 + $0x380] ss:$16 sps:$4 sm:$0xff]   ;;  %v5218_v59 = vld [vmem:[%s6074_s23 + $0x388] ss:$16 sps:$4 sm:$0xff]  }
  0x7d   : > { %3422 = vmatprep.subr.bf16.mxu0 %v5131_v60  ;;  %3766 = vmatprep.subr.bf16.mxu1 %v5133_v61  ;;  %v5223_v60 = vld [vmem:[%s6074_s23 + $0x3a4] ss:$16 sps:$4 sm:$0xff]   ;;  %v5226_v61 = vld [vmem:[%s6074_s23 + $0x3ac] ss:$16 sps:$4 sm:$0xff]  }
  0x80   : > { %3423 = vmatpush1.bf16.msra.mxu0 %v5135_v62  ;;  %3767 = vmatpush1.bf16.msra.mxu1 %v5136_v63  ;;  %v5221_v62 = vld [vmem:[%s6074_s23 + $0x3a0] ss:$16 sps:$4 sm:$0xff]   ;;  %v5224_v63 = vld [vmem:[%s6074_s23 + $0x3a8] ss:$16 sps:$4 sm:$0xff]  }
  0x81   : > { %3424 = vmatprep.subr.bf16.mxu0 %v5137_v0  ;;  %3768 = vmatprep.subr.bf16.mxu1 %v5139_v1  ;;  %v5229_v0 = vld [vmem:[%s6074_s23 + $0x3c4] ss:$16 sps:$4 sm:$0xff]   ;;  %v5232_v1 = vld [vmem:[%s6074_s23 + $0x3cc] ss:$16 sps:$4 sm:$0xff]  }
  0x84   : > { %3425 = vmatpush1.bf16.msra.mxu0 %v5141_v2  ;;  %3769 = vmatpush1.bf16.msra.mxu1 %v5142_v3  ;;  %v5227_v2 = vld [vmem:[%s6074_s23 + $0x3c0] ss:$16 sps:$4 sm:$0xff]   ;;  %v5230_v3 = vld [vmem:[%s6074_s23 + $0x3c8] ss:$16 sps:$4 sm:$0xff]  }
  0x85   : > { %3437 = vmatprep.subr.bf16.mxu0 %v5145_v4  ;;  %3781 = vmatprep.subr.bf16.mxu1 %v5148_v5  ;;  %v5235_v4 = vld [vmem:[%s6074_s23 + $0x3e4] ss:$16 sps:$4 sm:$0xff]   ;;  %v5238_v5 = vld [vmem:[%s6074_s23 + $0x3ec] ss:$16 sps:$4 sm:$0xff]  }
  0x87   : > { %3427 = vmatmul.mubr.bf16.vlgmr.msra.gmra.mrb[0].mxu0 %v4375_v6  ;;  %3771 = vmatmul.mubr.bf16.vlgmr.msra.gmra.mrb[0].mxu1 %v4375_v6  ;;  %v5233_v6 = vld [vmem:[%s6074_s23 + $0x3e0] ss:$16 sps:$4 sm:$0xff]  }
  0x88   : > { %3438 = vmatpush1.bf16.msra.mxu0 %v5143_v7  ;;  %3782 = vmatpush1.bf16.msra.mxu1 %v5146_v8  ;;  %v5236_v7 = vld [vmem:[%s6074_s23 + $0x3e8] ss:$16 sps:$4 sm:$0xff]   ;;  %v5241_v8 = vld [vmem:[%s6074_s23 + $0x404] ss:$16 sps:$4 sm:$0xff]  }
  0x89   : > { %3439 = vmatprep.subr.bf16.mxu0 %v5151_v9  ;;  %3783 = vmatprep.subr.bf16.mxu1 %v5154_v10  ;;  %v5244_v9 = vld [vmem:[%s6074_s23 + $0x40c] ss:$16 sps:$4 sm:$0xff]   ;;  %v4377_v10 = vcombine.low %v6170_v31, %v6173_v32  ;;  %v5266_v31 = vld [vmem:[%s6074_s23 + $0x488] ss:$16 sps:$4 sm:$0xff]   ;;  %v5271_v32 = vld [vmem:[%s6074_s23 + $0x4a4] ss:$16 sps:$4 sm:$0xff]  }
  0x8a   : > { %3469 = vmatprep.mubr.bf16.mxu0 %v4378_v35  ;;  %3813 = vmatprep.mubr.bf16.mxu1 %v4378_v35  ;;  %v5272_v35 = vld [vmem:[%s6074_s23 + $0x4a8] ss:$16 sps:$4 sm:$0xff]  }
  0x8c   : > { %3440 = vmatpush1.bf16.msra.mxu0 %v5149_v11  ;;  %3784 = vmatpush1.bf16.msra.mxu1 %v5152_v12  ;;  %v5239_v11 = vld [vmem:[%s6074_s23 + $0x400] ss:$16 sps:$4 sm:$0xff]   ;;  %v5242_v12 = vld [vmem:[%s6074_s23 + $0x408] ss:$16 sps:$4 sm:$0xff]  }
  0x8d   : > { %3441 = vmatprep.subr.bf16.mxu0 %v5157_v13  ;;  %3785 = vmatprep.subr.bf16.mxu1 %v5160_v14  ;;  %v5247_v13 = vld [vmem:[%s6074_s23 + $0x424] ss:$16 sps:$4 sm:$0xff]   ;;  %v5250_v14 = vld [vmem:[%s6074_s23 + $0x42c] ss:$16 sps:$4 sm:$0xff]  }
  0x90   : > { %3442 = vmatpush1.bf16.msra.mxu0 %v5155_v15  ;;  %3786 = vmatpush1.bf16.msra.mxu1 %v5158_v16  ;;  %v6224_v15 = vld [vmem:[%s6057_s25 + $0x10] sm:$0xff] }
  0x91   : > { %3443 = vmatprep.subr.bf16.mxu0 %v5163_v17  ;;  %3787 = vmatprep.subr.bf16.mxu1 %v5166_v18  ;;  %v6227_v16 = vld [vmem:[%s6057_s25 + $0x50] sm:$0xff] }
  0x92   : > { %v4380_v17 = vcombine.high %v6224_v15, %v6227_v16  ;;  %v5245_v18 = vld [vmem:[%s6074_s23 + $0x420] ss:$16 sps:$4 sm:$0xff]  }
  0x94   : > { %3444 = vmatpush1.bf16.msra.mxu0 %v5161_v19  ;;  %3788 = vmatpush1.bf16.msra.mxu1 %v5164_v20  ;;  %v5248_v19 = vld [vmem:[%s6074_s23 + $0x428] ss:$16 sps:$4 sm:$0xff]   ;;  %v5253_v20 = vld [vmem:[%s6074_s23 + $0x444] ss:$16 sps:$4 sm:$0xff]  }
  0x95   : > { %3445 = vmatprep.subr.bf16.mxu0 %v5169_v21  ;;  %3789 = vmatprep.subr.bf16.mxu1 %v5172_v22  ;;  %v5256_v21 = vld [vmem:[%s6074_s23 + $0x44c] ss:$16 sps:$4 sm:$0xff]   ;;  %v5251_v22 = vld [vmem:[%s6074_s23 + $0x440] ss:$16 sps:$4 sm:$0xff]  }
  0x98   : > { %3446 = vmatpush1.bf16.msra.mxu0 %v5167_v23  ;;  %3790 = vmatpush1.bf16.msra.mxu1 %v5170_v24  ;;  %v5254_v23 = vld [vmem:[%s6074_s23 + $0x448] ss:$16 sps:$4 sm:$0xff]   ;;  %v5259_v24 = vld [vmem:[%s6074_s23 + $0x464] ss:$16 sps:$4 sm:$0xff]  }
  0x99   : > { %3447 = vmatprep.subr.bf16.mxu0 %v5175_v25  ;;  %3791 = vmatprep.subr.bf16.mxu1 %v5178_v26  ;;  %v5262_v25 = vld [vmem:[%s6074_s23 + $0x46c] ss:$16 sps:$4 sm:$0xff]   ;;  %v5257_v26 = vld [vmem:[%s6074_s23 + $0x460] ss:$16 sps:$4 sm:$0xff]  }
  0x9c   : > { %3448 = vmatpush1.bf16.msra.mxu0 %v5173_v27  ;;  %3792 = vmatpush1.bf16.msra.mxu1 %v5176_v28  ;;  %v5260_v27 = vld [vmem:[%s6074_s23 + $0x468] ss:$16 sps:$4 sm:$0xff]   ;;  %v5265_v28 = vld [vmem:[%s6074_s23 + $0x484] ss:$16 sps:$4 sm:$0xff]  }
  0x9d   : > { %3449 = vmatprep.subr.bf16.mxu0 %v5181_v29  ;;  %3793 = vmatprep.subr.bf16.mxu1 %v5184_v30  ;;  %v5268_v29 = vld [vmem:[%s6074_s23 + $0x48c] ss:$16 sps:$4 sm:$0xff]   ;;  %v5263_v30 = vld [vmem:[%s6074_s23 + $0x480] ss:$16 sps:$4 sm:$0xff]  }
  0xa0   : > { %3450 = vmatpush1.bf16.msra.mxu0 %v5179_v33  ;;  %3794 = vmatpush1.bf16.msra.mxu1 %v5182_v34  ;;  %v5274_v33 = vld [vmem:[%s6074_s23 + $0x4ac] ss:$16 sps:$4 sm:$0xff]   ;;  %v5269_v34 = vld [vmem:[%s6074_s23 + $0x4a0] ss:$16 sps:$4 sm:$0xff]  }
  0xa1   : > { %3451 = vmatprep.subr.bf16.mxu0 %v5187_v36  ;;  %3795 = vmatprep.subr.bf16.mxu1 %v5190_v37  ;;  %v5277_v36 = vld [vmem:[%s6074_s23 + $0x4c4] ss:$16 sps:$4 sm:$0xff]   ;;  %v5280_v37 = vld [vmem:[%s6074_s23 + $0x4cc] ss:$16 sps:$4 sm:$0xff]  }
  0xa4   : > { %3452 = vmatpush1.bf16.msra.mxu0 %v5185_v38  ;;  %3796 = vmatpush1.bf16.msra.mxu1 %v5188_v39  ;;  %v5275_v38 = vld [vmem:[%s6074_s23 + $0x4c0] ss:$16 sps:$4 sm:$0xff]   ;;  %v5278_v39 = vld [vmem:[%s6074_s23 + $0x4c8] ss:$16 sps:$4 sm:$0xff]  }
  0xa5   : > { %3453 = vmatprep.subr.bf16.mxu0 %v5193_v40  ;;  %3797 = vmatprep.subr.bf16.mxu1 %v5196_v41  ;;  %v5283_v40 = vld [vmem:[%s6074_s23 + $0x4e4] ss:$16 sps:$4 sm:$0xff]   ;;  %v5286_v41 = vld [vmem:[%s6074_s23 + $0x4ec] ss:$16 sps:$4 sm:$0xff]  }
  0xa8   : > { %3454 = vmatpush1.bf16.msra.mxu0 %v5191_v42  ;;  %3798 = vmatpush1.bf16.msra.mxu1 %v5194_v43  ;;  %v5281_v42 = vld [vmem:[%s6074_s23 + $0x4e0] ss:$16 sps:$4 sm:$0xff]   ;;  %v5284_v43 = vld [vmem:[%s6074_s23 + $0x4e8] ss:$16 sps:$4 sm:$0xff]  }
  0xa9   : > { %3455 = vmatprep.subr.bf16.mxu0 %v5199_v44  ;;  %3799 = vmatprep.subr.bf16.mxu1 %v5202_v45  ;;  %v5289_v44 = vld [vmem:[%s6074_s23 + $0x504] ss:$16 sps:$4 sm:$0xff]   ;;  %v5292_v45 = vld [vmem:[%s6074_s23 + $0x50c] ss:$16 sps:$4 sm:$0xff]  }
  0xac   : > { %3456 = vmatpush1.bf16.msra.mxu0 %v5197_v46  ;;  %3800 = vmatpush1.bf16.msra.mxu1 %v5200_v47  ;;  %v5287_v46 = vld [vmem:[%s6074_s23 + $0x500] ss:$16 sps:$4 sm:$0xff]   ;;  %v5290_v47 = vld [vmem:[%s6074_s23 + $0x508] ss:$16 sps:$4 sm:$0xff]  }
  0xad   : > { %3457 = vmatprep.subr.bf16.mxu0 %v5205_v48  ;;  %3801 = vmatprep.subr.bf16.mxu1 %v5208_v49  ;;  %v5295_v48 = vld [vmem:[%s6074_s23 + $0x524] ss:$16 sps:$4 sm:$0xff]   ;;  %v5298_v49 = vld [vmem:[%s6074_s23 + $0x52c] ss:$16 sps:$4 sm:$0xff]  }
  0xb0   : > { %3458 = vmatpush1.bf16.msra.mxu0 %v5203_v50  ;;  %3802 = vmatpush1.bf16.msra.mxu1 %v5206_v51  ;;  %v5293_v50 = vld [vmem:[%s6074_s23 + $0x520] ss:$16 sps:$4 sm:$0xff]   ;;  %v5296_v51 = vld [vmem:[%s6074_s23 + $0x528] ss:$16 sps:$4 sm:$0xff]  }
  0xb1   : > { %3459 = vmatprep.subr.bf16.mxu0 %v5211_v52  ;;  %3803 = vmatprep.subr.bf16.mxu1 %v5214_v53  ;;  %v5301_v52 = vld [vmem:[%s6074_s23 + $0x544] ss:$16 sps:$4 sm:$0xff]   ;;  %v5304_v53 = vld [vmem:[%s6074_s23 + $0x54c] ss:$16 sps:$4 sm:$0xff]  }
  0xb4   : > { %3460 = vmatpush1.bf16.msra.mxu0 %v5209_v54  ;;  %3804 = vmatpush1.bf16.msra.mxu1 %v5212_v55  ;;  %v5299_v54 = vld [vmem:[%s6074_s23 + $0x540] ss:$16 sps:$4 sm:$0xff]   ;;  %v5302_v55 = vld [vmem:[%s6074_s23 + $0x548] ss:$16 sps:$4 sm:$0xff]  }
  0xb5   : > { %3461 = vmatprep.subr.bf16.mxu0 %v5217_v56  ;;  %3805 = vmatprep.subr.bf16.mxu1 %v5220_v57  ;;  %v5307_v56 = vld [vmem:[%s6074_s23 + $0x564] ss:$16 sps:$4 sm:$0xff]   ;;  %v5310_v57 = vld [vmem:[%s6074_s23 + $0x56c] ss:$16 sps:$4 sm:$0xff]  }
  0xb8   : > { %3462 = vmatpush1.bf16.msra.mxu0 %v5215_v58  ;;  %3806 = vmatpush1.bf16.msra.mxu1 %v5218_v59  ;;  %v5305_v58 = vld [vmem:[%s6074_s23 + $0x560] ss:$16 sps:$4 sm:$0xff]   ;;  %v5308_v59 = vld [vmem:[%s6074_s23 + $0x568] ss:$16 sps:$4 sm:$0xff]  }
  0xb9   : > { %3463 = vmatprep.subr.bf16.mxu0 %v5223_v60  ;;  %3807 = vmatprep.subr.bf16.mxu1 %v5226_v61  ;;  %v5313_v60 = vld [vmem:[%s6074_s23 + $0x584] ss:$16 sps:$4 sm:$0xff]   ;;  %v5316_v61 = vld [vmem:[%s6074_s23 + $0x58c] ss:$16 sps:$4 sm:$0xff]  }
  0xbc   : > { %3464 = vmatpush1.bf16.msra.mxu0 %v5221_v62  ;;  %3808 = vmatpush1.bf16.msra.mxu1 %v5224_v63  ;;  %v5311_v62 = vld [vmem:[%s6074_s23 + $0x580] ss:$16 sps:$4 sm:$0xff]   ;;  %v5314_v63 = vld [vmem:[%s6074_s23 + $0x588] ss:$16 sps:$4 sm:$0xff]  }
  0xbd   : > { %3465 = vmatprep.subr.bf16.mxu0 %v5229_v0  ;;  %3809 = vmatprep.subr.bf16.mxu1 %v5232_v1  ;;  %v5319_v0 = vld [vmem:[%s6074_s23 + $0x5a4] ss:$16 sps:$4 sm:$0xff]   ;;  %v5322_v1 = vld [vmem:[%s6074_s23 + $0x5ac] ss:$16 sps:$4 sm:$0xff]  }
  0xc0   : > { %3466 = vmatpush1.bf16.msra.mxu0 %v5227_v2  ;;  %3810 = vmatpush1.bf16.msra.mxu1 %v5230_v3  ;;  %v5317_v2 = vld [vmem:[%s6074_s23 + $0x5a0] ss:$16 sps:$4 sm:$0xff]   ;;  %v5320_v3 = vld [vmem:[%s6074_s23 + $0x5a8] ss:$16 sps:$4 sm:$0xff]  }
  0xc1   : > { %3467 = vmatprep.subr.bf16.mxu0 %v5235_v4  ;;  %3811 = vmatprep.subr.bf16.mxu1 %v5238_v5  ;;  %v5325_v4 = vld [vmem:[%s6074_s23 + $0x5c4] ss:$16 sps:$4 sm:$0xff]   ;;  %v5328_v5 = vld [vmem:[%s6074_s23 + $0x5cc] ss:$16 sps:$4 sm:$0xff]  }
  0xc4   : > { %3468 = vmatpush1.bf16.msra.mxu0 %v5233_v6  ;;  %3812 = vmatpush1.bf16.msra.mxu1 %v5236_v7  ;;  %v5323_v6 = vld [vmem:[%s6074_s23 + $0x5c0] ss:$16 sps:$4 sm:$0xff]   ;;  %v5326_v7 = vld [vmem:[%s6074_s23 + $0x5c8] ss:$16 sps:$4 sm:$0xff]  }
  0xc5   : > { %3480 = vmatprep.subr.bf16.mxu0 %v5241_v8  ;;  %3824 = vmatprep.subr.bf16.mxu1 %v5244_v9  ;;  %v5331_v8 = vld [vmem:[%s6074_s23 + $0x5e4] ss:$16 sps:$4 sm:$0xff]   ;;  %v5334_v9 = vld [vmem:[%s6074_s23 + $0x5ec] ss:$16 sps:$4 sm:$0xff]  }
  0xc7   : > { %3470 = vmatmul.mubr.bf16.vlgmr.msra.gmra.mrb[0].mxu0 %v4377_v10  ;;  %3814 = vmatmul.mubr.bf16.vlgmr.msra.gmra.mrb[0].mxu1 %v4377_v10  ;;  %v5329_v10 = vld [vmem:[%s6074_s23 + $0x5e0] ss:$16 sps:$4 sm:$0xff]  }
  0xc8   : > { %3481 = vmatpush1.bf16.msra.mxu0 %v5239_v11  ;;  %3825 = vmatpush1.bf16.msra.mxu1 %v5242_v12  ;;  %v5332_v11 = vld [vmem:[%s6074_s23 + $0x5e8] ss:$16 sps:$4 sm:$0xff]   ;;  %v5337_v12 = vld [vmem:[%s6074_s23 + $0x604] ss:$16 sps:$4 sm:$0xff]  }
  0xc9   : > { %3482 = vmatprep.subr.bf16.mxu0 %v5247_v13  ;;  %3826 = vmatprep.subr.bf16.mxu1 %v5250_v14  ;;  %v5340_v13 = vld [vmem:[%s6074_s23 + $0x60c] ss:$16 sps:$4 sm:$0xff]   ;;  %v5335_v14 = vld [vmem:[%s6074_s23 + $0x600] ss:$16 sps:$4 sm:$0xff]  }
  0xca   : > { %3512 = vmatprep.mubr.bf16.mxu0 %v4380_v17  ;;  %3856 = vmatprep.mubr.bf16.mxu1 %v4380_v17  ;;  %v5338_v17 = vld [vmem:[%s6074_s23 + $0x608] ss:$16 sps:$4 sm:$0xff]  }
  0xcc   : > { %3483 = vmatpush1.bf16.msra.mxu0 %v5245_v18  ;;  %3827 = vmatpush1.bf16.msra.mxu1 %v5248_v19  ;;  %v4379_v18 = vcombine.low %v6224_v15, %v6227_v16  ;;  %v6296_v19 = vld [vmem:[%s6057_s25 + $0x18] sm:$0xff]  ;;  %v5341_v15 = vld [vmem:[%s6074_s23 + $0x620] ss:$16 sps:$4 sm:$0xff]  }
  0xcd   : > { %3484 = vmatprep.subr.bf16.mxu0 %v5253_v20  ;;  %3828 = vmatprep.subr.bf16.mxu1 %v5256_v21  ;;  %v6299_v20 = vld [vmem:[%s6057_s25 + $0x58] sm:$0xff]  ;;  %v5343_v21 = vld [vmem:[%s6074_s23 + $0x624] ss:$16 sps:$4 sm:$0xff]  }
  0xce   : > { %v5344_v16 = vld [vmem:[%s6074_s23 + $0x628] ss:$16 sps:$4 sm:$0xff]  }
  0xd0   : > { %3485 = vmatpush1.bf16.msra.mxu0 %v5251_v22  ;;  %3829 = vmatpush1.bf16.msra.mxu1 %v5254_v23  ;;  %v5346_v22 = vld [vmem:[%s6074_s23 + $0x62c] ss:$16 sps:$4 sm:$0xff]   ;;  %v4382_v23 = vcombine.high %v6296_v19, %v6299_v20 }
  0xd1   : > { %3486 = vmatprep.subr.bf16.mxu0 %v5259_v24  ;;  %3830 = vmatprep.subr.bf16.mxu1 %v5262_v25  ;;  %v5349_v24 = vld [vmem:[%s6074_s23 + $0x644] ss:$16 sps:$4 sm:$0xff]   ;;  %v5352_v25 = vld [vmem:[%s6074_s23 + $0x64c] ss:$16 sps:$4 sm:$0xff]  }
  0xd4   : > { %3487 = vmatpush1.bf16.msra.mxu0 %v5257_v26  ;;  %3831 = vmatpush1.bf16.msra.mxu1 %v5260_v27  ;;  %v5347_v26 = vld [vmem:[%s6074_s23 + $0x640] ss:$16 sps:$4 sm:$0xff]   ;;  %v5350_v27 = vld [vmem:[%s6074_s23 + $0x648] ss:$16 sps:$4 sm:$0xff]  }
  0xd5   : > { %3488 = vmatprep.subr.bf16.mxu0 %v5265_v28  ;;  %3832 = vmatprep.subr.bf16.mxu1 %v5268_v29  ;;  %v5355_v28 = vld [vmem:[%s6074_s23 + $0x664] ss:$16 sps:$4 sm:$0xff]   ;;  %v5358_v29 = vld [vmem:[%s6074_s23 + $0x66c] ss:$16 sps:$4 sm:$0xff]  }
  0xd8   : > { %3489 = vmatpush1.bf16.msra.mxu0 %v5263_v30  ;;  %3833 = vmatpush1.bf16.msra.mxu1 %v5266_v31  ;;  %v5353_v30 = vld [vmem:[%s6074_s23 + $0x660] ss:$16 sps:$4 sm:$0xff]   ;;  %v5356_v31 = vld [vmem:[%s6074_s23 + $0x668] ss:$16 sps:$4 sm:$0xff]  }
  0xd9   : > { %3490 = vmatprep.subr.bf16.mxu0 %v5271_v32  ;;  %3834 = vmatprep.subr.bf16.mxu1 %v5274_v33  ;;  %v5361_v32 = vld [vmem:[%s6074_s23 + $0x684] ss:$16 sps:$4 sm:$0xff]   ;;  %v5364_v33 = vld [vmem:[%s6074_s23 + $0x68c] ss:$16 sps:$4 sm:$0xff]  }
  0xdc   : > { %3491 = vmatpush1.bf16.msra.mxu0 %v5269_v34  ;;  %3835 = vmatpush1.bf16.msra.mxu1 %v5272_v35  ;;  %v5359_v34 = vld [vmem:[%s6074_s23 + $0x680] ss:$16 sps:$4 sm:$0xff]   ;;  %v5362_v35 = vld [vmem:[%s6074_s23 + $0x688] ss:$16 sps:$4 sm:$0xff]  }
  0xdd   : > { %3492 = vmatprep.subr.bf16.mxu0 %v5277_v36  ;;  %3836 = vmatprep.subr.bf16.mxu1 %v5280_v37  ;;  %v5367_v36 = vld [vmem:[%s6074_s23 + $0x6a4] ss:$16 sps:$4 sm:$0xff]   ;;  %v5370_v37 = vld [vmem:[%s6074_s23 + $0x6ac] ss:$16 sps:$4 sm:$0xff]  }
  0xe0   : > { %3493 = vmatpush1.bf16.msra.mxu0 %v5275_v38  ;;  %3837 = vmatpush1.bf16.msra.mxu1 %v5278_v39  ;;  %v5365_v38 = vld [vmem:[%s6074_s23 + $0x6a0] ss:$16 sps:$4 sm:$0xff]   ;;  %v5368_v39 = vld [vmem:[%s6074_s23 + $0x6a8] ss:$16 sps:$4 sm:$0xff]  }
  0xe1   : > { %3494 = vmatprep.subr.bf16.mxu0 %v5283_v40  ;;  %3838 = vmatprep.subr.bf16.mxu1 %v5286_v41  ;;  %v5373_v40 = vld [vmem:[%s6074_s23 + $0x6c4] ss:$16 sps:$4 sm:$0xff]   ;;  %v5376_v41 = vld [vmem:[%s6074_s23 + $0x6cc] ss:$16 sps:$4 sm:$0xff]  }
  0xe4   : > { %3495 = vmatpush1.bf16.msra.mxu0 %v5281_v42  ;;  %3839 = vmatpush1.bf16.msra.mxu1 %v5284_v43  ;;  %v5371_v42 = vld [vmem:[%s6074_s23 + $0x6c0] ss:$16 sps:$4 sm:$0xff]   ;;  %v5374_v43 = vld [vmem:[%s6074_s23 + $0x6c8] ss:$16 sps:$4 sm:$0xff]  }
  0xe5   : > { %3496 = vmatprep.subr.bf16.mxu0 %v5289_v44  ;;  %3840 = vmatprep.subr.bf16.mxu1 %v5292_v45  ;;  %v5379_v44 = vld [vmem:[%s6074_s23 + $0x6e4] ss:$16 sps:$4 sm:$0xff]   ;;  %v5382_v45 = vld [vmem:[%s6074_s23 + $0x6ec] ss:$16 sps:$4 sm:$0xff]  }
  0xe8   : > { %3497 = vmatpush1.bf16.msra.mxu0 %v5287_v46  ;;  %3841 = vmatpush1.bf16.msra.mxu1 %v5290_v47  ;;  %v5377_v46 = vld [vmem:[%s6074_s23 + $0x6e0] ss:$16 sps:$4 sm:$0xff]   ;;  %v5380_v47 = vld [vmem:[%s6074_s23 + $0x6e8] ss:$16 sps:$4 sm:$0xff]  }
  0xe9   : > { %3498 = vmatprep.subr.bf16.mxu0 %v5295_v48  ;;  %3842 = vmatprep.subr.bf16.mxu1 %v5298_v49  ;;  %v5385_v48 = vld [vmem:[%s6074_s23 + $0x704] ss:$16 sps:$4 sm:$0xff]   ;;  %v5388_v49 = vld [vmem:[%s6074_s23 + $0x70c] ss:$16 sps:$4 sm:$0xff]  }
  0xec   : > { %3499 = vmatpush1.bf16.msra.mxu0 %v5293_v50  ;;  %3843 = vmatpush1.bf16.msra.mxu1 %v5296_v51  ;;  %v5383_v50 = vld [vmem:[%s6074_s23 + $0x700] ss:$16 sps:$4 sm:$0xff]   ;;  %v5386_v51 = vld [vmem:[%s6074_s23 + $0x708] ss:$16 sps:$4 sm:$0xff]  }
  0xed   : > { %3500 = vmatprep.subr.bf16.mxu0 %v5301_v52  ;;  %3844 = vmatprep.subr.bf16.mxu1 %v5304_v53  ;;  %v5391_v52 = vld [vmem:[%s6074_s23 + $0x724] ss:$16 sps:$4 sm:$0xff]   ;;  %v5394_v53 = vld [vmem:[%s6074_s23 + $0x72c] ss:$16 sps:$4 sm:$0xff]  }
  0xf0   : > { %3501 = vmatpush1.bf16.msra.mxu0 %v5299_v54  ;;  %3845 = vmatpush1.bf16.msra.mxu1 %v5302_v55  ;;  %v5389_v54 = vld [vmem:[%s6074_s23 + $0x720] ss:$16 sps:$4 sm:$0xff]   ;;  %v5392_v55 = vld [vmem:[%s6074_s23 + $0x728] ss:$16 sps:$4 sm:$0xff]  }
  0xf1   : > { %3502 = vmatprep.subr.bf16.mxu0 %v5307_v56  ;;  %3846 = vmatprep.subr.bf16.mxu1 %v5310_v57  ;;  %v5397_v56 = vld [vmem:[%s6074_s23 + $0x744] ss:$16 sps:$4 sm:$0xff]   ;;  %v5400_v57 = vld [vmem:[%s6074_s23 + $0x74c] ss:$16 sps:$4 sm:$0xff]  }
  0xf4   : > { %3503 = vmatpush1.bf16.msra.mxu0 %v5305_v58  ;;  %3847 = vmatpush1.bf16.msra.mxu1 %v5308_v59  ;;  %v5395_v58 = vld [vmem:[%s6074_s23 + $0x740] ss:$16 sps:$4 sm:$0xff]   ;;  %v5398_v59 = vld [vmem:[%s6074_s23 + $0x748] ss:$16 sps:$4 sm:$0xff]  }
  0xf5   : > { %3504 = vmatprep.subr.bf16.mxu0 %v5313_v60  ;;  %3848 = vmatprep.subr.bf16.mxu1 %v5316_v61  ;;  %v5403_v60 = vld [vmem:[%s6074_s23 + $0x764] ss:$16 sps:$4 sm:$0xff]   ;;  %v5406_v61 = vld [vmem:[%s6074_s23 + $0x76c] ss:$16 sps:$4 sm:$0xff]  }
  0xf8   : > { %3505 = vmatpush1.bf16.msra.mxu0 %v5311_v62  ;;  %3849 = vmatpush1.bf16.msra.mxu1 %v5314_v63  ;;  %v5401_v62 = vld [vmem:[%s6074_s23 + $0x760] ss:$16 sps:$4 sm:$0xff]   ;;  %v5404_v63 = vld [vmem:[%s6074_s23 + $0x768] ss:$16 sps:$4 sm:$0xff]  }
  0xf9   : > { %3506 = vmatprep.subr.bf16.mxu0 %v5319_v0  ;;  %3850 = vmatprep.subr.bf16.mxu1 %v5322_v1  ;;  %v5409_v0 = vld [vmem:[%s6074_s23 + $0x784] ss:$16 sps:$4 sm:$0xff]   ;;  %v5412_v1 = vld [vmem:[%s6074_s23 + $0x78c] ss:$16 sps:$4 sm:$0xff]  }
  0xfc   : > { %3507 = vmatpush1.bf16.msra.mxu0 %v5317_v2  ;;  %3851 = vmatpush1.bf16.msra.mxu1 %v5320_v3  ;;  %v5407_v2 = vld [vmem:[%s6074_s23 + $0x780] ss:$16 sps:$4 sm:$0xff]   ;;  %v5410_v3 = vld [vmem:[%s6074_s23 + $0x788] ss:$16 sps:$4 sm:$0xff]  }
  0xfd   : > { %3508 = vmatprep.subr.bf16.mxu0 %v5325_v4  ;;  %3852 = vmatprep.subr.bf16.mxu1 %v5328_v5  ;;  %v5415_v4 = vld [vmem:[%s6074_s23 + $0x7a4] ss:$16 sps:$4 sm:$0xff]   ;;  %v5418_v5 = vld [vmem:[%s6074_s23 + $0x7ac] ss:$16 sps:$4 sm:$0xff]  }
 0x100   : > { %3509 = vmatpush1.bf16.msra.mxu0 %v5323_v6  ;;  %3853 = vmatpush1.bf16.msra.mxu1 %v5326_v7  ;;  %v5413_v6 = vld [vmem:[%s6074_s23 + $0x7a0] ss:$16 sps:$4 sm:$0xff]   ;;  %v5416_v7 = vld [vmem:[%s6074_s23 + $0x7a8] ss:$16 sps:$4 sm:$0xff]  }
 0x101   : > { %3510 = vmatprep.subr.bf16.mxu0 %v5331_v8  ;;  %3854 = vmatprep.subr.bf16.mxu1 %v5334_v9  ;;  %v5421_v8 = vld [vmem:[%s6074_s23 + $0x7c4] ss:$16 sps:$4 sm:$0xff]   ;;  %v5424_v9 = vld [vmem:[%s6074_s23 + $0x7cc] ss:$16 sps:$4 sm:$0xff]  }
 0x104   : > { %3511 = vmatpush1.bf16.msra.mxu0 %v5329_v10  ;;  %3855 = vmatpush1.bf16.msra.mxu1 %v5332_v11  ;;  %v5419_v10 = vld [vmem:[%s6074_s23 + $0x7c0] ss:$16 sps:$4 sm:$0xff]   ;;  %v5422_v11 = vld [vmem:[%s6074_s23 + $0x7c8] ss:$16 sps:$4 sm:$0xff]  }
 0x105   : > { %3523 = vmatprep.subr.bf16.mxu0 %v5337_v12  ;;  %3867 = vmatprep.subr.bf16.mxu1 %v5340_v13  ;;  %v5427_v12 = vld [vmem:[%s6074_s23 + $0x7e4] ss:$16 sps:$4 sm:$0xff]   ;;  %v5430_v13 = vld [vmem:[%s6074_s23 + $0x7ec] ss:$16 sps:$4 sm:$0xff]  }
 0x107   : > { %3513 = vmatmul.mubr.bf16.vlgmr.msra.gmra.mrb[0].mxu0 %v4379_v18  ;;  %3857 = vmatmul.mubr.bf16.vlgmr.msra.gmra.mrb[0].mxu1 %v4379_v18  ;;  %v5433_v18 = vld [vmem:[%s6074_s23 + $0x804] ss:$16 sps:$4 sm:$0xff]  }
 0x108   : > { %3524 = vmatpush1.bf16.msra.mxu0 %v5335_v14  ;;  %3868 = vmatpush1.bf16.msra.mxu1 %v5338_v17  ;;  %v5425_v14 = vld [vmem:[%s6074_s23 + $0x7e0] ss:$16 sps:$4 sm:$0xff]   ;;  %v5428_v17 = vld [vmem:[%s6074_s23 + $0x7e8] ss:$16 sps:$4 sm:$0xff]  }
 0x109   : > { %3525 = vmatprep.subr.bf16.mxu0 %v5343_v21  ;;  %3869 = vmatprep.subr.bf16.mxu1 %v5346_v22  ;;  %v5436_v21 = vld [vmem:[%s6074_s23 + $0x80c] ss:$16 sps:$4 sm:$0xff]   ;;  %v6366_v22 = vld [vmem:[%s6057_s25 + $0x20] sm:$0xff] }
 0x10a   : > { %3555 = vmatprep.mubr.bf16.mxu0 %v4382_v23  ;;  %3899 = vmatprep.mubr.bf16.mxu1 %v4382_v23  ;;  %v4381_v23 = vcombine.low %v6296_v19, %v6299_v20  ;;  %v5437_v19 = vld [vmem:[%s6074_s23 + $0x820] ss:$16 sps:$4 sm:$0xff]   ;;  %v5440_v20 = vld [vmem:[%s6074_s23 + $0x828] ss:$16 sps:$4 sm:$0xff]  }
 0x10c   : > { %3526 = vmatpush1.bf16.msra.mxu0 %v5341_v15  ;;  %3870 = vmatpush1.bf16.msra.mxu1 %v5344_v16  ;;  %v6371_v15 = vld [vmem:[%s6057_s25 + $0x60] sm:$0xff] }
 0x10d   : > { %3527 = vmatprep.subr.bf16.mxu0 %v5349_v24  ;;  %3871 = vmatprep.subr.bf16.mxu1 %v5352_v25  ;;  %v5431_v16 = vld [vmem:[%s6074_s23 + $0x800] ss:$16 sps:$4 sm:$0xff]   ;;  %v5434_v24 = vld [vmem:[%s6074_s23 + $0x808] ss:$16 sps:$4 sm:$0xff]   ;;  %v5439_v25 = vld [vmem:[%s6074_s23 + $0x824] ss:$16 sps:$4 sm:$0xff]  }
 0x110   : > { %3528 = vmatpush1.bf16.msra.mxu0 %v5347_v26  ;;  %3872 = vmatpush1.bf16.msra.mxu1 %v5350_v27  ;;  %v5442_v26 = vld [vmem:[%s6074_s23 + $0x82c] ss:$16 sps:$4 sm:$0xff]   ;;  %v4384_v27 = vcombine.high %v6366_v22, %v6371_v15 }
 0x111   : > { %3529 = vmatprep.subr.bf16.mxu0 %v5355_v28  ;;  %3873 = vmatprep.subr.bf16.mxu1 %v5358_v29  ;;  %v5445_v28 = vld [vmem:[%s6074_s23 + $0x844] ss:$16 sps:$4 sm:$0xff]   ;;  %v5448_v29 = vld [vmem:[%s6074_s23 + $0x84c] ss:$16 sps:$4 sm:$0xff]  }
 0x114   : > { %3530 = vmatpush1.bf16.msra.mxu0 %v5353_v30  ;;  %3874 = vmatpush1.bf16.msra.mxu1 %v5356_v31  ;;  %v5443_v30 = vld [vmem:[%s6074_s23 + $0x840] ss:$16 sps:$4 sm:$0xff]   ;;  %v5446_v31 = vld [vmem:[%s6074_s23 + $0x848] ss:$16 sps:$4 sm:$0xff]  }
 0x115   : > { %3531 = vmatprep.subr.bf16.mxu0 %v5361_v32  ;;  %3875 = vmatprep.subr.bf16.mxu1 %v5364_v33  ;;  %v5451_v32 = vld [vmem:[%s6074_s23 + $0x864] ss:$16 sps:$4 sm:$0xff]   ;;  %v5454_v33 = vld [vmem:[%s6074_s23 + $0x86c] ss:$16 sps:$4 sm:$0xff]  }
 0x118   : > { %3532 = vmatpush1.bf16.msra.mxu0 %v5359_v34  ;;  %3876 = vmatpush1.bf16.msra.mxu1 %v5362_v35  ;;  %v5449_v34 = vld [vmem:[%s6074_s23 + $0x860] ss:$16 sps:$4 sm:$0xff]   ;;  %v5452_v35 = vld [vmem:[%s6074_s23 + $0x868] ss:$16 sps:$4 sm:$0xff]  }
 0x119   : > { %3533 = vmatprep.subr.bf16.mxu0 %v5367_v36  ;;  %3877 = vmatprep.subr.bf16.mxu1 %v5370_v37  ;;  %v5457_v36 = vld [vmem:[%s6074_s23 + $0x884] ss:$16 sps:$4 sm:$0xff]   ;;  %v5460_v37 = vld [vmem:[%s6074_s23 + $0x88c] ss:$16 sps:$4 sm:$0xff]  }
 0x11c   : > { %3534 = vmatpush1.bf16.msra.mxu0 %v5365_v38  ;;  %3878 = vmatpush1.bf16.msra.mxu1 %v5368_v39  ;;  %v5455_v38 = vld [vmem:[%s6074_s23 + $0x880] ss:$16 sps:$4 sm:$0xff]   ;;  %v5458_v39 = vld [vmem:[%s6074_s23 + $0x888] ss:$16 sps:$4 sm:$0xff]  }
 0x11d   : > { %3535 = vmatprep.subr.bf16.mxu0 %v5373_v40  ;;  %3879 = vmatprep.subr.bf16.mxu1 %v5376_v41  ;;  %v5463_v40 = vld [vmem:[%s6074_s23 + $0x8a4] ss:$16 sps:$4 sm:$0xff]   ;;  %v5466_v41 = vld [vmem:[%s6074_s23 + $0x8ac] ss:$16 sps:$4 sm:$0xff]  }
 0x120   : > { %3536 = vmatpush1.bf16.msra.mxu0 %v5371_v42  ;;  %3880 = vmatpush1.bf16.msra.mxu1 %v5374_v43  ;;  %v5461_v42 = vld [vmem:[%s6074_s23 + $0x8a0] ss:$16 sps:$4 sm:$0xff]   ;;  %v5464_v43 = vld [vmem:[%s6074_s23 + $0x8a8] ss:$16 sps:$4 sm:$0xff]  }
 0x121   : > { %3537 = vmatprep.subr.bf16.mxu0 %v5379_v44  ;;  %3881 = vmatprep.subr.bf16.mxu1 %v5382_v45  ;;  %v5469_v44 = vld [vmem:[%s6074_s23 + $0x8c4] ss:$16 sps:$4 sm:$0xff]   ;;  %v5472_v45 = vld [vmem:[%s6074_s23 + $0x8cc] ss:$16 sps:$4 sm:$0xff]  }
 0x124   : > { %3538 = vmatpush1.bf16.msra.mxu0 %v5377_v46  ;;  %3882 = vmatpush1.bf16.msra.mxu1 %v5380_v47  ;;  %v5467_v46 = vld [vmem:[%s6074_s23 + $0x8c0] ss:$16 sps:$4 sm:$0xff]   ;;  %v5470_v47 = vld [vmem:[%s6074_s23 + $0x8c8] ss:$16 sps:$4 sm:$0xff]  }
 0x125   : > { %3539 = vmatprep.subr.bf16.mxu0 %v5385_v48  ;;  %3883 = vmatprep.subr.bf16.mxu1 %v5388_v49  ;;  %v5475_v48 = vld [vmem:[%s6074_s23 + $0x8e4] ss:$16 sps:$4 sm:$0xff]   ;;  %v5478_v49 = vld [vmem:[%s6074_s23 + $0x8ec] ss:$16 sps:$4 sm:$0xff]  }
 0x128   : > { %3540 = vmatpush1.bf16.msra.mxu0 %v5383_v50  ;;  %3884 = vmatpush1.bf16.msra.mxu1 %v5386_v51  ;;  %v5473_v50 = vld [vmem:[%s6074_s23 + $0x8e0] ss:$16 sps:$4 sm:$0xff]   ;;  %v5476_v51 = vld [vmem:[%s6074_s23 + $0x8e8] ss:$16 sps:$4 sm:$0xff]  }
 0x129   : > { %3541 = vmatprep.subr.bf16.mxu0 %v5391_v52  ;;  %3885 = vmatprep.subr.bf16.mxu1 %v5394_v53  ;;  %v5481_v52 = vld [vmem:[%s6074_s23 + $0x904] ss:$16 sps:$4 sm:$0xff]   ;;  %v5484_v53 = vld [vmem:[%s6074_s23 + $0x90c] ss:$16 sps:$4 sm:$0xff]  }
 0x12c   : > { %3542 = vmatpush1.bf16.msra.mxu0 %v5389_v54  ;;  %3886 = vmatpush1.bf16.msra.mxu1 %v5392_v55  ;;  %v5479_v54 = vld [vmem:[%s6074_s23 + $0x900] ss:$16 sps:$4 sm:$0xff]   ;;  %v5482_v55 = vld [vmem:[%s6074_s23 + $0x908] ss:$16 sps:$4 sm:$0xff]  }
 0x12d   : > { %3543 = vmatprep.subr.bf16.mxu0 %v5397_v56  ;;  %3887 = vmatprep.subr.bf16.mxu1 %v5400_v57  ;;  %v5487_v56 = vld [vmem:[%s6074_s23 + $0x924] ss:$16 sps:$4 sm:$0xff]   ;;  %v5490_v57 = vld [vmem:[%s6074_s23 + $0x92c] ss:$16 sps:$4 sm:$0xff]  }
 0x130   : > { %3544 = vmatpush1.bf16.msra.mxu0 %v5395_v58  ;;  %3888 = vmatpush1.bf16.msra.mxu1 %v5398_v59  ;;  %v5485_v58 = vld [vmem:[%s6074_s23 + $0x920] ss:$16 sps:$4 sm:$0xff]   ;;  %v5488_v59 = vld [vmem:[%s6074_s23 + $0x928] ss:$16 sps:$4 sm:$0xff]  }
 0x131   : > { %3545 = vmatprep.subr.bf16.mxu0 %v5403_v60  ;;  %3889 = vmatprep.subr.bf16.mxu1 %v5406_v61  ;;  %v5493_v60 = vld [vmem:[%s6074_s23 + $0x944] ss:$16 sps:$4 sm:$0xff]   ;;  %v5496_v61 = vld [vmem:[%s6074_s23 + $0x94c] ss:$16 sps:$4 sm:$0xff]  }
 0x134   : > { %3546 = vmatpush1.bf16.msra.mxu0 %v5401_v62  ;;  %3890 = vmatpush1.bf16.msra.mxu1 %v5404_v63  ;;  %v5491_v62 = vld [vmem:[%s6074_s23 + $0x940] ss:$16 sps:$4 sm:$0xff]   ;;  %v5494_v63 = vld [vmem:[%s6074_s23 + $0x948] ss:$16 sps:$4 sm:$0xff]  }
 0x135   : > { %3547 = vmatprep.subr.bf16.mxu0 %v5409_v0  ;;  %3891 = vmatprep.subr.bf16.mxu1 %v5412_v1  ;;  %v5499_v0 = vld [vmem:[%s6074_s23 + $0x964] ss:$16 sps:$4 sm:$0xff]   ;;  %v5502_v1 = vld [vmem:[%s6074_s23 + $0x96c] ss:$16 sps:$4 sm:$0xff]  }
 0x138   : > { %3548 = vmatpush1.bf16.msra.mxu0 %v5407_v2  ;;  %3892 = vmatpush1.bf16.msra.mxu1 %v5410_v3  ;;  %v5497_v2 = vld [vmem:[%s6074_s23 + $0x960] ss:$16 sps:$4 sm:$0xff]   ;;  %v5500_v3 = vld [vmem:[%s6074_s23 + $0x968] ss:$16 sps:$4 sm:$0xff]  }
 0x139   : > { %3549 = vmatprep.subr.bf16.mxu0 %v5415_v4  ;;  %3893 = vmatprep.subr.bf16.mxu1 %v5418_v5  ;;  %v5505_v4 = vld [vmem:[%s6074_s23 + $0x984] ss:$16 sps:$4 sm:$0xff]   ;;  %v5508_v5 = vld [vmem:[%s6074_s23 + $0x98c] ss:$16 sps:$4 sm:$0xff]  }
 0x13c   : > { %3550 = vmatpush1.bf16.msra.mxu0 %v5413_v6  ;;  %3894 = vmatpush1.bf16.msra.mxu1 %v5416_v7  ;;  %v5503_v6 = vld [vmem:[%s6074_s23 + $0x980] ss:$16 sps:$4 sm:$0xff]   ;;  %v5506_v7 = vld [vmem:[%s6074_s23 + $0x988] ss:$16 sps:$4 sm:$0xff]  }
 0x13d   : > { %3551 = vmatprep.subr.bf16.mxu0 %v5421_v8  ;;  %3895 = vmatprep.subr.bf16.mxu1 %v5424_v9  ;;  %v5511_v8 = vld [vmem:[%s6074_s23 + $0x9a4] ss:$16 sps:$4 sm:$0xff]   ;;  %v5514_v9 = vld [vmem:[%s6074_s23 + $0x9ac] ss:$16 sps:$4 sm:$0xff]  }
 0x140   : > { %3552 = vmatpush1.bf16.msra.mxu0 %v5419_v10  ;;  %3896 = vmatpush1.bf16.msra.mxu1 %v5422_v11  ;;  %v5509_v10 = vld [vmem:[%s6074_s23 + $0x9a0] ss:$16 sps:$4 sm:$0xff]   ;;  %v5512_v11 = vld [vmem:[%s6074_s23 + $0x9a8] ss:$16 sps:$4 sm:$0xff]  }
 0x141   : > { %3553 = vmatprep.subr.bf16.mxu0 %v5427_v12  ;;  %3897 = vmatprep.subr.bf16.mxu1 %v5430_v13  ;;  %v5517_v12 = vld [vmem:[%s6074_s23 + $0x9c4] ss:$16 sps:$4 sm:$0xff]   ;;  %v5520_v13 = vld [vmem:[%s6074_s23 + $0x9cc] ss:$16 sps:$4 sm:$0xff]  }
 0x144   : > { %3554 = vmatpush1.bf16.msra.mxu0 %v5425_v14  ;;  %3898 = vmatpush1.bf16.msra.mxu1 %v5428_v17  ;;  %v5515_v14 = vld [vmem:[%s6074_s23 + $0x9c0] ss:$16 sps:$4 sm:$0xff]   ;;  %v5518_v17 = vld [vmem:[%s6074_s23 + $0x9c8] ss:$16 sps:$4 sm:$0xff]  }
 0x145   : > { %3566 = vmatprep.subr.bf16.mxu0 %v5433_v18  ;;  %3910 = vmatprep.subr.bf16.mxu1 %v5436_v21  ;;  %v5523_v18 = vld [vmem:[%s6074_s23 + $0x9e4] ss:$16 sps:$4 sm:$0xff]   ;;  %v5526_v21 = vld [vmem:[%s6074_s23 + $0x9ec] ss:$16 sps:$4 sm:$0xff]  }
 0x147   : > { %3556 = vmatmul.mubr.bf16.vlgmr.msra.gmra.mrb[0].mxu0 %v4381_v23  ;;  %3900 = vmatmul.mubr.bf16.vlgmr.msra.gmra.mrb[0].mxu1 %v4381_v23  ;;  %v5521_v23 = vld [vmem:[%s6074_s23 + $0x9e0] ss:$16 sps:$4 sm:$0xff]  }
 0x148   : > { %3567 = vmatpush1.bf16.msra.mxu0 %v5431_v16  ;;  %3911 = vmatpush1.bf16.msra.mxu1 %v5434_v24  ;;  %v5524_v16 = vld [vmem:[%s6074_s23 + $0x9e8] ss:$16 sps:$4 sm:$0xff]   ;;  %v5529_v24 = vld [vmem:[%s6074_s23 + $0xa04] ss:$16 sps:$4 sm:$0xff]  }
 0x149   : > { %3568 = vmatprep.subr.bf16.mxu0 %v5439_v25  ;;  %3912 = vmatprep.subr.bf16.mxu1 %v5442_v26  ;;  %v5532_v25 = vld [vmem:[%s6074_s23 + $0xa0c] ss:$16 sps:$4 sm:$0xff]  }
 0x14a   : > { %3598 = vmatprep.mubr.bf16.mxu0 %v4384_v27  ;;  %3942 = vmatprep.mubr.bf16.mxu1 %v4384_v27  ;;  %v6440_v26 = vld [vmem:[%s6057_s25 + $0x28] sm:$0xff] }
 0x14b   : > { %v6443_v27 = vld [vmem:[%s6057_s25 + $0x68] sm:$0xff] }
 0x14c   : > { %3569 = vmatpush1.bf16.msra.mxu0 %v5437_v19  ;;  %3913 = vmatpush1.bf16.msra.mxu1 %v5440_v20  ;;  %v4383_v19 = vcombine.low %v6366_v22, %v6371_v15  ;;  %v5527_v20 = vld [vmem:[%s6074_s23 + $0xa00] ss:$16 sps:$4 sm:$0xff]   ;;  %v5536_v15 = vld [vmem:[%s6074_s23 + $0xa28] ss:$16 sps:$4 sm:$0xff]  }
 0x14d   : > { %3570 = vmatprep.subr.bf16.mxu0 %v5445_v28  ;;  %3914 = vmatprep.subr.bf16.mxu1 %v5448_v29  ;;  %v5530_v28 = vld [vmem:[%s6074_s23 + $0xa08] ss:$16 sps:$4 sm:$0xff]   ;;  %v5535_v29 = vld [vmem:[%s6074_s23 + $0xa24] ss:$16 sps:$4 sm:$0xff]   ;;  %v5533_v22 = vld [vmem:[%s6074_s23 + $0xa20] ss:$16 sps:$4 sm:$0xff]  }
 0x150   : > { %3571 = vmatpush1.bf16.msra.mxu0 %v5443_v30  ;;  %3915 = vmatpush1.bf16.msra.mxu1 %v5446_v31  ;;  %v5538_v30 = vld [vmem:[%s6074_s23 + $0xa2c] ss:$16 sps:$4 sm:$0xff]   ;;  %v4386_v31 = vcombine.high %v6440_v26, %v6443_v27 }
 0x151   : > { %3572 = vmatprep.subr.bf16.mxu0 %v5451_v32  ;;  %3916 = vmatprep.subr.bf16.mxu1 %v5454_v33  ;;  %v5541_v32 = vld [vmem:[%s6074_s23 + $0xa44] ss:$16 sps:$4 sm:$0xff]   ;;  %v5544_v33 = vld [vmem:[%s6074_s23 + $0xa4c] ss:$16 sps:$4 sm:$0xff]  }
 0x154   : > { %3573 = vmatpush1.bf16.msra.mxu0 %v5449_v34  ;;  %3917 = vmatpush1.bf16.msra.mxu1 %v5452_v35  ;;  %v5539_v34 = vld [vmem:[%s6074_s23 + $0xa40] ss:$16 sps:$4 sm:$0xff]   ;;  %v5542_v35 = vld [vmem:[%s6074_s23 + $0xa48] ss:$16 sps:$4 sm:$0xff]  }
 0x155   : > { %3574 = vmatprep.subr.bf16.mxu0 %v5457_v36  ;;  %3918 = vmatprep.subr.bf16.mxu1 %v5460_v37  ;;  %v5547_v36 = vld [vmem:[%s6074_s23 + $0xa64] ss:$16 sps:$4 sm:$0xff]   ;;  %v5550_v37 = vld [vmem:[%s6074_s23 + $0xa6c] ss:$16 sps:$4 sm:$0xff]  }
 0x158   : > { %3575 = vmatpush1.bf16.msra.mxu0 %v5455_v38  ;;  %3919 = vmatpush1.bf16.msra.mxu1 %v5458_v39  ;;  %v5545_v38 = vld [vmem:[%s6074_s23 + $0xa60] ss:$16 sps:$4 sm:$0xff]   ;;  %v5548_v39 = vld [vmem:[%s6074_s23 + $0xa68] ss:$16 sps:$4 sm:$0xff]  }
 0x159   : > { %3576 = vmatprep.subr.bf16.mxu0 %v5463_v40  ;;  %3920 = vmatprep.subr.bf16.mxu1 %v5466_v41  ;;  %v5553_v40 = vld [vmem:[%s6074_s23 + $0xa84] ss:$16 sps:$4 sm:$0xff]   ;;  %v5556_v41 = vld [vmem:[%s6074_s23 + $0xa8c] ss:$16 sps:$4 sm:$0xff]  }
 0x15c   : > { %3577 = vmatpush1.bf16.msra.mxu0 %v5461_v42  ;;  %3921 = vmatpush1.bf16.msra.mxu1 %v5464_v43  ;;  %v5551_v42 = vld [vmem:[%s6074_s23 + $0xa80] ss:$16 sps:$4 sm:$0xff]   ;;  %v5554_v43 = vld [vmem:[%s6074_s23 + $0xa88] ss:$16 sps:$4 sm:$0xff]  }
 0x15d   : > { %3578 = vmatprep.subr.bf16.mxu0 %v5469_v44  ;;  %3922 = vmatprep.subr.bf16.mxu1 %v5472_v45  ;;  %v5559_v44 = vld [vmem:[%s6074_s23 + $0xaa4] ss:$16 sps:$4 sm:$0xff]   ;;  %v5562_v45 = vld [vmem:[%s6074_s23 + $0xaac] ss:$16 sps:$4 sm:$0xff]  }
 0x160   : > { %3579 = vmatpush1.bf16.msra.mxu0 %v5467_v46  ;;  %3923 = vmatpush1.bf16.msra.mxu1 %v5470_v47  ;;  %v5557_v46 = vld [vmem:[%s6074_s23 + $0xaa0] ss:$16 sps:$4 sm:$0xff]   ;;  %v5560_v47 = vld [vmem:[%s6074_s23 + $0xaa8] ss:$16 sps:$4 sm:$0xff]  }
 0x161   : > { %3580 = vmatprep.subr.bf16.mxu0 %v5475_v48  ;;  %3924 = vmatprep.subr.bf16.mxu1 %v5478_v49  ;;  %v5565_v48 = vld [vmem:[%s6074_s23 + $0xac4] ss:$16 sps:$4 sm:$0xff]   ;;  %v5568_v49 = vld [vmem:[%s6074_s23 + $0xacc] ss:$16 sps:$4 sm:$0xff]  }
 0x164   : > { %3581 = vmatpush1.bf16.msra.mxu0 %v5473_v50  ;;  %3925 = vmatpush1.bf16.msra.mxu1 %v5476_v51  ;;  %v5563_v50 = vld [vmem:[%s6074_s23 + $0xac0] ss:$16 sps:$4 sm:$0xff]   ;;  %v5566_v51 = vld [vmem:[%s6074_s23 + $0xac8] ss:$16 sps:$4 sm:$0xff]  }
 0x165   : > { %3582 = vmatprep.subr.bf16.mxu0 %v5481_v52  ;;  %3926 = vmatprep.subr.bf16.mxu1 %v5484_v53  ;;  %v5571_v52 = vld [vmem:[%s6074_s23 + $0xae4] ss:$16 sps:$4 sm:$0xff]   ;;  %v5574_v53 = vld [vmem:[%s6074_s23 + $0xaec] ss:$16 sps:$4 sm:$0xff]  }
 0x168   : > { %3583 = vmatpush1.bf16.msra.mxu0 %v5479_v54  ;;  %3927 = vmatpush1.bf16.msra.mxu1 %v5482_v55  ;;  %v5569_v54 = vld [vmem:[%s6074_s23 + $0xae0] ss:$16 sps:$4 sm:$0xff]   ;;  %v5572_v55 = vld [vmem:[%s6074_s23 + $0xae8] ss:$16 sps:$4 sm:$0xff]  }
 0x169   : > { %3584 = vmatprep.subr.bf16.mxu0 %v5487_v56  ;;  %3928 = vmatprep.subr.bf16.mxu1 %v5490_v57  ;;  %v5577_v56 = vld [vmem:[%s6074_s23 + $0xb04] ss:$16 sps:$4 sm:$0xff]   ;;  %v5580_v57 = vld [vmem:[%s6074_s23 + $0xb0c] ss:$16 sps:$4 sm:$0xff]  }
 0x16c   : > { %3585 = vmatpush1.bf16.msra.mxu0 %v5485_v58  ;;  %3929 = vmatpush1.bf16.msra.mxu1 %v5488_v59  ;;  %v5575_v58 = vld [vmem:[%s6074_s23 + $0xb00] ss:$16 sps:$4 sm:$0xff]   ;;  %v5578_v59 = vld [vmem:[%s6074_s23 + $0xb08] ss:$16 sps:$4 sm:$0xff]  }
 0x16d   : > { %3586 = vmatprep.subr.bf16.mxu0 %v5493_v60  ;;  %3930 = vmatprep.subr.bf16.mxu1 %v5496_v61  ;;  %v5583_v60 = vld [vmem:[%s6074_s23 + $0xb24] ss:$16 sps:$4 sm:$0xff]   ;;  %v5586_v61 = vld [vmem:[%s6074_s23 + $0xb2c] ss:$16 sps:$4 sm:$0xff]  }
 0x170   : > { %3587 = vmatpush1.bf16.msra.mxu0 %v5491_v62  ;;  %3931 = vmatpush1.bf16.msra.mxu1 %v5494_v63  ;;  %v5581_v62 = vld [vmem:[%s6074_s23 + $0xb20] ss:$16 sps:$4 sm:$0xff]   ;;  %v5584_v63 = vld [vmem:[%s6074_s23 + $0xb28] ss:$16 sps:$4 sm:$0xff]  }
 0x171   : > { %3588 = vmatprep.subr.bf16.mxu0 %v5499_v0  ;;  %3932 = vmatprep.subr.bf16.mxu1 %v5502_v1  ;;  %v5589_v0 = vld [vmem:[%s6074_s23 + $0xb44] ss:$16 sps:$4 sm:$0xff]   ;;  %v5592_v1 = vld [vmem:[%s6074_s23 + $0xb4c] ss:$16 sps:$4 sm:$0xff]  }
 0x174   : > { %3589 = vmatpush1.bf16.msra.mxu0 %v5497_v2  ;;  %3933 = vmatpush1.bf16.msra.mxu1 %v5500_v3  ;;  %v5587_v2 = vld [vmem:[%s6074_s23 + $0xb40] ss:$16 sps:$4 sm:$0xff]   ;;  %v5590_v3 = vld [vmem:[%s6074_s23 + $0xb48] ss:$16 sps:$4 sm:$0xff]  }
 0x175   : > { %3590 = vmatprep.subr.bf16.mxu0 %v5505_v4  ;;  %3934 = vmatprep.subr.bf16.mxu1 %v5508_v5  ;;  %v5595_v4 = vld [vmem:[%s6074_s23 + $0xb64] ss:$16 sps:$4 sm:$0xff]   ;;  %v5598_v5 = vld [vmem:[%s6074_s23 + $0xb6c] ss:$16 sps:$4 sm:$0xff]  }
 0x178   : > { %3591 = vmatpush1.bf16.msra.mxu0 %v5503_v6  ;;  %3935 = vmatpush1.bf16.msra.mxu1 %v5506_v7  ;;  %v5593_v6 = vld [vmem:[%s6074_s23 + $0xb60] ss:$16 sps:$4 sm:$0xff]   ;;  %v5596_v7 = vld [vmem:[%s6074_s23 + $0xb68] ss:$16 sps:$4 sm:$0xff]  }
 0x179   : > { %3592 = vmatprep.subr.bf16.mxu0 %v5511_v8  ;;  %3936 = vmatprep.subr.bf16.mxu1 %v5514_v9  ;;  %v5601_v8 = vld [vmem:[%s6074_s23 + $0xb84] ss:$16 sps:$4 sm:$0xff]   ;;  %v5604_v9 = vld [vmem:[%s6074_s23 + $0xb8c] ss:$16 sps:$4 sm:$0xff]  }
 0x17c   : > { %3593 = vmatpush1.bf16.msra.mxu0 %v5509_v10  ;;  %3937 = vmatpush1.bf16.msra.mxu1 %v5512_v11  ;;  %v5599_v10 = vld [vmem:[%s6074_s23 + $0xb80] ss:$16 sps:$4 sm:$0xff]   ;;  %v5602_v11 = vld [vmem:[%s6074_s23 + $0xb88] ss:$16 sps:$4 sm:$0xff]  }
 0x17d   : > { %3594 = vmatprep.subr.bf16.mxu0 %v5517_v12  ;;  %3938 = vmatprep.subr.bf16.mxu1 %v5520_v13  ;;  %v5607_v12 = vld [vmem:[%s6074_s23 + $0xba4] ss:$16 sps:$4 sm:$0xff]   ;;  %v5610_v13 = vld [vmem:[%s6074_s23 + $0xbac] ss:$16 sps:$4 sm:$0xff]  }
 0x180   : > { %3595 = vmatpush1.bf16.msra.mxu0 %v5515_v14  ;;  %3939 = vmatpush1.bf16.msra.mxu1 %v5518_v17  ;;  %v5605_v14 = vld [vmem:[%s6074_s23 + $0xba0] ss:$16 sps:$4 sm:$0xff]   ;;  %v5608_v17 = vld [vmem:[%s6074_s23 + $0xba8] ss:$16 sps:$4 sm:$0xff]  }
 0x181   : > { %3596 = vmatprep.subr.bf16.mxu0 %v5523_v18  ;;  %3940 = vmatprep.subr.bf16.mxu1 %v5526_v21  ;;  %v5613_v18 = vld [vmem:[%s6074_s23 + $0xbc4] ss:$16 sps:$4 sm:$0xff]   ;;  %v5616_v21 = vld [vmem:[%s6074_s23 + $0xbcc] ss:$16 sps:$4 sm:$0xff]  }
 0x184   : > { %3597 = vmatpush1.bf16.msra.mxu0 %v5521_v23  ;;  %3941 = vmatpush1.bf16.msra.mxu1 %v5524_v16  ;;  %v5611_v23 = vld [vmem:[%s6074_s23 + $0xbc0] ss:$16 sps:$4 sm:$0xff]   ;;  %v5614_v16 = vld [vmem:[%s6074_s23 + $0xbc8] ss:$16 sps:$4 sm:$0xff]  }
 0x185   : > { %3609 = vmatprep.subr.bf16.mxu0 %v5529_v24  ;;  %3953 = vmatprep.subr.bf16.mxu1 %v5532_v25  ;;  %v5619_v24 = vld [vmem:[%s6074_s23 + $0xbe4] ss:$16 sps:$4 sm:$0xff]   ;;  %v5622_v25 = vld [vmem:[%s6074_s23 + $0xbec] ss:$16 sps:$4 sm:$0xff]  }
 0x187   : > { %3599 = vmatmul.mubr.bf16.vlgmr.msra.gmra.mrb[0].mxu0 %v4383_v19  ;;  %3943 = vmatmul.mubr.bf16.vlgmr.msra.gmra.mrb[0].mxu1 %v4383_v19  ;;  %v5617_v19 = vld [vmem:[%s6074_s23 + $0xbe0] ss:$16 sps:$4 sm:$0xff]  }
 0x188   : > { %3610 = vmatpush1.bf16.msra.mxu0 %v5527_v20  ;;  %3954 = vmatpush1.bf16.msra.mxu1 %v5530_v28  ;;  %v5620_v20 = vld [vmem:[%s6074_s23 + $0xbe8] ss:$16 sps:$4 sm:$0xff]   ;;  %v5625_v28 = vld [vmem:[%s6074_s23 + $0xc04] ss:$16 sps:$4 sm:$0xff]  }
 0x189   : > { %3611 = vmatprep.subr.bf16.mxu0 %v5535_v29  ;;  %3955 = vmatprep.subr.bf16.mxu1 %v5538_v30  ;;  %v5628_v29 = vld [vmem:[%s6074_s23 + $0xc0c] ss:$16 sps:$4 sm:$0xff]   ;;  %v4385_v30 = vcombine.low %v6440_v26, %v6443_v27  ;;  %v5629_v27 = vld [vmem:[%s6074_s23 + $0xc20] ss:$16 sps:$4 sm:$0xff]  }
 0x18a   : > { %3641 = vmatprep.mubr.bf16.mxu0 %v4386_v31  ;;  %3985 = vmatprep.mubr.bf16.mxu1 %v4386_v31  ;;  %v6516_v31 = vld [vmem:[%s6057_s25 + $0x30] sm:$0xff] }
 0x18c   : > { %3612 = vmatpush1.bf16.msra.mxu0 %v5533_v22  ;;  %3956 = vmatpush1.bf16.msra.mxu1 %v5536_v15  ;;  %v6519_v22 = vld [vmem:[%s6057_s25 + $0x70] sm:$0xff] }
 0x18d   : > { %3613 = vmatprep.subr.bf16.mxu0 %v5541_v32  ;;  %3957 = vmatprep.subr.bf16.mxu1 %v5544_v33  ;;  %v5623_v15 = vld [vmem:[%s6074_s23 + $0xc00] ss:$16 sps:$4 sm:$0xff]   ;;  %v5626_v32 = vld [vmem:[%s6074_s23 + $0xc08] ss:$16 sps:$4 sm:$0xff]   ;;  %v5631_v33 = vld [vmem:[%s6074_s23 + $0xc24] ss:$16 sps:$4 sm:$0xff]   ;;  %v4388_v26 = vcombine.high %v6516_v31, %v6519_v22 }
 0x190   : > { %3614 = vmatpush1.bf16.msra.mxu0 %v5539_v34  ;;  %3958 = vmatpush1.bf16.msra.mxu1 %v5542_v35  ;;  %v5634_v34 = vld [vmem:[%s6074_s23 + $0xc2c] ss:$16 sps:$4 sm:$0xff]   ;;  %v5632_v35 = vld [vmem:[%s6074_s23 + $0xc28] ss:$16 sps:$4 sm:$0xff]  }
 0x191   : > { %3615 = vmatprep.subr.bf16.mxu0 %v5547_v36  ;;  %3959 = vmatprep.subr.bf16.mxu1 %v5550_v37  ;;  %v5637_v36 = vld [vmem:[%s6074_s23 + $0xc44] ss:$16 sps:$4 sm:$0xff]   ;;  %v5640_v37 = vld [vmem:[%s6074_s23 + $0xc4c] ss:$16 sps:$4 sm:$0xff]  }
 0x194   : > { %3616 = vmatpush1.bf16.msra.mxu0 %v5545_v38  ;;  %3960 = vmatpush1.bf16.msra.mxu1 %v5548_v39  ;;  %v5635_v38 = vld [vmem:[%s6074_s23 + $0xc40] ss:$16 sps:$4 sm:$0xff]   ;;  %v5638_v39 = vld [vmem:[%s6074_s23 + $0xc48] ss:$16 sps:$4 sm:$0xff]  }
 0x195   : > { %3617 = vmatprep.subr.bf16.mxu0 %v5553_v40  ;;  %3961 = vmatprep.subr.bf16.mxu1 %v5556_v41  ;;  %v5643_v40 = vld [vmem:[%s6074_s23 + $0xc64] ss:$16 sps:$4 sm:$0xff]   ;;  %v5646_v41 = vld [vmem:[%s6074_s23 + $0xc6c] ss:$16 sps:$4 sm:$0xff]  }
 0x198   : > { %3618 = vmatpush1.bf16.msra.mxu0 %v5551_v42  ;;  %3962 = vmatpush1.bf16.msra.mxu1 %v5554_v43  ;;  %v5641_v42 = vld [vmem:[%s6074_s23 + $0xc60] ss:$16 sps:$4 sm:$0xff]   ;;  %v5644_v43 = vld [vmem:[%s6074_s23 + $0xc68] ss:$16 sps:$4 sm:$0xff]  }
 0x199   : > { %3619 = vmatprep.subr.bf16.mxu0 %v5559_v44  ;;  %3963 = vmatprep.subr.bf16.mxu1 %v5562_v45  ;;  %v5649_v44 = vld [vmem:[%s6074_s23 + $0xc84] ss:$16 sps:$4 sm:$0xff]   ;;  %v5652_v45 = vld [vmem:[%s6074_s23 + $0xc8c] ss:$16 sps:$4 sm:$0xff]  }
 0x19c   : > { %3620 = vmatpush1.bf16.msra.mxu0 %v5557_v46  ;;  %3964 = vmatpush1.bf16.msra.mxu1 %v5560_v47  ;;  %v5647_v46 = vld [vmem:[%s6074_s23 + $0xc80] ss:$16 sps:$4 sm:$0xff]   ;;  %v5650_v47 = vld [vmem:[%s6074_s23 + $0xc88] ss:$16 sps:$4 sm:$0xff]  }
 0x19d   : > { %3621 = vmatprep.subr.bf16.mxu0 %v5565_v48  ;;  %3965 = vmatprep.subr.bf16.mxu1 %v5568_v49  ;;  %v5655_v48 = vld [vmem:[%s6074_s23 + $0xca4] ss:$16 sps:$4 sm:$0xff]   ;;  %v5658_v49 = vld [vmem:[%s6074_s23 + $0xcac] ss:$16 sps:$4 sm:$0xff]  }
 0x1a0   : > { %3622 = vmatpush1.bf16.msra.mxu0 %v5563_v50  ;;  %3966 = vmatpush1.bf16.msra.mxu1 %v5566_v51  ;;  %v5653_v50 = vld [vmem:[%s6074_s23 + $0xca0] ss:$16 sps:$4 sm:$0xff]   ;;  %v5656_v51 = vld [vmem:[%s6074_s23 + $0xca8] ss:$16 sps:$4 sm:$0xff]  }
 0x1a1   : > { %3623 = vmatprep.subr.bf16.mxu0 %v5571_v52  ;;  %3967 = vmatprep.subr.bf16.mxu1 %v5574_v53  ;;  %v5661_v52 = vld [vmem:[%s6074_s23 + $0xcc4] ss:$16 sps:$4 sm:$0xff]   ;;  %v5664_v53 = vld [vmem:[%s6074_s23 + $0xccc] ss:$16 sps:$4 sm:$0xff]  }
 0x1a4   : > { %3624 = vmatpush1.bf16.msra.mxu0 %v5569_v54  ;;  %3968 = vmatpush1.bf16.msra.mxu1 %v5572_v55  ;;  %v5659_v54 = vld [vmem:[%s6074_s23 + $0xcc0] ss:$16 sps:$4 sm:$0xff]   ;;  %v5662_v55 = vld [vmem:[%s6074_s23 + $0xcc8] ss:$16 sps:$4 sm:$0xff]  }
 0x1a5   : > { %3625 = vmatprep.subr.bf16.mxu0 %v5577_v56  ;;  %3969 = vmatprep.subr.bf16.mxu1 %v5580_v57  ;;  %v5667_v56 = vld [vmem:[%s6074_s23 + $0xce4] ss:$16 sps:$4 sm:$0xff]   ;;  %v5670_v57 = vld [vmem:[%s6074_s23 + $0xcec] ss:$16 sps:$4 sm:$0xff]  }
 0x1a8   : > { %3626 = vmatpush1.bf16.msra.mxu0 %v5575_v58  ;;  %3970 = vmatpush1.bf16.msra.mxu1 %v5578_v59  ;;  %v5665_v58 = vld [vmem:[%s6074_s23 + $0xce0] ss:$16 sps:$4 sm:$0xff]   ;;  %v5668_v59 = vld [vmem:[%s6074_s23 + $0xce8] ss:$16 sps:$4 sm:$0xff]  }
 0x1a9   : > { %3627 = vmatprep.subr.bf16.mxu0 %v5583_v60  ;;  %3971 = vmatprep.subr.bf16.mxu1 %v5586_v61  ;;  %v5673_v60 = vld [vmem:[%s6074_s23 + $0xd04] ss:$16 sps:$4 sm:$0xff]   ;;  %v5676_v61 = vld [vmem:[%s6074_s23 + $0xd0c] ss:$16 sps:$4 sm:$0xff]  }
 0x1ac   : > { %3628 = vmatpush1.bf16.msra.mxu0 %v5581_v62  ;;  %3972 = vmatpush1.bf16.msra.mxu1 %v5584_v63  ;;  %v5671_v62 = vld [vmem:[%s6074_s23 + $0xd00] ss:$16 sps:$4 sm:$0xff]   ;;  %v5674_v63 = vld [vmem:[%s6074_s23 + $0xd08] ss:$16 sps:$4 sm:$0xff]  }
 0x1ad   : > { %3629 = vmatprep.subr.bf16.mxu0 %v5589_v0  ;;  %3973 = vmatprep.subr.bf16.mxu1 %v5592_v1  ;;  %v5679_v0 = vld [vmem:[%s6074_s23 + $0xd24] ss:$16 sps:$4 sm:$0xff]   ;;  %v5682_v1 = vld [vmem:[%s6074_s23 + $0xd2c] ss:$16 sps:$4 sm:$0xff]  }
 0x1b0   : > { %3630 = vmatpush1.bf16.msra.mxu0 %v5587_v2  ;;  %3974 = vmatpush1.bf16.msra.mxu1 %v5590_v3  ;;  %v5677_v2 = vld [vmem:[%s6074_s23 + $0xd20] ss:$16 sps:$4 sm:$0xff]   ;;  %v5680_v3 = vld [vmem:[%s6074_s23 + $0xd28] ss:$16 sps:$4 sm:$0xff]  }
 0x1b1   : > { %3631 = vmatprep.subr.bf16.mxu0 %v5595_v4  ;;  %3975 = vmatprep.subr.bf16.mxu1 %v5598_v5  ;;  %v5685_v4 = vld [vmem:[%s6074_s23 + $0xd44] ss:$16 sps:$4 sm:$0xff]   ;;  %v5688_v5 = vld [vmem:[%s6074_s23 + $0xd4c] ss:$16 sps:$4 sm:$0xff]  }
 0x1b4   : > { %3632 = vmatpush1.bf16.msra.mxu0 %v5593_v6  ;;  %3976 = vmatpush1.bf16.msra.mxu1 %v5596_v7  ;;  %v5683_v6 = vld [vmem:[%s6074_s23 + $0xd40] ss:$16 sps:$4 sm:$0xff]   ;;  %v5686_v7 = vld [vmem:[%s6074_s23 + $0xd48] ss:$16 sps:$4 sm:$0xff]  }
 0x1b5   : > { %3633 = vmatprep.subr.bf16.mxu0 %v5601_v8  ;;  %3977 = vmatprep.subr.bf16.mxu1 %v5604_v9  ;;  %v5691_v8 = vld [vmem:[%s6074_s23 + $0xd64] ss:$16 sps:$4 sm:$0xff]   ;;  %v5694_v9 = vld [vmem:[%s6074_s23 + $0xd6c] ss:$16 sps:$4 sm:$0xff]  }
 0x1b8   : > { %3634 = vmatpush1.bf16.msra.mxu0 %v5599_v10  ;;  %3978 = vmatpush1.bf16.msra.mxu1 %v5602_v11  ;;  %v5689_v10 = vld [vmem:[%s6074_s23 + $0xd60] ss:$16 sps:$4 sm:$0xff]   ;;  %v5692_v11 = vld [vmem:[%s6074_s23 + $0xd68] ss:$16 sps:$4 sm:$0xff]  }
 0x1b9   : > { %3635 = vmatprep.subr.bf16.mxu0 %v5607_v12  ;;  %3979 = vmatprep.subr.bf16.mxu1 %v5610_v13  ;;  %v5697_v12 = vld [vmem:[%s6074_s23 + $0xd84] ss:$16 sps:$4 sm:$0xff]   ;;  %v5700_v13 = vld [vmem:[%s6074_s23 + $0xd8c] ss:$16 sps:$4 sm:$0xff]  }
 0x1bc   : > { %3636 = vmatpush1.bf16.msra.mxu0 %v5605_v14  ;;  %3980 = vmatpush1.bf16.msra.mxu1 %v5608_v17  ;;  %v5695_v14 = vld [vmem:[%s6074_s23 + $0xd80] ss:$16 sps:$4 sm:$0xff]   ;;  %v5698_v17 = vld [vmem:[%s6074_s23 + $0xd88] ss:$16 sps:$4 sm:$0xff]  }
 0x1bd   : > { %3637 = vmatprep.subr.bf16.mxu0 %v5613_v18  ;;  %3981 = vmatprep.subr.bf16.mxu1 %v5616_v21  ;;  %v5703_v18 = vld [vmem:[%s6074_s23 + $0xda4] ss:$16 sps:$4 sm:$0xff]   ;;  %v5706_v21 = vld [vmem:[%s6074_s23 + $0xdac] ss:$16 sps:$4 sm:$0xff]  }
 0x1c0   : > { %3638 = vmatpush1.bf16.msra.mxu0 %v5611_v23  ;;  %3982 = vmatpush1.bf16.msra.mxu1 %v5614_v16  ;;  %v5701_v23 = vld [vmem:[%s6074_s23 + $0xda0] ss:$16 sps:$4 sm:$0xff]   ;;  %v5704_v16 = vld [vmem:[%s6074_s23 + $0xda8] ss:$16 sps:$4 sm:$0xff]  }
 0x1c1   : > { %3639 = vmatprep.subr.bf16.mxu0 %v5619_v24  ;;  %3983 = vmatprep.subr.bf16.mxu1 %v5622_v25  ;;  %v5709_v24 = vld [vmem:[%s6074_s23 + $0xdc4] ss:$16 sps:$4 sm:$0xff]   ;;  %v5712_v25 = vld [vmem:[%s6074_s23 + $0xdcc] ss:$16 sps:$4 sm:$0xff]  }
 0x1c4   : > { %3640 = vmatpush1.bf16.msra.mxu0 %v5617_v19  ;;  %3984 = vmatpush1.bf16.msra.mxu1 %v5620_v20  ;;  %v5707_v19 = vld [vmem:[%s6074_s23 + $0xdc0] ss:$16 sps:$4 sm:$0xff]   ;;  %v5710_v20 = vld [vmem:[%s6074_s23 + $0xdc8] ss:$16 sps:$4 sm:$0xff]  }
 0x1c5   : > { %3652 = vmatprep.subr.bf16.mxu0 %v5625_v28  ;;  %3996 = vmatprep.subr.bf16.mxu1 %v5628_v29  ;;  %v5715_v28 = vld [vmem:[%s6074_s23 + $0xde4] ss:$16 sps:$4 sm:$0xff]   ;;  %v5718_v29 = vld [vmem:[%s6074_s23 + $0xdec] ss:$16 sps:$4 sm:$0xff]  }
 0x1c7   : > { %3642 = vmatmul.mubr.bf16.vlgmr.msra.gmra.mrb[0].mxu0 %v4385_v30  ;;  %3986 = vmatmul.mubr.bf16.vlgmr.msra.gmra.mrb[0].mxu1 %v4385_v30  ;;  %v5713_v30 = vld [vmem:[%s6074_s23 + $0xde0] ss:$16 sps:$4 sm:$0xff]  }
 0x1c8   : > { %3653 = vmatpush1.bf16.msra.mxu0 %v5623_v15  ;;  %3997 = vmatpush1.bf16.msra.mxu1 %v5626_v32  ;;  %v5716_v15 = vld [vmem:[%s6074_s23 + $0xde8] ss:$16 sps:$4 sm:$0xff]   ;;  %v5721_v32 = vld [vmem:[%s6074_s23 + $0xe04] ss:$16 sps:$4 sm:$0xff]  }
 0x1c9   : > { %3654 = vmatprep.subr.bf16.mxu0 %v5631_v33  ;;  %3998 = vmatprep.subr.bf16.mxu1 %v5634_v34  ;;  %v5724_v33 = vld [vmem:[%s6074_s23 + $0xe0c] ss:$16 sps:$4 sm:$0xff]   ;;  %v4387_v34 = vcombine.low %v6516_v31, %v6519_v22  ;;  %v5725_v22 = vld [vmem:[%s6074_s23 + $0xe20] ss:$16 sps:$4 sm:$0xff]  }
 0x1ca   : > { %3684 = vmatprep.mubr.bf16.mxu0 %v4388_v26  ;;  %4028 = vmatprep.mubr.bf16.mxu1 %v4388_v26  ;;  %v6590_v26 = vld [vmem:[%s6057_s25 + $0x38] sm:$0xff] }
 0x1cc   : > { %3655 = vmatpush1.bf16.msra.mxu0 %v5629_v27  ;;  %3999 = vmatpush1.bf16.msra.mxu1 %v5632_v35  ;;  %v6593_v27 = vld [vmem:[%s6057_s25 + $0x78] sm:$0xff]  ;;  %v5719_v35 = vld [vmem:[%s6074_s23 + $0xe00] ss:$16 sps:$4 sm:$0xff]  }
 0x1cd   : > { %3656 = vmatprep.subr.bf16.mxu0 %v5637_v36  ;;  %4000 = vmatprep.subr.bf16.mxu1 %v5640_v37  ;;  %v5722_v36 = vld [vmem:[%s6074_s23 + $0xe08] ss:$16 sps:$4 sm:$0xff]   ;;  %v5727_v37 = vld [vmem:[%s6074_s23 + $0xe24] ss:$16 sps:$4 sm:$0xff]   ;;  %v4390_v31 = vcombine.high %v6590_v26, %v6593_v27 }
 0x1d0   : > { %3657 = vmatpush1.bf16.msra.mxu0 %v5635_v38  ;;  %4001 = vmatpush1.bf16.msra.mxu1 %v5638_v39  ;;  %v5730_v38 = vld [vmem:[%s6074_s23 + $0xe2c] ss:$16 sps:$4 sm:$0xff]   ;;  %v5728_v39 = vld [vmem:[%s6074_s23 + $0xe28] ss:$16 sps:$4 sm:$0xff]  }
 0x1d1   : > { %3658 = vmatprep.subr.bf16.mxu0 %v5643_v40  ;;  %4002 = vmatprep.subr.bf16.mxu1 %v5646_v41  ;;  %v5733_v40 = vld [vmem:[%s6074_s23 + $0xe44] ss:$16 sps:$4 sm:$0xff]   ;;  %v5736_v41 = vld [vmem:[%s6074_s23 + $0xe4c] ss:$16 sps:$4 sm:$0xff]  }
 0x1d4   : > { %3659 = vmatpush1.bf16.msra.mxu0 %v5641_v42  ;;  %4003 = vmatpush1.bf16.msra.mxu1 %v5644_v43  ;;  %v5731_v42 = vld [vmem:[%s6074_s23 + $0xe40] ss:$16 sps:$4 sm:$0xff]   ;;  %v5734_v43 = vld [vmem:[%s6074_s23 + $0xe48] ss:$16 sps:$4 sm:$0xff]  }
 0x1d5   : > { %3660 = vmatprep.subr.bf16.mxu0 %v5649_v44  ;;  %4004 = vmatprep.subr.bf16.mxu1 %v5652_v45  ;;  %v5739_v44 = vld [vmem:[%s6074_s23 + $0xe64] ss:$16 sps:$4 sm:$0xff]   ;;  %v5742_v45 = vld [vmem:[%s6074_s23 + $0xe6c] ss:$16 sps:$4 sm:$0xff]  }
 0x1d8   : > { %3661 = vmatpush1.bf16.msra.mxu0 %v5647_v46  ;;  %4005 = vmatpush1.bf16.msra.mxu1 %v5650_v47  ;;  %v5737_v46 = vld [vmem:[%s6074_s23 + $0xe60] ss:$16 sps:$4 sm:$0xff]   ;;  %v5740_v47 = vld [vmem:[%s6074_s23 + $0xe68] ss:$16 sps:$4 sm:$0xff]  }
 0x1d9   : > { %3662 = vmatprep.subr.bf16.mxu0 %v5655_v48  ;;  %4006 = vmatprep.subr.bf16.mxu1 %v5658_v49  ;;  %v5745_v48 = vld [vmem:[%s6074_s23 + $0xe84] ss:$16 sps:$4 sm:$0xff]   ;;  %v5748_v49 = vld [vmem:[%s6074_s23 + $0xe8c] ss:$16 sps:$4 sm:$0xff]  }
 0x1dc   : > { %3663 = vmatpush1.bf16.msra.mxu0 %v5653_v50  ;;  %4007 = vmatpush1.bf16.msra.mxu1 %v5656_v51  ;;  %v5743_v50 = vld [vmem:[%s6074_s23 + $0xe80] ss:$16 sps:$4 sm:$0xff]   ;;  %v5746_v51 = vld [vmem:[%s6074_s23 + $0xe88] ss:$16 sps:$4 sm:$0xff]  }
 0x1dd   : > { %3664 = vmatprep.subr.bf16.mxu0 %v5661_v52  ;;  %4008 = vmatprep.subr.bf16.mxu1 %v5664_v53  ;;  %v5751_v52 = vld [vmem:[%s6074_s23 + $0xea4] ss:$16 sps:$4 sm:$0xff]   ;;  %v5754_v53 = vld [vmem:[%s6074_s23 + $0xeac] ss:$16 sps:$4 sm:$0xff]  }
 0x1e0   : > { %3665 = vmatpush1.bf16.msra.mxu0 %v5659_v54  ;;  %4009 = vmatpush1.bf16.msra.mxu1 %v5662_v55  ;;  %v5749_v54 = vld [vmem:[%s6074_s23 + $0xea0] ss:$16 sps:$4 sm:$0xff]   ;;  %v5752_v55 = vld [vmem:[%s6074_s23 + $0xea8] ss:$16 sps:$4 sm:$0xff]  }
 0x1e1   : > { %3666 = vmatprep.subr.bf16.mxu0 %v5667_v56  ;;  %4010 = vmatprep.subr.bf16.mxu1 %v5670_v57  ;;  %v5757_v56 = vld [vmem:[%s6074_s23 + $0xec4] ss:$16 sps:$4 sm:$0xff]   ;;  %v5760_v57 = vld [vmem:[%s6074_s23 + $0xecc] ss:$16 sps:$4 sm:$0xff]  }
 0x1e4   : > { %3667 = vmatpush1.bf16.msra.mxu0 %v5665_v58  ;;  %4011 = vmatpush1.bf16.msra.mxu1 %v5668_v59  ;;  %v5755_v58 = vld [vmem:[%s6074_s23 + $0xec0] ss:$16 sps:$4 sm:$0xff]   ;;  %v5758_v59 = vld [vmem:[%s6074_s23 + $0xec8] ss:$16 sps:$4 sm:$0xff]  }
 0x1e5   : > { %3668 = vmatprep.subr.bf16.mxu0 %v5673_v60  ;;  %4012 = vmatprep.subr.bf16.mxu1 %v5676_v61  ;;  %v5763_v60 = vld [vmem:[%s6074_s23 + $0xee4] ss:$16 sps:$4 sm:$0xff]   ;;  %v5766_v61 = vld [vmem:[%s6074_s23 + $0xeec] ss:$16 sps:$4 sm:$0xff]  }
 0x1e8   : > { %3669 = vmatpush1.bf16.msra.mxu0 %v5671_v62  ;;  %4013 = vmatpush1.bf16.msra.mxu1 %v5674_v63  ;;  %v5761_v62 = vld [vmem:[%s6074_s23 + $0xee0] ss:$16 sps:$4 sm:$0xff]   ;;  %v5764_v63 = vld [vmem:[%s6074_s23 + $0xee8] ss:$16 sps:$4 sm:$0xff]  }
 0x1e9   : > { %3670 = vmatprep.subr.bf16.mxu0 %v5679_v0  ;;  %4014 = vmatprep.subr.bf16.mxu1 %v5682_v1  ;;  %v5769_v0 = vld [vmem:[%s6074_s23 + $0xf04] ss:$16 sps:$4 sm:$0xff]   ;;  %v5772_v1 = vld [vmem:[%s6074_s23 + $0xf0c] ss:$16 sps:$4 sm:$0xff]  }
 0x1ec   : > { %3671 = vmatpush1.bf16.msra.mxu0 %v5677_v2  ;;  %4015 = vmatpush1.bf16.msra.mxu1 %v5680_v3  ;;  %v5767_v2 = vld [vmem:[%s6074_s23 + $0xf00] ss:$16 sps:$4 sm:$0xff]   ;;  %v5770_v3 = vld [vmem:[%s6074_s23 + $0xf08] ss:$16 sps:$4 sm:$0xff]  }
 0x1ed   : > { %3672 = vmatprep.subr.bf16.mxu0 %v5685_v4  ;;  %4016 = vmatprep.subr.bf16.mxu1 %v5688_v5  ;;  %v5775_v4 = vld [vmem:[%s6074_s23 + $0xf24] ss:$16 sps:$4 sm:$0xff]   ;;  %v5778_v5 = vld [vmem:[%s6074_s23 + $0xf2c] ss:$16 sps:$4 sm:$0xff]  }
 0x1f0   : > { %3673 = vmatpush1.bf16.msra.mxu0 %v5683_v6  ;;  %4017 = vmatpush1.bf16.msra.mxu1 %v5686_v7  ;;  %v5773_v6 = vld [vmem:[%s6074_s23 + $0xf20] ss:$16 sps:$4 sm:$0xff]   ;;  %v5776_v7 = vld [vmem:[%s6074_s23 + $0xf28] ss:$16 sps:$4 sm:$0xff]  }
 0x1f1   : > { %3674 = vmatprep.subr.bf16.mxu0 %v5691_v8  ;;  %4018 = vmatprep.subr.bf16.mxu1 %v5694_v9  ;;  %v5781_v8 = vld [vmem:[%s6074_s23 + $0xf44] ss:$16 sps:$4 sm:$0xff]   ;;  %v5784_v9 = vld [vmem:[%s6074_s23 + $0xf4c] ss:$16 sps:$4 sm:$0xff]  }
 0x1f4   : > { %3675 = vmatpush1.bf16.msra.mxu0 %v5689_v10  ;;  %4019 = vmatpush1.bf16.msra.mxu1 %v5692_v11  ;;  %v5779_v10 = vld [vmem:[%s6074_s23 + $0xf40] ss:$16 sps:$4 sm:$0xff]   ;;  %v5782_v11 = vld [vmem:[%s6074_s23 + $0xf48] ss:$16 sps:$4 sm:$0xff]  }
 0x1f5   : > { %3676 = vmatprep.subr.bf16.mxu0 %v5697_v12  ;;  %4020 = vmatprep.subr.bf16.mxu1 %v5700_v13  ;;  %v5787_v12 = vld [vmem:[%s6074_s23 + $0xf64] ss:$16 sps:$4 sm:$0xff]   ;;  %v5790_v13 = vld [vmem:[%s6074_s23 + $0xf6c] ss:$16 sps:$4 sm:$0xff]  }
 0x1f8   : > { %3677 = vmatpush1.bf16.msra.mxu0 %v5695_v14  ;;  %4021 = vmatpush1.bf16.msra.mxu1 %v5698_v17  ;;  %v5785_v14 = vld [vmem:[%s6074_s23 + $0xf60] ss:$16 sps:$4 sm:$0xff]   ;;  %v5788_v17 = vld [vmem:[%s6074_s23 + $0xf68] ss:$16 sps:$4 sm:$0xff]  }
 0x1f9   : > { %3678 = vmatprep.subr.bf16.mxu0 %v5703_v18  ;;  %4022 = vmatprep.subr.bf16.mxu1 %v5706_v21  ;;  %v5793_v18 = vld [vmem:[%s6074_s23 + $0xf84] ss:$16 sps:$4 sm:$0xff]   ;;  %v5796_v21 = vld [vmem:[%s6074_s23 + $0xf8c] ss:$16 sps:$4 sm:$0xff]  }
 0x1fc   : > { %3679 = vmatpush1.bf16.msra.mxu0 %v5701_v23  ;;  %4023 = vmatpush1.bf16.msra.mxu1 %v5704_v16  ;;  %v5791_v23 = vld [vmem:[%s6074_s23 + $0xf80] ss:$16 sps:$4 sm:$0xff]   ;;  %v5794_v16 = vld [vmem:[%s6074_s23 + $0xf88] ss:$16 sps:$4 sm:$0xff]  }
 0x1fd   : > { %3680 = vmatprep.subr.bf16.mxu0 %v5709_v24  ;;  %4024 = vmatprep.subr.bf16.mxu1 %v5712_v25  ;;  %v5799_v24 = vld [vmem:[%s6074_s23 + $0xfa4] ss:$16 sps:$4 sm:$0xff]   ;;  %v5802_v25 = vld [vmem:[%s6074_s23 + $0xfac] ss:$16 sps:$4 sm:$0xff]  }
 0x200   : > { %3681 = vmatpush1.bf16.msra.mxu0 %v5707_v19  ;;  %4025 = vmatpush1.bf16.msra.mxu1 %v5710_v20  ;;  %v5797_v19 = vld [vmem:[%s6074_s23 + $0xfa0] ss:$16 sps:$4 sm:$0xff]   ;;  %v5800_v20 = vld [vmem:[%s6074_s23 + $0xfa8] ss:$16 sps:$4 sm:$0xff]  }
 0x201   : > { %3682 = vmatprep.subr.bf16.mxu0 %v5715_v28  ;;  %4026 = vmatprep.subr.bf16.mxu1 %v5718_v29  ;;  %v5805_v28 = vld [vmem:[%s6074_s23 + $0xfc4] ss:$16 sps:$4 sm:$0xff]   ;;  %v5808_v29 = vld [vmem:[%s6074_s23 + $0xfcc] ss:$16 sps:$4 sm:$0xff]  }
 0x204   : > { %3683 = vmatpush1.bf16.msra.mxu0 %v5713_v30  ;;  %4027 = vmatpush1.bf16.msra.mxu1 %v5716_v15  ;;  %v5803_v30 = vld [vmem:[%s6074_s23 + $0xfc0] ss:$16 sps:$4 sm:$0xff]   ;;  %v5806_v15 = vld [vmem:[%s6074_s23 + $0xfc8] ss:$16 sps:$4 sm:$0xff]  }
 0x205   : > { %3695 = vmatprep.subr.bf16.mxu0 %v5721_v32  ;;  %4039 = vmatprep.subr.bf16.mxu1 %v5724_v33  ;;  %v5811_v32 = vld [vmem:[%s6074_s23 + $0xfe4] ss:$16 sps:$4 sm:$0xff]   ;;  %v5814_v33 = vld [vmem:[%s6074_s23 + $0xfec] ss:$16 sps:$4 sm:$0xff]  }
 0x207   : > { %3685 = vmatmul.mubr.bf16.vlgmr.msra.gmra.mrb[0].mxu0 %v4387_v34  ;;  %4029 = vmatmul.mubr.bf16.vlgmr.msra.gmra.mrb[0].mxu1 %v4387_v34  ;;  %v5809_v34 = vld [vmem:[%s6074_s23 + $0xfe0] ss:$16 sps:$4 sm:$0xff]  }
 0x208   : > { %3696 = vmatpush1.bf16.msra.mxu0 %v5719_v35  ;;  %4040 = vmatpush1.bf16.msra.mxu1 %v5722_v36  ;;  %v5812_v35 = vld [vmem:[%s6074_s23 + $0xfe8] ss:$16 sps:$4 sm:$0xff]   ;;  %v4389_v36 = vcombine.low %v6590_v26, %v6593_v27 }
 0x209   : > { %3697 = vmatprep.subr.bf16.mxu0 %v5727_v37  ;;  %4041 = vmatprep.subr.bf16.mxu1 %v5730_v38  ;;  %v218_v37 = vld [vmem:[#allocation2] sm:$0xff]  ;;  %v220_v38 = vld [vmem:[#allocation2 + $0x10] sm:$0xff] }
 0x20a   : > { %3727 = vmatprep.mubr.bf16.mxu0 %v4390_v31  ;;  %4071 = vmatprep.mubr.bf16.mxu1 %v4390_v31  ;;  %v219_v31 = vld [vmem:[#allocation2 + $0x8] sm:$0xff] }
 0x20c   : > { %3698 = vmatpush1.bf16.msra.mxu0 %v5725_v22  ;;  %4042 = vmatpush1.bf16.msra.mxu1 %v5728_v39  ;;  %v221_v22 = vld [vmem:[#allocation2 + $0x18] sm:$0xff] }
 0x20d   : > { %3699 = vmatprep.subr.bf16.mxu0 %v5733_v40  ;;  %4043 = vmatprep.subr.bf16.mxu1 %v5736_v41  ;;  %v222_v41 = vld [vmem:[#allocation2 + $0x20] sm:$0xff] }
 0x210   : > { %3700 = vmatpush1.bf16.msra.mxu0 %v5731_v42  ;;  %4044 = vmatpush1.bf16.msra.mxu1 %v5734_v43  ;;  %v224_v42 = vld [vmem:[#allocation2 + $0x30] sm:$0xff] }
 0x211   : > { %3701 = vmatprep.subr.bf16.mxu0 %v5739_v44  ;;  %4045 = vmatprep.subr.bf16.mxu1 %v5742_v45 }
 0x214   : > { %3702 = vmatpush1.bf16.msra.mxu0 %v5737_v46  ;;  %4046 = vmatpush1.bf16.msra.mxu1 %v5740_v47  ;;  %v223_v47 = vld [vmem:[#allocation2 + $0x28] sm:$0xff] }
 0x215   : > { %3703 = vmatprep.subr.bf16.mxu0 %v5745_v48  ;;  %4047 = vmatprep.subr.bf16.mxu1 %v5748_v49  ;;  %v225_v48 = vld [vmem:[#allocation2 + $0x38] sm:$0xff] }
 0x218   : > { %3704 = vmatpush1.bf16.msra.mxu0 %v5743_v50  ;;  %4048 = vmatpush1.bf16.msra.mxu1 %v5746_v51 }
 0x219   : > { %3705 = vmatprep.subr.bf16.mxu0 %v5751_v52  ;;  %4049 = vmatprep.subr.bf16.mxu1 %v5754_v53 }
 0x21c   : > { %3706 = vmatpush1.bf16.msra.mxu0 %v5749_v54  ;;  %4050 = vmatpush1.bf16.msra.mxu1 %v5752_v55 }
 0x21d   : > { %3707 = vmatprep.subr.bf16.mxu0 %v5757_v56  ;;  %4051 = vmatprep.subr.bf16.mxu1 %v5760_v57 }
 0x220   : > { %3708 = vmatpush1.bf16.msra.mxu0 %v5755_v58  ;;  %4052 = vmatpush1.bf16.msra.mxu1 %v5758_v59 }
 0x221   : > { %3709 = vmatprep.subr.bf16.mxu0 %v5763_v60  ;;  %4053 = vmatprep.subr.bf16.mxu1 %v5766_v61 }
 0x224   : > { %3710 = vmatpush1.bf16.msra.mxu0 %v5761_v62  ;;  %4054 = vmatpush1.bf16.msra.mxu1 %v5764_v63 }
 0x225   : > { %3711 = vmatprep.subr.bf16.mxu0 %v5769_v0  ;;  %4055 = vmatprep.subr.bf16.mxu1 %v5772_v1 }
 0x228   : > { %3712 = vmatpush1.bf16.msra.mxu0 %v5767_v2  ;;  %4056 = vmatpush1.bf16.msra.mxu1 %v5770_v3 }
 0x229   : > { %3713 = vmatprep.subr.bf16.mxu0 %v5775_v4  ;;  %4057 = vmatprep.subr.bf16.mxu1 %v5778_v5 }
 0x22c   : > { %3714 = vmatpush1.bf16.msra.mxu0 %v5773_v6  ;;  %4058 = vmatpush1.bf16.msra.mxu1 %v5776_v7 }
 0x22d   : > { %3715 = vmatprep.subr.bf16.mxu0 %v5781_v8  ;;  %4059 = vmatprep.subr.bf16.mxu1 %v5784_v9 }
 0x230   : > { %3716 = vmatpush1.bf16.msra.mxu0 %v5779_v10  ;;  %4060 = vmatpush1.bf16.msra.mxu1 %v5782_v11 }
 0x231   : > { %3717 = vmatprep.subr.bf16.mxu0 %v5787_v12  ;;  %4061 = vmatprep.subr.bf16.mxu1 %v5790_v13 }
 0x234   : > { %3718 = vmatpush1.bf16.msra.mxu0 %v5785_v14  ;;  %4062 = vmatpush1.bf16.msra.mxu1 %v5788_v17 }
 0x235   : > { %3719 = vmatprep.subr.bf16.mxu0 %v5793_v18  ;;  %4063 = vmatprep.subr.bf16.mxu1 %v5796_v21 }
 0x238   : > { %3720 = vmatpush1.bf16.msra.mxu0 %v5791_v23  ;;  %4064 = vmatpush1.bf16.msra.mxu1 %v5794_v16 }
 0x239   : > { %3721 = vmatprep.subr.bf16.mxu0 %v5799_v24  ;;  %4065 = vmatprep.subr.bf16.mxu1 %v5802_v25 }
 0x23c   : > { %3722 = vmatpush1.bf16.msra.mxu0 %v5797_v19  ;;  %4066 = vmatpush1.bf16.msra.mxu1 %v5800_v20 }
 0x23d   : > { %3723 = vmatprep.subr.bf16.mxu0 %v5805_v28  ;;  %4067 = vmatprep.subr.bf16.mxu1 %v5808_v29 }
 0x240   : > { %3724 = vmatpush1.bf16.msra.mxu0 %v5803_v30  ;;  %4068 = vmatpush1.bf16.msra.mxu1 %v5806_v15 }
 0x241   : > { %3725 = vmatprep.subr.bf16.mxu0 %v5811_v32  ;;  %4069 = vmatprep.subr.bf16.mxu1 %v5814_v33 }
 0x244   : > { %3726 = vmatpush1.bf16.msra.mxu0 %v5809_v34  ;;  %4070 = vmatpush1.bf16.msra.mxu1 %v5812_v35 }
 0x247   : > { %3728 = vmatmul.mubr.bf16.vlgmr.msra.gmra.mrb[0].mxu0 %v4389_v36  ;;  %4072 = vmatmul.mubr.bf16.vlgmr.msra.gmra.mrb[0].mxu1 %v4389_v36 }
 0x31a   : > { %v3729_v39 = vpop.f32.mrb[0].mxu0  ;;  %v4073_v40 = vpop.f32.mrb[0].mxu1  ;;  %4101 = sbr.rel (%p4903_p6) target bundleno = 855 (0x357), region = 40 }
 0x31b   : > { %v4082_v43 = vadd.f32 %v3729_v39, %v218_v37  ;;  %v4084_v44 = vadd.f32 %v4073_v40, %v220_v38  ;;  %v3731_v45 = vpop.f32.mrb[1].mxu0  ;;  %v4075_v46 = vpop.f32.mrb[1].mxu1 }
 0x31c   : > { %v4083_v49 = vadd.f32 %v3731_v45, %v219_v31  ;;  %v4085_v26 = vadd.f32 %v4075_v46, %v221_v22  ;;  %v3733_v27 = vpop.f32.mrb[2].mxu0  ;;  %v4077_v50 = vpop.f32.mrb[2].mxu1 }
 0x31d   : > { %4090 = vst [vmem:[#allocation2] sm:$0xff] %v4082_v43  ;;  %4092 = vst [vmem:[#allocation2 + $0x10] sm:$0xff] %v4084_v44  ;;  %v4086_v51 = vadd.f32 %v3733_v27, %v222_v41  ;;  %v4088_v52 = vadd.f32 %v4077_v50, %v224_v42  ;;  %v3735_v53 = vpop.f32.mrb[3].mxu0  ;;  %v4079_v54 = vpop.f32.mrb[3].mxu1 }
 0x31e   : > { %4091 = vst [vmem:[#allocation2 + $0x8] sm:$0xff] %v4083_v49  ;;  %4093 = vst [vmem:[#allocation2 + $0x18] sm:$0xff] %v4085_v26  ;;  %v4087_v55 = vadd.f32 %v3735_v53, %v223_v47  ;;  %v4089_v56 = vadd.f32 %v4079_v54, %v225_v48 }
 0x31f   : > { %4094 = vst [vmem:[#allocation2 + $0x20] sm:$0xff] %v4086_v51  ;;  %4096 = vst [vmem:[#allocation2 + $0x30] sm:$0xff] %v4088_v52 }
 0x320   : > { %4095 = vst [vmem:[#allocation2 + $0x28] sm:$0xff] %v4087_v55  ;;  %4097 = vst [vmem:[#allocation2 + $0x38] sm:$0xff] %v4089_v56 }
 0x324   : > { %v6662_v57 = vld [vmem:[#allocation2] sm:$0xff]  ;;  %v6678_v1 = vld [vmem:[#allocation2 + $0x10] sm:$0xff] }
 0x325   : > { %v6664_v58 = vld [vmem:[#allocation2 + $0x8] sm:$0xff]  ;;  %v4138_v62 = vmul.f32 %v6662_v57, %v6662_v57  ;;  %v6680_v2 = vld [vmem:[#allocation2 + $0x18] sm:$0xff]  ;;  %v4140_v7 = vmul.f32 %v6678_v1, %v6678_v1 }
 0x326   : > { %v6666_v59 = vld [vmem:[#allocation2 + $0x20] sm:$0xff]  ;;  %v4139_v63 = vmul.f32 %v6664_v58, %v6664_v58  ;;  %v6686_v5 = vld [vmem:[#allocation2 + $0x30] sm:$0xff]  ;;  %v4141_v8 = vmul.f32 %v6680_v2, %v6680_v2 }
 0x327   : > { %v6668_v60 = vld [vmem:[#allocation2 + $0x28] sm:$0xff]  ;;  %v4110_v61 = vadd.f32 %v6666_v59, %v6662_v57  ;;  %v4142_v0 = vmul.f32 %v6666_v59, %v6666_v59  ;;  %v6688_v6 = vld [vmem:[#allocation2 + $0x38] sm:$0xff]  ;;  %v4124_v11 = vadd.f32 %v6686_v5, %v6678_v1  ;;  %v4144_v17 = vmul.f32 %v6686_v5, %v6686_v5 }
 0x328   : > { %v4117_v3 = vadd.f32 %v6668_v60, %v6664_v58  ;;  %v4143_v4 = vmul.f32 %v6668_v60, %v6668_v60  ;;  %v4131_v12 = vadd.f32 %v6688_v6, %v6680_v2  ;;  %v4145_v18 = vmul.f32 %v6688_v6, %v6688_v6 }
 0x329   : > { %v4111_v9 = vrot.slane %v4110_v61, 4  ;;  %v4146_v10 = vadd.f32 %v4142_v0, %v4138_v62  ;;  %v4125_v16 = vrot.slane %v4124_v11, 4  ;;  %v4160_v20 = vadd.f32 %v4144_v17, %v4140_v7 }
 0x32a   : > { %v4118_v13 = vrot.slane %v4117_v3, 4  ;;  %v4153_v14 = vadd.f32 %v4143_v4, %v4139_v63  ;;  %v4132_v24 = vrot.slane %v4131_v12, 4  ;;  %v4167_v28 = vadd.f32 %v4145_v18, %v4141_v8 }
 0x32b   : > { %v4112_v21 = vadd.f32 %v4111_v9, %v4110_v61  ;;  %v4147_v23 = vrot.slane %v4146_v10, 4  ;;  %v4126_v15 = vadd.f32 %v4125_v16, %v4124_v11  ;;  %v4161_v35 = vrot.slane %v4160_v20, 4 }
 0x32c   : > { %v4119_v25 = vadd.f32 %v4118_v13, %v4117_v3  ;;  %v4154_v19 = vrot.slane %v4153_v14, 4  ;;  %v4133_v32 = vadd.f32 %v4132_v24, %v4131_v12  ;;  %v4168_v36 = vrot.slane %v4167_v28, 4 }
 0x32d   : > { %v4113_v29 = vrot.slane %v4112_v21, 2  ;;  %v4148_v30 = vadd.f32 %v4147_v23, %v4146_v10  ;;  %v4127_v31 = vrot.slane %v4126_v15, 2  ;;  %v4162_v41 = vadd.f32 %v4161_v35, %v4160_v20 }
 0x32e   : > { %v4120_v33 = vrot.slane %v4119_v25, 2  ;;  %v4155_v34 = vadd.f32 %v4154_v19, %v4153_v14  ;;  %v4134_v22 = vrot.slane %v4133_v32, 2  ;;  %v4169_v42 = vadd.f32 %v4168_v36, %v4167_v28 }
 0x32f   : > { %v4114_v37 = vadd.f32 %v4113_v29, %v4112_v21  ;;  %v4149_v38 = vrot.slane %v4148_v30, 2  ;;  %v4128_v45 = vadd.f32 %v4127_v31, %v4126_v15  ;;  %v4163_v49 = vrot.slane %v4162_v41, 2 }
 0x330   : > { %v4121_v39 = vadd.f32 %v4120_v33, %v4119_v25  ;;  %v4156_v40 = vrot.slane %v4155_v34, 2  ;;  %v4135_v46 = vadd.f32 %v4134_v22, %v4133_v32  ;;  %v4170_v26 = vrot.slane %v4169_v42, 2 }
 0x331   : > { %v4115_v43 = vrot.slane %v4114_v37, 1  ;;  %v4150_v44 = vadd.f32 %v4149_v38, %v4148_v30  ;;  %v4129_v51 = vrot.slane %v4128_v45, 1  ;;  %v4164_v55 = vadd.f32 %v4163_v49, %v4162_v41 }
 0x332   : > { %v4122_v47 = vrot.slane %v4121_v39, 1  ;;  %v4157_v48 = vadd.f32 %v4156_v40, %v4155_v34  ;;  %v4136_v52 = vrot.slane %v4135_v46, 1  ;;  %v4171_v56 = vadd.f32 %v4170_v26, %v4169_v42 }
 0x333   : > { %v4116_v27 = vadd.f32 %v4115_v43, %v4114_v37  ;;  %v4151_v50 = vrot.slane %v4150_v44, 1  ;;  %v4130_v63 = vadd.f32 %v4129_v51, %v4128_v45  ;;  %v4165_v7 = vrot.slane %v4164_v55, 1 }
 0x334   : > { %v4123_v53 = vadd.f32 %v4122_v47, %v4121_v39  ;;  %v4158_v54 = vrot.slane %v4157_v48, 1  ;;  %v4137_v0 = vadd.f32 %v4136_v52, %v4135_v46  ;;  %v4172_v8 = vrot.slane %v4171_v56, 1 }
 0x335   : > { %v4152_v61 = vadd.f32 %v4151_v50, %v4150_v44  ;;  %v4174_v62 = vmul.f32 0.0625, %v4116_v27  ;;  %v4176_v11 = vmul.f32 0.0625, %v4130_v63  ;;  %v4166_v14 = vadd.f32 %v4165_v7, %v4164_v55 }
 0x336   : > { %v4159_v3 = vadd.f32 %v4158_v54, %v4157_v48  ;;  %v4175_v4 = vmul.f32 0.0625, %v4123_v53  ;;  %v4173_v18 = vadd.f32 %v4172_v8, %v4171_v56  ;;  %v4177_v21 = vmul.f32 0.0625, %v4137_v0 }
 0x337   : > { %v4178_v9 = vmul.f32 0.0625, %v4152_v61  ;;  %v4182_v10 = vmul.f32 %v4174_v62, %v4174_v62  ;;  %v4184_v23 = vmul.f32 %v4176_v11, %v4176_v11  ;;  %v4180_v24 = vmul.f32 0.0625, %v4166_v14 }
 0x338   : > { %v4179_v12 = vmul.f32 0.0625, %v4159_v3  ;;  %v4183_v13 = vmul.f32 %v4175_v4, %v4175_v4  ;;  %v4181_v19 = vmul.f32 0.0625, %v4173_v18  ;;  %v4185_v20 = vmul.f32 %v4177_v21, %v4177_v21 }
 0x339   : > { %v4186_v17 = vsub.f32 %v4178_v9, %v4182_v10  ;;  %v4188_v29 = vsub.f32 %v4180_v24, %v4184_v23  ;;  %v4190_v33 = vsub.f32 %v6662_v57, %v4174_v62  ;;  %v4194_v34 = vsub.f32 %v6666_v59, %v4174_v62 }
 0x33a   : > { %v4187_v16 = vsub.f32 %v4179_v12, %v4183_v13  ;;  %v4189_v30 = vsub.f32 %v4181_v19, %v4185_v20  ;;  %v4191_v35 = vsub.f32 %v6664_v58, %v4175_v4  ;;  %v4195_v36 = vsub.f32 %v6668_v60, %v4175_v4 }
 0x33b   : > { %v4198_v25 = vadd.f32 1e-05, %v4186_v17  ;;  %v4200_v15 = vadd.f32 1e-05, %v4188_v29  ;;  %v4192_v38 = vsub.f32 %v6678_v1, %v4176_v11  ;;  %v4193_v39 = vsub.f32 %v6680_v2, %v4177_v21 }
 0x33c   : > { %v4199_v28 = vadd.f32 1e-05, %v4187_v16  ;;  %v4201_v32 = vadd.f32 1e-05, %v4189_v30  ;;  %v4196_v43 = vsub.f32 %v6686_v5, %v4176_v11  ;;  %v4197_v57 = vsub.f32 %v6688_v6, %v4177_v21 }
 0x33d   : > { %5815 = vrsqrt.f32 %v4198_v25 }
 0x33e   : > { %5817 = vrsqrt.f32 %v4199_v28 }
 0x33f   : > { %5819 = vrsqrt.f32 %v4200_v15 }
 0x340   : > { %5821 = vrsqrt.f32 %v4201_v32 }
 0x347   : > { %v5816_v37 = vpop.eup %5815 }
 0x348   : > { %v5818_v31 = vpop.eup %5817  ;;  %v4206_v22 = vmul.f32 %v5816_v37, %v4190_v33  ;;  %v4210_v40 = vmul.f32 %v5816_v37, %v4194_v34 }
 0x349   : > { %v4207_v41 = vmul.f32 %v5818_v31, %v4191_v35  ;;  %v4211_v42 = vmul.f32 %v5818_v31, %v4195_v36  ;;  %v5820_v44 = vpop.eup %5819 }
 0x34a   : > { %vm4214_vm0 = vcmp.ge.f32.partialorder %v4206_v22, 0.0  ;;  %v4222_v59 = vmul.f32 0.2, %v4206_v22  ;;  %vm4218_vm1 = vcmp.ge.f32.partialorder %v4210_v40, 0.0  ;;  %v4226_v58 = vmul.f32 0.2, %v4210_v40  ;;  %v5822_v60 = vpop.eup %5821 }
 0x34b   : > { %vm4215_vm2 = vcmp.ge.f32.partialorder %v4207_v41, 0.0  ;;  %v4223_v45 = vmul.f32 0.2, %v4207_v41  ;;  %v4208_v1 = vmul.f32 %v5820_v44, %v4192_v38  ;;  %vm4219_vm3 = vcmp.ge.f32.partialorder %v4211_v42, 0.0 }
 0x34c   : > { %v4230_v46 = vsel %vm4214_vm0, %v4206_v22, %v4222_v59  ;;  %v4209_v2 = vmul.f32 %v5822_v60, %v4193_v39  ;;  %v4227_v47 = vmul.f32 0.2, %v4211_v42  ;;  %v4234_v48 = vsel %vm4218_vm1, %v4210_v40, %v4226_v58 }
 0x34d   : > { %v4231_v49 = vsel %vm4215_vm2, %v4207_v41, %v4223_v45  ;;  %vm4216_vm4 = vcmp.ge.f32.partialorder %v4208_v1, 0.0  ;;  %v4224_v5 = vmul.f32 0.2, %v4208_v1  ;;  %v4212_v6 = vmul.f32 %v5820_v44, %v4196_v43 }
 0x34e   : > { %v4912_v26 = vpack.c.bf16 %v4231_v49, %v4230_v46  ;;  %vm4217_vm5 = vcmp.ge.f32.partialorder %v4209_v2, 0.0  ;;  %v4225_v27 = vmul.f32 0.2, %v4209_v2  ;;  %v4235_v50 = vsel %vm4219_vm3, %v4211_v42, %v4227_v47 }
 0x34f   : > { %v4232_v51 = vsel %vm4216_vm4, %v4208_v1, %v4224_v5  ;;  %v4914_v52 = vpack.c.bf16 %v4235_v50, %v4234_v48  ;;  %v4213_v53 = vmul.f32 %v5822_v60, %v4197_v57  ;;  %vm4220_vm6 = vcmp.ge.f32.partialorder %v4212_v6, 0.0 }
 0x350   : > { %4262 = vst [vmem:[%s6069_s28] sm:$0xff] %v4912_v26  ;;  %v4233_v54 = vsel %vm4217_vm5, %v4209_v2, %v4225_v27  ;;  %v4228_v55 = vmul.f32 0.2, %v4212_v6 }
 0x351   : > { %v4913_v56 = vpack.c.bf16 %v4233_v54, %v4232_v51  ;;  %4264 = vst [vmem:[%s6069_s28 + $0x10] sm:$0xff] %v4914_v52  ;;  %vm4221_vm7 = vcmp.ge.f32.partialorder %v4213_v53, 0.0  ;;  %v4229_v61 = vmul.f32 0.2, %v4213_v53 }
 0x352   : > { %v4236_v62 = vsel %vm4220_vm6, %v4212_v6, %v4228_v55 }
 0x353   : > { %4263 = vst [vmem:[%s6069_s28 + $0x8] sm:$0xff] %v4913_v56  ;;  %v4237_v63 = vsel %vm4221_vm7, %v4213_v53, %v4229_v61 }
 0x354   : > { %v4915_v0 = vpack.c.bf16 %v4237_v63, %v4236_v62 }
 0x356   : > { %4265 = vst [vmem:[%s6069_s28 + $0x18] sm:$0xff] %v4915_v0 }
 0x357 PF: > { %s15_s16 = sadd.s32 1, %s5919_s16   ;;  %s6744_s9 = smov %s5895_s10 }
 0x358   : > { %p12_p8 = scmp.ge.s32.totalorder %s15_s16, 6   ;;  %s6745_s10 = smov %s5899_s11 }
 0x359   : > { %s6746_s11 = smov %s6008_s29  ;;  %s6747_s12 = smov %s5911_s14 }
 0x35a   : > { %s6748_s13 = smov %s5915_s15  ;;  %s6749_s14 = smov %s6752_s18 }
 0x35b   : > { %s6750_s15 = smov %s6756_s19  ;;  %14 = sbr.rel (!%p12_p8) target bundleno = 5 (0x5), region = 79 }
 0x362   :  { %4287 = vsyncpa [#allocation4], 1 }
 0x363   :  { %4289 = vsyncpa [#allocation4 + $0x1], 1 }

// kernel: patch_discriminator70.10
= control target key start
LH: loop header
LB: loop body
LE: loop exit
PB: predicated region body
PF: predicated region fallthrough
CT: control target
= control target key end

     0   :  { %7 = vsyncpa [#allocation4], 0  ;;  %s6738_s0 = inlined_call_operand.hbm [shape: bf16[2,16,8192], index: 0, kind: input, shape index: {}]   ;;  %s6739_s1 = inlined_call_operand.vmem [shape: bf16[8192,512], index: 1, kind: input, shape index: {}]   ;;  %s6740_s2 = inlined_call_operand.vmem [shape: bf16[2,16,512], index: 2, kind: output, shape index: {}]  }
   0x1   :  { %9 = vsyncpa [#allocation4 + $0x1], 0  ;;  %s5941_s9 = smov 0   ;;  %s5943_s10 = smov 0  }
   0x2   :  { %s5945_s11 = smov 0   ;;  %s5947_s12 = smov 0  }
   0x3   :  { %s5949_s13 = smov 0   ;;  %s5951_s14 = smov 0  }
   0x4   :  { %s5953_s15 = smov 0   ;;  %s5955_s16 = smov 0  }
   0x5 LB: > { %s4359_s17 = sadd.s32 4294967295, %s5919_s16   ;;  %s24_s18 = sadd.s32 1, %s5911_s14  ;;  %s5919_s16 = sphi %s5955_s16, %s15_s16   ;;  %s5915_s15 = sphi %s5953_s15, %s6750_s15   ;;  %s5911_s14 = sphi %s5951_s14, %s6749_s14   ;;  %s5907_s13 = sphi %s5949_s13, %s6748_s13   ;;  %s5903_s12 = sphi %s5947_s12, %s6747_s12   ;;  %s5899_s11 = sphi %s5945_s11, %s6746_s11   ;;  %s5895_s10 = sphi %s5943_s10, %s6745_s10   ;;  %s5891_s9 = sphi %s5941_s9, %s6744_s9  }
   0x6   : > { %p25_p0 = scmp.ge.s32.totalorder %s24_s18, 4  ;;  %s27_s19 = sadd.s32 1, %s5915_s15 }
   0x7   : > { %s36_s20 = sadd.s32 1, %s5899_s11  ;;  %p43_p1 = scmp.ne.s32.totalorder %s5899_s11, %s5895_s10 }
   0x8   : > { %s6752_s18 = smov (%p25_p0, %s24_s18), 0  ;;  %s6754_s19 = smov (!%p25_p0, %s27_s19), %s5915_s15 }
   0x9   : > { %s32_s21 = ssub.s32 %s5911_s14, %s6752_s18  ;;  %p44_p2 = scmp.eq.s32.totalorder %s5919_s16, 0 }
   0xa   : > { %p29_p3 = scmp.ge.s32.totalorder %s6754_s19, 2  ;;  %p49_p4 = scmp.ne.s32.totalorder %s5895_s10, %s5891_s9 }
   0xb   : > { %p5992_p5 = por %p44_p2, %p43_p1  ;;  %p50_p6 = scmp.eq.s32.totalorder %s4359_s17, 0 }
   0xc   : > { %s6756_s19 = smov (%p29_p3, %s6754_s19), 0  ;;  %p4978_p8 = scmp.lt.s32.totalorder %s5919_s16, 8 }
   0xd   : > { %p5998_p7 = por %p50_p6, %p49_p4  ;;  %s31_s24 = ssub.s32 %s5915_s15, %s6756_s19 }
   0xe   : > { %s33_s25 = sor.u32 %s32_s21, %s31_s24  ;;  %s125_s26 = sand.u32 1, %s5899_s11  }
   0xf   : > { %p34_p9 = scmp.eq.s32.totalorder %s33_s25, 0  ;;  %s4363_s27 = sshll.u32 %s125_s26, 7 }
  0x10   : > { %s4364_s28 = sshll.u32 %s5911_s14, 4  ;;  %s4365_s30 = sshll.u32 %s5915_s15, 7 }
  0x11   : > { %s6008_s29 = scalar_select %p34_p9, %s5899_s11, %s36_s20  }
  0x12   : > { %s135_s3 = sadd.s32 %s4365_s30, %s4364_s28  ;;  %s129_s4 = scalar_lea.vmem [#allocation3], %s4363_s27 }
  0x13   : > { %s138_s5 = sshll.u32 %s129_s4, 4  ;;  %s4366_s6 = sshll.u32 %s135_s3, 6  ;;  %s6011_s5 = int_to_ptr.vmem [resolvable:$true] %s138_s5 }
  0x14   : > { %s6016_s9 = scalar_lea.hbm %s6738_s0, %s4366_s6  ;;  %p6022_p10 = pnand %p4978_p8, %p5992_p5 }
  0x15   : > { %s6026_s20 = scalar_lea.sflag [#allocation4], %s125_s26  ;;  %s5823_s21 = scalar_lea.hbm %s6016_s9, 2048 }
  0x16   : > { %p5824_p11 = scmp.ne.s32.totalorder %s6016_s9, %s5823_s21  ;;  %p5825_p12 = pneg %p6022_p10 }
  0x17   : > { %s5828_s25 = scalar_lea.hbm %s6738_s0, 16384  ;;  %p5829_p1 = scmp.lt.u32.totalorder %s6016_s9, %s6738_s0 }
  0x18   : > { %p5826_p13 = pnand %p5825_p12, %p5824_p11  ;;  %p5830_p2 = scmp.lt.u32.totalorder %s5828_s25, %s5823_s21 }
  0x19   : > { %p5832_p4 = scmp.lt.u32.totalorder %s5823_s21, %s6016_s9 }
  0x1a   : > { %p5827_p0 = pneg %p5826_p13  ;;  %p5831_p3 = por %p5830_p2, %p5829_p1 }
  0x1c   : > { %p5833_p5 = por %p5832_p4, %p5831_p3 }
  0x1e   : > { %p5834_p6 = pnand %p5833_p5, %p5827_p0 }
  0x20   : > { %5837 = shalt.err (!%p5834_p6)
}
  0x21   : > { %s5838_s26 = scalar_lea.vmem %s6011_s5, 2048  ;;  %s5921_s30 = smov [#allocation3]  }
  0x22   : > { %p5839_p8 = scmp.ne.s32.totalorder %s6011_s5, %s5838_s26  ;;  %s5843_s3 = sshll.u32 %s5921_s30, 4  ;;  %s5844_s3 = int_to_ptr.vmem [resolvable:$false] %s5843_s3 }
  0x23   : > { %s5845_s4 = scalar_lea.vmem %s5844_s3, 4096  ;;  %p5846_p13 = scmp.lt.s32.totalorder %s6011_s5, %s5844_s3 }
  0x24   : > { %p5841_p9 = pnand %p5839_p8, %p5825_p12  ;;  %p5847_p1 = scmp.lt.s32.totalorder %s5845_s4, %s5838_s26 }
  0x26   : > { %p5842_p11 = pneg %p5841_p9  ;;  %p5848_p2 = por %p5847_p1, %p5846_p13 }
  0x28   : > { %p5849_p3 = pnand %p5848_p2, %p5842_p11 }
  0x2a   : > { %5852 = shalt.err (!%p5849_p3)
}
  0x2b   : > { %s5922_s6 = smov 4096   ;;  %s5923_s7 = smov 1024  }
  0x2c   : > { %s5924_s8 = smov 64   ;;  %p4367_p12 = scmp.ge.s32.totalorder %s5919_s16, 1 }
  0x2d   : > { %4977 = dma.hbm_to_vmem [thread:$0]  (!%p6022_p10), %s6016_s9, 2048, %s6011_s5, %s6026_s20, %s5922_s6, %s5923_s7, %s5924_s8  }
  0x2e   : > { %p156_p0 = scmp.lt.s32.totalorder %s5919_s16, 9 }
  0x30   : > { %p157_p4 = pnand %p4367_p12, %p156_p0 }
  0x31   : > { %s162_s21 = sand.u32 (!%p157_p4), 1, %s5895_s10  }
  0x32   : > { %160 = sbr.rel (%p157_p4) target bundleno = 855 (0x357), region = 28  ;;  %s4368_s22 = sshll.u32 (!%p157_p4), %s162_s21, 7 }
  0x33   : > { %s163_s24 = scalar_lea.sflag (!%p157_p4), [#allocation4], %s162_s21  ;;  %s6057_s25 = scalar_lea.vmem (!%p157_p4), [#allocation3], %s4368_s22 }
  0x39   : > { %5886 = dma.done.wait (%p5998_p7), %s163_s24, 2048  }
  0x3a   : > { %5888 = vsyncadd (%p5998_p7), %s163_s24, 4294965248  ;;  %s4369_s5 = sshll.u32 %s5903_s12, 8  ;;  %p201_p10 = scmp.lt.s32.totalorder %s5907_s13, 1 }
  0x3b   : > { %p195_p5 = scmp.lt.s32.totalorder %s4369_s5, 1023  ;;  %p4374_p7 = scmp.ne.s32.totalorder %s5903_s12, 0 }
  0x3c   : > { %s6758_s13 = smov (!%p201_p10, %s5907_s13), 1  ;;  %v5925_v0 = vmov (!%p4374_p7), 0.0  }
  0x3d   : > { %s6760_s5 = smov (!%p195_p5, %s4369_s5), 1023  ;;  %s4911_s9 = sshll.u32 %s6758_s13, 5  ;;  %210 = vst [vmem:[#allocation2] sm:$0xff] (!%p4374_p7), %v5925_v0  ;;  %211 = vst [vmem:[#allocation2 + $0x8] sm:$0xff] (!%p4374_p7), %v5925_v0 }
  0x3e   : > { %s4910_s17 = sshll.u32 %s6760_s5, 4  ;;  %s6069_s28 = scalar_lea.vmem %s6740_s2, %s4911_s9  ;;  %212 = vst [vmem:[#allocation2 + $0x10] sm:$0xff] (!%p4374_p7), %v5925_v0  ;;  %213 = vst [vmem:[#allocation2 + $0x18] sm:$0xff] (!%p4374_p7), %v5925_v0 }
  0x3f   : > { %s6074_s23 = scalar_lea.vmem %s6739_s1, %s4910_s17  ;;  %209 = sbr.rel (%p4374_p7) target bundleno = 70 (0x46), region = 36  ;;  %214 = vst [vmem:[#allocation2 + $0x20] sm:$0xff] (!%p4374_p7), %v5925_v0  ;;  %215 = vst [vmem:[#allocation2 + $0x28] sm:$0xff] (!%p4374_p7), %v5925_v0 }
  0x40   : > { %216 = vst [vmem:[#allocation2 + $0x30] sm:$0xff] (!%p4374_p7), %v5925_v0  ;;  %217 = vst [vmem:[#allocation2 + $0x38] sm:$0xff] (!%p4374_p7), %v5925_v0 }
  0x46 PF: > { %v5047_v1 = vld [vmem:[%s6074_s23 + $0x4] ss:$16 sps:$4 sm:$0xff]   ;;  %v5049_v2 = vld [vmem:[%s6074_s23 + $0xc] ss:$16 sps:$4 sm:$0xff]   ;;  %v5051_v3 = vld [vmem:[%s6074_s23] ss:$16 sps:$4 sm:$0xff]  }
  0x47   : > { %3394 = vmatprep.subr.bf16.mxu0 %v5047_v1  ;;  %v5052_v4 = vld [vmem:[%s6074_s23 + $0x8] ss:$16 sps:$4 sm:$0xff]   ;;  %3738 = vmatprep.subr.bf16.mxu1 %v5049_v2  ;;  %v5053_v5 = vld [vmem:[%s6074_s23 + $0x24] ss:$16 sps:$4 sm:$0xff]   ;;  %v5055_v6 = vld [vmem:[%s6074_s23 + $0x2c] ss:$16 sps:$4 sm:$0xff]  }
  0x48   : > { %3395 = vmatpush1.bf16.msra.mxu0 %v5051_v3  ;;  %3739 = vmatpush1.bf16.msra.mxu1 %v5052_v4  ;;  %v5057_v7 = vld [vmem:[%s6074_s23 + $0x20] ss:$16 sps:$4 sm:$0xff]   ;;  %v5058_v8 = vld [vmem:[%s6074_s23 + $0x28] ss:$16 sps:$4 sm:$0xff]   ;;  %v5059_v9 = vld [vmem:[%s6074_s23 + $0x44] ss:$16 sps:$4 sm:$0xff]  }
  0x49   : > { %3396 = vmatprep.subr.bf16.mxu0 %v5053_v5  ;;  %3740 = vmatprep.subr.bf16.mxu1 %v5055_v6  ;;  %v5061_v10 = vld [vmem:[%s6074_s23 + $0x4c] ss:$16 sps:$4 sm:$0xff]   ;;  %v5063_v11 = vld [vmem:[%s6074_s23 + $0x40] ss:$16 sps:$4 sm:$0xff]   ;;  %v5064_v12 = vld [vmem:[%s6074_s23 + $0x48] ss:$16 sps:$4 sm:$0xff]  }
  0x4a   : > { %v5065_v13 = vld [vmem:[%s6074_s23 + $0x64] ss:$16 sps:$4 sm:$0xff]   ;;  %v5067_v14 = vld [vmem:[%s6074_s23 + $0x6c] ss:$16 sps:$4 sm:$0xff]   ;;  %v5069_v15 = vld [vmem:[%s6074_s23 + $0x60] ss:$16 sps:$4 sm:$0xff]  }
  0x4b   : > { %v5070_v16 = vld [vmem:[%s6074_s23 + $0x68] ss:$16 sps:$4 sm:$0xff]   ;;  %v5071_v17 = vld [vmem:[%s6074_s23 + $0x84] ss:$16 sps:$4 sm:$0xff]   ;;  %v5073_v18 = vld [vmem:[%s6074_s23 + $0x8c] ss:$16 sps:$4 sm:$0xff]  }
  0x4c   : > { %3397 = vmatpush1.bf16.msra.mxu0 %v5057_v7  ;;  %3741 = vmatpush1.bf16.msra.mxu1 %v5058_v8  ;;  %v5075_v19 = vld [vmem:[%s6074_s23 + $0x80] ss:$16 sps:$4 sm:$0xff]   ;;  %v5076_v20 = vld [vmem:[%s6074_s23 + $0x88] ss:$16 sps:$4 sm:$0xff]   ;;  %v5077_v21 = vld [vmem:[%s6074_s23 + $0xa4] ss:$16 sps:$4 sm:$0xff]  }
  0x4d   : > { %3398 = vmatprep.subr.bf16.mxu0 %v5059_v9  ;;  %3742 = vmatprep.subr.bf16.mxu1 %v5061_v10  ;;  %v5079_v22 = vld [vmem:[%s6074_s23 + $0xac] ss:$16 sps:$4 sm:$0xff]   ;;  %v5081_v23 = vld [vmem:[%s6074_s23 + $0xa0] ss:$16 sps:$4 sm:$0xff]   ;;  %v5082_v24 = vld [vmem:[%s6074_s23 + $0xa8] ss:$16 sps:$4 sm:$0xff]  }
  0x4e   : > { %v5083_v25 = vld [vmem:[%s6074_s23 + $0xc4] ss:$16 sps:$4 sm:$0xff]   ;;  %v5085_v26 = vld [vmem:[%s6074_s23 + $0xcc] ss:$16 sps:$4 sm:$0xff]   ;;  %v5087_v27 = vld [vmem:[%s6074_s23 + $0xc0] ss:$16 sps:$4 sm:$0xff]  }
  0x4f   : > { %v5088_v28 = vld [vmem:[%s6074_s23 + $0xc8] ss:$16 sps:$4 sm:$0xff]   ;;  %v5089_v29 = vld [vmem:[%s6074_s23 + $0xe4] ss:$16 sps:$4 sm:$0xff]   ;;  %v5091_v30 = vld [vmem:[%s6074_s23 + $0xec] ss:$16 sps:$4 sm:$0xff]  }
  0x50   : > { %3399 = vmatpush1.bf16.msra.mxu0 %v5063_v11  ;;  %3743 = vmatpush1.bf16.msra.mxu1 %v5064_v12  ;;  %v5093_v31 = vld [vmem:[%s6074_s23 + $0xe0] ss:$16 sps:$4 sm:$0xff]   ;;  %v5094_v32 = vld [vmem:[%s6074_s23 + $0xe8] ss:$16 sps:$4 sm:$0xff]   ;;  %v5095_v33 = vld [vmem:[%s6074_s23 + $0x104] ss:$16 sps:$4 sm:$0xff]  }
  0x51   : > { %3400 = vmatprep.subr.bf16.mxu0 %v5065_v13  ;;  %3744 = vmatprep.subr.bf16.mxu1 %v5067_v14  ;;  %v5097_v34 = vld [vmem:[%s6074_s23 + $0x10c] ss:$16 sps:$4 sm:$0xff]   ;;  %v5099_v35 = vld [vmem:[%s6074_s23 + $0x100] ss:$16 sps:$4 sm:$0xff]   ;;  %v5100_v36 = vld [vmem:[%s6074_s23 + $0x108] ss:$16 sps:$4 sm:$0xff]  }
  0x52   : > { %v5101_v37 = vld [vmem:[%s6074_s23 + $0x124] ss:$16 sps:$4 sm:$0xff]   ;;  %v5103_v38 = vld [vmem:[%s6074_s23 + $0x12c] ss:$16 sps:$4 sm:$0xff]   ;;  %v5105_v39 = vld [vmem:[%s6074_s23 + $0x120] ss:$16 sps:$4 sm:$0xff]  }
  0x53   : > { %v5106_v40 = vld [vmem:[%s6074_s23 + $0x128] ss:$16 sps:$4 sm:$0xff]   ;;  %v5107_v41 = vld [vmem:[%s6074_s23 + $0x144] ss:$16 sps:$4 sm:$0xff]   ;;  %v5109_v42 = vld [vmem:[%s6074_s23 + $0x14c] ss:$16 sps:$4 sm:$0xff]  }
  0x54   : > { %3401 = vmatpush1.bf16.msra.mxu0 %v5069_v15  ;;  %3745 = vmatpush1.bf16.msra.mxu1 %v5070_v16  ;;  %v5111_v43 = vld [vmem:[%s6074_s23 + $0x140] ss:$16 sps:$4 sm:$0xff]   ;;  %v5112_v44 = vld [vmem:[%s6074_s23 + $0x148] ss:$16 sps:$4 sm:$0xff]   ;;  %v5113_v45 = vld [vmem:[%s6074_s23 + $0x164] ss:$16 sps:$4 sm:$0xff]  }
  0x55   : > { %3402 = vmatprep.subr.bf16.mxu0 %v5071_v17  ;;  %3746 = vmatprep.subr.bf16.mxu1 %v5073_v18  ;;  %v5115_v46 = vld [vmem:[%s6074_s23 + $0x16c] ss:$16 sps:$4 sm:$0xff]   ;;  %v226_v47 = vld [vmem:[%s6057_s25] sm:$0xff]  ;;  %v5118_v50 = vld [vmem:[%s6074_s23 + $0x168] ss:$16 sps:$4 sm:$0xff]   ;;  %p4903_p6 = scmp.ne.s32.totalorder %s5903_s12, 3 }
  0x56   : > { %v234_v48 = vld [vmem:[%s6057_s25 + $0x40] sm:$0xff]  ;;  %v5121_v53 = vld [vmem:[%s6074_s23 + $0x18c] ss:$16 sps:$4 sm:$0xff]   ;;  %v5124_v55 = vld [vmem:[%s6074_s23 + $0x188] ss:$16 sps:$4 sm:$0xff]  }
  0x57   : > { %v5117_v49 = vld [vmem:[%s6074_s23 + $0x160] ss:$16 sps:$4 sm:$0xff]   ;;  %v4376_v51 = vcombine.high %v226_v47, %v234_v48  ;;  %v5119_v52 = vld [vmem:[%s6074_s23 + $0x184] ss:$16 sps:$4 sm:$0xff]   ;;  %v5127_v57 = vld [vmem:[%s6074_s23 + $0x1ac] ss:$16 sps:$4 sm:$0xff]   ;;  %v4375_v6 = vcombine.low %v226_v47, %v234_v48 }
  0x58   : > { %3403 = vmatpush1.bf16.msra.mxu0 %v5075_v19  ;;  %3747 = vmatpush1.bf16.msra.mxu1 %v5076_v20  ;;  %v5123_v54 = vld [vmem:[%s6074_s23 + $0x180] ss:$16 sps:$4 sm:$0xff]   ;;  %v5125_v56 = vld [vmem:[%s6074_s23 + $0x1a4] ss:$16 sps:$4 sm:$0xff]   ;;  %v5130_v59 = vld [vmem:[%s6074_s23 + $0x1a8] ss:$16 sps:$4 sm:$0xff]  }
  0x59   : > { %3404 = vmatprep.subr.bf16.mxu0 %v5077_v21  ;;  %3748 = vmatprep.subr.bf16.mxu1 %v5079_v22  ;;  %v5129_v58 = vld [vmem:[%s6074_s23 + $0x1a0] ss:$16 sps:$4 sm:$0xff]   ;;  %v5131_v60 = vld [vmem:[%s6074_s23 + $0x1c4] ss:$16 sps:$4 sm:$0xff]   ;;  %v5133_v61 = vld [vmem:[%s6074_s23 + $0x1cc] ss:$16 sps:$4 sm:$0xff]  }
  0x5a   : > { %3426 = vmatprep.mubr.bf16.mxu0 %v4376_v51  ;;  %3770 = vmatprep.mubr.bf16.mxu1 %v4376_v51  ;;  %v5135_v62 = vld [vmem:[%s6074_s23 + $0x1c0] ss:$16 sps:$4 sm:$0xff]   ;;  %v5136_v63 = vld [vmem:[%s6074_s23 + $0x1c8] ss:$16 sps:$4 sm:$0xff]   ;;  %v5137_v0 = vld [vmem:[%s6074_s23 + $0x1e4] ss:$16 sps:$4 sm:$0xff]  }
  0x5b   : > { %v5139_v1 = vld [vmem:[%s6074_s23 + $0x1ec] ss:$16 sps:$4 sm:$0xff]   ;;  %v5141_v2 = vld [vmem:[%s6074_s23 + $0x1e0] ss:$16 sps:$4 sm:$0xff]   ;;  %v5142_v3 = vld [vmem:[%s6074_s23 + $0x1e8] ss:$16 sps:$4 sm:$0xff]  }
  0x5c   : > { %3405 = vmatpush1.bf16.msra.mxu0 %v5081_v23  ;;  %3749 = vmatpush1.bf16.msra.mxu1 %v5082_v24  ;;  %v5145_v4 = vld [vmem:[%s6074_s23 + $0x204] ss:$16 sps:$4 sm:$0xff]   ;;  %v5148_v5 = vld [vmem:[%s6074_s23 + $0x20c] ss:$16 sps:$4 sm:$0xff]   ;;  %v5143_v7 = vld [vmem:[%s6074_s23 + $0x200] ss:$16 sps:$4 sm:$0xff]  }
  0x5d   : > { %3406 = vmatprep.subr.bf16.mxu0 %v5083_v25  ;;  %3750 = vmatprep.subr.bf16.mxu1 %v5085_v26  ;;  %v5146_v8 = vld [vmem:[%s6074_s23 + $0x208] ss:$16 sps:$4 sm:$0xff]   ;;  %v5151_v9 = vld [vmem:[%s6074_s23 + $0x224] ss:$16 sps:$4 sm:$0xff]   ;;  %v5154_v10 = vld [vmem:[%s6074_s23 + $0x22c] ss:$16 sps:$4 sm:$0xff]  }
  0x5e   : > { %v5149_v11 = vld [vmem:[%s6074_s23 + $0x220] ss:$16 sps:$4 sm:$0xff]   ;;  %v5152_v12 = vld [vmem:[%s6074_s23 + $0x228] ss:$16 sps:$4 sm:$0xff]   ;;  %v5157_v13 = vld [vmem:[%s6074_s23 + $0x244] ss:$16 sps:$4 sm:$0xff]  }
  0x5f   : > { %v5160_v14 = vld [vmem:[%s6074_s23 + $0x24c] ss:$16 sps:$4 sm:$0xff]   ;;  %v5155_v15 = vld [vmem:[%s6074_s23 + $0x240] ss:$16 sps:$4 sm:$0xff]   ;;  %v5158_v16 = vld [vmem:[%s6074_s23 + $0x248] ss:$16 sps:$4 sm:$0xff]  }
  0x60   : > { %3407 = vmatpush1.bf16.msra.mxu0 %v5087_v27  ;;  %3751 = vmatpush1.bf16.msra.mxu1 %v5088_v28  ;;  %v5163_v17 = vld [vmem:[%s6074_s23 + $0x264] ss:$16 sps:$4 sm:$0xff]   ;;  %v5166_v18 = vld [vmem:[%s6074_s23 + $0x26c] ss:$16 sps:$4 sm:$0xff]   ;;  %v5161_v19 = vld [vmem:[%s6074_s23 + $0x260] ss:$16 sps:$4 sm:$0xff]  }
  0x61   : > { %3408 = vmatprep.subr.bf16.mxu0 %v5089_v29  ;;  %3752 = vmatprep.subr.bf16.mxu1 %v5091_v30  ;;  %v5164_v20 = vld [vmem:[%s6074_s23 + $0x268] ss:$16 sps:$4 sm:$0xff]   ;;  %v5169_v21 = vld [vmem:[%s6074_s23 + $0x284] ss:$16 sps:$4 sm:$0xff]   ;;  %v5172_v22 = vld [vmem:[%s6074_s23 + $0x28c] ss:$16 sps:$4 sm:$0xff]  }
  0x62   : > { %v5167_v23 = vld [vmem:[%s6074_s23 + $0x280] ss:$16 sps:$4 sm:$0xff]   ;;  %v5170_v24 = vld [vmem:[%s6074_s23 + $0x288] ss:$16 sps:$4 sm:$0xff]   ;;  %v5175_v25 = vld [vmem:[%s6074_s23 + $0x2a4] ss:$16 sps:$4 sm:$0xff]  }
  0x63   : > { %v5178_v26 = vld [vmem:[%s6074_s23 + $0x2ac] ss:$16 sps:$4 sm:$0xff]   ;;  %v5173_v27 = vld [vmem:[%s6074_s23 + $0x2a0] ss:$16 sps:$4 sm:$0xff]   ;;  %v5176_v28 = vld [vmem:[%s6074_s23 + $0x2a8] ss:$16 sps:$4 sm:$0xff]  }
  0x64   : > { %3409 = vmatpush1.bf16.msra.mxu0 %v5093_v31  ;;  %3753 = vmatpush1.bf16.msra.mxu1 %v5094_v32  ;;  %v5181_v29 = vld [vmem:[%s6074_s23 + $0x2c4] ss:$16 sps:$4 sm:$0xff]   ;;  %v5184_v30 = vld [vmem:[%s6074_s23 + $0x2cc] ss:$16 sps:$4 sm:$0xff]   ;;  %v5200_v47 = vld [vmem:[%s6074_s23 + $0x328] ss:$16 sps:$4 sm:$0xff]  }
  0x65   : > { %3410 = vmatprep.subr.bf16.mxu0 %v5095_v33  ;;  %3754 = vmatprep.subr.bf16.mxu1 %v5097_v34  ;;  %v6170_v31 = vld [vmem:[%s6057_s25 + $0x8] sm:$0xff]  ;;  %v5179_v33 = vld [vmem:[%s6074_s23 + $0x2c0] ss:$16 sps:$4 sm:$0xff]   ;;  %v5205_v48 = vld [vmem:[%s6074_s23 + $0x344] ss:$16 sps:$4 sm:$0xff]  }
  0x66   : > { %v6173_v32 = vld [vmem:[%s6057_s25 + $0x48] sm:$0xff] }
  0x67   : > { %v5182_v34 = vld [vmem:[%s6074_s23 + $0x2c8] ss:$16 sps:$4 sm:$0xff]  }
  0x68   : > { %3411 = vmatpush1.bf16.msra.mxu0 %v5099_v35  ;;  %3755 = vmatpush1.bf16.msra.mxu1 %v5100_v36  ;;  %v4378_v35 = vcombine.high %v6170_v31, %v6173_v32  ;;  %v5187_v36 = vld [vmem:[%s6074_s23 + $0x2e4] ss:$16 sps:$4 sm:$0xff]   ;;  %v5206_v51 = vld [vmem:[%s6074_s23 + $0x348] ss:$16 sps:$4 sm:$0xff]  }
  0x69   : > { %3412 = vmatprep.subr.bf16.mxu0 %v5101_v37  ;;  %3756 = vmatprep.subr.bf16.mxu1 %v5103_v38  ;;  %v5190_v37 = vld [vmem:[%s6074_s23 + $0x2ec] ss:$16 sps:$4 sm:$0xff]   ;;  %v5185_v38 = vld [vmem:[%s6074_s23 + $0x2e0] ss:$16 sps:$4 sm:$0xff]  }
  0x6c   : > { %3413 = vmatpush1.bf16.msra.mxu0 %v5105_v39  ;;  %3757 = vmatpush1.bf16.msra.mxu1 %v5106_v40  ;;  %v5188_v39 = vld [vmem:[%s6074_s23 + $0x2e8] ss:$16 sps:$4 sm:$0xff]   ;;  %v5193_v40 = vld [vmem:[%s6074_s23 + $0x304] ss:$16 sps:$4 sm:$0xff]  }
  0x6d   : > { %3414 = vmatprep.subr.bf16.mxu0 %v5107_v41  ;;  %3758 = vmatprep.subr.bf16.mxu1 %v5109_v42  ;;  %v5196_v41 = vld [vmem:[%s6074_s23 + $0x30c] ss:$16 sps:$4 sm:$0xff]   ;;  %v5191_v42 = vld [vmem:[%s6074_s23 + $0x300] ss:$16 sps:$4 sm:$0xff]  }
  0x70   : > { %3415 = vmatpush1.bf16.msra.mxu0 %v5111_v43  ;;  %3759 = vmatpush1.bf16.msra.mxu1 %v5112_v44  ;;  %v5194_v43 = vld [vmem:[%s6074_s23 + $0x308] ss:$16 sps:$4 sm:$0xff]   ;;  %v5199_v44 = vld [vmem:[%s6074_s23 + $0x324] ss:$16 sps:$4 sm:$0xff]  }
  0x71   : > { %3416 = vmatprep.subr.bf16.mxu0 %v5113_v45  ;;  %3760 = vmatprep.subr.bf16.mxu1 %v5115_v46  ;;  %v5202_v45 = vld [vmem:[%s6074_s23 + $0x32c] ss:$16 sps:$4 sm:$0xff]   ;;  %v5197_v46 = vld [vmem:[%s6074_s23 + $0x320] ss:$16 sps:$4 sm:$0xff]  }
  0x74   : > { %3417 = vmatpush1.bf16.msra.mxu0 %v5117_v49  ;;  %3761 = vmatpush1.bf16.msra.mxu1 %v5118_v50  ;;  %v5208_v49 = vld [vmem:[%s6074_s23 + $0x34c] ss:$16 sps:$4 sm:$0xff]   ;;  %v5203_v50 = vld [vmem:[%s6074_s23 + $0x340] ss:$16 sps:$4 sm:$0xff]  }
  0x75   : > { %3418 = vmatprep.subr.bf16.mxu0 %v5119_v52  ;;  %3762 = vmatprep.subr.bf16.mxu1 %v5121_v53  ;;  %v5211_v52 = vld [vmem:[%s6074_s23 + $0x364] ss:$16 sps:$4 sm:$0xff]   ;;  %v5214_v53 = vld [vmem:[%s6074_s23 + $0x36c] ss:$16 sps:$4 sm:$0xff]  }
  0x78   : > { %3419 = vmatpush1.bf16.msra.mxu0 %v5123_v54  ;;  %3763 = vmatpush1.bf16.msra.mxu1 %v5124_v55  ;;  %v5209_v54 = vld [vmem:[%s6074_s23 + $0x360] ss:$16 sps:$4 sm:$0xff]   ;;  %v5212_v55 = vld [vmem:[%s6074_s23 + $0x368] ss:$16 sps:$4 sm:$0xff]  }
  0x79   : > { %3420 = vmatprep.subr.bf16.mxu0 %v5125_v56  ;;  %3764 = vmatprep.subr.bf16.mxu1 %v5127_v57  ;;  %v5217_v56 = vld [vmem:[%s6074_s23 + $0x384] ss:$16 sps:$4 sm:$0xff]   ;;  %v5220_v57 = vld [vmem:[%s6074_s23 + $0x38c] ss:$16 sps:$4 sm:$0xff]  }
  0x7c   : > { %3421 = vmatpush1.bf16.msra.mxu0 %v5129_v58  ;;  %3765 = vmatpush1.bf16.msra.mxu1 %v5130_v59  ;;  %v5215_v58 = vld [vmem:[%s6074_s23 + $0x380] ss:$16 sps:$4 sm:$0xff]   ;;  %v5218_v59 = vld [vmem:[%s6074_s23 + $0x388] ss:$16 sps:$4 sm:$0xff]  }
  0x7d   : > { %3422 = vmatprep.subr.bf16.mxu0 %v5131_v60  ;;  %3766 = vmatprep.subr.bf16.mxu1 %v5133_v61  ;;  %v5223_v60 = vld [vmem:[%s6074_s23 + $0x3a4] ss:$16 sps:$4 sm:$0xff]   ;;  %v5226_v61 = vld [vmem:[%s6074_s23 + $0x3ac] ss:$16 sps:$4 sm:$0xff]  }
  0x80   : > { %3423 = vmatpush1.bf16.msra.mxu0 %v5135_v62  ;;  %3767 = vmatpush1.bf16.msra.mxu1 %v5136_v63  ;;  %v5221_v62 = vld [vmem:[%s6074_s23 + $0x3a0] ss:$16 sps:$4 sm:$0xff]   ;;  %v5224_v63 = vld [vmem:[%s6074_s23 + $0x3a8] ss:$16 sps:$4 sm:$0xff]  }
  0x81   : > { %3424 = vmatprep.subr.bf16.mxu0 %v5137_v0  ;;  %3768 = vmatprep.subr.bf16.mxu1 %v5139_v1  ;;  %v5229_v0 = vld [vmem:[%s6074_s23 + $0x3c4] ss:$16 sps:$4 sm:$0xff]   ;;  %v5232_v1 = vld [vmem:[%s6074_s23 + $0x3cc] ss:$16 sps:$4 sm:$0xff]  }
  0x84   : > { %3425 = vmatpush1.bf16.msra.mxu0 %v5141_v2  ;;  %3769 = vmatpush1.bf16.msra.mxu1 %v5142_v3  ;;  %v5227_v2 = vld [vmem:[%s6074_s23 + $0x3c0] ss:$16 sps:$4 sm:$0xff]   ;;  %v5230_v3 = vld [vmem:[%s6074_s23 + $0x3c8] ss:$16 sps:$4 sm:$0xff]  }
  0x85   : > { %3437 = vmatprep.subr.bf16.mxu0 %v5145_v4  ;;  %3781 = vmatprep.subr.bf16.mxu1 %v5148_v5  ;;  %v5235_v4 = vld [vmem:[%s6074_s23 + $0x3e4] ss:$16 sps:$4 sm:$0xff]   ;;  %v5238_v5 = vld [vmem:[%s6074_s23 + $0x3ec] ss:$16 sps:$4 sm:$0xff]  }
  0x87   : > { %3427 = vmatmul.mubr.bf16.vlgmr.msra.gmra.mrb[0].mxu0 %v4375_v6  ;;  %3771 = vmatmul.mubr.bf16.vlgmr.msra.gmra.mrb[0].mxu1 %v4375_v6  ;;  %v5233_v6 = vld [vmem:[%s6074_s23 + $0x3e0] ss:$16 sps:$4 sm:$0xff]  }
  0x88   : > { %3438 = vmatpush1.bf16.msra.mxu0 %v5143_v7  ;;  %3782 = vmatpush1.bf16.msra.mxu1 %v5146_v8  ;;  %v5236_v7 = vld [vmem:[%s6074_s23 + $0x3e8] ss:$16 sps:$4 sm:$0xff]   ;;  %v5241_v8 = vld [vmem:[%s6074_s23 + $0x404] ss:$16 sps:$4 sm:$0xff]  }
  0x89   : > { %3439 = vmatprep.subr.bf16.mxu0 %v5151_v9  ;;  %3783 = vmatprep.subr.bf16.mxu1 %v5154_v10  ;;  %v5244_v9 = vld [vmem:[%s6074_s23 + $0x40c] ss:$16 sps:$4 sm:$0xff]   ;;  %v4377_v10 = vcombine.low %v6170_v31, %v6173_v32  ;;  %v5266_v31 = vld [vmem:[%s6074_s23 + $0x488] ss:$16 sps:$4 sm:$0xff]   ;;  %v5271_v32 = vld [vmem:[%s6074_s23 + $0x4a4] ss:$16 sps:$4 sm:$0xff]  }
  0x8a   : > { %3469 = vmatprep.mubr.bf16.mxu0 %v4378_v35  ;;  %3813 = vmatprep.mubr.bf16.mxu1 %v4378_v35  ;;  %v5272_v35 = vld [vmem:[%s6074_s23 + $0x4a8] ss:$16 sps:$4 sm:$0xff]  }
  0x8c   : > { %3440 = vmatpush1.bf16.msra.mxu0 %v5149_v11  ;;  %3784 = vmatpush1.bf16.msra.mxu1 %v5152_v12  ;;  %v5239_v11 = vld [vmem:[%s6074_s23 + $0x400] ss:$16 sps:$4 sm:$0xff]   ;;  %v5242_v12 = vld [vmem:[%s6074_s23 + $0x408] ss:$16 sps:$4 sm:$0xff]  }
  0x8d   : > { %3441 = vmatprep.subr.bf16.mxu0 %v5157_v13  ;;  %3785 = vmatprep.subr.bf16.mxu1 %v5160_v14  ;;  %v5247_v13 = vld [vmem:[%s6074_s23 + $0x424] ss:$16 sps:$4 sm:$0xff]   ;;  %v5250_v14 = vld [vmem:[%s6074_s23 + $0x42c] ss:$16 sps:$4 sm:$0xff]  }
  0x90   : > { %3442 = vmatpush1.bf16.msra.mxu0 %v5155_v15  ;;  %3786 = vmatpush1.bf16.msra.mxu1 %v5158_v16  ;;  %v6224_v15 = vld [vmem:[%s6057_s25 + $0x10] sm:$0xff] }
  0x91   : > { %3443 = vmatprep.subr.bf16.mxu0 %v5163_v17  ;;  %3787 = vmatprep.subr.bf16.mxu1 %v5166_v18  ;;  %v6227_v16 = vld [vmem:[%s6057_s25 + $0x50] sm:$0xff] }
  0x92   : > { %v4380_v17 = vcombine.high %v6224_v15, %v6227_v16  ;;  %v5245_v18 = vld [vmem:[%s6074_s23 + $0x420] ss:$16 sps:$4 sm:$0xff]  }
  0x94   : > { %3444 = vmatpush1.bf16.msra.mxu0 %v5161_v19  ;;  %3788 = vmatpush1.bf16.msra.mxu1 %v5164_v20  ;;  %v5248_v19 = vld [vmem:[%s6074_s23 + $0x428] ss:$16 sps:$4 sm:$0xff]   ;;  %v5253_v20 = vld [vmem:[%s6074_s23 + $0x444] ss:$16 sps:$4 sm:$0xff]  }
  0x95   : > { %3445 = vmatprep.subr.bf16.mxu0 %v5169_v21  ;;  %3789 = vmatprep.subr.bf16.mxu1 %v5172_v22  ;;  %v5256_v21 = vld [vmem:[%s6074_s23 + $0x44c] ss:$16 sps:$4 sm:$0xff]   ;;  %v5251_v22 = vld [vmem:[%s6074_s23 + $0x440] ss:$16 sps:$4 sm:$0xff]  }
  0x98   : > { %3446 = vmatpush1.bf16.msra.mxu0 %v5167_v23  ;;  %3790 = vmatpush1.bf16.msra.mxu1 %v5170_v24  ;;  %v5254_v23 = vld [vmem:[%s6074_s23 + $0x448] ss:$16 sps:$4 sm:$0xff]   ;;  %v5259_v24 = vld [vmem:[%s6074_s23 + $0x464] ss:$16 sps:$4 sm:$0xff]  }
  0x99   : > { %3447 = vmatprep.subr.bf16.mxu0 %v5175_v25  ;;  %3791 = vmatprep.subr.bf16.mxu1 %v5178_v26  ;;  %v5262_v25 = vld [vmem:[%s6074_s23 + $0x46c] ss:$16 sps:$4 sm:$0xff]   ;;  %v5257_v26 = vld [vmem:[%s6074_s23 + $0x460] ss:$16 sps:$4 sm:$0xff]  }
  0x9c   : > { %3448 = vmatpush1.bf16.msra.mxu0 %v5173_v27  ;;  %3792 = vmatpush1.bf16.msra.mxu1 %v5176_v28  ;;  %v5260_v27 = vld [vmem:[%s6074_s23 + $0x468] ss:$16 sps:$4 sm:$0xff]   ;;  %v5265_v28 = vld [vmem:[%s6074_s23 + $0x484] ss:$16 sps:$4 sm:$0xff]  }
  0x9d   : > { %3449 = vmatprep.subr.bf16.mxu0 %v5181_v29  ;;  %3793 = vmatprep.subr.bf16.mxu1 %v5184_v30  ;;  %v5268_v29 = vld [vmem:[%s6074_s23 + $0x48c] ss:$16 sps:$4 sm:$0xff]   ;;  %v5263_v30 = vld [vmem:[%s6074_s23 + $0x480] ss:$16 sps:$4 sm:$0xff]  }
  0xa0   : > { %3450 = vmatpush1.bf16.msra.mxu0 %v5179_v33  ;;  %3794 = vmatpush1.bf16.msra.mxu1 %v5182_v34  ;;  %v5274_v33 = vld [vmem:[%s6074_s23 + $0x4ac] ss:$16 sps:$4 sm:$0xff]   ;;  %v5269_v34 = vld [vmem:[%s6074_s23 + $0x4a0] ss:$16 sps:$4 sm:$0xff]  }
  0xa1   : > { %3451 = vmatprep.subr.bf16.mxu0 %v5187_v36  ;;  %3795 = vmatprep.subr.bf16.mxu1 %v5190_v37  ;;  %v5277_v36 = vld [vmem:[%s6074_s23 + $0x4c4] ss:$16 sps:$4 sm:$0xff]   ;;  %v5280_v37 = vld [vmem:[%s6074_s23 + $0x4cc] ss:$16 sps:$4 sm:$0xff]  }
  0xa4   : > { %3452 = vmatpush1.bf16.msra.mxu0 %v5185_v38  ;;  %3796 = vmatpush1.bf16.msra.mxu1 %v5188_v39  ;;  %v5275_v38 = vld [vmem:[%s6074_s23 + $0x4c0] ss:$16 sps:$4 sm:$0xff]   ;;  %v5278_v39 = vld [vmem:[%s6074_s23 + $0x4c8] ss:$16 sps:$4 sm:$0xff]  }
  0xa5   : > { %3453 = vmatprep.subr.bf16.mxu0 %v5193_v40  ;;  %3797 = vmatprep.subr.bf16.mxu1 %v5196_v41  ;;  %v5283_v40 = vld [vmem:[%s6074_s23 + $0x4e4] ss:$16 sps:$4 sm:$0xff]   ;;  %v5286_v41 = vld [vmem:[%s6074_s23 + $0x4ec] ss:$16 sps:$4 sm:$0xff]  }
  0xa8   : > { %3454 = vmatpush1.bf16.msra.mxu0 %v5191_v42  ;;  %3798 = vmatpush1.bf16.msra.mxu1 %v5194_v43  ;;  %v5281_v42 = vld [vmem:[%s6074_s23 + $0x4e0] ss:$16 sps:$4 sm:$0xff]   ;;  %v5284_v43 = vld [vmem:[%s6074_s23 + $0x4e8] ss:$16 sps:$4 sm:$0xff]  }
  0xa9   : > { %3455 = vmatprep.subr.bf16.mxu0 %v5199_v44  ;;  %3799 = vmatprep.subr.bf16.mxu1 %v5202_v45  ;;  %v5289_v44 = vld [vmem:[%s6074_s23 + $0x504] ss:$16 sps:$4 sm:$0xff]   ;;  %v5292_v45 = vld [vmem:[%s6074_s23 + $0x50c] ss:$16 sps:$4 sm:$0xff]  }
  0xac   : > { %3456 = vmatpush1.bf16.msra.mxu0 %v5197_v46  ;;  %3800 = vmatpush1.bf16.msra.mxu1 %v5200_v47  ;;  %v5287_v46 = vld [vmem:[%s6074_s23 + $0x500] ss:$16 sps:$4 sm:$0xff]   ;;  %v5290_v47 = vld [vmem:[%s6074_s23 + $0x508] ss:$16 sps:$4 sm:$0xff]  }
  0xad   : > { %3457 = vmatprep.subr.bf16.mxu0 %v5205_v48  ;;  %3801 = vmatprep.subr.bf16.mxu1 %v5208_v49  ;;  %v5295_v48 = vld [vmem:[%s6074_s23 + $0x524] ss:$16 sps:$4 sm:$0xff]   ;;  %v5298_v49 = vld [vmem:[%s6074_s23 + $0x52c] ss:$16 sps:$4 sm:$0xff]  }
  0xb0   : > { %3458 = vmatpush1.bf16.msra.mxu0 %v5203_v50  ;;  %3802 = vmatpush1.bf16.msra.mxu1 %v5206_v51  ;;  %v5293_v50 = vld [vmem:[%s6074_s23 + $0x520] ss:$16 sps:$4 sm:$0xff]   ;;  %v5296_v51 = vld [vmem:[%s6074_s23 + $0x528] ss:$16 sps:$4 sm:$0xff]  }
  0xb1   : > { %3459 = vmatprep.subr.bf16.mxu0 %v5211_v52  ;;  %3803 = vmatprep.subr.bf16.mxu1 %v5214_v53  ;;  %v5301_v52 = vld [vmem:[%s6074_s23 + $0x544] ss:$16 sps:$4 sm:$0xff]   ;;  %v5304_v53 = vld [vmem:[%s6074_s23 + $0x54c] ss:$16 sps:$4 sm:$0xff]  }
  0xb4   : > { %3460 = vmatpush1.bf16.msra.mxu0 %v5209_v54  ;;  %3804 = vmatpush1.bf16.msra.mxu1 %v5212_v55  ;;  %v5299_v54 = vld [vmem:[%s6074_s23 + $0x540] ss:$16 sps:$4 sm:$0xff]   ;;  %v5302_v55 = vld [vmem:[%s6074_s23 + $0x548] ss:$16 sps:$4 sm:$0xff]  }
  0xb5   : > { %3461 = vmatprep.subr.bf16.mxu0 %v5217_v56  ;;  %3805 = vmatprep.subr.bf16.mxu1 %v5220_v57  ;;  %v5307_v56 = vld [vmem:[%s6074_s23 + $0x564] ss:$16 sps:$4 sm:$0xff]   ;;  %v5310_v57 = vld [vmem:[%s6074_s23 + $0x56c] ss:$16 sps:$4 sm:$0xff]  }
  0xb8   : > { %3462 = vmatpush1.bf16.msra.mxu0 %v5215_v58  ;;  %3806 = vmatpush1.bf16.msra.mxu1 %v5218_v59  ;;  %v5305_v58 = vld [vmem:[%s6074_s23 + $0x560] ss:$16 sps:$4 sm:$0xff]   ;;  %v5308_v59 = vld [vmem:[%s6074_s23 + $0x568] ss:$16 sps:$4 sm:$0xff]  }
  0xb9   : > { %3463 = vmatprep.subr.bf16.mxu0 %v5223_v60  ;;  %3807 = vmatprep.subr.bf16.mxu1 %v5226_v61  ;;  %v5313_v60 = vld [vmem:[%s6074_s23 + $0x584] ss:$16 sps:$4 sm:$0xff]   ;;  %v5316_v61 = vld [vmem:[%s6074_s23 + $0x58c] ss:$16 sps:$4 sm:$0xff]  }
  0xbc   : > { %3464 = vmatpush1.bf16.msra.mxu0 %v5221_v62  ;;  %3808 = vmatpush1.bf16.msra.mxu1 %v5224_v63  ;;  %v5311_v62 = vld [vmem:[%s6074_s23 + $0x580] ss:$16 sps:$4 sm:$0xff]   ;;  %v5314_v63 = vld [vmem:[%s6074_s23 + $0x588] ss:$16 sps:$4 sm:$0xff]  }
  0xbd   : > { %3465 = vmatprep.subr.bf16.mxu0 %v5229_v0  ;;  %3809 = vmatprep.subr.bf16.mxu1 %v5232_v1  ;;  %v5319_v0 = vld [vmem:[%s6074_s23 + $0x5a4] ss:$16 sps:$4 sm:$0xff]   ;;  %v5322_v1 = vld [vmem:[%s6074_s23 + $0x5ac] ss:$16 sps:$4 sm:$0xff]  }
  0xc0   : > { %3466 = vmatpush1.bf16.msra.mxu0 %v5227_v2  ;;  %3810 = vmatpush1.bf16.msra.mxu1 %v5230_v3  ;;  %v5317_v2 = vld [vmem:[%s6074_s23 + $0x5a0] ss:$16 sps:$4 sm:$0xff]   ;;  %v5320_v3 = vld [vmem:[%s6074_s23 + $0x5a8] ss:$16 sps:$4 sm:$0xff]  }
  0xc1   : > { %3467 = vmatprep.subr.bf16.mxu0 %v5235_v4  ;;  %3811 = vmatprep.subr.bf16.mxu1 %v5238_v5  ;;  %v5325_v4 = vld [vmem:[%s6074_s23 + $0x5c4] ss:$16 sps:$4 sm:$0xff]   ;;  %v5328_v5 = vld [vmem:[%s6074_s23 + $0x5cc] ss:$16 sps:$4 sm:$0xff]  }
  0xc4   : > { %3468 = vmatpush1.bf16.msra.mxu0 %v5233_v6  ;;  %3812 = vmatpush1.bf16.msra.mxu1 %v5236_v7  ;;  %v5323_v6 = vld [vmem:[%s6074_s23 + $0x5c0] ss:$16 sps:$4 sm:$0xff]   ;;  %v5326_v7 = vld [vmem:[%s6074_s23 + $0x5c8] ss:$16 sps:$4 sm:$0xff]  }
  0xc5   : > { %3480 = vmatprep.subr.bf16.mxu0 %v5241_v8  ;;  %3824 = vmatprep.subr.bf16.mxu1 %v5244_v9  ;;  %v5331_v8 = vld [vmem:[%s6074_s23 + $0x5e4] ss:$16 sps:$4 sm:$0xff]   ;;  %v5334_v9 = vld [vmem:[%s6074_s23 + $0x5ec] ss:$16 sps:$4 sm:$0xff]  }
  0xc7   : > { %3470 = vmatmul.mubr.bf16.vlgmr.msra.gmra.mrb[0].mxu0 %v4377_v10  ;;  %3814 = vmatmul.mubr.bf16.vlgmr.msra.gmra.mrb[0].mxu1 %v4377_v10  ;;  %v5329_v10 = vld [vmem:[%s6074_s23 + $0x5e0] ss:$16 sps:$4 sm:$0xff]  }
  0xc8   : > { %3481 = vmatpush1.bf16.msra.mxu0 %v5239_v11  ;;  %3825 = vmatpush1.bf16.msra.mxu1 %v5242_v12  ;;  %v5332_v11 = vld [vmem:[%s6074_s23 + $0x5e8] ss:$16 sps:$4 sm:$0xff]   ;;  %v5337_v12 = vld [vmem:[%s6074_s23 + $0x604] ss:$16 sps:$4 sm:$0xff]  }
  0xc9   : > { %3482 = vmatprep.subr.bf16.mxu0 %v5247_v13  ;;  %3826 = vmatprep.subr.bf16.mxu1 %v5250_v14  ;;  %v5340_v13 = vld [vmem:[%s6074_s23 + $0x60c] ss:$16 sps:$4 sm:$0xff]   ;;  %v5335_v14 = vld [vmem:[%s6074_s23 + $0x600] ss:$16 sps:$4 sm:$0xff]  }
  0xca   : > { %3512 = vmatprep.mubr.bf16.mxu0 %v4380_v17  ;;  %3856 = vmatprep.mubr.bf16.mxu1 %v4380_v17  ;;  %v5338_v17 = vld [vmem:[%s6074_s23 + $0x608] ss:$16 sps:$4 sm:$0xff]  }
  0xcc   : > { %3483 = vmatpush1.bf16.msra.mxu0 %v5245_v18  ;;  %3827 = vmatpush1.bf16.msra.mxu1 %v5248_v19  ;;  %v4379_v18 = vcombine.low %v6224_v15, %v6227_v16  ;;  %v6296_v19 = vld [vmem:[%s6057_s25 + $0x18] sm:$0xff]  ;;  %v5341_v15 = vld [vmem:[%s6074_s23 + $0x620] ss:$16 sps:$4 sm:$0xff]  }
  0xcd   : > { %3484 = vmatprep.subr.bf16.mxu0 %v5253_v20  ;;  %3828 = vmatprep.subr.bf16.mxu1 %v5256_v21  ;;  %v6299_v20 = vld [vmem:[%s6057_s25 + $0x58] sm:$0xff]  ;;  %v5343_v21 = vld [vmem:[%s6074_s23 + $0x624] ss:$16 sps:$4 sm:$0xff]  }
  0xce   : > { %v5344_v16 = vld [vmem:[%s6074_s23 + $0x628] ss:$16 sps:$4 sm:$0xff]  }
  0xd0   : > { %3485 = vmatpush1.bf16.msra.mxu0 %v5251_v22  ;;  %3829 = vmatpush1.bf16.msra.mxu1 %v5254_v23  ;;  %v5346_v22 = vld [vmem:[%s6074_s23 + $0x62c] ss:$16 sps:$4 sm:$0xff]   ;;  %v4382_v23 = vcombine.high %v6296_v19, %v6299_v20 }
  0xd1   : > { %3486 = vmatprep.subr.bf16.mxu0 %v5259_v24  ;;  %3830 = vmatprep.subr.bf16.mxu1 %v5262_v25  ;;  %v5349_v24 = vld [vmem:[%s6074_s23 + $0x644] ss:$16 sps:$4 sm:$0xff]   ;;  %v5352_v25 = vld [vmem:[%s6074_s23 + $0x64c] ss:$16 sps:$4 sm:$0xff]  }
  0xd4   : > { %3487 = vmatpush1.bf16.msra.mxu0 %v5257_v26  ;;  %3831 = vmatpush1.bf16.msra.mxu1 %v5260_v27  ;;  %v5347_v26 = vld [vmem:[%s6074_s23 + $0x640] ss:$16 sps:$4 sm:$0xff]   ;;  %v5350_v27 = vld [vmem:[%s6074_s23 + $0x648] ss:$16 sps:$4 sm:$0xff]  }
  0xd5   : > { %3488 = vmatprep.subr.bf16.mxu0 %v5265_v28  ;;  %3832 = vmatprep.subr.bf16.mxu1 %v5268_v29  ;;  %v5355_v28 = vld [vmem:[%s6074_s23 + $0x664] ss:$16 sps:$4 sm:$0xff]   ;;  %v5358_v29 = vld [vmem:[%s6074_s23 + $0x66c] ss:$16 sps:$4 sm:$0xff]  }
  0xd8   : > { %3489 = vmatpush1.bf16.msra.mxu0 %v5263_v30  ;;  %3833 = vmatpush1.bf16.msra.mxu1 %v5266_v31  ;;  %v5353_v30 = vld [vmem:[%s6074_s23 + $0x660] ss:$16 sps:$4 sm:$0xff]   ;;  %v5356_v31 = vld [vmem:[%s6074_s23 + $0x668] ss:$16 sps:$4 sm:$0xff]  }
  0xd9   : > { %3490 = vmatprep.subr.bf16.mxu0 %v5271_v32  ;;  %3834 = vmatprep.subr.bf16.mxu1 %v5274_v33  ;;  %v5361_v32 = vld [vmem:[%s6074_s23 + $0x684] ss:$16 sps:$4 sm:$0xff]   ;;  %v5364_v33 = vld [vmem:[%s6074_s23 + $0x68c] ss:$16 sps:$4 sm:$0xff]  }
  0xdc   : > { %3491 = vmatpush1.bf16.msra.mxu0 %v5269_v34  ;;  %3835 = vmatpush1.bf16.msra.mxu1 %v5272_v35  ;;  %v5359_v34 = vld [vmem:[%s6074_s23 + $0x680] ss:$16 sps:$4 sm:$0xff]   ;;  %v5362_v35 = vld [vmem:[%s6074_s23 + $0x688] ss:$16 sps:$4 sm:$0xff]  }
  0xdd   : > { %3492 = vmatprep.subr.bf16.mxu0 %v5277_v36  ;;  %3836 = vmatprep.subr.bf16.mxu1 %v5280_v37  ;;  %v5367_v36 = vld [vmem:[%s6074_s23 + $0x6a4] ss:$16 sps:$4 sm:$0xff]   ;;  %v5370_v37 = vld [vmem:[%s6074_s23 + $0x6ac] ss:$16 sps:$4 sm:$0xff]  }
  0xe0   : > { %3493 = vmatpush1.bf16.msra.mxu0 %v5275_v38  ;;  %3837 = vmatpush1.bf16.msra.mxu1 %v5278_v39  ;;  %v5365_v38 = vld [vmem:[%s6074_s23 + $0x6a0] ss:$16 sps:$4 sm:$0xff]   ;;  %v5368_v39 = vld [vmem:[%s6074_s23 + $0x6a8] ss:$16 sps:$4 sm:$0xff]  }
  0xe1   : > { %3494 = vmatprep.subr.bf16.mxu0 %v5283_v40  ;;  %3838 = vmatprep.subr.bf16.mxu1 %v5286_v41  ;;  %v5373_v40 = vld [vmem:[%s6074_s23 + $0x6c4] ss:$16 sps:$4 sm:$0xff]   ;;  %v5376_v41 = vld [vmem:[%s6074_s23 + $0x6cc] ss:$16 sps:$4 sm:$0xff]  }
  0xe4   : > { %3495 = vmatpush1.bf16.msra.mxu0 %v5281_v42  ;;  %3839 = vmatpush1.bf16.msra.mxu1 %v5284_v43  ;;  %v5371_v42 = vld [vmem:[%s6074_s23 + $0x6c0] ss:$16 sps:$4 sm:$0xff]   ;;  %v5374_v43 = vld [vmem:[%s6074_s23 + $0x6c8] ss:$16 sps:$4 sm:$0xff]  }
  0xe5   : > { %3496 = vmatprep.subr.bf16.mxu0 %v5289_v44  ;;  %3840 = vmatprep.subr.bf16.mxu1 %v5292_v45  ;;  %v5379_v44 = vld [vmem:[%s6074_s23 + $0x6e4] ss:$16 sps:$4 sm:$0xff]   ;;  %v5382_v45 = vld [vmem:[%s6074_s23 + $0x6ec] ss:$16 sps:$4 sm:$0xff]  }
  0xe8   : > { %3497 = vmatpush1.bf16.msra.mxu0 %v5287_v46  ;;  %3841 = vmatpush1.bf16.msra.mxu1 %v5290_v47  ;;  %v5377_v46 = vld [vmem:[%s6074_s23 + $0x6e0] ss:$16 sps:$4 sm:$0xff]   ;;  %v5380_v47 = vld [vmem:[%s6074_s23 + $0x6e8] ss:$16 sps:$4 sm:$0xff]  }
  0xe9   : > { %3498 = vmatprep.subr.bf16.mxu0 %v5295_v48  ;;  %3842 = vmatprep.subr.bf16.mxu1 %v5298_v49  ;;  %v5385_v48 = vld [vmem:[%s6074_s23 + $0x704] ss:$16 sps:$4 sm:$0xff]   ;;  %v5388_v49 = vld [vmem:[%s6074_s23 + $0x70c] ss:$16 sps:$4 sm:$0xff]  }
  0xec   : > { %3499 = vmatpush1.bf16.msra.mxu0 %v5293_v50  ;;  %3843 = vmatpush1.bf16.msra.mxu1 %v5296_v51  ;;  %v5383_v50 = vld [vmem:[%s6074_s23 + $0x700] ss:$16 sps:$4 sm:$0xff]   ;;  %v5386_v51 = vld [vmem:[%s6074_s23 + $0x708] ss:$16 sps:$4 sm:$0xff]  }
  0xed   : > { %3500 = vmatprep.subr.bf16.mxu0 %v5301_v52  ;;  %3844 = vmatprep.subr.bf16.mxu1 %v5304_v53  ;;  %v5391_v52 = vld [vmem:[%s6074_s23 + $0x724] ss:$16 sps:$4 sm:$0xff]   ;;  %v5394_v53 = vld [vmem:[%s6074_s23 + $0x72c] ss:$16 sps:$4 sm:$0xff]  }
  0xf0   : > { %3501 = vmatpush1.bf16.msra.mxu0 %v5299_v54  ;;  %3845 = vmatpush1.bf16.msra.mxu1 %v5302_v55  ;;  %v5389_v54 = vld [vmem:[%s6074_s23 + $0x720] ss:$16 sps:$4 sm:$0xff]   ;;  %v5392_v55 = vld [vmem:[%s6074_s23 + $0x728] ss:$16 sps:$4 sm:$0xff]  }
  0xf1   : > { %3502 = vmatprep.subr.bf16.mxu0 %v5307_v56  ;;  %3846 = vmatprep.subr.bf16.mxu1 %v5310_v57  ;;  %v5397_v56 = vld [vmem:[%s6074_s23 + $0x744] ss:$16 sps:$4 sm:$0xff]   ;;  %v5400_v57 = vld [vmem:[%s6074_s23 + $0x74c] ss:$16 sps:$4 sm:$0xff]  }
  0xf4   : > { %3503 = vmatpush1.bf16.msra.mxu0 %v5305_v58  ;;  %3847 = vmatpush1.bf16.msra.mxu1 %v5308_v59  ;;  %v5395_v58 = vld [vmem:[%s6074_s23 + $0x740] ss:$16 sps:$4 sm:$0xff]   ;;  %v5398_v59 = vld [vmem:[%s6074_s23 + $0x748] ss:$16 sps:$4 sm:$0xff]  }
  0xf5   : > { %3504 = vmatprep.subr.bf16.mxu0 %v5313_v60  ;;  %3848 = vmatprep.subr.bf16.mxu1 %v5316_v61  ;;  %v5403_v60 = vld [vmem:[%s6074_s23 + $0x764] ss:$16 sps:$4 sm:$0xff]   ;;  %v5406_v61 = vld [vmem:[%s6074_s23 + $0x76c] ss:$16 sps:$4 sm:$0xff]  }
  0xf8   : > { %3505 = vmatpush1.bf16.msra.mxu0 %v5311_v62  ;;  %3849 = vmatpush1.bf16.msra.mxu1 %v5314_v63  ;;  %v5401_v62 = vld [vmem:[%s6074_s23 + $0x760] ss:$16 sps:$4 sm:$0xff]   ;;  %v5404_v63 = vld [vmem:[%s6074_s23 + $0x768] ss:$16 sps:$4 sm:$0xff]  }
  0xf9   : > { %3506 = vmatprep.subr.bf16.mxu0 %v5319_v0  ;;  %3850 = vmatprep.subr.bf16.mxu1 %v5322_v1  ;;  %v5409_v0 = vld [vmem:[%s6074_s23 + $0x784] ss:$16 sps:$4 sm:$0xff]   ;;  %v5412_v1 = vld [vmem:[%s6074_s23 + $0x78c] ss:$16 sps:$4 sm:$0xff]  }
  0xfc   : > { %3507 = vmatpush1.bf16.msra.mxu0 %v5317_v2  ;;  %3851 = vmatpush1.bf16.msra.mxu1 %v5320_v3  ;;  %v5407_v2 = vld [vmem:[%s6074_s23 + $0x780] ss:$16 sps:$4 sm:$0xff]   ;;  %v5410_v3 = vld [vmem:[%s6074_s23 + $0x788] ss:$16 sps:$4 sm:$0xff]  }
  0xfd   : > { %3508 = vmatprep.subr.bf16.mxu0 %v5325_v4  ;;  %3852 = vmatprep.subr.bf16.mxu1 %v5328_v5  ;;  %v5415_v4 = vld [vmem:[%s6074_s23 + $0x7a4] ss:$16 sps:$4 sm:$0xff]   ;;  %v5418_v5 = vld [vmem:[%s6074_s23 + $0x7ac] ss:$16 sps:$4 sm:$0xff]  }
 0x100   : > { %3509 = vmatpush1.bf16.msra.mxu0 %v5323_v6  ;;  %3853 = vmatpush1.bf16.msra.mxu1 %v5326_v7  ;;  %v5413_v6 = vld [vmem:[%s6074_s23 + $0x7a0] ss:$16 sps:$4 sm:$0xff]   ;;  %v5416_v7 = vld [vmem:[%s6074_s23 + $0x7a8] ss:$16 sps:$4 sm:$0xff]  }
 0x101   : > { %3510 = vmatprep.subr.bf16.mxu0 %v5331_v8  ;;  %3854 = vmatprep.subr.bf16.mxu1 %v5334_v9  ;;  %v5421_v8 = vld [vmem:[%s6074_s23 + $0x7c4] ss:$16 sps:$4 sm:$0xff]   ;;  %v5424_v9 = vld [vmem:[%s6074_s23 + $0x7cc] ss:$16 sps:$4 sm:$0xff]  }
 0x104   : > { %3511 = vmatpush1.bf16.msra.mxu0 %v5329_v10  ;;  %3855 = vmatpush1.bf16.msra.mxu1 %v5332_v11  ;;  %v5419_v10 = vld [vmem:[%s6074_s23 + $0x7c0] ss:$16 sps:$4 sm:$0xff]   ;;  %v5422_v11 = vld [vmem:[%s6074_s23 + $0x7c8] ss:$16 sps:$4 sm:$0xff]  }
 0x105   : > { %3523 = vmatprep.subr.bf16.mxu0 %v5337_v12  ;;  %3867 = vmatprep.subr.bf16.mxu1 %v5340_v13  ;;  %v5427_v12 = vld [vmem:[%s6074_s23 + $0x7e4] ss:$16 sps:$4 sm:$0xff]   ;;  %v5430_v13 = vld [vmem:[%s6074_s23 + $0x7ec] ss:$16 sps:$4 sm:$0xff]  }
 0x107   : > { %3513 = vmatmul.mubr.bf16.vlgmr.msra.gmra.mrb[0].mxu0 %v4379_v18  ;;  %3857 = vmatmul.mubr.bf16.vlgmr.msra.gmra.mrb[0].mxu1 %v4379_v18  ;;  %v5433_v18 = vld [vmem:[%s6074_s23 + $0x804] ss:$16 sps:$4 sm:$0xff]  }
 0x108   : > { %3524 = vmatpush1.bf16.msra.mxu0 %v5335_v14  ;;  %3868 = vmatpush1.bf16.msra.mxu1 %v5338_v17  ;;  %v5425_v14 = vld [vmem:[%s6074_s23 + $0x7e0] ss:$16 sps:$4 sm:$0xff]   ;;  %v5428_v17 = vld [vmem:[%s6074_s23 + $0x7e8] ss:$16 sps:$4 sm:$0xff]  }
 0x109   : > { %3525 = vmatprep.subr.bf16.mxu0 %v5343_v21  ;;  %3869 = vmatprep.subr.bf16.mxu1 %v5346_v22  ;;  %v5436_v21 = vld [vmem:[%s6074_s23 + $0x80c] ss:$16 sps:$4 sm:$0xff]   ;;  %v6366_v22 = vld [vmem:[%s6057_s25 + $0x20] sm:$0xff] }
 0x10a   : > { %3555 = vmatprep.mubr.bf16.mxu0 %v4382_v23  ;;  %3899 = vmatprep.mubr.bf16.mxu1 %v4382_v23  ;;  %v4381_v23 = vcombine.low %v6296_v19, %v6299_v20  ;;  %v5437_v19 = vld [vmem:[%s6074_s23 + $0x820] ss:$16 sps:$4 sm:$0xff]   ;;  %v5440_v20 = vld [vmem:[%s6074_s23 + $0x828] ss:$16 sps:$4 sm:$0xff]  }
 0x10c   : > { %3526 = vmatpush1.bf16.msra.mxu0 %v5341_v15  ;;  %3870 = vmatpush1.bf16.msra.mxu1 %v5344_v16  ;;  %v6371_v15 = vld [vmem:[%s6057_s25 + $0x60] sm:$0xff] }
 0x10d   : > { %3527 = vmatprep.subr.bf16.mxu0 %v5349_v24  ;;  %3871 = vmatprep.subr.bf16.mxu1 %v5352_v25  ;;  %v5431_v16 = vld [vmem:[%s6074_s23 + $0x800] ss:$16 sps:$4 sm:$0xff]   ;;  %v5434_v24 = vld [vmem:[%s6074_s23 + $0x808] ss:$16 sps:$4 sm:$0xff]   ;;  %v5439_v25 = vld [vmem:[%s6074_s23 + $0x824] ss:$16 sps:$4 sm:$0xff]  }
 0x110   : > { %3528 = vmatpush1.bf16.msra.mxu0 %v5347_v26  ;;  %3872 = vmatpush1.bf16.msra.mxu1 %v5350_v27  ;;  %v5442_v26 = vld [vmem:[%s6074_s23 + $0x82c] ss:$16 sps:$4 sm:$0xff]   ;;  %v4384_v27 = vcombine.high %v6366_v22, %v6371_v15 }
 0x111   : > { %3529 = vmatprep.subr.bf16.mxu0 %v5355_v28  ;;  %3873 = vmatprep.subr.bf16.mxu1 %v5358_v29  ;;  %v5445_v28 = vld [vmem:[%s6074_s23 + $0x844] ss:$16 sps:$4 sm:$0xff]   ;;  %v5448_v29 = vld [vmem:[%s6074_s23 + $0x84c] ss:$16 sps:$4 sm:$0xff]  }
 0x114   : > { %3530 = vmatpush1.bf16.msra.mxu0 %v5353_v30  ;;  %3874 = vmatpush1.bf16.msra.mxu1 %v5356_v31  ;;  %v5443_v30 = vld [vmem:[%s6074_s23 + $0x840] ss:$16 sps:$4 sm:$0xff]   ;;  %v5446_v31 = vld [vmem:[%s6074_s23 + $0x848] ss:$16 sps:$4 sm:$0xff]  }
 0x115   : > { %3531 = vmatprep.subr.bf16.mxu0 %v5361_v32  ;;  %3875 = vmatprep.subr.bf16.mxu1 %v5364_v33  ;;  %v5451_v32 = vld [vmem:[%s6074_s23 + $0x864] ss:$16 sps:$4 sm:$0xff]   ;;  %v5454_v33 = vld [vmem:[%s6074_s23 + $0x86c] ss:$16 sps:$4 sm:$0xff]  }
 0x118   : > { %3532 = vmatpush1.bf16.msra.mxu0 %v5359_v34  ;;  %3876 = vmatpush1.bf16.msra.mxu1 %v5362_v35  ;;  %v5449_v34 = vld [vmem:[%s6074_s23 + $0x860] ss:$16 sps:$4 sm:$0xff]   ;;  %v5452_v35 = vld [vmem:[%s6074_s23 + $0x868] ss:$16 sps:$4 sm:$0xff]  }
 0x119   : > { %3533 = vmatprep.subr.bf16.mxu0 %v5367_v36  ;;  %3877 = vmatprep.subr.bf16.mxu1 %v5370_v37  ;;  %v5457_v36 = vld [vmem:[%s6074_s23 + $0x884] ss:$16 sps:$4 sm:$0xff]   ;;  %v5460_v37 = vld [vmem:[%s6074_s23 + $0x88c] ss:$16 sps:$4 sm:$0xff]  }
 0x11c   : > { %3534 = vmatpush1.bf16.msra.mxu0 %v5365_v38  ;;  %3878 = vmatpush1.bf16.msra.mxu1 %v5368_v39  ;;  %v5455_v38 = vld [vmem:[%s6074_s23 + $0x880] ss:$16 sps:$4 sm:$0xff]   ;;  %v5458_v39 = vld [vmem:[%s6074_s23 + $0x888] ss:$16 sps:$4 sm:$0xff]  }
 0x11d   : > { %3535 = vmatprep.subr.bf16.mxu0 %v5373_v40  ;;  %3879 = vmatprep.subr.bf16.mxu1 %v5376_v41  ;;  %v5463_v40 = vld [vmem:[%s6074_s23 + $0x8a4] ss:$16 sps:$4 sm:$0xff]   ;;  %v5466_v41 = vld [vmem:[%s6074_s23 + $0x8ac] ss:$16 sps:$4 sm:$0xff]  }
 0x120   : > { %3536 = vmatpush1.bf16.msra.mxu0 %v5371_v42  ;;  %3880 = vmatpush1.bf16.msra.mxu1 %v5374_v43  ;;  %v5461_v42 = vld [vmem:[%s6074_s23 + $0x8a0] ss:$16 sps:$4 sm:$0xff]   ;;  %v5464_v43 = vld [vmem:[%s6074_s23 + $0x8a8] ss:$16 sps:$4 sm:$0xff]  }
 0x121   : > { %3537 = vmatprep.subr.bf16.mxu0 %v5379_v44  ;;  %3881 = vmatprep.subr.bf16.mxu1 %v5382_v45  ;;  %v5469_v44 = vld [vmem:[%s6074_s23 + $0x8c4] ss:$16 sps:$4 sm:$0xff]   ;;  %v5472_v45 = vld [vmem:[%s6074_s23 + $0x8cc] ss:$16 sps:$4 sm:$0xff]  }
 0x124   : > { %3538 = vmatpush1.bf16.msra.mxu0 %v5377_v46  ;;  %3882 = vmatpush1.bf16.msra.mxu1 %v5380_v47  ;;  %v5467_v46 = vld [vmem:[%s6074_s23 + $0x8c0] ss:$16 sps:$4 sm:$0xff]   ;;  %v5470_v47 = vld [vmem:[%s6074_s23 + $0x8c8] ss:$16 sps:$4 sm:$0xff]  }
 0x125   : > { %3539 = vmatprep.subr.bf16.mxu0 %v5385_v48  ;;  %3883 = vmatprep.subr.bf16.mxu1 %v5388_v49  ;;  %v5475_v48 = vld [vmem:[%s6074_s23 + $0x8e4] ss:$16 sps:$4 sm:$0xff]   ;;  %v5478_v49 = vld [vmem:[%s6074_s23 + $0x8ec] ss:$16 sps:$4 sm:$0xff]  }
 0x128   : > { %3540 = vmatpush1.bf16.msra.mxu0 %v5383_v50  ;;  %3884 = vmatpush1.bf16.msra.mxu1 %v5386_v51  ;;  %v5473_v50 = vld [vmem:[%s6074_s23 + $0x8e0] ss:$16 sps:$4 sm:$0xff]   ;;  %v5476_v51 = vld [vmem:[%s6074_s23 + $0x8e8] ss:$16 sps:$4 sm:$0xff]  }
 0x129   : > { %3541 = vmatprep.subr.bf16.mxu0 %v5391_v52  ;;  %3885 = vmatprep.subr.bf16.mxu1 %v5394_v53  ;;  %v5481_v52 = vld [vmem:[%s6074_s23 + $0x904] ss:$16 sps:$4 sm:$0xff]   ;;  %v5484_v53 = vld [vmem:[%s6074_s23 + $0x90c] ss:$16 sps:$4 sm:$0xff]  }
 0x12c   : > { %3542 = vmatpush1.bf16.msra.mxu0 %v5389_v54  ;;  %3886 = vmatpush1.bf16.msra.mxu1 %v5392_v55  ;;  %v5479_v54 = vld [vmem:[%s6074_s23 + $0x900] ss:$16 sps:$4 sm:$0xff]   ;;  %v5482_v55 = vld [vmem:[%s6074_s23 + $0x908] ss:$16 sps:$4 sm:$0xff]  }
 0x12d   : > { %3543 = vmatprep.subr.bf16.mxu0 %v5397_v56  ;;  %3887 = vmatprep.subr.bf16.mxu1 %v5400_v57  ;;  %v5487_v56 = vld [vmem:[%s6074_s23 + $0x924] ss:$16 sps:$4 sm:$0xff]   ;;  %v5490_v57 = vld [vmem:[%s6074_s23 + $0x92c] ss:$16 sps:$4 sm:$0xff]  }
 0x130   : > { %3544 = vmatpush1.bf16.msra.mxu0 %v5395_v58  ;;  %3888 = vmatpush1.bf16.msra.mxu1 %v5398_v59  ;;  %v5485_v58 = vld [vmem:[%s6074_s23 + $0x920] ss:$16 sps:$4 sm:$0xff]   ;;  %v5488_v59 = vld [vmem:[%s6074_s23 + $0x928] ss:$16 sps:$4 sm:$0xff]  }
 0x131   : > { %3545 = vmatprep.subr.bf16.mxu0 %v5403_v60  ;;  %3889 = vmatprep.subr.bf16.mxu1 %v5406_v61  ;;  %v5493_v60 = vld [vmem:[%s6074_s23 + $0x944] ss:$16 sps:$4 sm:$0xff]   ;;  %v5496_v61 = vld [vmem:[%s6074_s23 + $0x94c] ss:$16 sps:$4 sm:$0xff]  }
 0x134   : > { %3546 = vmatpush1.bf16.msra.mxu0 %v5401_v62  ;;  %3890 = vmatpush1.bf16.msra.mxu1 %v5404_v63  ;;  %v5491_v62 = vld [vmem:[%s6074_s23 + $0x940] ss:$16 sps:$4 sm:$0xff]   ;;  %v5494_v63 = vld [vmem:[%s6074_s23 + $0x948] ss:$16 sps:$4 sm:$0xff]  }
 0x135   : > { %3547 = vmatprep.subr.bf16.mxu0 %v5409_v0  ;;  %3891 = vmatprep.subr.bf16.mxu1 %v5412_v1  ;;  %v5499_v0 = vld [vmem:[%s6074_s23 + $0x964] ss:$16 sps:$4 sm:$0xff]   ;;  %v5502_v1 = vld [vmem:[%s6074_s23 + $0x96c] ss:$16 sps:$4 sm:$0xff]  }
 0x138   : > { %3548 = vmatpush1.bf16.msra.mxu0 %v5407_v2  ;;  %3892 = vmatpush1.bf16.msra.mxu1 %v5410_v3  ;;  %v5497_v2 = vld [vmem:[%s6074_s23 + $0x960] ss:$16 sps:$4 sm:$0xff]   ;;  %v5500_v3 = vld [vmem:[%s6074_s23 + $0x968] ss:$16 sps:$4 sm:$0xff]  }
 0x139   : > { %3549 = vmatprep.subr.bf16.mxu0 %v5415_v4  ;;  %3893 = vmatprep.subr.bf16.mxu1 %v5418_v5  ;;  %v5505_v4 = vld [vmem:[%s6074_s23 + $0x984] ss:$16 sps:$4 sm:$0xff]   ;;  %v5508_v5 = vld [vmem:[%s6074_s23 + $0x98c] ss:$16 sps:$4 sm:$0xff]  }
 0x13c   : > { %3550 = vmatpush1.bf16.msra.mxu0 %v5413_v6  ;;  %3894 = vmatpush1.bf16.msra.mxu1 %v5416_v7  ;;  %v5503_v6 = vld [vmem:[%s6074_s23 + $0x980] ss:$16 sps:$4 sm:$0xff]   ;;  %v5506_v7 = vld [vmem:[%s6074_s23 + $0x988] ss:$16 sps:$4 sm:$0xff]  }
 0x13d   : > { %3551 = vmatprep.subr.bf16.mxu0 %v5421_v8  ;;  %3895 = vmatprep.subr.bf16.mxu1 %v5424_v9  ;;  %v5511_v8 = vld [vmem:[%s6074_s23 + $0x9a4] ss:$16 sps:$4 sm:$0xff]   ;;  %v5514_v9 = vld [vmem:[%s6074_s23 + $0x9ac] ss:$16 sps:$4 sm:$0xff]  }
 0x140   : > { %3552 = vmatpush1.bf16.msra.mxu0 %v5419_v10  ;;  %3896 = vmatpush1.bf16.msra.mxu1 %v5422_v11  ;;  %v5509_v10 = vld [vmem:[%s6074_s23 + $0x9a0] ss:$16 sps:$4 sm:$0xff]   ;;  %v5512_v11 = vld [vmem:[%s6074_s23 + $0x9a8] ss:$16 sps:$4 sm:$0xff]  }
 0x141   : > { %3553 = vmatprep.subr.bf16.mxu0 %v5427_v12  ;;  %3897 = vmatprep.subr.bf16.mxu1 %v5430_v13  ;;  %v5517_v12 = vld [vmem:[%s6074_s23 + $0x9c4] ss:$16 sps:$4 sm:$0xff]   ;;  %v5520_v13 = vld [vmem:[%s6074_s23 + $0x9cc] ss:$16 sps:$4 sm:$0xff]  }
 0x144   : > { %3554 = vmatpush1.bf16.msra.mxu0 %v5425_v14  ;;  %3898 = vmatpush1.bf16.msra.mxu1 %v5428_v17  ;;  %v5515_v14 = vld [vmem:[%s6074_s23 + $0x9c0] ss:$16 sps:$4 sm:$0xff]   ;;  %v5518_v17 = vld [vmem:[%s6074_s23 + $0x9c8] ss:$16 sps:$4 sm:$0xff]  }
 0x145   : > { %3566 = vmatprep.subr.bf16.mxu0 %v5433_v18  ;;  %3910 = vmatprep.subr.bf16.mxu1 %v5436_v21  ;;  %v5523_v18 = vld [vmem:[%s6074_s23 + $0x9e4] ss:$16 sps:$4 sm:$0xff]   ;;  %v5526_v21 = vld [vmem:[%s6074_s23 + $0x9ec] ss:$16 sps:$4 sm:$0xff]  }
 0x147   : > { %3556 = vmatmul.mubr.bf16.vlgmr.msra.gmra.mrb[0].mxu0 %v4381_v23  ;;  %3900 = vmatmul.mubr.bf16.vlgmr.msra.gmra.mrb[0].mxu1 %v4381_v23  ;;  %v5521_v23 = vld [vmem:[%s6074_s23 + $0x9e0] ss:$16 sps:$4 sm:$0xff]  }
 0x148   : > { %3567 = vmatpush1.bf16.msra.mxu0 %v5431_v16  ;;  %3911 = vmatpush1.bf16.msra.mxu1 %v5434_v24  ;;  %v5524_v16 = vld [vmem:[%s6074_s23 + $0x9e8] ss:$16 sps:$4 sm:$0xff]   ;;  %v5529_v24 = vld [vmem:[%s6074_s23 + $0xa04] ss:$16 sps:$4 sm:$0xff]  }
 0x149   : > { %3568 = vmatprep.subr.bf16.mxu0 %v5439_v25  ;;  %3912 = vmatprep.subr.bf16.mxu1 %v5442_v26  ;;  %v5532_v25 = vld [vmem:[%s6074_s23 + $0xa0c] ss:$16 sps:$4 sm:$0xff]  }
 0x14a   : > { %3598 = vmatprep.mubr.bf16.mxu0 %v4384_v27  ;;  %3942 = vmatprep.mubr.bf16.mxu1 %v4384_v27  ;;  %v6440_v26 = vld [vmem:[%s6057_s25 + $0x28] sm:$0xff] }
 0x14b   : > { %v6443_v27 = vld [vmem:[%s6057_s25 + $0x68] sm:$0xff] }
 0x14c   : > { %3569 = vmatpush1.bf16.msra.mxu0 %v5437_v19  ;;  %3913 = vmatpush1.bf16.msra.mxu1 %v5440_v20  ;;  %v4383_v19 = vcombine.low %v6366_v22, %v6371_v15  ;;  %v5527_v20 = vld [vmem:[%s6074_s23 + $0xa00] ss:$16 sps:$4 sm:$0xff]   ;;  %v5536_v15 = vld [vmem:[%s6074_s23 + $0xa28] ss:$16 sps:$4 sm:$0xff]  }
 0x14d   : > { %3570 = vmatprep.subr.bf16.mxu0 %v5445_v28  ;;  %3914 = vmatprep.subr.bf16.mxu1 %v5448_v29  ;;  %v5530_v28 = vld [vmem:[%s6074_s23 + $0xa08] ss:$16 sps:$4 sm:$0xff]   ;;  %v5535_v29 = vld [vmem:[%s6074_s23 + $0xa24] ss:$16 sps:$4 sm:$0xff]   ;;  %v5533_v22 = vld [vmem:[%s6074_s23 + $0xa20] ss:$16 sps:$4 sm:$0xff]  }
 0x150   : > { %3571 = vmatpush1.bf16.msra.mxu0 %v5443_v30  ;;  %3915 = vmatpush1.bf16.msra.mxu1 %v5446_v31  ;;  %v5538_v30 = vld [vmem:[%s6074_s23 + $0xa2c] ss:$16 sps:$4 sm:$0xff]   ;;  %v4386_v31 = vcombine.high %v6440_v26, %v6443_v27 }
 0x151   : > { %3572 = vmatprep.subr.bf16.mxu0 %v5451_v32  ;;  %3916 = vmatprep.subr.bf16.mxu1 %v5454_v33  ;;  %v5541_v32 = vld [vmem:[%s6074_s23 + $0xa44] ss:$16 sps:$4 sm:$0xff]   ;;  %v5544_v33 = vld [vmem:[%s6074_s23 + $0xa4c] ss:$16 sps:$4 sm:$0xff]  }
 0x154   : > { %3573 = vmatpush1.bf16.msra.mxu0 %v5449_v34  ;;  %3917 = vmatpush1.bf16.msra.mxu1 %v5452_v35  ;;  %v5539_v34 = vld [vmem:[%s6074_s23 + $0xa40] ss:$16 sps:$4 sm:$0xff]   ;;  %v5542_v35 = vld [vmem:[%s6074_s23 + $0xa48] ss:$16 sps:$4 sm:$0xff]  }
 0x155   : > { %3574 = vmatprep.subr.bf16.mxu0 %v5457_v36  ;;  %3918 = vmatprep.subr.bf16.mxu1 %v5460_v37  ;;  %v5547_v36 = vld [vmem:[%s6074_s23 + $0xa64] ss:$16 sps:$4 sm:$0xff]   ;;  %v5550_v37 = vld [vmem:[%s6074_s23 + $0xa6c] ss:$16 sps:$4 sm:$0xff]  }
 0x158   : > { %3575 = vmatpush1.bf16.msra.mxu0 %v5455_v38  ;;  %3919 = vmatpush1.bf16.msra.mxu1 %v5458_v39  ;;  %v5545_v38 = vld [vmem:[%s6074_s23 + $0xa60] ss:$16 sps:$4 sm:$0xff]   ;;  %v5548_v39 = vld [vmem:[%s6074_s23 + $0xa68] ss:$16 sps:$4 sm:$0xff]  }
 0x159   : > { %3576 = vmatprep.subr.bf16.mxu0 %v5463_v40  ;;  %3920 = vmatprep.subr.bf16.mxu1 %v5466_v41  ;;  %v5553_v40 = vld [vmem:[%s6074_s23 + $0xa84] ss:$16 sps:$4 sm:$0xff]   ;;  %v5556_v41 = vld [vmem:[%s6074_s23 + $0xa8c] ss:$16 sps:$4 sm:$0xff]  }
 0x15c   : > { %3577 = vmatpush1.bf16.msra.mxu0 %v5461_v42  ;;  %3921 = vmatpush1.bf16.msra.mxu1 %v5464_v43  ;;  %v5551_v42 = vld [vmem:[%s6074_s23 + $0xa80] ss:$16 sps:$4 sm:$0xff]   ;;  %v5554_v43 = vld [vmem:[%s6074_s23 + $0xa88] ss:$16 sps:$4 sm:$0xff]  }
 0x15d   : > { %3578 = vmatprep.subr.bf16.mxu0 %v5469_v44  ;;  %3922 = vmatprep.subr.bf16.mxu1 %v5472_v45  ;;  %v5559_v44 = vld [vmem:[%s6074_s23 + $0xaa4] ss:$16 sps:$4 sm:$0xff]   ;;  %v5562_v45 = vld [vmem:[%s6074_s23 + $0xaac] ss:$16 sps:$4 sm:$0xff]  }
 0x160   : > { %3579 = vmatpush1.bf16.msra.mxu0 %v5467_v46  ;;  %3923 = vmatpush1.bf16.msra.mxu1 %v5470_v47  ;;  %v5557_v46 = vld [vmem:[%s6074_s23 + $0xaa0] ss:$16 sps:$4 sm:$0xff]   ;;  %v5560_v47 = vld [vmem:[%s6074_s23 + $0xaa8] ss:$16 sps:$4 sm:$0xff]  }
 0x161   : > { %3580 = vmatprep.subr.bf16.mxu0 %v5475_v48  ;;  %3924 = vmatprep.subr.bf16.mxu1 %v5478_v49  ;;  %v5565_v48 = vld [vmem:[%s6074_s23 + $0xac4] ss:$16 sps:$4 sm:$0xff]   ;;  %v5568_v49 = vld [vmem:[%s6074_s23 + $0xacc] ss:$16 sps:$4 sm:$0xff]  }
 0x164   : > { %3581 = vmatpush1.bf16.msra.mxu0 %v5473_v50  ;;  %3925 = vmatpush1.bf16.msra.mxu1 %v5476_v51  ;;  %v5563_v50 = vld [vmem:[%s6074_s23 + $0xac0] ss:$16 sps:$4 sm:$0xff]   ;;  %v5566_v51 = vld [vmem:[%s6074_s23 + $0xac8] ss:$16 sps:$4 sm:$0xff]  }
 0x165   : > { %3582 = vmatprep.subr.bf16.mxu0 %v5481_v52  ;;  %3926 = vmatprep.subr.bf16.mxu1 %v5484_v53  ;;  %v5571_v52 = vld [vmem:[%s6074_s23 + $0xae4] ss:$16 sps:$4 sm:$0xff]   ;;  %v5574_v53 = vld [vmem:[%s6074_s23 + $0xaec] ss:$16 sps:$4 sm:$0xff]  }
 0x168   : > { %3583 = vmatpush1.bf16.msra.mxu0 %v5479_v54  ;;  %3927 = vmatpush1.bf16.msra.mxu1 %v5482_v55  ;;  %v5569_v54 = vld [vmem:[%s6074_s23 + $0xae0] ss:$16 sps:$4 sm:$0xff]   ;;  %v5572_v55 = vld [vmem:[%s6074_s23 + $0xae8] ss:$16 sps:$4 sm:$0xff]  }
 0x169   : > { %3584 = vmatprep.subr.bf16.mxu0 %v5487_v56  ;;  %3928 = vmatprep.subr.bf16.mxu1 %v5490_v57  ;;  %v5577_v56 = vld [vmem:[%s6074_s23 + $0xb04] ss:$16 sps:$4 sm:$0xff]   ;;  %v5580_v57 = vld [vmem:[%s6074_s23 + $0xb0c] ss:$16 sps:$4 sm:$0xff]  }
 0x16c   : > { %3585 = vmatpush1.bf16.msra.mxu0 %v5485_v58  ;;  %3929 = vmatpush1.bf16.msra.mxu1 %v5488_v59  ;;  %v5575_v58 = vld [vmem:[%s6074_s23 + $0xb00] ss:$16 sps:$4 sm:$0xff]   ;;  %v5578_v59 = vld [vmem:[%s6074_s23 + $0xb08] ss:$16 sps:$4 sm:$0xff]  }
 0x16d   : > { %3586 = vmatprep.subr.bf16.mxu0 %v5493_v60  ;;  %3930 = vmatprep.subr.bf16.mxu1 %v5496_v61  ;;  %v5583_v60 = vld [vmem:[%s6074_s23 + $0xb24] ss:$16 sps:$4 sm:$0xff]   ;;  %v5586_v61 = vld [vmem:[%s6074_s23 + $0xb2c] ss:$16 sps:$4 sm:$0xff]  }
 0x170   : > { %3587 = vmatpush1.bf16.msra.mxu0 %v5491_v62  ;;  %3931 = vmatpush1.bf16.msra.mxu1 %v5494_v63  ;;  %v5581_v62 = vld [vmem:[%s6074_s23 + $0xb20] ss:$16 sps:$4 sm:$0xff]   ;;  %v5584_v63 = vld [vmem:[%s6074_s23 + $0xb28] ss:$16 sps:$4 sm:$0xff]  }
 0x171   : > { %3588 = vmatprep.subr.bf16.mxu0 %v5499_v0  ;;  %3932 = vmatprep.subr.bf16.mxu1 %v5502_v1  ;;  %v5589_v0 = vld [vmem:[%s6074_s23 + $0xb44] ss:$16 sps:$4 sm:$0xff]   ;;  %v5592_v1 = vld [vmem:[%s6074_s23 + $0xb4c] ss:$16 sps:$4 sm:$0xff]  }
 0x174   : > { %3589 = vmatpush1.bf16.msra.mxu0 %v5497_v2  ;;  %3933 = vmatpush1.bf16.msra.mxu1 %v5500_v3  ;;  %v5587_v2 = vld [vmem:[%s6074_s23 + $0xb40] ss:$16 sps:$4 sm:$0xff]   ;;  %v5590_v3 = vld [vmem:[%s6074_s23 + $0xb48] ss:$16 sps:$4 sm:$0xff]  }
 0x175   : > { %3590 = vmatprep.subr.bf16.mxu0 %v5505_v4  ;;  %3934 = vmatprep.subr.bf16.mxu1 %v5508_v5  ;;  %v5595_v4 = vld [vmem:[%s6074_s23 + $0xb64] ss:$16 sps:$4 sm:$0xff]   ;;  %v5598_v5 = vld [vmem:[%s6074_s23 + $0xb6c] ss:$16 sps:$4 sm:$0xff]  }
 0x178   : > { %3591 = vmatpush1.bf16.msra.mxu0 %v5503_v6  ;;  %3935 = vmatpush1.bf16.msra.mxu1 %v5506_v7  ;;  %v5593_v6 = vld [vmem:[%s6074_s23 + $0xb60] ss:$16 sps:$4 sm:$0xff]   ;;  %v5596_v7 = vld [vmem:[%s6074_s23 + $0xb68] ss:$16 sps:$4 sm:$0xff]  }
 0x179   : > { %3592 = vmatprep.subr.bf16.mxu0 %v5511_v8  ;;  %3936 = vmatprep.subr.bf16.mxu1 %v5514_v9  ;;  %v5601_v8 = vld [vmem:[%s6074_s23 + $0xb84] ss:$16 sps:$4 sm:$0xff]   ;;  %v5604_v9 = vld [vmem:[%s6074_s23 + $0xb8c] ss:$16 sps:$4 sm:$0xff]  }
 0x17c   : > { %3593 = vmatpush1.bf16.msra.mxu0 %v5509_v10  ;;  %3937 = vmatpush1.bf16.msra.mxu1 %v5512_v11  ;;  %v5599_v10 = vld [vmem:[%s6074_s23 + $0xb80] ss:$16 sps:$4 sm:$0xff]   ;;  %v5602_v11 = vld [vmem:[%s6074_s23 + $0xb88] ss:$16 sps:$4 sm:$0xff]  }
 0x17d   : > { %3594 = vmatprep.subr.bf16.mxu0 %v5517_v12  ;;  %3938 = vmatprep.subr.bf16.mxu1 %v5520_v13  ;;  %v5607_v12 = vld [vmem:[%s6074_s23 + $0xba4] ss:$16 sps:$4 sm:$0xff]   ;;  %v5610_v13 = vld [vmem:[%s6074_s23 + $0xbac] ss:$16 sps:$4 sm:$0xff]  }
 0x180   : > { %3595 = vmatpush1.bf16.msra.mxu0 %v5515_v14  ;;  %3939 = vmatpush1.bf16.msra.mxu1 %v5518_v17  ;;  %v5605_v14 = vld [vmem:[%s6074_s23 + $0xba0] ss:$16 sps:$4 sm:$0xff]   ;;  %v5608_v17 = vld [vmem:[%s6074_s23 + $0xba8] ss:$16 sps:$4 sm:$0xff]  }
 0x181   : > { %3596 = vmatprep.subr.bf16.mxu0 %v5523_v18  ;;  %3940 = vmatprep.subr.bf16.mxu1 %v5526_v21  ;;  %v5613_v18 = vld [vmem:[%s6074_s23 + $0xbc4] ss:$16 sps:$4 sm:$0xff]   ;;  %v5616_v21 = vld [vmem:[%s6074_s23 + $0xbcc] ss:$16 sps:$4 sm:$0xff]  }
 0x184   : > { %3597 = vmatpush1.bf16.msra.mxu0 %v5521_v23  ;;  %3941 = vmatpush1.bf16.msra.mxu1 %v5524_v16  ;;  %v5611_v23 = vld [vmem:[%s6074_s23 + $0xbc0] ss:$16 sps:$4 sm:$0xff]   ;;  %v5614_v16 = vld [vmem:[%s6074_s23 + $0xbc8] ss:$16 sps:$4 sm:$0xff]  }
 0x185   : > { %3609 = vmatprep.subr.bf16.mxu0 %v5529_v24  ;;  %3953 = vmatprep.subr.bf16.mxu1 %v5532_v25  ;;  %v5619_v24 = vld [vmem:[%s6074_s23 + $0xbe4] ss:$16 sps:$4 sm:$0xff]   ;;  %v5622_v25 = vld [vmem:[%s6074_s23 + $0xbec] ss:$16 sps:$4 sm:$0xff]  }
 0x187   : > { %3599 = vmatmul.mubr.bf16.vlgmr.msra.gmra.mrb[0].mxu0 %v4383_v19  ;;  %3943 = vmatmul.mubr.bf16.vlgmr.msra.gmra.mrb[0].mxu1 %v4383_v19  ;;  %v5617_v19 = vld [vmem:[%s6074_s23 + $0xbe0] ss:$16 sps:$4 sm:$0xff]  }
 0x188   : > { %3610 = vmatpush1.bf16.msra.mxu0 %v5527_v20  ;;  %3954 = vmatpush1.bf16.msra.mxu1 %v5530_v28  ;;  %v5620_v20 = vld [vmem:[%s6074_s23 + $0xbe8] ss:$16 sps:$4 sm:$0xff]   ;;  %v5625_v28 = vld [vmem:[%s6074_s23 + $0xc04] ss:$16 sps:$4 sm:$0xff]  }
 0x189   : > { %3611 = vmatprep.subr.bf16.mxu0 %v5535_v29  ;;  %3955 = vmatprep.subr.bf16.mxu1 %v5538_v30  ;;  %v5628_v29 = vld [vmem:[%s6074_s23 + $0xc0c] ss:$16 sps:$4 sm:$0xff]   ;;  %v4385_v30 = vcombine.low %v6440_v26, %v6443_v27  ;;  %v5629_v27 = vld [vmem:[%s6074_s23 + $0xc20] ss:$16 sps:$4 sm:$0xff]  }
 0x18a   : > { %3641 = vmatprep.mubr.bf16.mxu0 %v4386_v31  ;;  %3985 = vmatprep.mubr.bf16.mxu1 %v4386_v31  ;;  %v6516_v31 = vld [vmem:[%s6057_s25 + $0x30] sm:$0xff] }
 0x18c   : > { %3612 = vmatpush1.bf16.msra.mxu0 %v5533_v22  ;;  %3956 = vmatpush1.bf16.msra.mxu1 %v5536_v15  ;;  %v6519_v22 = vld [vmem:[%s6057_s25 + $0x70] sm:$0xff] }
 0x18d   : > { %3613 = vmatprep.subr.bf16.mxu0 %v5541_v32  ;;  %3957 = vmatprep.subr.bf16.mxu1 %v5544_v33  ;;  %v5623_v15 = vld [vmem:[%s6074_s23 + $0xc00] ss:$16 sps:$4 sm:$0xff]   ;;  %v5626_v32 = vld [vmem:[%s6074_s23 + $0xc08] ss:$16 sps:$4 sm:$0xff]   ;;  %v5631_v33 = vld [vmem:[%s6074_s23 + $0xc24] ss:$16 sps:$4 sm:$0xff]   ;;  %v4388_v26 = vcombine.high %v6516_v31, %v6519_v22 }
 0x190   : > { %3614 = vmatpush1.bf16.msra.mxu0 %v5539_v34  ;;  %3958 = vmatpush1.bf16.msra.mxu1 %v5542_v35  ;;  %v5634_v34 = vld [vmem:[%s6074_s23 + $0xc2c] ss:$16 sps:$4 sm:$0xff]   ;;  %v5632_v35 = vld [vmem:[%s6074_s23 + $0xc28] ss:$16 sps:$4 sm:$0xff]  }
 0x191   : > { %3615 = vmatprep.subr.bf16.mxu0 %v5547_v36  ;;  %3959 = vmatprep.subr.bf16.mxu1 %v5550_v37  ;;  %v5637_v36 = vld [vmem:[%s6074_s23 + $0xc44] ss:$16 sps:$4 sm:$0xff]   ;;  %v5640_v37 = vld [vmem:[%s6074_s23 + $0xc4c] ss:$16 sps:$4 sm:$0xff]  }
 0x194   : > { %3616 = vmatpush1.bf16.msra.mxu0 %v5545_v38  ;;  %3960 = vmatpush1.bf16.msra.mxu1 %v5548_v39  ;;  %v5635_v38 = vld [vmem:[%s6074_s23 + $0xc40] ss:$16 sps:$4 sm:$0xff]   ;;  %v5638_v39 = vld [vmem:[%s6074_s23 + $0xc48] ss:$16 sps:$4 sm:$0xff]  }
 0x195   : > { %3617 = vmatprep.subr.bf16.mxu0 %v5553_v40  ;;  %3961 = vmatprep.subr.bf16.mxu1 %v5556_v41  ;;  %v5643_v40 = vld [vmem:[%s6074_s23 + $0xc64] ss:$16 sps:$4 sm:$0xff]   ;;  %v5646_v41 = vld [vmem:[%s6074_s23 + $0xc6c] ss:$16 sps:$4 sm:$0xff]  }
 0x198   : > { %3618 = vmatpush1.bf16.msra.mxu0 %v5551_v42  ;;  %3962 = vmatpush1.bf16.msra.mxu1 %v5554_v43  ;;  %v5641_v42 = vld [vmem:[%s6074_s23 + $0xc60] ss:$16 sps:$4 sm:$0xff]   ;;  %v5644_v43 = vld [vmem:[%s6074_s23 + $0xc68] ss:$16 sps:$4 sm:$0xff]  }
 0x199   : > { %3619 = vmatprep.subr.bf16.mxu0 %v5559_v44  ;;  %3963 = vmatprep.subr.bf16.mxu1 %v5562_v45  ;;  %v5649_v44 = vld [vmem:[%s6074_s23 + $0xc84] ss:$16 sps:$4 sm:$0xff]   ;;  %v5652_v45 = vld [vmem:[%s6074_s23 + $0xc8c] ss:$16 sps:$4 sm:$0xff]  }
 0x19c   : > { %3620 = vmatpush1.bf16.msra.mxu0 %v5557_v46  ;;  %3964 = vmatpush1.bf16.msra.mxu1 %v5560_v47  ;;  %v5647_v46 = vld [vmem:[%s6074_s23 + $0xc80] ss:$16 sps:$4 sm:$0xff]   ;;  %v5650_v47 = vld [vmem:[%s6074_s23 + $0xc88] ss:$16 sps:$4 sm:$0xff]  }
 0x19d   : > { %3621 = vmatprep.subr.bf16.mxu0 %v5565_v48  ;;  %3965 = vmatprep.subr.bf16.mxu1 %v5568_v49  ;;  %v5655_v48 = vld [vmem:[%s6074_s23 + $0xca4] ss:$16 sps:$4 sm:$0xff]   ;;  %v5658_v49 = vld [vmem:[%s6074_s23 + $0xcac] ss:$16 sps:$4 sm:$0xff]  }
 0x1a0   : > { %3622 = vmatpush1.bf16.msra.mxu0 %v5563_v50  ;;  %3966 = vmatpush1.bf16.msra.mxu1 %v5566_v51  ;;  %v5653_v50 = vld [vmem:[%s6074_s23 + $0xca0] ss:$16 sps:$4 sm:$0xff]   ;;  %v5656_v51 = vld [vmem:[%s6074_s23 + $0xca8] ss:$16 sps:$4 sm:$0xff]  }
 0x1a1   : > { %3623 = vmatprep.subr.bf16.mxu0 %v5571_v52  ;;  %3967 = vmatprep.subr.bf16.mxu1 %v5574_v53  ;;  %v5661_v52 = vld [vmem:[%s6074_s23 + $0xcc4] ss:$16 sps:$4 sm:$0xff]   ;;  %v5664_v53 = vld [vmem:[%s6074_s23 + $0xccc] ss:$16 sps:$4 sm:$0xff]  }
 0x1a4   : > { %3624 = vmatpush1.bf16.msra.mxu0 %v5569_v54  ;;  %3968 = vmatpush1.bf16.msra.mxu1 %v5572_v55  ;;  %v5659_v54 = vld [vmem:[%s6074_s23 + $0xcc0] ss:$16 sps:$4 sm:$0xff]   ;;  %v5662_v55 = vld [vmem:[%s6074_s23 + $0xcc8] ss:$16 sps:$4 sm:$0xff]  }
 0x1a5   : > { %3625 = vmatprep.subr.bf16.mxu0 %v5577_v56  ;;  %3969 = vmatprep.subr.bf16.mxu1 %v5580_v57  ;;  %v5667_v56 = vld [vmem:[%s6074_s23 + $0xce4] ss:$16 sps:$4 sm:$0xff]   ;;  %v5670_v57 = vld [vmem:[%s6074_s23 + $0xcec] ss:$16 sps:$4 sm:$0xff]  }
 0x1a8   : > { %3626 = vmatpush1.bf16.msra.mxu0 %v5575_v58  ;;  %3970 = vmatpush1.bf16.msra.mxu1 %v5578_v59  ;;  %v5665_v58 = vld [vmem:[%s6074_s23 + $0xce0] ss:$16 sps:$4 sm:$0xff]   ;;  %v5668_v59 = vld [vmem:[%s6074_s23 + $0xce8] ss:$16 sps:$4 sm:$0xff]  }
 0x1a9   : > { %3627 = vmatprep.subr.bf16.mxu0 %v5583_v60  ;;  %3971 = vmatprep.subr.bf16.mxu1 %v5586_v61  ;;  %v5673_v60 = vld [vmem:[%s6074_s23 + $0xd04] ss:$16 sps:$4 sm:$0xff]   ;;  %v5676_v61 = vld [vmem:[%s6074_s23 + $0xd0c] ss:$16 sps:$4 sm:$0xff]  }
 0x1ac   : > { %3628 = vmatpush1.bf16.msra.mxu0 %v5581_v62  ;;  %3972 = vmatpush1.bf16.msra.mxu1 %v5584_v63  ;;  %v5671_v62 = vld [vmem:[%s6074_s23 + $0xd00] ss:$16 sps:$4 sm:$0xff]   ;;  %v5674_v63 = vld [vmem:[%s6074_s23 + $0xd08] ss:$16 sps:$4 sm:$0xff]  }
 0x1ad   : > { %3629 = vmatprep.subr.bf16.mxu0 %v5589_v0  ;;  %3973 = vmatprep.subr.bf16.mxu1 %v5592_v1  ;;  %v5679_v0 = vld [vmem:[%s6074_s23 + $0xd24] ss:$16 sps:$4 sm:$0xff]   ;;  %v5682_v1 = vld [vmem:[%s6074_s23 + $0xd2c] ss:$16 sps:$4 sm:$0xff]  }
 0x1b0   : > { %3630 = vmatpush1.bf16.msra.mxu0 %v5587_v2  ;;  %3974 = vmatpush1.bf16.msra.mxu1 %v5590_v3  ;;  %v5677_v2 = vld [vmem:[%s6074_s23 + $0xd20] ss:$16 sps:$4 sm:$0xff]   ;;  %v5680_v3 = vld [vmem:[%s6074_s23 + $0xd28] ss:$16 sps:$4 sm:$0xff]  }
 0x1b1   : > { %3631 = vmatprep.subr.bf16.mxu0 %v5595_v4  ;;  %3975 = vmatprep.subr.bf16.mxu1 %v5598_v5  ;;  %v5685_v4 = vld [vmem:[%s6074_s23 + $0xd44] ss:$16 sps:$4 sm:$0xff]   ;;  %v5688_v5 = vld [vmem:[%s6074_s23 + $0xd4c] ss:$16 sps:$4 sm:$0xff]  }
 0x1b4   : > { %3632 = vmatpush1.bf16.msra.mxu0 %v5593_v6  ;;  %3976 = vmatpush1.bf16.msra.mxu1 %v5596_v7  ;;  %v5683_v6 = vld [vmem:[%s6074_s23 + $0xd40] ss:$16 sps:$4 sm:$0xff]   ;;  %v5686_v7 = vld [vmem:[%s6074_s23 + $0xd48] ss:$16 sps:$4 sm:$0xff]  }
 0x1b5   : > { %3633 = vmatprep.subr.bf16.mxu0 %v5601_v8  ;;  %3977 = vmatprep.subr.bf16.mxu1 %v5604_v9  ;;  %v5691_v8 = vld [vmem:[%s6074_s23 + $0xd64] ss:$16 sps:$4 sm:$0xff]   ;;  %v5694_v9 = vld [vmem:[%s6074_s23 + $0xd6c] ss:$16 sps:$4 sm:$0xff]  }
 0x1b8   : > { %3634 = vmatpush1.bf16.msra.mxu0 %v5599_v10  ;;  %3978 = vmatpush1.bf16.msra.mxu1 %v5602_v11  ;;  %v5689_v10 = vld [vmem:[%s6074_s23 + $0xd60] ss:$16 sps:$4 sm:$0xff]   ;;  %v5692_v11 = vld [vmem:[%s6074_s23 + $0xd68] ss:$16 sps:$4 sm:$0xff]  }
 0x1b9   : > { %3635 = vmatprep.subr.bf16.mxu0 %v5607_v12  ;;  %3979 = vmatprep.subr.bf16.mxu1 %v5610_v13  ;;  %v5697_v12 = vld [vmem:[%s6074_s23 + $0xd84] ss:$16 sps:$4 sm:$0xff]   ;;  %v5700_v13 = vld [vmem:[%s6074_s23 + $0xd8c] ss:$16 sps:$4 sm:$0xff]  }
 0x1bc   : > { %3636 = vmatpush1.bf16.msra.mxu0 %v5605_v14  ;;  %3980 = vmatpush1.bf16.msra.mxu1 %v5608_v17  ;;  %v5695_v14 = vld [vmem:[%s6074_s23 + $0xd80] ss:$16 sps:$4 sm:$0xff]   ;;  %v5698_v17 = vld [vmem:[%s6074_s23 + $0xd88] ss:$16 sps:$4 sm:$0xff]  }
 0x1bd   : > { %3637 = vmatprep.subr.bf16.mxu0 %v5613_v18  ;;  %3981 = vmatprep.subr.bf16.mxu1 %v5616_v21  ;;  %v5703_v18 = vld [vmem:[%s6074_s23 + $0xda4] ss:$16 sps:$4 sm:$0xff]   ;;  %v5706_v21 = vld [vmem:[%s6074_s23 + $0xdac] ss:$16 sps:$4 sm:$0xff]  }
 0x1c0   : > { %3638 = vmatpush1.bf16.msra.mxu0 %v5611_v23  ;;  %3982 = vmatpush1.bf16.msra.mxu1 %v5614_v16  ;;  %v5701_v23 = vld [vmem:[%s6074_s23 + $0xda0] ss:$16 sps:$4 sm:$0xff]   ;;  %v5704_v16 = vld [vmem:[%s6074_s23 + $0xda8] ss:$16 sps:$4 sm:$0xff]  }
 0x1c1   : > { %3639 = vmatprep.subr.bf16.mxu0 %v5619_v24  ;;  %3983 = vmatprep.subr.bf16.mxu1 %v5622_v25  ;;  %v5709_v24 = vld [vmem:[%s6074_s23 + $0xdc4] ss:$16 sps:$4 sm:$0xff]   ;;  %v5712_v25 = vld [vmem:[%s6074_s23 + $0xdcc] ss:$16 sps:$4 sm:$0xff]  }
 0x1c4   : > { %3640 = vmatpush1.bf16.msra.mxu0 %v5617_v19  ;;  %3984 = vmatpush1.bf16.msra.mxu1 %v5620_v20  ;;  %v5707_v19 = vld [vmem:[%s6074_s23 + $0xdc0] ss:$16 sps:$4 sm:$0xff]   ;;  %v5710_v20 = vld [vmem:[%s6074_s23 + $0xdc8] ss:$16 sps:$4 sm:$0xff]  }
 0x1c5   : > { %3652 = vmatprep.subr.bf16.mxu0 %v5625_v28  ;;  %3996 = vmatprep.subr.bf16.mxu1 %v5628_v29  ;;  %v5715_v28 = vld [vmem:[%s6074_s23 + $0xde4] ss:$16 sps:$4 sm:$0xff]   ;;  %v5718_v29 = vld [vmem:[%s6074_s23 + $0xdec] ss:$16 sps:$4 sm:$0xff]  }
 0x1c7   : > { %3642 = vmatmul.mubr.bf16.vlgmr.msra.gmra.mrb[0].mxu0 %v4385_v30  ;;  %3986 = vmatmul.mubr.bf16.vlgmr.msra.gmra.mrb[0].mxu1 %v4385_v30  ;;  %v5713_v30 = vld [vmem:[%s6074_s23 + $0xde0] ss:$16 sps:$4 sm:$0xff]  }
 0x1c8   : > { %3653 = vmatpush1.bf16.msra.mxu0 %v5623_v15  ;;  %3997 = vmatpush1.bf16.msra.mxu1 %v5626_v32  ;;  %v5716_v15 = vld [vmem:[%s6074_s23 + $0xde8] ss:$16 sps:$4 sm:$0xff]   ;;  %v5721_v32 = vld [vmem:[%s6074_s23 + $0xe04] ss:$16 sps:$4 sm:$0xff]  }
 0x1c9   : > { %3654 = vmatprep.subr.bf16.mxu0 %v5631_v33  ;;  %3998 = vmatprep.subr.bf16.mxu1 %v5634_v34  ;;  %v5724_v33 = vld [vmem:[%s6074_s23 + $0xe0c] ss:$16 sps:$4 sm:$0xff]   ;;  %v4387_v34 = vcombine.low %v6516_v31, %v6519_v22  ;;  %v5725_v22 = vld [vmem:[%s6074_s23 + $0xe20] ss:$16 sps:$4 sm:$0xff]  }
 0x1ca   : > { %3684 = vmatprep.mubr.bf16.mxu0 %v4388_v26  ;;  %4028 = vmatprep.mubr.bf16.mxu1 %v4388_v26  ;;  %v6590_v26 = vld [vmem:[%s6057_s25 + $0x38] sm:$0xff] }
 0x1cc   : > { %3655 = vmatpush1.bf16.msra.mxu0 %v5629_v27  ;;  %3999 = vmatpush1.bf16.msra.mxu1 %v5632_v35  ;;  %v6593_v27 = vld [vmem:[%s6057_s25 + $0x78] sm:$0xff]  ;;  %v5719_v35 = vld [vmem:[%s6074_s23 + $0xe00] ss:$16 sps:$4 sm:$0xff]  }
 0x1cd   : > { %3656 = vmatprep.subr.bf16.mxu0 %v5637_v36  ;;  %4000 = vmatprep.subr.bf16.mxu1 %v5640_v37  ;;  %v5722_v36 = vld [vmem:[%s6074_s23 + $0xe08] ss:$16 sps:$4 sm:$0xff]   ;;  %v5727_v37 = vld [vmem:[%s6074_s23 + $0xe24] ss:$16 sps:$4 sm:$0xff]   ;;  %v4390_v31 = vcombine.high %v6590_v26, %v6593_v27 }
 0x1d0   : > { %3657 = vmatpush1.bf16.msra.mxu0 %v5635_v38  ;;  %4001 = vmatpush1.bf16.msra.mxu1 %v5638_v39  ;;  %v5730_v38 = vld [vmem:[%s6074_s23 + $0xe2c] ss:$16 sps:$4 sm:$0xff]   ;;  %v5728_v39 = vld [vmem:[%s6074_s23 + $0xe28] ss:$16 sps:$4 sm:$0xff]  }
 0x1d1   : > { %3658 = vmatprep.subr.bf16.mxu0 %v5643_v40  ;;  %4002 = vmatprep.subr.bf16.mxu1 %v5646_v41  ;;  %v5733_v40 = vld [vmem:[%s6074_s23 + $0xe44] ss:$16 sps:$4 sm:$0xff]   ;;  %v5736_v41 = vld [vmem:[%s6074_s23 + $0xe4c] ss:$16 sps:$4 sm:$0xff]  }
 0x1d4   : > { %3659 = vmatpush1.bf16.msra.mxu0 %v5641_v42  ;;  %4003 = vmatpush1.bf16.msra.mxu1 %v5644_v43  ;;  %v5731_v42 = vld [vmem:[%s6074_s23 + $0xe40] ss:$16 sps:$4 sm:$0xff]   ;;  %v5734_v43 = vld [vmem:[%s6074_s23 + $0xe48] ss:$16 sps:$4 sm:$0xff]  }
 0x1d5   : > { %3660 = vmatprep.subr.bf16.mxu0 %v5649_v44  ;;  %4004 = vmatprep.subr.bf16.mxu1 %v5652_v45  ;;  %v5739_v44 = vld [vmem:[%s6074_s23 + $0xe64] ss:$16 sps:$4 sm:$0xff]   ;;  %v5742_v45 = vld [vmem:[%s6074_s23 + $0xe6c] ss:$16 sps:$4 sm:$0xff]  }
 0x1d8   : > { %3661 = vmatpush1.bf16.msra.mxu0 %v5647_v46  ;;  %4005 = vmatpush1.bf16.msra.mxu1 %v5650_v47  ;;  %v5737_v46 = vld [vmem:[%s6074_s23 + $0xe60] ss:$16 sps:$4 sm:$0xff]   ;;  %v5740_v47 = vld [vmem:[%s6074_s23 + $0xe68] ss:$16 sps:$4 sm:$0xff]  }
 0x1d9   : > { %3662 = vmatprep.subr.bf16.mxu0 %v5655_v48  ;;  %4006 = vmatprep.subr.bf16.mxu1 %v5658_v49  ;;  %v5745_v48 = vld [vmem:[%s6074_s23 + $0xe84] ss:$16 sps:$4 sm:$0xff]   ;;  %v5748_v49 = vld [vmem:[%s6074_s23 + $0xe8c] ss:$16 sps:$4 sm:$0xff]  }
 0x1dc   : > { %3663 = vmatpush1.bf16.msra.mxu0 %v5653_v50  ;;  %4007 = vmatpush1.bf16.msra.mxu1 %v5656_v51  ;;  %v5743_v50 = vld [vmem:[%s6074_s23 + $0xe80] ss:$16 sps:$4 sm:$0xff]   ;;  %v5746_v51 = vld [vmem:[%s6074_s23 + $0xe88] ss:$16 sps:$4 sm:$0xff]  }
 0x1dd   : > { %3664 = vmatprep.subr.bf16.mxu0 %v5661_v52  ;;  %4008 = vmatprep.subr.bf16.mxu1 %v5664_v53  ;;  %v5751_v52 = vld [vmem:[%s6074_s23 + $0xea4] ss:$16 sps:$4 sm:$0xff]   ;;  %v5754_v53 = vld [vmem:[%s6074_s23 + $0xeac] ss:$16 sps:$4 sm:$0xff]  }
 0x1e0   : > { %3665 = vmatpush1.bf16.msra.mxu0 %v5659_v54  ;;  %4009 = vmatpush1.bf16.msra.mxu1 %v5662_v55  ;;  %v5749_v54 = vld [vmem:[%s6074_s23 + $0xea0] ss:$16 sps:$4 sm:$0xff]   ;;  %v5752_v55 = vld [vmem:[%s6074_s23 + $0xea8] ss:$16 sps:$4 sm:$0xff]  }
 0x1e1   : > { %3666 = vmatprep.subr.bf16.mxu0 %v5667_v56  ;;  %4010 = vmatprep.subr.bf16.mxu1 %v5670_v57  ;;  %v5757_v56 = vld [vmem:[%s6074_s23 + $0xec4] ss:$16 sps:$4 sm:$0xff]   ;;  %v5760_v57 = vld [vmem:[%s6074_s23 + $0xecc] ss:$16 sps:$4 sm:$0xff]  }
 0x1e4   : > { %3667 = vmatpush1.bf16.msra.mxu0 %v5665_v58  ;;  %4011 = vmatpush1.bf16.msra.mxu1 %v5668_v59  ;;  %v5755_v58 = vld [vmem:[%s6074_s23 + $0xec0] ss:$16 sps:$4 sm:$0xff]   ;;  %v5758_v59 = vld [vmem:[%s6074_s23 + $0xec8] ss:$16 sps:$4 sm:$0xff]  }
 0x1e5   : > { %3668 = vmatprep.subr.bf16.mxu0 %v5673_v60  ;;  %4012 = vmatprep.subr.bf16.mxu1 %v5676_v61  ;;  %v5763_v60 = vld [vmem:[%s6074_s23 + $0xee4] ss:$16 sps:$4 sm:$0xff]   ;;  %v5766_v61 = vld [vmem:[%s6074_s23 + $0xeec] ss:$16 sps:$4 sm:$0xff]  }
 0x1e8   : > { %3669 = vmatpush1.bf16.msra.mxu0 %v5671_v62  ;;  %4013 = vmatpush1.bf16.msra.mxu1 %v5674_v63  ;;  %v5761_v62 = vld [vmem:[%s6074_s23 + $0xee0] ss:$16 sps:$4 sm:$0xff]   ;;  %v5764_v63 = vld [vmem:[%s6074_s23 + $0xee8] ss:$16 sps:$4 sm:$0xff]  }
 0x1e9   : > { %3670 = vmatprep.subr.bf16.mxu0 %v5679_v0  ;;  %4014 = vmatprep.subr.bf16.mxu1 %v5682_v1  ;;  %v5769_v0 = vld [vmem:[%s6074_s23 + $0xf04] ss:$16 sps:$4 sm:$0xff]   ;;  %v5772_v1 = vld [vmem:[%s6074_s23 + $0xf0c] ss:$16 sps:$4 sm:$0xff]  }
 0x1ec   : > { %3671 = vmatpush1.bf16.msra.mxu0 %v5677_v2  ;;  %4015 = vmatpush1.bf16.msra.mxu1 %v5680_v3  ;;  %v5767_v2 = vld [vmem:[%s6074_s23 + $0xf00] ss:$16 sps:$4 sm:$0xff]   ;;  %v5770_v3 = vld [vmem:[%s6074_s23 + $0xf08] ss:$16 sps:$4 sm:$0xff]  }
 0x1ed   : > { %3672 = vmatprep.subr.bf16.mxu0 %v5685_v4  ;;  %4016 = vmatprep.subr.bf16.mxu1 %v5688_v5  ;;  %v5775_v4 = vld [vmem:[%s6074_s23 + $0xf24] ss:$16 sps:$4 sm:$0xff]   ;;  %v5778_v5 = vld [vmem:[%s6074_s23 + $0xf2c] ss:$16 sps:$4 sm:$0xff]  }
 0x1f0   : > { %3673 = vmatpush1.bf16.msra.mxu0 %v5683_v6  ;;  %4017 = vmatpush1.bf16.msra.mxu1 %v5686_v7  ;;  %v5773_v6 = vld [vmem:[%s6074_s23 + $0xf20] ss:$16 sps:$4 sm:$0xff]   ;;  %v5776_v7 = vld [vmem:[%s6074_s23 + $0xf28] ss:$16 sps:$4 sm:$0xff]  }
 0x1f1   : > { %3674 = vmatprep.subr.bf16.mxu0 %v5691_v8  ;;  %4018 = vmatprep.subr.bf16.mxu1 %v5694_v9  ;;  %v5781_v8 = vld [vmem:[%s6074_s23 + $0xf44] ss:$16 sps:$4 sm:$0xff]   ;;  %v5784_v9 = vld [vmem:[%s6074_s23 + $0xf4c] ss:$16 sps:$4 sm:$0xff]  }
 0x1f4   : > { %3675 = vmatpush1.bf16.msra.mxu0 %v5689_v10  ;;  %4019 = vmatpush1.bf16.msra.mxu1 %v5692_v11  ;;  %v5779_v10 = vld [vmem:[%s6074_s23 + $0xf40] ss:$16 sps:$4 sm:$0xff]   ;;  %v5782_v11 = vld [vmem:[%s6074_s23 + $0xf48] ss:$16 sps:$4 sm:$0xff]  }
 0x1f5   : > { %3676 = vmatprep.subr.bf16.mxu0 %v5697_v12  ;;  %4020 = vmatprep.subr.bf16.mxu1 %v5700_v13  ;;  %v5787_v12 = vld [vmem:[%s6074_s23 + $0xf64] ss:$16 sps:$4 sm:$0xff]   ;;  %v5790_v13 = vld [vmem:[%s6074_s23 + $0xf6c] ss:$16 sps:$4 sm:$0xff]  }
 0x1f8   : > { %3677 = vmatpush1.bf16.msra.mxu0 %v5695_v14  ;;  %4021 = vmatpush1.bf16.msra.mxu1 %v5698_v17  ;;  %v5785_v14 = vld [vmem:[%s6074_s23 + $0xf60] ss:$16 sps:$4 sm:$0xff]   ;;  %v5788_v17 = vld [vmem:[%s6074_s23 + $0xf68] ss:$16 sps:$4 sm:$0xff]  }
 0x1f9   : > { %3678 = vmatprep.subr.bf16.mxu0 %v5703_v18  ;;  %4022 = vmatprep.subr.bf16.mxu1 %v5706_v21  ;;  %v5793_v18 = vld [vmem:[%s6074_s23 + $0xf84] ss:$16 sps:$4 sm:$0xff]   ;;  %v5796_v21 = vld [vmem:[%s6074_s23 + $0xf8c] ss:$16 sps:$4 sm:$0xff]  }
 0x1fc   : > { %3679 = vmatpush1.bf16.msra.mxu0 %v5701_v23  ;;  %4023 = vmatpush1.bf16.msra.mxu1 %v5704_v16  ;;  %v5791_v23 = vld [vmem:[%s6074_s23 + $0xf80] ss:$16 sps:$4 sm:$0xff]   ;;  %v5794_v16 = vld [vmem:[%s6074_s23 + $0xf88] ss:$16 sps:$4 sm:$0xff]  }
 0x1fd   : > { %3680 = vmatprep.subr.bf16.mxu0 %v5709_v24  ;;  %4024 = vmatprep.subr.bf16.mxu1 %v5712_v25  ;;  %v5799_v24 = vld [vmem:[%s6074_s23 + $0xfa4] ss:$16 sps:$4 sm:$0xff]   ;;  %v5802_v25 = vld [vmem:[%s6074_s23 + $0xfac] ss:$16 sps:$4 sm:$0xff]  }
 0x200   : > { %3681 = vmatpush1.bf16.msra.mxu0 %v5707_v19  ;;  %4025 = vmatpush1.bf16.msra.mxu1 %v5710_v20  ;;  %v5797_v19 = vld [vmem:[%s6074_s23 + $0xfa0] ss:$16 sps:$4 sm:$0xff]   ;;  %v5800_v20 = vld [vmem:[%s6074_s23 + $0xfa8] ss:$16 sps:$4 sm:$0xff]  }
 0x201   : > { %3682 = vmatprep.subr.bf16.mxu0 %v5715_v28  ;;  %4026 = vmatprep.subr.bf16.mxu1 %v5718_v29  ;;  %v5805_v28 = vld [vmem:[%s6074_s23 + $0xfc4] ss:$16 sps:$4 sm:$0xff]   ;;  %v5808_v29 = vld [vmem:[%s6074_s23 + $0xfcc] ss:$16 sps:$4 sm:$0xff]  }
 0x204   : > { %3683 = vmatpush1.bf16.msra.mxu0 %v5713_v30  ;;  %4027 = vmatpush1.bf16.msra.mxu1 %v5716_v15  ;;  %v5803_v30 = vld [vmem:[%s6074_s23 + $0xfc0] ss:$16 sps:$4 sm:$0xff]   ;;  %v5806_v15 = vld [vmem:[%s6074_s23 + $0xfc8] ss:$16 sps:$4 sm:$0xff]  }
 0x205   : > { %3695 = vmatprep.subr.bf16.mxu0 %v5721_v32  ;;  %4039 = vmatprep.subr.bf16.mxu1 %v5724_v33  ;;  %v5811_v32 = vld [vmem:[%s6074_s23 + $0xfe4] ss:$16 sps:$4 sm:$0xff]   ;;  %v5814_v33 = vld [vmem:[%s6074_s23 + $0xfec] ss:$16 sps:$4 sm:$0xff]  }
 0x207   : > { %3685 = vmatmul.mubr.bf16.vlgmr.msra.gmra.mrb[0].mxu0 %v4387_v34  ;;  %4029 = vmatmul.mubr.bf16.vlgmr.msra.gmra.mrb[0].mxu1 %v4387_v34  ;;  %v5809_v34 = vld [vmem:[%s6074_s23 + $0xfe0] ss:$16 sps:$4 sm:$0xff]  }
 0x208   : > { %3696 = vmatpush1.bf16.msra.mxu0 %v5719_v35  ;;  %4040 = vmatpush1.bf16.msra.mxu1 %v5722_v36  ;;  %v5812_v35 = vld [vmem:[%s6074_s23 + $0xfe8] ss:$16 sps:$4 sm:$0xff]   ;;  %v4389_v36 = vcombine.low %v6590_v26, %v6593_v27 }
 0x209   : > { %3697 = vmatprep.subr.bf16.mxu0 %v5727_v37  ;;  %4041 = vmatprep.subr.bf16.mxu1 %v5730_v38  ;;  %v218_v37 = vld [vmem:[#allocation2] sm:$0xff]  ;;  %v220_v38 = vld [vmem:[#allocation2 + $0x10] sm:$0xff] }
 0x20a   : > { %3727 = vmatprep.mubr.bf16.mxu0 %v4390_v31  ;;  %4071 = vmatprep.mubr.bf16.mxu1 %v4390_v31  ;;  %v219_v31 = vld [vmem:[#allocation2 + $0x8] sm:$0xff] }
 0x20c   : > { %3698 = vmatpush1.bf16.msra.mxu0 %v5725_v22  ;;  %4042 = vmatpush1.bf16.msra.mxu1 %v5728_v39  ;;  %v221_v22 = vld [vmem:[#allocation2 + $0x18] sm:$0xff] }
 0x20d   : > { %3699 = vmatprep.subr.bf16.mxu0 %v5733_v40  ;;  %4043 = vmatprep.subr.bf16.mxu1 %v5736_v41  ;;  %v222_v41 = vld [vmem:[#allocation2 + $0x20] sm:$0xff] }
 0x210   : > { %3700 = vmatpush1.bf16.msra.mxu0 %v5731_v42  ;;  %4044 = vmatpush1.bf16.msra.mxu1 %v5734_v43  ;;  %v224_v42 = vld [vmem:[#allocation2 + $0x30] sm:$0xff] }
 0x211   : > { %3701 = vmatprep.subr.bf16.mxu0 %v5739_v44  ;;  %4045 = vmatprep.subr.bf16.mxu1 %v5742_v45 }
 0x214   : > { %3702 = vmatpush1.bf16.msra.mxu0 %v5737_v46  ;;  %4046 = vmatpush1.bf16.msra.mxu1 %v5740_v47  ;;  %v223_v47 = vld [vmem:[#allocation2 + $0x28] sm:$0xff] }
 0x215   : > { %3703 = vmatprep.subr.bf16.mxu0 %v5745_v48  ;;  %4047 = vmatprep.subr.bf16.mxu1 %v5748_v49  ;;  %v225_v48 = vld [vmem:[#allocation2 + $0x38] sm:$0xff] }
 0x218   : > { %3704 = vmatpush1.bf16.msra.mxu0 %v5743_v50  ;;  %4048 = vmatpush1.bf16.msra.mxu1 %v5746_v51 }
 0x219   : > { %3705 = vmatprep.subr.bf16.mxu0 %v5751_v52  ;;  %4049 = vmatprep.subr.bf16.mxu1 %v5754_v53 }
 0x21c   : > { %3706 = vmatpush1.bf16.msra.mxu0 %v5749_v54  ;;  %4050 = vmatpush1.bf16.msra.mxu1 %v5752_v55 }
 0x21d   : > { %3707 = vmatprep.subr.bf16.mxu0 %v5757_v56  ;;  %4051 = vmatprep.subr.bf16.mxu1 %v5760_v57 }
 0x220   : > { %3708 = vmatpush1.bf16.msra.mxu0 %v5755_v58  ;;  %4052 = vmatpush1.bf16.msra.mxu1 %v5758_v59 }
 0x221   : > { %3709 = vmatprep.subr.bf16.mxu0 %v5763_v60  ;;  %4053 = vmatprep.subr.bf16.mxu1 %v5766_v61 }
 0x224   : > { %3710 = vmatpush1.bf16.msra.mxu0 %v5761_v62  ;;  %4054 = vmatpush1.bf16.msra.mxu1 %v5764_v63 }
 0x225   : > { %3711 = vmatprep.subr.bf16.mxu0 %v5769_v0  ;;  %4055 = vmatprep.subr.bf16.mxu1 %v5772_v1 }
 0x228   : > { %3712 = vmatpush1.bf16.msra.mxu0 %v5767_v2  ;;  %4056 = vmatpush1.bf16.msra.mxu1 %v5770_v3 }
 0x229   : > { %3713 = vmatprep.subr.bf16.mxu0 %v5775_v4  ;;  %4057 = vmatprep.subr.bf16.mxu1 %v5778_v5 }
 0x22c   : > { %3714 = vmatpush1.bf16.msra.mxu0 %v5773_v6  ;;  %4058 = vmatpush1.bf16.msra.mxu1 %v5776_v7 }
 0x22d   : > { %3715 = vmatprep.subr.bf16.mxu0 %v5781_v8  ;;  %4059 = vmatprep.subr.bf16.mxu1 %v5784_v9 }
 0x230   : > { %3716 = vmatpush1.bf16.msra.mxu0 %v5779_v10  ;;  %4060 = vmatpush1.bf16.msra.mxu1 %v5782_v11 }
 0x231   : > { %3717 = vmatprep.subr.bf16.mxu0 %v5787_v12  ;;  %4061 = vmatprep.subr.bf16.mxu1 %v5790_v13 }
 0x234   : > { %3718 = vmatpush1.bf16.msra.mxu0 %v5785_v14  ;;  %4062 = vmatpush1.bf16.msra.mxu1 %v5788_v17 }
 0x235   : > { %3719 = vmatprep.subr.bf16.mxu0 %v5793_v18  ;;  %4063 = vmatprep.subr.bf16.mxu1 %v5796_v21 }
 0x238   : > { %3720 = vmatpush1.bf16.msra.mxu0 %v5791_v23  ;;  %4064 = vmatpush1.bf16.msra.mxu1 %v5794_v16 }
 0x239   : > { %3721 = vmatprep.subr.bf16.mxu0 %v5799_v24  ;;  %4065 = vmatprep.subr.bf16.mxu1 %v5802_v25 }
 0x23c   : > { %3722 = vmatpush1.bf16.msra.mxu0 %v5797_v19  ;;  %4066 = vmatpush1.bf16.msra.mxu1 %v5800_v20 }
 0x23d   : > { %3723 = vmatprep.subr.bf16.mxu0 %v5805_v28  ;;  %4067 = vmatprep.subr.bf16.mxu1 %v5808_v29 }
 0x240   : > { %3724 = vmatpush1.bf16.msra.mxu0 %v5803_v30  ;;  %4068 = vmatpush1.bf16.msra.mxu1 %v5806_v15 }
 0x241   : > { %3725 = vmatprep.subr.bf16.mxu0 %v5811_v32  ;;  %4069 = vmatprep.subr.bf16.mxu1 %v5814_v33 }
 0x244   : > { %3726 = vmatpush1.bf16.msra.mxu0 %v5809_v34  ;;  %4070 = vmatpush1.bf16.msra.mxu1 %v5812_v35 }
 0x247   : > { %3728 = vmatmul.mubr.bf16.vlgmr.msra.gmra.mrb[0].mxu0 %v4389_v36  ;;  %4072 = vmatmul.mubr.bf16.vlgmr.msra.gmra.mrb[0].mxu1 %v4389_v36 }
 0x31a   : > { %v3729_v39 = vpop.f32.mrb[0].mxu0  ;;  %v4073_v40 = vpop.f32.mrb[0].mxu1  ;;  %4101 = sbr.rel (%p4903_p6) target bundleno = 855 (0x357), region = 40 }
 0x31b   : > { %v4082_v43 = vadd.f32 %v3729_v39, %v218_v37  ;;  %v4084_v44 = vadd.f32 %v4073_v40, %v220_v38  ;;  %v3731_v45 = vpop.f32.mrb[1].mxu0  ;;  %v4075_v46 = vpop.f32.mrb[1].mxu1 }
 0x31c   : > { %v4083_v49 = vadd.f32 %v3731_v45, %v219_v31  ;;  %v4085_v26 = vadd.f32 %v4075_v46, %v221_v22  ;;  %v3733_v27 = vpop.f32.mrb[2].mxu0  ;;  %v4077_v50 = vpop.f32.mrb[2].mxu1 }
 0x31d   : > { %4090 = vst [vmem:[#allocation2] sm:$0xff] %v4082_v43  ;;  %4092 = vst [vmem:[#allocation2 + $0x10] sm:$0xff] %v4084_v44  ;;  %v4086_v51 = vadd.f32 %v3733_v27, %v222_v41  ;;  %v4088_v52 = vadd.f32 %v4077_v50, %v224_v42  ;;  %v3735_v53 = vpop.f32.mrb[3].mxu0  ;;  %v4079_v54 = vpop.f32.mrb[3].mxu1 }
 0x31e   : > { %4091 = vst [vmem:[#allocation2 + $0x8] sm:$0xff] %v4083_v49  ;;  %4093 = vst [vmem:[#allocation2 + $0x18] sm:$0xff] %v4085_v26  ;;  %v4087_v55 = vadd.f32 %v3735_v53, %v223_v47  ;;  %v4089_v56 = vadd.f32 %v4079_v54, %v225_v48 }
 0x31f   : > { %4094 = vst [vmem:[#allocation2 + $0x20] sm:$0xff] %v4086_v51  ;;  %4096 = vst [vmem:[#allocation2 + $0x30] sm:$0xff] %v4088_v52 }
 0x320   : > { %4095 = vst [vmem:[#allocation2 + $0x28] sm:$0xff] %v4087_v55  ;;  %4097 = vst [vmem:[#allocation2 + $0x38] sm:$0xff] %v4089_v56 }
 0x324   : > { %v6662_v57 = vld [vmem:[#allocation2] sm:$0xff]  ;;  %v6678_v1 = vld [vmem:[#allocation2 + $0x10] sm:$0xff] }
 0x325   : > { %v6664_v58 = vld [vmem:[#allocation2 + $0x8] sm:$0xff]  ;;  %v4138_v62 = vmul.f32 %v6662_v57, %v6662_v57  ;;  %v6680_v2 = vld [vmem:[#allocation2 + $0x18] sm:$0xff]  ;;  %v4140_v7 = vmul.f32 %v6678_v1, %v6678_v1 }
 0x326   : > { %v6666_v59 = vld [vmem:[#allocation2 + $0x20] sm:$0xff]  ;;  %v4139_v63 = vmul.f32 %v6664_v58, %v6664_v58  ;;  %v6686_v5 = vld [vmem:[#allocation2 + $0x30] sm:$0xff]  ;;  %v4141_v8 = vmul.f32 %v6680_v2, %v6680_v2 }
 0x327   : > { %v6668_v60 = vld [vmem:[#allocation2 + $0x28] sm:$0xff]  ;;  %v4110_v61 = vadd.f32 %v6666_v59, %v6662_v57  ;;  %v4142_v0 = vmul.f32 %v6666_v59, %v6666_v59  ;;  %v6688_v6 = vld [vmem:[#allocation2 + $0x38] sm:$0xff]  ;;  %v4124_v11 = vadd.f32 %v6686_v5, %v6678_v1  ;;  %v4144_v17 = vmul.f32 %v6686_v5, %v6686_v5 }
 0x328   : > { %v4117_v3 = vadd.f32 %v6668_v60, %v6664_v58  ;;  %v4143_v4 = vmul.f32 %v6668_v60, %v6668_v60  ;;  %v4131_v12 = vadd.f32 %v6688_v6, %v6680_v2  ;;  %v4145_v18 = vmul.f32 %v6688_v6, %v6688_v6 }
 0x329   : > { %v4111_v9 = vrot.slane %v4110_v61, 4  ;;  %v4146_v10 = vadd.f32 %v4142_v0, %v4138_v62  ;;  %v4125_v16 = vrot.slane %v4124_v11, 4  ;;  %v4160_v20 = vadd.f32 %v4144_v17, %v4140_v7 }
 0x32a   : > { %v4118_v13 = vrot.slane %v4117_v3, 4  ;;  %v4153_v14 = vadd.f32 %v4143_v4, %v4139_v63  ;;  %v4132_v24 = vrot.slane %v4131_v12, 4  ;;  %v4167_v28 = vadd.f32 %v4145_v18, %v4141_v8 }
 0x32b   : > { %v4112_v21 = vadd.f32 %v4111_v9, %v4110_v61  ;;  %v4147_v23 = vrot.slane %v4146_v10, 4  ;;  %v4126_v15 = vadd.f32 %v4125_v16, %v4124_v11  ;;  %v4161_v35 = vrot.slane %v4160_v20, 4 }
 0x32c   : > { %v4119_v25 = vadd.f32 %v4118_v13, %v4117_v3  ;;  %v4154_v19 = vrot.slane %v4153_v14, 4  ;;  %v4133_v32 = vadd.f32 %v4132_v24, %v4131_v12  ;;  %v4168_v36 = vrot.slane %v4167_v28, 4 }
 0x32d   : > { %v4113_v29 = vrot.slane %v4112_v21, 2  ;;  %v4148_v30 = vadd.f32 %v4147_v23, %v4146_v10  ;;  %v4127_v31 = vrot.slane %v4126_v15, 2  ;;  %v4162_v41 = vadd.f32 %v4161_v35, %v4160_v20 }
 0x32e   : > { %v4120_v33 = vrot.slane %v4119_v25, 2  ;;  %v4155_v34 = vadd.f32 %v4154_v19, %v4153_v14  ;;  %v4134_v22 = vrot.slane %v4133_v32, 2  ;;  %v4169_v42 = vadd.f32 %v4168_v36, %v4167_v28 }
 0x32f   : > { %v4114_v37 = vadd.f32 %v4113_v29, %v4112_v21  ;;  %v4149_v38 = vrot.slane %v4148_v30, 2  ;;  %v4128_v45 = vadd.f32 %v4127_v31, %v4126_v15  ;;  %v4163_v49 = vrot.slane %v4162_v41, 2 }
 0x330   : > { %v4121_v39 = vadd.f32 %v4120_v33, %v4119_v25  ;;  %v4156_v40 = vrot.slane %v4155_v34, 2  ;;  %v4135_v46 = vadd.f32 %v4134_v22, %v4133_v32  ;;  %v4170_v26 = vrot.slane %v4169_v42, 2 }
 0x331   : > { %v4115_v43 = vrot.slane %v4114_v37, 1  ;;  %v4150_v44 = vadd.f32 %v4149_v38, %v4148_v30  ;;  %v4129_v51 = vrot.slane %v4128_v45, 1  ;;  %v4164_v55 = vadd.f32 %v4163_v49, %v4162_v41 }
 0x332   : > { %v4122_v47 = vrot.slane %v4121_v39, 1  ;;  %v4157_v48 = vadd.f32 %v4156_v40, %v4155_v34  ;;  %v4136_v52 = vrot.slane %v4135_v46, 1  ;;  %v4171_v56 = vadd.f32 %v4170_v26, %v4169_v42 }
 0x333   : > { %v4116_v27 = vadd.f32 %v4115_v43, %v4114_v37  ;;  %v4151_v50 = vrot.slane %v4150_v44, 1  ;;  %v4130_v63 = vadd.f32 %v4129_v51, %v4128_v45  ;;  %v4165_v7 = vrot.slane %v4164_v55, 1 }
 0x334   : > { %v4123_v53 = vadd.f32 %v4122_v47, %v4121_v39  ;;  %v4158_v54 = vrot.slane %v4157_v48, 1  ;;  %v4137_v0 = vadd.f32 %v4136_v52, %v4135_v46  ;;  %v4172_v8 = vrot.slane %v4171_v56, 1 }
 0x335   : > { %v4152_v61 = vadd.f32 %v4151_v50, %v4150_v44  ;;  %v4174_v62 = vmul.f32 0.11111111, %v4116_v27  ;;  %v4176_v11 = vmul.f32 0.11111111, %v4130_v63  ;;  %v4166_v14 = vadd.f32 %v4165_v7, %v4164_v55 }
 0x336   : > { %v4159_v3 = vadd.f32 %v4158_v54, %v4157_v48  ;;  %v4175_v4 = vmul.f32 0.11111111, %v4123_v53  ;;  %v4173_v18 = vadd.f32 %v4172_v8, %v4171_v56  ;;  %v4177_v21 = vmul.f32 0.11111111, %v4137_v0 }
 0x337   : > { %v4178_v9 = vmul.f32 0.11111111, %v4152_v61  ;;  %v4182_v10 = vmul.f32 %v4174_v62, %v4174_v62  ;;  %v4184_v23 = vmul.f32 %v4176_v11, %v4176_v11  ;;  %v4180_v24 = vmul.f32 0.11111111, %v4166_v14 }
 0x338   : > { %v4179_v12 = vmul.f32 0.11111111, %v4159_v3  ;;  %v4183_v13 = vmul.f32 %v4175_v4, %v4175_v4  ;;  %v4181_v19 = vmul.f32 0.11111111, %v4173_v18  ;;  %v4185_v20 = vmul.f32 %v4177_v21, %v4177_v21 }
 0x339   : > { %v4186_v17 = vsub.f32 %v4178_v9, %v4182_v10  ;;  %v4188_v29 = vsub.f32 %v4180_v24, %v4184_v23  ;;  %v4190_v33 = vsub.f32 %v6662_v57, %v4174_v62  ;;  %v4194_v34 = vsub.f32 %v6666_v59, %v4174_v62 }
 0x33a   : > { %v4187_v16 = vsub.f32 %v4179_v12, %v4183_v13  ;;  %v4189_v30 = vsub.f32 %v4181_v19, %v4185_v20  ;;  %v4191_v35 = vsub.f32 %v6664_v58, %v4175_v4  ;;  %v4195_v36 = vsub.f32 %v6668_v60, %v4175_v4 }
 0x33b   : > { %v4198_v25 = vadd.f32 1e-05, %v4186_v17  ;;  %v4200_v15 = vadd.f32 1e-05, %v4188_v29  ;;  %v4192_v38 = vsub.f32 %v6678_v1, %v4176_v11  ;;  %v4193_v39 = vsub.f32 %v6680_v2, %v4177_v21 }
 0x33c   : > { %v4199_v28 = vadd.f32 1e-05, %v4187_v16  ;;  %v4201_v32 = vadd.f32 1e-05, %v4189_v30  ;;  %v4196_v43 = vsub.f32 %v6686_v5, %v4176_v11  ;;  %v4197_v57 = vsub.f32 %v6688_v6, %v4177_v21 }
 0x33d   : > { %5815 = vrsqrt.f32 %v4198_v25 }
 0x33e   : > { %5817 = vrsqrt.f32 %v4199_v28 }
 0x33f   : > { %5819 = vrsqrt.f32 %v4200_v15 }
 0x340   : > { %5821 = vrsqrt.f32 %v4201_v32 }
 0x347   : > { %v5816_v37 = vpop.eup %5815 }
 0x348   : > { %v5818_v31 = vpop.eup %5817  ;;  %v4206_v22 = vmul.f32 %v5816_v37, %v4190_v33  ;;  %v4210_v40 = vmul.f32 %v5816_v37, %v4194_v34 }
 0x349   : > { %v4207_v41 = vmul.f32 %v5818_v31, %v4191_v35  ;;  %v4211_v42 = vmul.f32 %v5818_v31, %v4195_v36  ;;  %v5820_v44 = vpop.eup %5819 }
 0x34a   : > { %vm4214_vm0 = vcmp.ge.f32.partialorder %v4206_v22, 0.0  ;;  %v4222_v59 = vmul.f32 0.2, %v4206_v22  ;;  %vm4218_vm1 = vcmp.ge.f32.partialorder %v4210_v40, 0.0  ;;  %v4226_v58 = vmul.f32 0.2, %v4210_v40  ;;  %v5822_v60 = vpop.eup %5821 }
 0x34b   : > { %vm4215_vm2 = vcmp.ge.f32.partialorder %v4207_v41, 0.0  ;;  %v4223_v45 = vmul.f32 0.2, %v4207_v41  ;;  %v4208_v1 = vmul.f32 %v5820_v44, %v4192_v38  ;;  %vm4219_vm3 = vcmp.ge.f32.partialorder %v4211_v42, 0.0 }
 0x34c   : > { %v4230_v46 = vsel %vm4214_vm0, %v4206_v22, %v4222_v59  ;;  %v4209_v2 = vmul.f32 %v5822_v60, %v4193_v39  ;;  %v4227_v47 = vmul.f32 0.2, %v4211_v42  ;;  %v4234_v48 = vsel %vm4218_vm1, %v4210_v40, %v4226_v58 }
 0x34d   : > { %v4231_v49 = vsel %vm4215_vm2, %v4207_v41, %v4223_v45  ;;  %vm4216_vm4 = vcmp.ge.f32.partialorder %v4208_v1, 0.0  ;;  %v4224_v5 = vmul.f32 0.2, %v4208_v1  ;;  %v4212_v6 = vmul.f32 %v5820_v44, %v4196_v43 }
 0x34e   : > { %v4912_v26 = vpack.c.bf16 %v4231_v49, %v4230_v46  ;;  %vm4217_vm5 = vcmp.ge.f32.partialorder %v4209_v2, 0.0  ;;  %v4225_v27 = vmul.f32 0.2, %v4209_v2  ;;  %v4235_v50 = vsel %vm4219_vm3, %v4211_v42, %v4227_v47 }
 0x34f   : > { %v4232_v51 = vsel %vm4216_vm4, %v4208_v1, %v4224_v5  ;;  %v4914_v52 = vpack.c.bf16 %v4235_v50, %v4234_v48  ;;  %v4213_v53 = vmul.f32 %v5822_v60, %v4197_v57  ;;  %vm4220_vm6 = vcmp.ge.f32.partialorder %v4212_v6, 0.0 }
 0x350   : > { %4262 = vst [vmem:[%s6069_s28] sm:$0xff] %v4912_v26  ;;  %v4233_v54 = vsel %vm4217_vm5, %v4209_v2, %v4225_v27  ;;  %v4228_v55 = vmul.f32 0.2, %v4212_v6 }
 0x351   : > { %v4913_v56 = vpack.c.bf16 %v4233_v54, %v4232_v51  ;;  %4264 = vst [vmem:[%s6069_s28 + $0x10] sm:$0xff] %v4914_v52  ;;  %vm4221_vm7 = vcmp.ge.f32.partialorder %v4213_v53, 0.0  ;;  %v4229_v61 = vmul.f32 0.2, %v4213_v53 }
 0x352   : > { %v4236_v62 = vsel %vm4220_vm6, %v4212_v6, %v4228_v55 }
 0x353   : > { %4263 = vst [vmem:[%s6069_s28 + $0x8] sm:$0xff] %v4913_v56  ;;  %v4237_v63 = vsel %vm4221_vm7, %v4213_v53, %v4229_v61 }
 0x354   : > { %v4915_v0 = vpack.c.bf16 %v4237_v63, %v4236_v62 }
 0x356   : > { %4265 = vst [vmem:[%s6069_s28 + $0x18] sm:$0xff] %v4915_v0 }
 0x357 PF: > { %s15_s16 = sadd.s32 1, %s5919_s16   ;;  %s6744_s9 = smov %s5895_s10 }
 0x358   : > { %p12_p8 = scmp.ge.s32.totalorder %s15_s16, 10   ;;  %s6745_s10 = smov %s5899_s11 }
 0x359   : > { %s6746_s11 = smov %s6008_s29  ;;  %s6747_s12 = smov %s5911_s14 }
 0x35a   : > { %s6748_s13 = smov %s5915_s15  ;;  %s6749_s14 = smov %s6752_s18 }
 0x35b   : > { %s6750_s15 = smov %s6756_s19  ;;  %14 = sbr.rel (!%p12_p8) target bundleno = 5 (0x5), region = 79 }
 0x362   :  { %4287 = vsyncpa [#allocation4], 1 }
 0x363   :  { %4289 = vsyncpa [#allocation4 + $0x1], 1 }

// kernel: patch_discriminator70.11
= control target key start
LH: loop header
LB: loop body
LE: loop exit
PB: predicated region body
PF: predicated region fallthrough
CT: control target
= control target key end

     0   :  { %s2392_s12 = smov 0   ;;  %s2394_s13 = smov 0   ;;  %s2634_s0 = inlined_call_operand.vmem [shape: bf16[16,8192], index: 0, kind: input, shape index: {}]   ;;  %s2635_s1 = inlined_call_operand.vmem [shape: bf16[8192,128], index: 1, kind: input, shape index: {}]   ;;  %s2636_s2 = inlined_call_operand.vmem [shape: f32[1,128], index: 2, kind: input, shape index: {}]   ;;  %s2637_s3 = inlined_call_operand.vmem [shape: f32[16,128], index: 3, kind: output, shape index: {}]  }
   0x1   :  { %s2396_s14 = smov 0   ;;  %s2398_s15 = smov 0  }
   0x2   :  { %s2400_s16 = smov 0  }
   0x3 LB: > { %s22_s17 = sadd.s32 1, %s2365_s15  ;;  %p41_p1 = scmp.ne.s32.totalorder %s2357_s13, %s2353_s12  ;;  %s2369_s16 = sphi %s2400_s16, %s13_s16   ;;  %s2365_s15 = sphi %s2398_s15, %s2641_s15   ;;  %s2361_s14 = sphi %s2396_s14, %s2640_s14   ;;  %s2357_s13 = sphi %s2394_s13, %s2639_s13   ;;  %s2353_s12 = sphi %s2392_s12, %s2638_s12  }
   0x4   : > { %p23_p0 = scmp.ge.s32.totalorder %s22_s17, 4  ;;  %p42_p2 = scmp.eq.s32.totalorder %s2369_s16, 0 }
   0x5   : > { %s34_s19 = sadd.s32 1, %s2357_s13  ;;  %p1826_p5 = scmp.ge.s32.totalorder %s2369_s16, 4 }
   0x6   : > { %s2643_s17 = smov (%p23_p0, %s22_s17), 0  ;;  %p43_p3 = por %p42_p2, %p41_p1 }
   0x7   : > { %s30_s18 = ssub.s32 %s2365_s15, %s2643_s17  ;;  %143 = sbr.rel (%p1826_p5) target bundleno = 26 (0x1a), region = 20 }
   0x8   : > { %p32_p4 = scmp.eq.s32.totalorder %s30_s18, 0 }
   0xa   : > { %s2427_s20 = scalar_select %p32_p4, %s2357_s13, %s34_s19  }
   0xe   : > { %146 = sbr.rel (!%p43_p3) target bundleno = 26 (0x1a), region = 24  ;;  %s148_s21 = sand.u32 (%p43_p3), 1, %s2357_s13  }
   0xf   : > { %s1985_s22 = sshll.u32 (%p43_p3), %s2365_s15, 6  ;;  %s1827_s23 = sshll.u32 (%p43_p3), %s148_s21, 7 }
  0x10   : > { %s2435_s26 = scalar_lea.vmem (%p43_p3), %s2634_s0, %s1985_s22  ;;  %s150_s27 = scalar_lea.vmem (%p43_p3), [#allocation3], %s1827_s23 }
  0x11   : > { %v169_v0 = vld [vmem:[%s2435_s26] sm:$0xff] (%p43_p3)  ;;  %v171_v1 = vld [vmem:[%s2435_s26 + $0x8] sm:$0xff] (%p43_p3)  ;;  %v173_v2 = vld [vmem:[%s2435_s26 + $0x10] sm:$0xff] (%p43_p3) }
  0x12   : > { %170 = vst [vmem:[%s150_s27] sm:$0xff] (%p43_p3), %v169_v0  ;;  %172 = vst [vmem:[%s150_s27 + $0x8] sm:$0xff] (%p43_p3), %v171_v1  ;;  %v175_v3 = vld [vmem:[%s2435_s26 + $0x18] sm:$0xff] (%p43_p3)  ;;  %v177_v4 = vld [vmem:[%s2435_s26 + $0x20] sm:$0xff] (%p43_p3) }
  0x13   : > { %174 = vst [vmem:[%s150_s27 + $0x10] sm:$0xff] (%p43_p3), %v173_v2  ;;  %v179_v5 = vld [vmem:[%s2435_s26 + $0x28] sm:$0xff] (%p43_p3)  ;;  %176 = vst [vmem:[%s150_s27 + $0x18] sm:$0xff] (%p43_p3), %v175_v3  ;;  %v181_v6 = vld [vmem:[%s2435_s26 + $0x30] sm:$0xff] (%p43_p3) }
  0x14   : > { %178 = vst [vmem:[%s150_s27 + $0x20] sm:$0xff] (%p43_p3), %v177_v4  ;;  %180 = vst [vmem:[%s150_s27 + $0x28] sm:$0xff] (%p43_p3), %v179_v5  ;;  %v183_v7 = vld [vmem:[%s2435_s26 + $0x38] sm:$0xff] (%p43_p3)  ;;  %v185_v8 = vld [vmem:[%s2435_s26 + $0x100] sm:$0xff] (%p43_p3) }
  0x15   : > { %182 = vst [vmem:[%s150_s27 + $0x30] sm:$0xff] %v181_v6  ;;  %184 = vst [vmem:[%s150_s27 + $0x38] sm:$0xff] %v183_v7  ;;  %v187_v9 = vld [vmem:[%s2435_s26 + $0x108] sm:$0xff]  ;;  %v189_v10 = vld [vmem:[%s2435_s26 + $0x110] sm:$0xff] }
  0x16   : > { %186 = vst [vmem:[%s150_s27 + $0x40] sm:$0xff] %v185_v8  ;;  %v191_v11 = vld [vmem:[%s2435_s26 + $0x118] sm:$0xff]  ;;  %188 = vst [vmem:[%s150_s27 + $0x48] sm:$0xff] %v187_v9  ;;  %v193_v12 = vld [vmem:[%s2435_s26 + $0x120] sm:$0xff] }
  0x17   : > { %190 = vst [vmem:[%s150_s27 + $0x50] sm:$0xff] %v189_v10  ;;  %192 = vst [vmem:[%s150_s27 + $0x58] sm:$0xff] %v191_v11  ;;  %v195_v13 = vld [vmem:[%s2435_s26 + $0x128] sm:$0xff]  ;;  %v197_v14 = vld [vmem:[%s2435_s26 + $0x130] sm:$0xff] }
  0x18   : > { %194 = vst [vmem:[%s150_s27 + $0x60] sm:$0xff] %v193_v12  ;;  %196 = vst [vmem:[%s150_s27 + $0x68] sm:$0xff] %v195_v13  ;;  %v199_v15 = vld [vmem:[%s2435_s26 + $0x138] sm:$0xff] }
  0x19   : > { %198 = vst [vmem:[%s150_s27 + $0x70] sm:$0xff] %v197_v14  ;;  %200 = vst [vmem:[%s150_s27 + $0x78] sm:$0xff] %v199_v15 }
  0x1a PF: > { %p1830_p6 = scmp.ge.s32.totalorder %s2369_s16, 1  ;;  %p214_p7 = scmp.lt.s32.totalorder %s2369_s16, 5 }
  0x1c   : > { %p215_p8 = pnand %p1830_p6, %p214_p7 }
  0x1d   : > { %s221_s28 = sand.u32 (!%p215_p8), 1, %s2353_s12   ;;  %s1832_s29 = sshll.u32 (!%p215_p8), %s2361_s14, 8 }
  0x1e   : > { %218 = sbr.rel (%p215_p8) target bundleno = 408 (0x198), region = 51  ;;  %s1831_s30 = sshll.u32 (!%p215_p8), %s221_s28, 7 }
  0x1f   : > { %p252_p9 = scmp.lt.s32.totalorder (!%p215_p8), %s1832_s29, 1023  ;;  %s2462_s8 = scalar_lea.vmem (!%p215_p8), [#allocation3], %s1831_s30 }
  0x20   : > { %p1834_p10 = scmp.ne.s32.totalorder (!%p215_p8), %s2361_s14, 0 }
  0x25   : > { %s2645_s29 = smov (!%p252_p9, %s1832_s29), 1023  ;;  %267 = sbr.rel (%p1834_p10) target bundleno = 44 (0x2c), region = 59 }
  0x26   : > { %s1833_s4 = sshll.u32 %s2645_s29, 2  ;;  %v2371_v16 = vmov (!%p1834_p10), 0.0  }
  0x27   : > { %s2460_s7 = scalar_lea.vmem %s2635_s1, %s1833_s4  ;;  %268 = vst [vmem:[#allocation2] sm:$0xff] (!%p1834_p10), %v2371_v16  ;;  %269 = vst [vmem:[#allocation2 + $0x8] sm:$0xff] (!%p1834_p10), %v2371_v16 }
  0x2c PF: > { %v2203_v17 = vld [vmem:[%s2460_s7 + $0x40] sm:$0xff]   ;;  %v2207_v21 = vld [vmem:[%s2460_s7 + $0x48] sm:$0xff]   ;;  %v2211_v25 = vld [vmem:[%s2460_s7 + $0x50] sm:$0xff]   ;;  %p1979_p11 = scmp.ne.s32.totalorder %s2361_s14, 3 }
  0x2d   : > { %v2204_v18 = vld [vmem:[%s2460_s7 + $0xc0] sm:$0xff]   ;;  %1986 = vmatprep.subr.bf16.mxu0 %v2203_v17  ;;  %v2208_v22 = vld [vmem:[%s2460_s7 + $0xc8] sm:$0xff]   ;;  %v2212_v26 = vld [vmem:[%s2460_s7 + $0xd0] sm:$0xff]  }
  0x2e   : > { %v2205_v19 = vld [vmem:[%s2460_s7] sm:$0xff]   ;;  %2008 = vmatprep.subr.bf16.mxu1 %v2204_v18  ;;  %v2209_v23 = vld [vmem:[%s2460_s7 + $0x8] sm:$0xff]   ;;  %v2213_v27 = vld [vmem:[%s2460_s7 + $0x10] sm:$0xff]  }
  0x2f   : > { %v2206_v20 = vld [vmem:[%s2460_s7 + $0x80] sm:$0xff]   ;;  %1987 = vmatpush3.bf16.msra.mxu0 %v2205_v19  ;;  %v2210_v24 = vld [vmem:[%s2460_s7 + $0x88] sm:$0xff]   ;;  %v2214_v28 = vld [vmem:[%s2460_s7 + $0x90] sm:$0xff]  }
  0x30   : > { %2009 = vmatpush3.bf16.msra.mxu1 %v2206_v20  ;;  %1988 = vmatprep.subr.bf16.mxu0 %v2207_v21  ;;  %v2215_v29 = vld [vmem:[%s2460_s7 + $0x58] sm:$0xff]   ;;  %v2219_v33 = vld [vmem:[%s2460_s7 + $0x60] sm:$0xff]   ;;  %v2223_v37 = vld [vmem:[%s2460_s7 + $0x68] sm:$0xff]  }
  0x31   : > { %2010 = vmatprep.subr.bf16.mxu1 %v2208_v22  ;;  %v2216_v30 = vld [vmem:[%s2460_s7 + $0xd8] sm:$0xff]   ;;  %v2220_v34 = vld [vmem:[%s2460_s7 + $0xe0] sm:$0xff]   ;;  %v2224_v38 = vld [vmem:[%s2460_s7 + $0xe8] sm:$0xff]  }
  0x32   : > { %v2217_v31 = vld [vmem:[%s2460_s7 + $0x18] sm:$0xff]   ;;  %v2221_v35 = vld [vmem:[%s2460_s7 + $0x20] sm:$0xff]   ;;  %v2225_v39 = vld [vmem:[%s2460_s7 + $0x28] sm:$0xff]  }
  0x33   : > { %1989 = vmatpush3.bf16.msra.mxu0 %v2209_v23  ;;  %v2218_v32 = vld [vmem:[%s2460_s7 + $0x98] sm:$0xff]   ;;  %v2222_v36 = vld [vmem:[%s2460_s7 + $0xa0] sm:$0xff]   ;;  %v2226_v40 = vld [vmem:[%s2460_s7 + $0xa8] sm:$0xff]  }
  0x34   : > { %2011 = vmatpush3.bf16.msra.mxu1 %v2210_v24  ;;  %1990 = vmatprep.subr.bf16.mxu0 %v2211_v25  ;;  %v2227_v41 = vld [vmem:[%s2460_s7 + $0x70] sm:$0xff]   ;;  %v2231_v45 = vld [vmem:[%s2460_s7 + $0x78] sm:$0xff]   ;;  %v2235_v57 = vld [vmem:[%s2460_s7 + $0x140] sm:$0xff]  }
  0x35   : > { %2012 = vmatprep.subr.bf16.mxu1 %v2212_v26  ;;  %v2228_v42 = vld [vmem:[%s2460_s7 + $0xf0] sm:$0xff]   ;;  %v2232_v46 = vld [vmem:[%s2460_s7 + $0xf8] sm:$0xff]   ;;  %v2236_v58 = vld [vmem:[%s2460_s7 + $0x1c0] sm:$0xff]  }
  0x36   : > { %v2229_v43 = vld [vmem:[%s2460_s7 + $0x30] sm:$0xff]   ;;  %v2233_v47 = vld [vmem:[%s2460_s7 + $0x38] sm:$0xff]   ;;  %v2237_v59 = vld [vmem:[%s2460_s7 + $0x100] sm:$0xff]  }
  0x37   : > { %1991 = vmatpush3.bf16.msra.mxu0 %v2213_v27  ;;  %v2230_v44 = vld [vmem:[%s2460_s7 + $0xb0] sm:$0xff]   ;;  %v2234_v48 = vld [vmem:[%s2460_s7 + $0xb8] sm:$0xff]   ;;  %v2238_v60 = vld [vmem:[%s2460_s7 + $0x180] sm:$0xff]  }
  0x38   : > { %2013 = vmatpush3.bf16.msra.mxu1 %v2214_v28  ;;  %1992 = vmatprep.subr.bf16.mxu0 %v2215_v29  ;;  %v272_v49 = vld [vmem:[%s2462_s8] sm:$0xff]  ;;  %v273_v51 = vld [vmem:[%s2462_s8 + $0x8] sm:$0xff]  ;;  %v2239_v61 = vld [vmem:[%s2460_s7 + $0x148] sm:$0xff]  }
  0x39   : > { %2014 = vmatprep.subr.bf16.mxu1 %v2216_v30  ;;  %v280_v50 = vld [vmem:[%s2462_s8 + $0x40] sm:$0xff]  ;;  %v281_v54 = vld [vmem:[%s2462_s8 + $0x48] sm:$0xff]  ;;  %v2240_v62 = vld [vmem:[%s2460_s7 + $0x1c8] sm:$0xff]  }
  0x3a   : > { %v1835_v52 = vcombine.low %v272_v49, %v280_v50  ;;  %v1836_v53 = vcombine.high %v272_v49, %v280_v50  ;;  %v1837_v55 = vcombine.low %v273_v51, %v281_v54  ;;  %v1838_v56 = vcombine.high %v273_v51, %v281_v54  ;;  %v2241_v63 = vld [vmem:[%s2460_s7 + $0x108] sm:$0xff]   ;;  %v2243_v1 = vld [vmem:[%s2460_s7 + $0x150] sm:$0xff]   ;;  %v2247_v5 = vld [vmem:[%s2460_s7 + $0x158] sm:$0xff]  }
  0x3b   : > { %1993 = vmatpush3.bf16.msra.mxu0 %v2217_v31  ;;  %v2242_v0 = vld [vmem:[%s2460_s7 + $0x188] sm:$0xff]   ;;  %v2244_v2 = vld [vmem:[%s2460_s7 + $0x1d0] sm:$0xff]   ;;  %v2248_v6 = vld [vmem:[%s2460_s7 + $0x1d8] sm:$0xff]  }
  0x3c   : > { %2015 = vmatpush3.bf16.msra.mxu1 %v2218_v32  ;;  %1994 = vmatprep.subr.bf16.mxu0 %v2219_v33  ;;  %v2245_v3 = vld [vmem:[%s2460_s7 + $0x110] sm:$0xff]   ;;  %v2249_v7 = vld [vmem:[%s2460_s7 + $0x118] sm:$0xff]   ;;  %v2251_v9 = vld [vmem:[%s2460_s7 + $0x160] sm:$0xff]  }
  0x3d   : > { %2016 = vmatprep.subr.bf16.mxu1 %v2220_v34  ;;  %1424 = vmatprep.mubr.bf16.mxu0 %v1836_v53  ;;  %v2246_v4 = vld [vmem:[%s2460_s7 + $0x190] sm:$0xff]   ;;  %v2250_v8 = vld [vmem:[%s2460_s7 + $0x198] sm:$0xff]   ;;  %v2252_v10 = vld [vmem:[%s2460_s7 + $0x1e0] sm:$0xff]  }
  0x3e   : > { %1465 = vmatprep.mubr.bf16.mxu1 %v1838_v56  ;;  %v2253_v11 = vld [vmem:[%s2460_s7 + $0x120] sm:$0xff]   ;;  %v2255_v13 = vld [vmem:[%s2460_s7 + $0x168] sm:$0xff]   ;;  %v2259_v17 = vld [vmem:[%s2460_s7 + $0x170] sm:$0xff]  }
  0x3f   : > { %1995 = vmatpush3.bf16.msra.mxu0 %v2221_v35  ;;  %v2254_v12 = vld [vmem:[%s2460_s7 + $0x1a0] sm:$0xff]   ;;  %v2256_v14 = vld [vmem:[%s2460_s7 + $0x1e8] sm:$0xff]   ;;  %v2260_v18 = vld [vmem:[%s2460_s7 + $0x1f0] sm:$0xff]  }
  0x40   : > { %2017 = vmatpush3.bf16.msra.mxu1 %v2222_v36  ;;  %1996 = vmatprep.subr.bf16.mxu0 %v2223_v37  ;;  %v2257_v15 = vld [vmem:[%s2460_s7 + $0x128] sm:$0xff]   ;;  %v2261_v19 = vld [vmem:[%s2460_s7 + $0x130] sm:$0xff]   ;;  %v2263_v21 = vld [vmem:[%s2460_s7 + $0x178] sm:$0xff]  }
  0x41   : > { %2018 = vmatprep.subr.bf16.mxu1 %v2224_v38  ;;  %v2258_v16 = vld [vmem:[%s2460_s7 + $0x1a8] sm:$0xff]   ;;  %v2262_v20 = vld [vmem:[%s2460_s7 + $0x1b0] sm:$0xff]   ;;  %v2264_v22 = vld [vmem:[%s2460_s7 + $0x1f8] sm:$0xff]  }
  0x42   : > { %v2265_v23 = vld [vmem:[%s2460_s7 + $0x138] sm:$0xff]   ;;  %v274_v25 = vld [vmem:[%s2462_s8 + $0x10] sm:$0xff]  ;;  %v275_v29 = vld [vmem:[%s2462_s8 + $0x18] sm:$0xff] }
  0x43   : > { %1997 = vmatpush3.bf16.msra.mxu0 %v2225_v39  ;;  %v2266_v24 = vld [vmem:[%s2460_s7 + $0x1b8] sm:$0xff]   ;;  %v282_v26 = vld [vmem:[%s2462_s8 + $0x50] sm:$0xff]  ;;  %v283_v30 = vld [vmem:[%s2462_s8 + $0x58] sm:$0xff] }
  0x44   : > { %2019 = vmatpush3.bf16.msra.mxu1 %v2226_v40  ;;  %1998 = vmatprep.subr.bf16.mxu0 %v2227_v41  ;;  %v1839_v27 = vcombine.low %v274_v25, %v282_v26  ;;  %v1840_v28 = vcombine.high %v274_v25, %v282_v26  ;;  %v1841_v31 = vcombine.low %v275_v29, %v283_v30  ;;  %v2267_v33 = vld [vmem:[%s2460_s7 + $0x240] sm:$0xff]   ;;  %v2271_v37 = vld [vmem:[%s2460_s7 + $0x248] sm:$0xff]   ;;  %v2275_v41 = vld [vmem:[%s2460_s7 + $0x250] sm:$0xff]  }
  0x45   : > { %2020 = vmatprep.subr.bf16.mxu1 %v2228_v42  ;;  %v1842_v32 = vcombine.high %v275_v29, %v283_v30  ;;  %v2268_v34 = vld [vmem:[%s2460_s7 + $0x2c0] sm:$0xff]   ;;  %v2272_v38 = vld [vmem:[%s2460_s7 + $0x2c8] sm:$0xff]   ;;  %v2276_v42 = vld [vmem:[%s2460_s7 + $0x2d0] sm:$0xff]  }
  0x46   : > { %v2269_v35 = vld [vmem:[%s2460_s7 + $0x200] sm:$0xff]   ;;  %v2273_v39 = vld [vmem:[%s2460_s7 + $0x208] sm:$0xff]  }
  0x47   : > { %1999 = vmatpush3.bf16.msra.mxu0 %v2229_v43  ;;  %v2270_v36 = vld [vmem:[%s2460_s7 + $0x280] sm:$0xff]   ;;  %v2274_v40 = vld [vmem:[%s2460_s7 + $0x288] sm:$0xff]   ;;  %v2277_v43 = vld [vmem:[%s2460_s7 + $0x210] sm:$0xff]  }
  0x48   : > { %2021 = vmatpush3.bf16.msra.mxu1 %v2230_v44  ;;  %2000 = vmatprep.subr.bf16.mxu0 %v2231_v45  ;;  %v2278_v44 = vld [vmem:[%s2460_s7 + $0x290] sm:$0xff]   ;;  %v2279_v45 = vld [vmem:[%s2460_s7 + $0x258] sm:$0xff]   ;;  %v2283_v49 = vld [vmem:[%s2460_s7 + $0x260] sm:$0xff]  }
  0x49   : > { %2022 = vmatprep.subr.bf16.mxu1 %v2232_v46  ;;  %v2280_v46 = vld [vmem:[%s2460_s7 + $0x2d8] sm:$0xff]   ;;  %v2284_v50 = vld [vmem:[%s2460_s7 + $0x2e0] sm:$0xff]   ;;  %v2287_v53 = vld [vmem:[%s2460_s7 + $0x268] sm:$0xff]  }
  0x4a   : > { %v2285_v51 = vld [vmem:[%s2460_s7 + $0x220] sm:$0xff]   ;;  %v2288_v54 = vld [vmem:[%s2460_s7 + $0x2e8] sm:$0xff]  }
  0x4b   : > { %2001 = vmatpush3.bf16.msra.mxu0 %v2233_v47  ;;  %v2281_v47 = vld [vmem:[%s2460_s7 + $0x218] sm:$0xff]   ;;  %v2290_v56 = vld [vmem:[%s2460_s7 + $0x2a8] sm:$0xff]   ;;  %v2315_v25 = vld [vmem:[%s2460_s7 + $0x360] sm:$0xff]  }
  0x4c   : > { %2023 = vmatpush3.bf16.msra.mxu1 %v2234_v48  ;;  %2030 = vmatprep.subr.bf16.mxu0 %v2235_v57  ;;  %v2282_v48 = vld [vmem:[%s2460_s7 + $0x298] sm:$0xff]   ;;  %v2291_v57 = vld [vmem:[%s2460_s7 + $0x270] sm:$0xff]   ;;  %v2316_v26 = vld [vmem:[%s2460_s7 + $0x3e0] sm:$0xff]  }
  0x4d   : > { %2052 = vmatprep.subr.bf16.mxu1 %v2236_v58  ;;  %v2292_v58 = vld [vmem:[%s2460_s7 + $0x2f0] sm:$0xff]   ;;  %v2319_v29 = vld [vmem:[%s2460_s7 + $0x368] sm:$0xff]  }
  0x4e   : > { %1425 = vmatmul.mubr.bf16.vlgmr.msra.gmra.mrb[0].mxu0 %v1835_v52  ;;  %v2286_v52 = vld [vmem:[%s2460_s7 + $0x2a0] sm:$0xff]   ;;  %v2320_v30 = vld [vmem:[%s2460_s7 + $0x3e8] sm:$0xff]  }
  0x4f   : > { %1466 = vmatmul.mubr.bf16.vlgmr.msra.gmra.mrb[0].mxu1 %v1837_v55  ;;  %2031 = vmatpush3.bf16.msra.mxu0 %v2237_v59  ;;  %v2289_v55 = vld [vmem:[%s2460_s7 + $0x228] sm:$0xff]   ;;  %v2293_v59 = vld [vmem:[%s2460_s7 + $0x230] sm:$0xff]  }
  0x50   : > { %2053 = vmatpush3.bf16.msra.mxu1 %v2238_v60  ;;  %2032 = vmatprep.subr.bf16.mxu0 %v2239_v61  ;;  %v2294_v60 = vld [vmem:[%s2460_s7 + $0x2b0] sm:$0xff]   ;;  %v2295_v61 = vld [vmem:[%s2460_s7 + $0x278] sm:$0xff]  }
  0x51   : > { %2054 = vmatprep.subr.bf16.mxu1 %v2240_v62  ;;  %1506 = vmatprep.mubr.bf16.mxu0 %v1840_v28  ;;  %v2296_v62 = vld [vmem:[%s2460_s7 + $0x2f8] sm:$0xff]   ;;  %v2318_v28 = vld [vmem:[%s2460_s7 + $0x3a0] sm:$0xff]  }
  0x52   : > { %1547 = vmatprep.mubr.bf16.mxu1 %v1842_v32  ;;  %v2322_v32 = vld [vmem:[%s2460_s7 + $0x3a8] sm:$0xff]  }
  0x53   : > { %2033 = vmatpush3.bf16.msra.mxu0 %v2241_v63  ;;  %v2297_v63 = vld [vmem:[%s2460_s7 + $0x238] sm:$0xff]  }
  0x54   : > { %2055 = vmatpush3.bf16.msra.mxu1 %v2242_v0  ;;  %2034 = vmatprep.subr.bf16.mxu0 %v2243_v1  ;;  %v2298_v0 = vld [vmem:[%s2460_s7 + $0x2b8] sm:$0xff]   ;;  %v276_v1 = vld [vmem:[%s2462_s8 + $0x20] sm:$0xff] }
  0x55   : > { %2056 = vmatprep.subr.bf16.mxu1 %v2244_v2  ;;  %v284_v2 = vld [vmem:[%s2462_s8 + $0x60] sm:$0xff] }
  0x57   : > { %2035 = vmatpush3.bf16.msra.mxu0 %v2245_v3  ;;  %v277_v3 = vld [vmem:[%s2462_s8 + $0x28] sm:$0xff] }
  0x58   : > { %2057 = vmatpush3.bf16.msra.mxu1 %v2246_v4  ;;  %2036 = vmatprep.subr.bf16.mxu0 %v2247_v5  ;;  %v285_v4 = vld [vmem:[%s2462_s8 + $0x68] sm:$0xff]  ;;  %v1843_v5 = vcombine.low %v276_v1, %v284_v2 }
  0x59   : > { %2058 = vmatprep.subr.bf16.mxu1 %v2248_v6  ;;  %v1844_v6 = vcombine.high %v276_v1, %v284_v2 }
  0x5b   : > { %2037 = vmatpush3.bf16.msra.mxu0 %v2249_v7  ;;  %v1845_v7 = vcombine.low %v277_v3, %v285_v4 }
  0x5c   : > { %2059 = vmatpush3.bf16.msra.mxu1 %v2250_v8  ;;  %2038 = vmatprep.subr.bf16.mxu0 %v2251_v9  ;;  %v1846_v8 = vcombine.high %v277_v3, %v285_v4  ;;  %v2299_v9 = vld [vmem:[%s2460_s7 + $0x340] sm:$0xff]  }
  0x5d   : > { %2060 = vmatprep.subr.bf16.mxu1 %v2252_v10  ;;  %v2300_v10 = vld [vmem:[%s2460_s7 + $0x3c0] sm:$0xff]  }
  0x5f   : > { %2039 = vmatpush3.bf16.msra.mxu0 %v2253_v11  ;;  %v2301_v11 = vld [vmem:[%s2460_s7 + $0x300] sm:$0xff]  }
  0x60   : > { %2061 = vmatpush3.bf16.msra.mxu1 %v2254_v12  ;;  %2040 = vmatprep.subr.bf16.mxu0 %v2255_v13  ;;  %v2302_v12 = vld [vmem:[%s2460_s7 + $0x380] sm:$0xff]   ;;  %v2303_v13 = vld [vmem:[%s2460_s7 + $0x348] sm:$0xff]  }
  0x61   : > { %2062 = vmatprep.subr.bf16.mxu1 %v2256_v14  ;;  %v2304_v14 = vld [vmem:[%s2460_s7 + $0x3c8] sm:$0xff]  }
  0x63   : > { %2041 = vmatpush3.bf16.msra.mxu0 %v2257_v15  ;;  %v2305_v15 = vld [vmem:[%s2460_s7 + $0x308] sm:$0xff]  }
  0x64   : > { %2063 = vmatpush3.bf16.msra.mxu1 %v2258_v16  ;;  %2042 = vmatprep.subr.bf16.mxu0 %v2259_v17  ;;  %v2306_v16 = vld [vmem:[%s2460_s7 + $0x388] sm:$0xff]   ;;  %v2307_v17 = vld [vmem:[%s2460_s7 + $0x350] sm:$0xff]  }
  0x65   : > { %2064 = vmatprep.subr.bf16.mxu1 %v2260_v18  ;;  %v2308_v18 = vld [vmem:[%s2460_s7 + $0x3d0] sm:$0xff]  }
  0x67   : > { %2043 = vmatpush3.bf16.msra.mxu0 %v2261_v19  ;;  %v2309_v19 = vld [vmem:[%s2460_s7 + $0x310] sm:$0xff]  }
  0x68   : > { %2065 = vmatpush3.bf16.msra.mxu1 %v2262_v20  ;;  %2044 = vmatprep.subr.bf16.mxu0 %v2263_v21  ;;  %v2310_v20 = vld [vmem:[%s2460_s7 + $0x390] sm:$0xff]   ;;  %v2311_v21 = vld [vmem:[%s2460_s7 + $0x358] sm:$0xff]  }
  0x69   : > { %2066 = vmatprep.subr.bf16.mxu1 %v2264_v22  ;;  %v2312_v22 = vld [vmem:[%s2460_s7 + $0x3d8] sm:$0xff]  }
  0x6b   : > { %2045 = vmatpush3.bf16.msra.mxu0 %v2265_v23  ;;  %v2313_v23 = vld [vmem:[%s2460_s7 + $0x318] sm:$0xff]  }
  0x6c   : > { %2067 = vmatpush3.bf16.msra.mxu1 %v2266_v24  ;;  %2074 = vmatprep.subr.bf16.mxu0 %v2267_v33  ;;  %v2314_v24 = vld [vmem:[%s2460_s7 + $0x398] sm:$0xff]   ;;  %v2323_v33 = vld [vmem:[%s2460_s7 + $0x370] sm:$0xff]  }
  0x6d   : > { %2096 = vmatprep.subr.bf16.mxu1 %v2268_v34  ;;  %v2324_v34 = vld [vmem:[%s2460_s7 + $0x3f0] sm:$0xff]  }
  0x6e   : > { %1507 = vmatmul.mubr.bf16.vlgmr.msra.gmra.mrb[4].mxu0 %v1839_v27  ;;  %v2317_v27 = vld [vmem:[%s2460_s7 + $0x320] sm:$0xff]  }
  0x6f   : > { %1548 = vmatmul.mubr.bf16.vlgmr.msra.gmra.mrb[4].mxu1 %v1841_v31  ;;  %2075 = vmatpush3.bf16.msra.mxu0 %v2269_v35  ;;  %v2321_v31 = vld [vmem:[%s2460_s7 + $0x328] sm:$0xff]   ;;  %v2325_v35 = vld [vmem:[%s2460_s7 + $0x330] sm:$0xff]  }
  0x70   : > { %2097 = vmatpush3.bf16.msra.mxu1 %v2270_v36  ;;  %2076 = vmatprep.subr.bf16.mxu0 %v2271_v37  ;;  %v2326_v36 = vld [vmem:[%s2460_s7 + $0x3b0] sm:$0xff]   ;;  %v2327_v37 = vld [vmem:[%s2460_s7 + $0x378] sm:$0xff]  }
  0x71   : > { %2098 = vmatprep.subr.bf16.mxu1 %v2272_v38  ;;  %1588 = vmatprep.mubr.bf16.mxu0 %v1844_v6  ;;  %v2328_v38 = vld [vmem:[%s2460_s7 + $0x3f8] sm:$0xff]  }
  0x72   : > { %1629 = vmatprep.mubr.bf16.mxu1 %v1846_v8 }
  0x73   : > { %2077 = vmatpush3.bf16.msra.mxu0 %v2273_v39  ;;  %v2329_v39 = vld [vmem:[%s2460_s7 + $0x338] sm:$0xff]  }
  0x74   : > { %2099 = vmatpush3.bf16.msra.mxu1 %v2274_v40  ;;  %2078 = vmatprep.subr.bf16.mxu0 %v2275_v41  ;;  %v2330_v40 = vld [vmem:[%s2460_s7 + $0x3b8] sm:$0xff]   ;;  %v278_v41 = vld [vmem:[%s2462_s8 + $0x30] sm:$0xff] }
  0x75   : > { %2100 = vmatprep.subr.bf16.mxu1 %v2276_v42  ;;  %v286_v42 = vld [vmem:[%s2462_s8 + $0x70] sm:$0xff] }
  0x77   : > { %2079 = vmatpush3.bf16.msra.mxu0 %v2277_v43  ;;  %v279_v43 = vld [vmem:[%s2462_s8 + $0x38] sm:$0xff] }
  0x78   : > { %2101 = vmatpush3.bf16.msra.mxu1 %v2278_v44  ;;  %2080 = vmatprep.subr.bf16.mxu0 %v2279_v45  ;;  %v1847_v44 = vcombine.low %v278_v41, %v286_v42  ;;  %v1848_v45 = vcombine.high %v278_v41, %v286_v42 }
  0x79   : > { %2102 = vmatprep.subr.bf16.mxu1 %v2280_v46  ;;  %v287_v46 = vld [vmem:[%s2462_s8 + $0x78] sm:$0xff] }
  0x7b   : > { %2081 = vmatpush3.bf16.msra.mxu0 %v2281_v47  ;;  %v1849_v47 = vcombine.low %v279_v43, %v287_v46 }
  0x7c   : > { %2103 = vmatpush3.bf16.msra.mxu1 %v2282_v48  ;;  %2082 = vmatprep.subr.bf16.mxu0 %v2283_v49  ;;  %v1850_v48 = vcombine.high %v279_v43, %v287_v46  ;;  %v270_v43 = vld [vmem:[#allocation2] sm:$0xff] }
  0x7d   : > { %2104 = vmatprep.subr.bf16.mxu1 %v2284_v50 }
  0x7f   : > { %2083 = vmatpush3.bf16.msra.mxu0 %v2285_v51 }
  0x80   : > { %2105 = vmatpush3.bf16.msra.mxu1 %v2286_v52  ;;  %2084 = vmatprep.subr.bf16.mxu0 %v2287_v53 }
  0x81   : > { %2106 = vmatprep.subr.bf16.mxu1 %v2288_v54 }
  0x83   : > { %2085 = vmatpush3.bf16.msra.mxu0 %v2289_v55 }
  0x84   : > { %2107 = vmatpush3.bf16.msra.mxu1 %v2290_v56  ;;  %2086 = vmatprep.subr.bf16.mxu0 %v2291_v57 }
  0x85   : > { %2108 = vmatprep.subr.bf16.mxu1 %v2292_v58 }
  0x87   : > { %2087 = vmatpush3.bf16.msra.mxu0 %v2293_v59 }
  0x88   : > { %2109 = vmatpush3.bf16.msra.mxu1 %v2294_v60  ;;  %2088 = vmatprep.subr.bf16.mxu0 %v2295_v61 }
  0x89   : > { %2110 = vmatprep.subr.bf16.mxu1 %v2296_v62 }
  0x8b   : > { %2089 = vmatpush3.bf16.msra.mxu0 %v2297_v63 }
  0x8c   : > { %2111 = vmatpush3.bf16.msra.mxu1 %v2298_v0  ;;  %2118 = vmatprep.subr.bf16.mxu0 %v2299_v9 }
  0x8d   : > { %2140 = vmatprep.subr.bf16.mxu1 %v2300_v10 }
  0x8e   : > { %1589 = vmatmul.mubr.bf16.vlgmr.msra.gmra.mrb[8].mxu0 %v1843_v5 }
  0x8f   : > { %1630 = vmatmul.mubr.bf16.vlgmr.msra.gmra.mrb[8].mxu1 %v1845_v7  ;;  %2119 = vmatpush3.bf16.msra.mxu0 %v2301_v11 }
  0x90   : > { %2141 = vmatpush3.bf16.msra.mxu1 %v2302_v12  ;;  %2120 = vmatprep.subr.bf16.mxu0 %v2303_v13 }
  0x91   : > { %2142 = vmatprep.subr.bf16.mxu1 %v2304_v14  ;;  %1670 = vmatprep.mubr.bf16.mxu0 %v1848_v45 }
  0x92   : > { %1711 = vmatprep.mubr.bf16.mxu1 %v1850_v48 }
  0x93   : > { %2121 = vmatpush3.bf16.msra.mxu0 %v2305_v15 }
  0x94   : > { %2143 = vmatpush3.bf16.msra.mxu1 %v2306_v16  ;;  %2122 = vmatprep.subr.bf16.mxu0 %v2307_v17 }
  0x95   : > { %2144 = vmatprep.subr.bf16.mxu1 %v2308_v18 }
  0x97   : > { %2123 = vmatpush3.bf16.msra.mxu0 %v2309_v19 }
  0x98   : > { %2145 = vmatpush3.bf16.msra.mxu1 %v2310_v20  ;;  %2124 = vmatprep.subr.bf16.mxu0 %v2311_v21 }
  0x99   : > { %2146 = vmatprep.subr.bf16.mxu1 %v2312_v22 }
  0x9b   : > { %2125 = vmatpush3.bf16.msra.mxu0 %v2313_v23 }
  0x9c   : > { %2147 = vmatpush3.bf16.msra.mxu1 %v2314_v24  ;;  %2126 = vmatprep.subr.bf16.mxu0 %v2315_v25 }
  0x9d   : > { %2148 = vmatprep.subr.bf16.mxu1 %v2316_v26 }
  0x9f   : > { %2127 = vmatpush3.bf16.msra.mxu0 %v2317_v27 }
  0xa0   : > { %2149 = vmatpush3.bf16.msra.mxu1 %v2318_v28  ;;  %2128 = vmatprep.subr.bf16.mxu0 %v2319_v29 }
  0xa1   : > { %2150 = vmatprep.subr.bf16.mxu1 %v2320_v30 }
  0xa3   : > { %2129 = vmatpush3.bf16.msra.mxu0 %v2321_v31 }
  0xa4   : > { %2151 = vmatpush3.bf16.msra.mxu1 %v2322_v32  ;;  %2130 = vmatprep.subr.bf16.mxu0 %v2323_v33 }
  0xa5   : > { %2152 = vmatprep.subr.bf16.mxu1 %v2324_v34 }
  0xa7   : > { %2131 = vmatpush3.bf16.msra.mxu0 %v2325_v35 }
  0xa8   : > { %2153 = vmatpush3.bf16.msra.mxu1 %v2326_v36  ;;  %2132 = vmatprep.subr.bf16.mxu0 %v2327_v37 }
  0xa9   : > { %2154 = vmatprep.subr.bf16.mxu1 %v2328_v38 }
  0xab   : > { %2133 = vmatpush3.bf16.msra.mxu0 %v2329_v39 }
  0xac   : > { %2155 = vmatpush3.bf16.msra.mxu1 %v2330_v40 }
  0xae   : > { %1671 = vmatmul.mubr.bf16.vlgmr.msra.gmra.mrb[12].mxu0 %v1847_v44 }
  0xaf   : > { %1712 = vmatmul.mubr.bf16.vlgmr.msra.gmra.mrb[12].mxu1 %v1849_v47  ;;  %v271_v47 = vld [vmem:[#allocation2 + $0x8] sm:$0xff] }
 0x121   : > { %v2002_v49 = vpop.f32.mrb[0].mxu0 }
 0x122   : > { %v2024_v50 = vpop.f32.mrb[0].mxu1  ;;  %v2003_v51 = vpop.f32.mrb[1].mxu0 }
 0x123   : > { %v2004_v52 = vadd.f32 %v2003_v51, %v2002_v49  ;;  %v2025_v53 = vpop.f32.mrb[1].mxu1  ;;  %v2005_v54 = vpop.f32.mrb[2].mxu0 }
 0x124   : > { %v2026_v55 = vadd.f32 %v2025_v53, %v2024_v50  ;;  %v2027_v56 = vpop.f32.mrb[2].mxu1  ;;  %v2006_v57 = vpop.f32.mrb[3].mxu0 }
 0x125   : > { %v2007_v58 = vadd.f32 %v2006_v57, %v2005_v54  ;;  %v2028_v59 = vpop.f32.mrb[3].mxu1 }
 0x126   : > { %v1468_v60 = vadd.f32 %v2026_v55, %v2004_v52  ;;  %v2029_v61 = vadd.f32 %v2028_v59, %v2027_v56  ;;  %v1980_v52 = vld [vmem:[%s2636_s2] ss:$0 sm:$0xff] (!%p1979_p11) }
 0x128   : > { %v1471_v62 = vadd.f32 %v2029_v61, %v2007_v58 }
 0x141   : > { %v2046_v63 = vpop.f32.mrb[4].mxu0 }
 0x142   : > { %v2068_v0 = vpop.f32.mrb[4].mxu1  ;;  %v2047_v1 = vpop.f32.mrb[5].mxu0 }
 0x143   : > { %v2048_v2 = vadd.f32 %v2047_v1, %v2046_v63  ;;  %v2069_v3 = vpop.f32.mrb[5].mxu1  ;;  %v2049_v4 = vpop.f32.mrb[6].mxu0 }
 0x144   : > { %v2070_v5 = vadd.f32 %v2069_v3, %v2068_v0  ;;  %v2071_v6 = vpop.f32.mrb[6].mxu1  ;;  %v2050_v7 = vpop.f32.mrb[7].mxu0 }
 0x145   : > { %v1509_v8 = vadd.f32 %v2048_v2, %v1468_v60  ;;  %v2051_v9 = vadd.f32 %v2050_v7, %v2049_v4  ;;  %v2072_v10 = vpop.f32.mrb[7].mxu1 }
 0x146   : > { %v2073_v11 = vadd.f32 %v2072_v10, %v2071_v6 }
 0x147   : > { %v1550_v12 = vadd.f32 %v2070_v5, %v1509_v8  ;;  %v1512_v13 = vadd.f32 %v2051_v9, %v1471_v62 }
 0x149   : > { %v1553_v14 = vadd.f32 %v2073_v11, %v1512_v13 }
 0x161   : > { %v2090_v15 = vpop.f32.mrb[8].mxu0 }
 0x162   : > { %v2112_v16 = vpop.f32.mrb[8].mxu1  ;;  %v2091_v17 = vpop.f32.mrb[9].mxu0 }
 0x163   : > { %v2113_v18 = vpop.f32.mrb[9].mxu1  ;;  %v2092_v19 = vadd.f32 %v2091_v17, %v2090_v15  ;;  %v2093_v21 = vpop.f32.mrb[10].mxu0 }
 0x164   : > { %v2114_v20 = vadd.f32 %v2113_v18, %v2112_v16  ;;  %v2115_v22 = vpop.f32.mrb[10].mxu1  ;;  %v2094_v23 = vpop.f32.mrb[11].mxu0 }
 0x165   : > { %v2116_v24 = vpop.f32.mrb[11].mxu1  ;;  %v1591_v25 = vadd.f32 %v2092_v19, %v1550_v12  ;;  %v2095_v26 = vadd.f32 %v2094_v23, %v2093_v21 }
 0x166   : > { %v2117_v27 = vadd.f32 %v2116_v24, %v2115_v22 }
 0x167   : > { %v1632_v28 = vadd.f32 %v2114_v20, %v1591_v25  ;;  %v1594_v29 = vadd.f32 %v2095_v26, %v1553_v14 }
 0x169   : > { %v1635_v30 = vadd.f32 %v2117_v27, %v1594_v29 }
 0x181   : > { %v2134_v31 = vpop.f32.mrb[12].mxu0 }
 0x182   : > { %v2156_v32 = vpop.f32.mrb[12].mxu1  ;;  %v2135_v33 = vpop.f32.mrb[13].mxu0 }
 0x183   : > { %v2136_v34 = vadd.f32 %v2135_v33, %v2134_v31  ;;  %v2157_v35 = vpop.f32.mrb[13].mxu1  ;;  %v2137_v36 = vpop.f32.mrb[14].mxu0 }
 0x184   : > { %v2158_v37 = vadd.f32 %v2157_v35, %v2156_v32  ;;  %v2159_v38 = vpop.f32.mrb[14].mxu1  ;;  %v2138_v39 = vpop.f32.mrb[15].mxu0 }
 0x185   : > { %v1673_v40 = vadd.f32 %v2136_v34, %v1632_v28  ;;  %v2139_v41 = vadd.f32 %v2138_v39, %v2137_v36  ;;  %v2160_v42 = vpop.f32.mrb[15].mxu1 }
 0x186   : > { %v2161_v44 = vadd.f32 %v2160_v42, %v2159_v38 }
 0x187   : > { %v1714_v45 = vadd.f32 %v2158_v37, %v1673_v40  ;;  %v1676_v46 = vadd.f32 %v2139_v41, %v1635_v30  ;;  %1727 = sbr.rel (%p1979_p11) target bundleno = 408 (0x198), region = 63 }
 0x189   : > { %v1720_v48 = vadd.f32 %v1714_v45, %v270_v43  ;;  %v1717_v49 = vadd.f32 %v2161_v44, %v1676_v46 }
 0x18b   : > { %1722 = vst [vmem:[#allocation2] sm:$0xff] %v1720_v48  ;;  %v1721_v50 = vadd.f32 %v1717_v49, %v271_v47 }
 0x18d   : > { %1723 = vst [vmem:[#allocation2 + $0x8] sm:$0xff] %v1721_v50 }
 0x192   : > { %v1728_v51 = vld [vmem:[#allocation2] sm:$0xff] }
 0x193   : > { %v1737_v54 = vadd.f32 %v1980_v52, %v1728_v51 }
 0x194   : > { %v1729_v53 = vld [vmem:[#allocation2 + $0x8] sm:$0xff] }
 0x195   : > { %v1738_v55 = vadd.f32 %v1980_v52, %v1729_v53  ;;  %1739 = vst [vmem:[%s2637_s3] sm:$0xff] %v1737_v54 }
 0x197   : > { %1740 = vst [vmem:[%s2637_s3 + $0x8] sm:$0xff] %v1738_v55 }
 0x198 PF: > { %s13_s16 = sadd.s32 1, %s2369_s16   ;;  %s2638_s12 = smov %s2357_s13 }
 0x199   : > { %p10_p12 = scmp.ge.s32.totalorder %s13_s16, 6   ;;  %s2639_s13 = smov %s2427_s20 }
 0x19a   : > { %s2640_s14 = smov %s2365_s15  ;;  %s2641_s15 = smov %s2643_s17 }
 0x19b   :  { %12 = sbr.rel (!%p10_p12) target bundleno = 3 (0x3), region = 101 }

</bundles_post_ra>
